<compile_context>
chip_gen: v7x
topology: tpu7x:2x2x1
jax: 0.10.0
libtpu: 0.0.40
codegen_flags: <defaults>
</compile_context>

<pallas_src>
import functools

import jax
import jax.numpy as jnp
from jax.experimental import pallas as pl
from jax.experimental.pallas import tpu as pltpu


# Lane-tile sizes (multiples of 128).  Big enough that per-grid-step overhead
# is negligible, small enough that double-buffered blocks fit VMEM on v7x.
_LANE_TILE_PW = 16384    # fc0 / pointwise-conv kernels (width-channel blocks)
_LANE_TILE_FC12 = 8192   # fc1+fc2 fused kernel (holds a (256, tile) intermediate)


def _cparams(sem):
    # 32 MiB scoped VMEM works on every generation (v7x physical VMEM is 64 MiB).
    return pltpu.CompilerParams(dimension_semantics=sem,
                                vmem_limit_bytes=32 * 1024 * 1024)


def _round_up(x, m):
    return ((x + m - 1) // m) * m


def _lane_tiling(n, max_tile):
    """Pad the lane dim to 128 alignment and pick a lane tile <= max_tile."""
    n128 = _round_up(n, 128)
    if n128 <= max_tile:
        return n128, n128, 1
    n_pad = _round_up(n, max_tile)
    return n_pad, max_tile, n_pad // max_tile


def _pad_lanes(x2d, n_pad):
    n = x2d.shape[-1]
    if n == n_pad:
        return x2d
    return jnp.pad(x2d, ((0, 0), (0, n_pad - n)))


# ----------------------------------------------------------------------------
# erf-based GELU (matches torch.nn.functional.gelu default up to ~1e-4).
# A&S 7.1.26 on |x|; sign restored for free via x*erf(x/√2) = |x|*erf(|x|/√2);
# the 1/(1+p*z) divide rides the EUP (approx reciprocal), exp rides the EUP.
# ----------------------------------------------------------------------------
def _gelu_exact(x):
    ax = jnp.abs(x)
    z = ax * 0.7071067811865476
    t = pl.reciprocal(1.0 + 0.3275911 * z, approx=True)
    poly = ((((1.061405429 * t - 1.453152027) * t + 1.421413741) * t
             - 0.284496736) * t + 0.254829592) * t
    erf_abs = 1.0 - poly * jnp.exp(-z * z)
    return 0.5 * (x + ax * erf_abs)


# ----------------------------------------------------------------------------
# Pallas kernel: lane-dense linear  Y = W @ X + b (+ GELU)
#   X: (Cin, Ntile), W: (Cout, Cin), b: (Cout, 1) -> Y: (Cout, Ntile)
# ----------------------------------------------------------------------------
def _fc_kernel(x_ref, w_ref, b_ref, o_ref, *, apply_gelu):
    y = jnp.dot(w_ref[...], x_ref[...],
                preferred_element_type=jnp.float32) + b_ref[...]
    if apply_gelu:
        y = _gelu_exact(y)
    o_ref[...] = y.astype(o_ref.dtype)


def pallas_fc_t(x_t, w, b, *, apply_gelu=False):
    """x_t: (Cin, N); w: (Cout, Cin) (PyTorch layout); b: (Cout,)."""
    cin, n = x_t.shape
    cout = w.shape[0]
    n_pad, tile, nt = _lane_tiling(n, _LANE_TILE_PW)
    x_p = _pad_lanes(x_t, n_pad)
    cost = pl.CostEstimate(
        flops=2 * cout * cin * n_pad + cout * n_pad,
        transcendentals=(2 * cout * n_pad) if apply_gelu else 0,
        bytes_accessed=4 * ((cin + cout) * n_pad + cout * cin + cout))
    y = pl.pallas_call(
        functools.partial(_fc_kernel, apply_gelu=apply_gelu),
        out_shape=jax.ShapeDtypeStruct((cout, n_pad), x_t.dtype),
        grid=(nt,),
        in_specs=[pl.BlockSpec((cin, tile), lambda i: (0, i)),
                  pl.BlockSpec((cout, cin), lambda i: (0, 0)),
                  pl.BlockSpec((cout, 1), lambda i: (0, 0))],
        out_specs=pl.BlockSpec((cout, tile), lambda i: (0, i)),
        compiler_params=_cparams(("parallel",)),
        cost_estimate=cost,
    )(x_p, w, b.reshape(cout, 1))
    return y if n_pad == n else y[:, :n]


# ----------------------------------------------------------------------------
# Pallas kernel: fused 1x1 conv + bias + spectral skip-add (+ GELU).
# Single output-channel block (no cout split); grid only over lane tiles.
# ----------------------------------------------------------------------------
def _pw_kernel(x_ref, w_ref, b_ref, s_ref, o_ref, *, apply_gelu):
    y = jnp.dot(w_ref[...], x_ref[...], preferred_element_type=jnp.float32)
    y = y + b_ref[...] + s_ref[...]
    if apply_gelu:
        y = _gelu_exact(y)
    o_ref[...] = y.astype(o_ref.dtype)


def pallas_pw_conv_skip(x_t, w, b, skip_t, *, apply_gelu):
    """y = w @ x_t + b + skip_t (+ GELU);  x_t/skip_t: (C, N), w: (Cout, Cin)."""
    cin, n = x_t.shape
    cout = w.shape[0]
    n_pad, tile, nt = _lane_tiling(n, _LANE_TILE_PW)
    x_p = _pad_lanes(x_t, n_pad)
    s_p = _pad_lanes(skip_t, n_pad)
    cost = pl.CostEstimate(
        flops=2 * cout * cin * n_pad + 2 * cout * n_pad,
        transcendentals=(2 * cout * n_pad) if apply_gelu else 0,
        bytes_accessed=4 * ((cin + 2 * cout) * n_pad + cout * cin + cout))
    # NOTE: on v5e, where this kernel is HBM-bound, pipeline_mode=pl.Buffered(3)
    # on the x/skip specs hides more DMA latency; left at the default depth here.
    y = pl.pallas_call(
        functools.partial(_pw_kernel, apply_gelu=apply_gelu),
        out_shape=jax.ShapeDtypeStruct((cout, n_pad), x_t.dtype),
        grid=(nt,),
        in_specs=[pl.BlockSpec((cin, tile), lambda i: (0, i)),
                  pl.BlockSpec((cout, cin), lambda i: (0, 0)),
                  pl.BlockSpec((cout, 1), lambda i: (0, 0)),
                  pl.BlockSpec((cout, tile), lambda i: (0, i))],
        out_specs=pl.BlockSpec((cout, tile), lambda i: (0, i)),
        compiler_params=_cparams(("parallel",)),
        cost_estimate=cost,
    )(x_p, w, b.reshape(cout, 1), s_p)
    return y if n_pad == n else y[:, :n]


# ----------------------------------------------------------------------------
# Pallas kernel: fused fc1 + GELU + fc2.  The (256, Ntile) fc1 activation
# stays in VMEM; only the (2, Ntile) lane-dense result is stored.
# ----------------------------------------------------------------------------
def _fc12_kernel(x_ref, w1_ref, b1_ref, w2_ref, b2_ref, o_ref):
    t = jnp.dot(w1_ref[...], x_ref[...],
                preferred_element_type=jnp.float32) + b1_ref[...]
    t = _gelu_exact(t)
    y = jnp.dot(w2_ref[...], t,
                preferred_element_type=jnp.float32) + b2_ref[...]
    o_ref[...] = y.astype(o_ref.dtype)


def pallas_fc12(x_t, w1, b1, w2, b2):
    cin, n = x_t.shape
    c1 = w1.shape[0]
    c2 = w2.shape[0]
    n_pad, tile, nt = _lane_tiling(n, _LANE_TILE_FC12)
    x_p = _pad_lanes(x_t, n_pad)
    cost = pl.CostEstimate(
        flops=2 * n_pad * (c1 * cin + c2 * c1) + n_pad * (c1 + c2),
        transcendentals=2 * c1 * n_pad,
        bytes_accessed=4 * ((cin + c2) * n_pad + c1 * cin + c1 + c2 * c1 + c2))
    y = pl.pallas_call(
        _fc12_kernel,
        out_shape=jax.ShapeDtypeStruct((c2, n_pad), x_t.dtype),
        grid=(nt,),
        in_specs=[pl.BlockSpec((cin, tile), lambda i: (0, i)),
                  pl.BlockSpec((c1, cin), lambda i: (0, 0)),
                  pl.BlockSpec((c1, 1), lambda i: (0, 0)),
                  pl.BlockSpec((c2, c1), lambda i: (0, 0)),
                  pl.BlockSpec((c2, 1), lambda i: (0, 0))],
        out_specs=pl.BlockSpec((c2, tile), lambda i: (0, i)),
        compiler_params=_cparams(("parallel",)),
        cost_estimate=cost,
    )(x_p, w1, b1.reshape(c1, 1), w2, b2.reshape(c2, 1))
    return y if n_pad == n else y[:, :n]


# ----------------------------------------------------------------------------
# Pallas kernel: complex channel mixing for ALL Fourier modes of one spectral
# conv in a single call, packed into per-group block-diagonal matmuls:
#   out[g] = X[g] @ Wgrp[g]     X[g]: (B, G*2Cin),  Wgrp[g]: (G*2Cin, G*2Cout)
# where each mode's lane slot holds [Re | Im] channels and Wgrp[g] has that
# mode's [[Re, Im], [-Im, Re]] block on the diagonal (built once at init).
# ----------------------------------------------------------------------------
def _mode_mix_kernel(x_ref, w_ref, o_ref):
    o_ref[...] = jnp.einsum(
        "gbi,gio->gbo", x_ref[...], w_ref[...],
        preferred_element_type=jnp.float32).astype(o_ref.dtype)


def pallas_mode_mix(x_grp, w_grp):
    """x_grp: (NG, B, G*2Cin) f32; w_grp: (NG, G*2Cin, G*2Cout) f32."""
    ng, b, ci = x_grp.shape
    co = w_grp.shape[2]
    cost = pl.CostEstimate(
        flops=2 * ng * b * ci * co, transcendentals=0,
        bytes_accessed=4 * (ng * b * ci + ng * ci * co + ng * b * co))
    return pl.pallas_call(
        _mode_mix_kernel,
        out_shape=jax.ShapeDtypeStruct((ng, b, co), jnp.float32),
        grid=(1,),
        in_specs=[pl.BlockSpec((ng, b, ci), lambda i: (0, 0, 0)),
                  pl.BlockSpec((ng, ci, co), lambda i: (0, 0, 0))],
        out_specs=pl.BlockSpec((ng, b, co), lambda i: (0, 0, 0)),
        compiler_params=_cparams(("arbitrary",)),
        cost_estimate=cost,
    )(x_grp, w_grp)


# ----------------------------------------------------------------------------
# SpectralConv2d forward (channels-first (C, B, H, W) layout).
# ----------------------------------------------------------------------------
def spectral_conv2d(h, sw_grp, modes1, modes2):
    """h: (Cin, B, Hp, Wp) f32; sw_grp: (NG, G*2Cin, G*2Cout) f32 block-diag."""
    cin, B, Hp, Wp = h.shape
    ng = sw_grp.shape[0]
    total = 2 * modes1 * modes2
    G = total // ng
    cout = sw_grp.shape[2] // (2 * G)
    Wf = Wp // 2 + 1
    assert Hp >= 2 * modes1 and Wf >= modes2, "spatial grid too small for modes"

    # TODO(synk): rfft2 / irfft2 have no Pallas TPU primitive; use XLA's FFT.
    x_ft = jnp.fft.rfft2(h, axes=(2, 3))                      # (Cin,B,Hp,Wf) c64

    lo = x_ft[:, :, :modes1, :modes2]                         # (Cin,B,m1,m2)
    hi = x_ft[:, :, Hp - modes1:, :modes2]
    xm = jnp.concatenate([lo, hi], axis=2)                    # (Cin,B,2m1,m2)
    xm = xm.reshape(cin, B, ng, G)
    xg = jnp.transpose(xm, (2, 1, 3, 0))                      # (NG,B,G,Cin) c64
    x_grp = jnp.concatenate([jnp.real(xg), jnp.imag(xg)], axis=3)
    x_grp = x_grp.reshape(ng, B, G * 2 * cin).astype(jnp.float32)

    o = pallas_mode_mix(x_grp, sw_grp)                        # (NG,B,G*2Cout)
    o = o.reshape(ng, B, G, 2 * cout)
    o_c = jax.lax.complex(o[..., :cout], o[..., cout:])       # (NG,B,G,Cout)
    o_c = jnp.transpose(o_c, (3, 1, 0, 2)).reshape(cout, B, 2, modes1, modes2)
    o_c = jnp.pad(o_c, ((0, 0), (0, 0), (0, 0), (0, 0), (0, Wf - modes2)))
    mid = jnp.zeros((cout, B, Hp - 2 * modes1, Wf), jnp.complex64)
    out_ft = jnp.concatenate([o_c[:, :, 0], mid, o_c[:, :, 1]], axis=2)

    return jnp.fft.irfft2(out_ft, s=(Hp, Wp), axes=(2, 3)).astype(h.dtype)


# ----------------------------------------------------------------------------
# FNO2d forward.
# ----------------------------------------------------------------------------
def fno2d_forward(params, x, *, modes1, modes2, width, layernum, padding=9):
    """x: (B, Sx, Sy, 3) float32 -> (B, Sx, Sy, 2) float32."""
    B, Sx, Sy, _ = x.shape

    # get_grid + concat, moved to channels-first lane-dense layout.
    xt = jnp.transpose(x, (3, 0, 1, 2)).astype(jnp.float32)        # (3,B,Sx,Sy)
    gridx = jnp.broadcast_to(
        jnp.linspace(0.0, 1.0, Sx, dtype=jnp.float32).reshape(1, 1, Sx, 1),
        (1, B, Sx, Sy))
    gridy = jnp.broadcast_to(
        jnp.linspace(0.0, 1.0, Sy, dtype=jnp.float32).reshape(1, 1, 1, Sy),
        (1, B, Sx, Sy))
    h = jnp.concatenate([xt, gridx, gridy], axis=0)                # (5,B,Sx,Sy)

    n1 = B * Sx * Sy
    h = pallas_fc_t(h.reshape(5, n1), params["fc0_w"], params["fc0_b"])
    h = h.reshape(width, B, Sx, Sy)

    # F.pad(x, [0, pad, 0, pad]) on NCHW == pad the two spatial axes.
    h = jnp.pad(h, ((0, 0), (0, 0), (0, padding), (0, padding)))
    Hp, Wp = Sx + padding, Sy + padding
    n2 = B * Hp * Wp

    for idx in range(layernum):
        p = params["layers"][idx]
        x1 = spectral_conv2d(h, p["sw_grp"], modes1, modes2)       # (C,B,Hp,Wp)
        # 1x1 conv + bias + spectral skip-add (+ GELU except last layer), fused.
        hf = pallas_pw_conv_skip(h.reshape(width, n2), p["cw"], p["cb"],
                                 x1.reshape(width, n2),
                                 apply_gelu=(idx < layernum - 1))
        h = hf.reshape(width, B, Hp, Wp)

    h = h[:, :, :Sx, :Sy]                                          # crop padding

    # fc1 + GELU + fc2, fused into one kernel (lane-dense (2, N) output).
    out = pallas_fc12(h.reshape(width, n1),
                      params["fc1_w"], params["fc1_b"],
                      params["fc2_w"], params["fc2_b"])            # (2, n1)
    out = out.reshape(2, B, Sx, Sy)
    return jnp.transpose(out, (1, 2, 3, 0))                        # (B,Sx,Sy,2)


# ----------------------------------------------------------------------------
# Spectral weight preprocessing (done ONCE at init, never per forward).
# ----------------------------------------------------------------------------
def _choose_group(total_modes, width):
    """Largest G dividing total_modes such that G*2*width stays <= 256 lanes
    (matches the native MXU tile on v6e/v7x; 128-wide fallback on odd sizes)."""
    target = max(1, 256 // (2 * width))
    g = 1
    for cand in range(2, target + 1):
        if total_modes % cand == 0:
            g = cand
    return g


def _spectral_block_weight(wr, wi):
    """real/imag (Cin, Cout, m1, m2) -> per-mode (M, 2Cin, 2Cout) blocks so
    that for input rows [Re(X)|Im(X)]:  out = x @ blk  gives [Re|Im] outputs."""
    cin, cout, m1, m2 = wr.shape
    wrT = jnp.transpose(wr, (2, 3, 0, 1)).reshape(m1 * m2, cin, cout)
    wiT = jnp.transpose(wi, (2, 3, 0, 1)).reshape(m1 * m2, cin, cout)
    re_rows = jnp.concatenate([wrT, wiT], axis=2)     # rows fed by Re(X)
    im_rows = jnp.concatenate([-wiT, wrT], axis=2)    # rows fed by Im(X)
    return jnp.concatenate([re_rows, im_rows], axis=1)    # (M, 2Cin, 2Cout)


def _pack_block_diag(blk, group):
    """(2M, 2Cin, 2Cout) per-mode blocks -> (2M/G, G*2Cin, G*2Cout)
    block-diagonal group weights (one MXU-friendly matmul per group)."""
    m_tot, ci, co = blk.shape
    ng = m_tot // group
    b = blk.reshape(ng, group, ci, co)
    eye = jnp.eye(group, dtype=blk.dtype)
    w = jnp.einsum("gjab,jk->gjakb", b, eye)
    return w.reshape(ng, group * ci, group * co)


# ----------------------------------------------------------------------------
# Deterministic synthetic parameter init (shapes follow FNO2d.__init__;
# linear / conv weights kept in PyTorch (out, in) layout).
# ----------------------------------------------------------------------------
def init_fno_params(key, modes1, modes2, width, layernum):
    keys = iter(jax.random.split(key, 6 + 6 * layernum))

    def u(shape, scale):
        return scale * jax.random.uniform(next(keys), shape, dtype=jnp.float32)

    group = _choose_group(2 * modes1 * modes2, width)
    params = {
        "fc0_w": u((width, 5), 0.4),   "fc0_b": u((width,), 0.1),
        "fc1_w": u((256, width), 0.2), "fc1_b": u((256,), 0.1),
        "fc2_w": u((2, 256), 0.05),    "fc2_b": u((2,), 0.1),
        "layers": [],
    }
    sscale = 1.0 / (width * width)
    for _ in range(layernum):
        # real/imag parts of weights1 / weights2 (torch: scale * rand(cfloat)).
        w1r = u((width, width, modes1, modes2), sscale)
        w1i = u((width, width, modes1, modes2), sscale)
        w2r = u((width, width, modes1, modes2), sscale)
        w2i = u((width, width, modes1, modes2), sscale)
        blk = jnp.concatenate([_spectral_block_weight(w1r, w1i),
                               _spectral_block_weight(w2r, w2i)], axis=0)
        params["layers"].append({
            "sw_grp": _pack_block_diag(blk, group),  # (NG, G*2w, G*2w) f32
            "cw": u((width, width), 0.2),            # 1x1 Conv2d weight (Co,Ci)
            "cb": u((width,), 0.1),
        })
    return params


if __name__ == "__main__":
    modes1 = modes2 = 4
    width = 16
    layernum = 5
    B, Sx, Sy = 2, 16, 16

    key = jax.random.PRNGKey(0)
    kp, kx = jax.random.split(key)
    params = init_fno_params(kp, modes1, modes2, width, layernum)
    x = jax.random.normal(kx, (B, Sx, Sy, 3), dtype=jnp.float32)

    fwd = jax.jit(functools.partial(
        fno2d_forward, modes1=modes1, modes2=modes2,
        width=width, layernum=layernum))
    out = fwd(params, x)
    jax.block_until_ready(out)
    assert out.shape == (B, Sx, Sy, 2) and out.dtype == jnp.float32
    print("KERNEL_OK")
</pallas_src>

<mosaic_0001>
module attributes {stable_mosaic.version = 11 : i64} {
  func.func @_fc_kernel(%arg0: i32, %arg1: memref<5x512xf32, #tpu.memory_space<vmem>>, %arg2: memref<16x5xf32, #tpu.memory_space<vmem>>, %arg3: memref<16x1xf32, #tpu.memory_space<vmem>>, %arg4: memref<16x512xf32, #tpu.memory_space<vmem>>) attributes {dimension_semantics = [#tpu.dimension_semantics<parallel>], iteration_bounds = array<i64: 1>, scalar_prefetch = 0 : i64, scratch_operands = 0 : i64, tpu.core_type = #tpu.core_type<tc>, window_params = [{transform_indices = @transform_0, window_bounds = array<i64: 5, 512>}, {pipeline_mode = #tpu.pipeline_mode<synchronous>, transform_indices = @transform_1, window_bounds = array<i64: 16, 5>}, {pipeline_mode = #tpu.pipeline_mode<synchronous>, transform_indices = @transform_2, window_bounds = array<i64: 16, 1>}, {transform_indices = @transform_3, window_bounds = array<i64: 16, 512>}]} {
    %c0 = arith.constant 0 : index
    %c0_0 = arith.constant 0 : index
    %0 = vector.load %arg2[%c0, %c0_0] : memref<16x5xf32, #tpu.memory_space<vmem>>, vector<16x5xf32>
    %c0_1 = arith.constant 0 : index
    %c0_2 = arith.constant 0 : index
    %1 = vector.load %arg1[%c0_1, %c0_2] : memref<5x512xf32, #tpu.memory_space<vmem>>, vector<5x512xf32>
    %cst = arith.constant dense<0.000000e+00> : vector<16x512xf32>
    %2 = tpu.matmul %0, %1, %cst {dimension_numbers = #tpu.dot_dimension_numbers<[1], [0], [0], [1], [0, 0, 1, 1], [], []>} : vector<16x5xf32>, vector<5x512xf32>, vector<16x512xf32> -> vector<16x512xf32>
    %c0_3 = arith.constant 0 : index
    %c0_4 = arith.constant 0 : index
    %3 = vector.load %arg3[%c0_3, %c0_4] : memref<16x1xf32, #tpu.memory_space<vmem>>, vector<16x1xf32>
    %4 = vector.broadcast %3 : vector<16x1xf32> to vector<16x512xf32>
    %5 = arith.addf %2, %4 : vector<16x512xf32>
    %c0_5 = arith.constant 0 : index
    %c0_6 = arith.constant 0 : index
    %6 = vector.load %arg4[%c0_5, %c0_6] : memref<16x512xf32, #tpu.memory_space<vmem>>, vector<16x512xf32>
    tpu.vector_store %arg4[%c0_5, %c0_6], %5 {strides = array<i32>} : memref<16x512xf32, #tpu.memory_space<vmem>>, vector<16x512xf32>,
    return
  }
  func.func @transform_0(%arg0: i32) -> (i32, i32) {
    %c0_i32 = arith.constant 0 : i32
    %c0_i32_0 = arith.constant 0 : i32
    return %c0_i32, %arg0 : i32, i32
  }
  func.func @transform_1(%arg0: i32) -> (i32, i32) {
    %c0_i32 = arith.constant 0 : i32
    %c0_i32_0 = arith.constant 0 : i32
    %c0_i32_1 = arith.constant 0 : i32
    return %c0_i32, %c0_i32_0 : i32, i32
  }
  func.func @transform_2(%arg0: i32) -> (i32, i32) {
    %c0_i32 = arith.constant 0 : i32
    %c0_i32_0 = arith.constant 0 : i32
    %c0_i32_1 = arith.constant 0 : i32
    return %c0_i32, %c0_i32_0 : i32, i32
  }
  func.func @transform_3(%arg0: i32) -> (i32, i32) {
    %c0_i32 = arith.constant 0 : i32
    %c0_i32_0 = arith.constant 0 : i32
    return %c0_i32, %arg0 : i32, i32
  }
}

module attributes {stable_mosaic.version = 11 : i64} {
  func.func @_mode_mix_kernel(%arg0: i32, %arg1: memref<4x2x256xf32, #tpu.memory_space<vmem>>, %arg2: memref<4x256x256xf32, #tpu.memory_space<vmem>>, %arg3: memref<4x2x256xf32, #tpu.memory_space<vmem>>) attributes {dimension_semantics = [#tpu.dimension_semantics<arbitrary>], iteration_bounds = array<i64: 1>, scalar_prefetch = 0 : i64, scratch_operands = 0 : i64, tpu.core_type = #tpu.core_type<tc>, window_params = [{pipeline_mode = #tpu.pipeline_mode<synchronous>, transform_indices = @transform_0, window_bounds = array<i64: 4, 2, 256>}, {pipeline_mode = #tpu.pipeline_mode<synchronous>, transform_indices = @transform_1, window_bounds = array<i64: 4, 256, 256>}, {pipeline_mode = #tpu.pipeline_mode<synchronous>, transform_indices = @transform_2, window_bounds = array<i64: 4, 2, 256>}]} {
    %c0 = arith.constant 0 : index
    %c0_0 = arith.constant 0 : index
    %c0_1 = arith.constant 0 : index
    %0 = vector.load %arg1[%c0, %c0_0, %c0_1] : memref<4x2x256xf32, #tpu.memory_space<vmem>>, vector<4x2x256xf32>
    %c0_2 = arith.constant 0 : index
    %c0_3 = arith.constant 0 : index
    %c0_4 = arith.constant 0 : index
    %1 = vector.load %arg2[%c0_2, %c0_3, %c0_4] : memref<4x256x256xf32, #tpu.memory_space<vmem>>, vector<4x256x256xf32>
    "tpu.trace_start"() <{level = 10 : i32, message = "gbi,gio->gbo"}> : () -> ()
    %cst = arith.constant dense<0.000000e+00> : vector<4x2x256xf32>
    %2 = tpu.matmul %0, %1, %cst {dimension_numbers = #tpu.dot_dimension_numbers<[2], [1], [1], [2], [0, 0, 0, 1, 1, 2], [0], [0]>} : vector<4x2x256xf32>, vector<4x256x256xf32>, vector<4x2x256xf32> -> vector<4x2x256xf32>
    "tpu.trace_stop"() : () -> ()
    %c0_5 = arith.constant 0 : index
    %c0_6 = arith.constant 0 : index
    %c0_7 = arith.constant 0 : index
    %3 = vector.load %arg3[%c0_5, %c0_6, %c0_7] : memref<4x2x256xf32, #tpu.memory_space<vmem>>, vector<4x2x256xf32>
    tpu.vector_store %arg3[%c0_5, %c0_6, %c0_7], %2 {strides = array<i32>} : memref<4x2x256xf32, #tpu.memory_space<vmem>>, vector<4x2x256xf32>,
    return
  }
  func.func @transform_0(%arg0: i32) -> (i32, i32, i32) {
    %c0_i32 = arith.constant 0 : i32
    %c0_i32_0 = arith.constant 0 : i32
    %c0_i32_1 = arith.constant 0 : i32
    %c0_i32_2 = arith.constant 0 : i32
    return %c0_i32, %c0_i32_0, %c0_i32_1 : i32, i32, i32
  }
  func.func @transform_1(%arg0: i32) -> (i32, i32, i32) {
    %c0_i32 = arith.constant 0 : i32
    %c0_i32_0 = arith.constant 0 : i32
    %c0_i32_1 = arith.constant 0 : i32
    %c0_i32_2 = arith.constant 0 : i32
    return %c0_i32, %c0_i32_0, %c0_i32_1 : i32, i32, i32
  }
  func.func @transform_2(%arg0: i32) -> (i32, i32, i32) {
    %c0_i32 = arith.constant 0 : i32
    %c0_i32_0 = arith.constant 0 : i32
    %c0_i32_1 = arith.constant 0 : i32
    %c0_i32_2 = arith.constant 0 : i32
    return %c0_i32, %c0_i32_0, %c0_i32_1 : i32, i32, i32
  }
}

module attributes {stable_mosaic.version = 11 : i64} {
  func.func @_pw_kernel(%arg0: i32, %arg1: memref<16x1280xf32, #tpu.memory_space<vmem>>, %arg2: memref<16x16xf32, #tpu.memory_space<vmem>>, %arg3: memref<16x1xf32, #tpu.memory_space<vmem>>, %arg4: memref<16x1280xf32, #tpu.memory_space<vmem>>, %arg5: memref<16x1280xf32, #tpu.memory_space<vmem>>) attributes {dimension_semantics = [#tpu.dimension_semantics<parallel>], iteration_bounds = array<i64: 1>, scalar_prefetch = 0 : i64, scratch_operands = 0 : i64, tpu.core_type = #tpu.core_type<tc>, window_params = [{transform_indices = @transform_0, window_bounds = array<i64: 16, 1280>}, {pipeline_mode = #tpu.pipeline_mode<synchronous>, transform_indices = @transform_1, window_bounds = array<i64: 16, 16>}, {pipeline_mode = #tpu.pipeline_mode<synchronous>, transform_indices = @transform_2, window_bounds = array<i64: 16, 1>}, {transform_indices = @transform_3, window_bounds = array<i64: 16, 1280>}, {transform_indices = @transform_4, window_bounds = array<i64: 16, 1280>}]} {
    %c0 = arith.constant 0 : index
    %c0_0 = arith.constant 0 : index
    %0 = vector.load %arg2[%c0, %c0_0] : memref<16x16xf32, #tpu.memory_space<vmem>>, vector<16x16xf32>
    %c0_1 = arith.constant 0 : index
    %c0_2 = arith.constant 0 : index
    %1 = vector.load %arg1[%c0_1, %c0_2] : memref<16x1280xf32, #tpu.memory_space<vmem>>, vector<16x1280xf32>
    %cst = arith.constant dense<0.000000e+00> : vector<16x1280xf32>
    %2 = tpu.matmul %0, %1, %cst {dimension_numbers = #tpu.dot_dimension_numbers<[1], [0], [0], [1], [0, 0, 1, 1], [], []>} : vector<16x16xf32>, vector<16x1280xf32>, vector<16x1280xf32> -> vector<16x1280xf32>
    %c0_3 = arith.constant 0 : index
    %c0_4 = arith.constant 0 : index
    %3 = vector.load %arg3[%c0_3, %c0_4] : memref<16x1xf32, #tpu.memory_space<vmem>>, vector<16x1xf32>
    %4 = vector.broadcast %3 : vector<16x1xf32> to vector<16x1280xf32>
    %5 = arith.addf %2, %4 : vector<16x1280xf32>
    %c0_5 = arith.constant 0 : index
    %c0_6 = arith.constant 0 : index
    %6 = vector.load %arg4[%c0_5, %c0_6] : memref<16x1280xf32, #tpu.memory_space<vmem>>, vector<16x1280xf32>
    %7 = arith.addf %5, %6 : vector<16x1280xf32>
    %8 = math.absf %7 : vector<16x1280xf32>
    %cst_7 = arith.constant 0.707106769 : f32
    %9 = vector.broadcast %cst_7 : f32 to vector<16x1280xf32>
    %10 = arith.mulf %8, %9 : vector<16x1280xf32>
    %cst_8 = arith.constant 0.327591091 : f32
    %11 = vector.broadcast %cst_8 : f32 to vector<16x1280xf32>
    %12 = arith.mulf %11, %10 : vector<16x1280xf32>
    %cst_9 = arith.constant 1.000000e+00 : f32
    %13 = vector.broadcast %cst_9 : f32 to vector<16x1280xf32>
    %14 = arith.addf %13, %12 : vector<16x1280xf32>
    %15 = tpu.reciprocal %14 {approx = true} : vector<16x1280xf32> -> vector<16x1280xf32>
    %cst_10 = arith.constant 1.06140542 : f32
    %16 = vector.broadcast %cst_10 : f32 to vector<16x1280xf32>
    %17 = arith.mulf %16, %15 : vector<16x1280xf32>
    %cst_11 = arith.constant 1.45315206 : f32
    %18 = vector.broadcast %cst_11 : f32 to vector<16x1280xf32>
    %19 = arith.subf %17, %18 : vector<16x1280xf32>
    %20 = arith.mulf %19, %15 : vector<16x1280xf32>
    %cst_12 = arith.constant 1.42141378 : f32
    %21 = vector.broadcast %cst_12 : f32 to vector<16x1280xf32>
    %22 = arith.addf %20, %21 : vector<16x1280xf32>
    %23 = arith.mulf %22, %15 : vector<16x1280xf32>
    %cst_13 = arith.constant 0.284496725 : f32
    %24 = vector.broadcast %cst_13 : f32 to vector<16x1280xf32>
    %25 = arith.subf %23, %24 : vector<16x1280xf32>
    %26 = arith.mulf %25, %15 : vector<16x1280xf32>
    %cst_14 = arith.constant 0.254829586 : f32
    %27 = vector.broadcast %cst_14 : f32 to vector<16x1280xf32>
    %28 = arith.addf %26, %27 : vector<16x1280xf32>
    %29 = arith.mulf %28, %15 : vector<16x1280xf32>
    %cst_15 = arith.constant 0.000000e+00 : f32
    %30 = vector.broadcast %cst_15 : f32 to vector<16x1280xf32>
    %31 = arith.subf %30, %10 : vector<16x1280xf32>
    %32 = arith.mulf %31, %10 : vector<16x1280xf32>
    %33 = math.exp %32 : vector<16x1280xf32>
    %34 = arith.mulf %29, %33 : vector<16x1280xf32>
    %cst_16 = arith.constant 1.000000e+00 : f32
    %35 = vector.broadcast %cst_16 : f32 to vector<16x1280xf32>
    %36 = arith.subf %35, %34 : vector<16x1280xf32>
    %37 = arith.mulf %8, %36 : vector<16x1280xf32>
    %38 = arith.addf %7, %37 : vector<16x1280xf32>
    %cst_17 = arith.constant 5.000000e-01 : f32
    %39 = vector.broadcast %cst_17 : f32 to vector<16x1280xf32>
    %40 = arith.mulf %39, %38 : vector<16x1280xf32>
    %c0_18 = arith.constant 0 : index
    %c0_19 = arith.constant 0 : index
    %41 = vector.load %arg5[%c0_18, %c0_19] : memref<16x1280xf32, #tpu.memory_space<vmem>>, vector<16x1280xf32>
    tpu.vector_store %arg5[%c0_18, %c0_19], %40 {strides = array<i32>} : memref<16x1280xf32, #tpu.memory_space<vmem>>, vector<16x1280xf32>,
    return
  }
  func.func @transform_0(%arg0: i32) -> (i32, i32) {
    %c0_i32 = arith.constant 0 : i32
    %c0_i32_0 = arith.constant 0 : i32
    return %c0_i32, %arg0 : i32, i32
  }
  func.func @transform_1(%arg0: i32) -> (i32, i32) {
    %c0_i32 = arith.constant 0 : i32
    %c0_i32_0 = arith.constant 0 : i32
    %c0_i32_1 = arith.constant 0 : i32
    return %c0_i32, %c0_i32_0 : i32, i32
  }
  func.func @transform_2(%arg0: i32) -> (i32, i32) {
    %c0_i32 = arith.constant 0 : i32
    %c0_i32_0 = arith.constant 0 : i32
    %c0_i32_1 = arith.constant 0 : i32
    return %c0_i32, %c0_i32_0 : i32, i32
  }
  func.func @transform_3(%arg0: i32) -> (i32, i32) {
    %c0_i32 = arith.constant 0 : i32
    %c0_i32_0 = arith.constant 0 : i32
    return %c0_i32, %arg0 : i32, i32
  }
  func.func @transform_4(%arg0: i32) -> (i32, i32) {
    %c0_i32 = arith.constant 0 : i32
    %c0_i32_0 = arith.constant 0 : i32
    return %c0_i32, %arg0 : i32, i32
  }
}

module attributes {stable_mosaic.version = 11 : i64} {
  func.func @_pw_kernel(%arg0: i32, %arg1: memref<16x1280xf32, #tpu.memory_space<vmem>>, %arg2: memref<16x16xf32, #tpu.memory_space<vmem>>, %arg3: memref<16x1xf32, #tpu.memory_space<vmem>>, %arg4: memref<16x1280xf32, #tpu.memory_space<vmem>>, %arg5: memref<16x1280xf32, #tpu.memory_space<vmem>>) attributes {dimension_semantics = [#tpu.dimension_semantics<parallel>], iteration_bounds = array<i64: 1>, scalar_prefetch = 0 : i64, scratch_operands = 0 : i64, tpu.core_type = #tpu.core_type<tc>, window_params = [{transform_indices = @transform_0, window_bounds = array<i64: 16, 1280>}, {pipeline_mode = #tpu.pipeline_mode<synchronous>, transform_indices = @transform_1, window_bounds = array<i64: 16, 16>}, {pipeline_mode = #tpu.pipeline_mode<synchronous>, transform_indices = @transform_2, window_bounds = array<i64: 16, 1>}, {transform_indices = @transform_3, window_bounds = array<i64: 16, 1280>}, {transform_indices = @transform_4, window_bounds = array<i64: 16, 1280>}]} {
    %c0 = arith.constant 0 : index
    %c0_0 = arith.constant 0 : index
    %0 = vector.load %arg2[%c0, %c0_0] : memref<16x16xf32, #tpu.memory_space<vmem>>, vector<16x16xf32>
    %c0_1 = arith.constant 0 : index
    %c0_2 = arith.constant 0 : index
    %1 = vector.load %arg1[%c0_1, %c0_2] : memref<16x1280xf32, #tpu.memory_space<vmem>>, vector<16x1280xf32>
    %cst = arith.constant dense<0.000000e+00> : vector<16x1280xf32>
    %2 = tpu.matmul %0, %1, %cst {dimension_numbers = #tpu.dot_dimension_numbers<[1], [0], [0], [1], [0, 0, 1, 1], [], []>} : vector<16x16xf32>, vector<16x1280xf32>, vector<16x1280xf32> -> vector<16x1280xf32>
    %c0_3 = arith.constant 0 : index
    %c0_4 = arith.constant 0 : index
    %3 = vector.load %arg3[%c0_3, %c0_4] : memref<16x1xf32, #tpu.memory_space<vmem>>, vector<16x1xf32>
    %4 = vector.broadcast %3 : vector<16x1xf32> to vector<16x1280xf32>
    %5 = arith.addf %2, %4 : vector<16x1280xf32>
    %c0_5 = arith.constant 0 : index
    %c0_6 = arith.constant 0 : index
    %6 = vector.load %arg4[%c0_5, %c0_6] : memref<16x1280xf32, #tpu.memory_space<vmem>>, vector<16x1280xf32>
    %7 = arith.addf %5, %6 : vector<16x1280xf32>
    %c0_7 = arith.constant 0 : index
    %c0_8 = arith.constant 0 : index
    %8 = vector.load %arg5[%c0_7, %c0_8] : memref<16x1280xf32, #tpu.memory_space<vmem>>, vector<16x1280xf32>
    tpu.vector_store %arg5[%c0_7, %c0_8], %7 {strides = array<i32>} : memref<16x1280xf32, #tpu.memory_space<vmem>>, vector<16x1280xf32>,
    return
  }
  func.func @transform_0(%arg0: i32) -> (i32, i32) {
    %c0_i32 = arith.constant 0 : i32
    %c0_i32_0 = arith.constant 0 : i32
    return %c0_i32, %arg0 : i32, i32
  }
  func.func @transform_1(%arg0: i32) -> (i32, i32) {
    %c0_i32 = arith.constant 0 : i32
    %c0_i32_0 = arith.constant 0 : i32
    %c0_i32_1 = arith.constant 0 : i32
    return %c0_i32, %c0_i32_0 : i32, i32
  }
  func.func @transform_2(%arg0: i32) -> (i32, i32) {
    %c0_i32 = arith.constant 0 : i32
    %c0_i32_0 = arith.constant 0 : i32
    %c0_i32_1 = arith.constant 0 : i32
    return %c0_i32, %c0_i32_0 : i32, i32
  }
  func.func @transform_3(%arg0: i32) -> (i32, i32) {
    %c0_i32 = arith.constant 0 : i32
    %c0_i32_0 = arith.constant 0 : i32
    return %c0_i32, %arg0 : i32, i32
  }
  func.func @transform_4(%arg0: i32) -> (i32, i32) {
    %c0_i32 = arith.constant 0 : i32
    %c0_i32_0 = arith.constant 0 : i32
    return %c0_i32, %arg0 : i32, i32
  }
}

module attributes {stable_mosaic.version = 11 : i64} {
  func.func @_fc12_kernel(%arg0: i32, %arg1: memref<16x512xf32, #tpu.memory_space<vmem>>, %arg2: memref<256x16xf32, #tpu.memory_space<vmem>>, %arg3: memref<256x1xf32, #tpu.memory_space<vmem>>, %arg4: memref<2x256xf32, #tpu.memory_space<vmem>>, %arg5: memref<2x1xf32, #tpu.memory_space<vmem>>, %arg6: memref<2x512xf32, #tpu.memory_space<vmem>>) attributes {dimension_semantics = [#tpu.dimension_semantics<parallel>], iteration_bounds = array<i64: 1>, scalar_prefetch = 0 : i64, scratch_operands = 0 : i64, tpu.core_type = #tpu.core_type<tc>, window_params = [{transform_indices = @transform_0, window_bounds = array<i64: 16, 512>}, {pipeline_mode = #tpu.pipeline_mode<synchronous>, transform_indices = @transform_1, window_bounds = array<i64: 256, 16>}, {pipeline_mode = #tpu.pipeline_mode<synchronous>, transform_indices = @transform_2, window_bounds = array<i64: 256, 1>}, {pipeline_mode = #tpu.pipeline_mode<synchronous>, transform_indices = @transform_3, window_bounds = array<i64: 2, 256>}, {pipeline_mode = #tpu.pipeline_mode<synchronous>, transform_indices = @transform_4, window_bounds = array<i64: 2, 1>}, {transform_indices = @transform_5, window_bounds = array<i64: 2, 512>}]} {
    %c0 = arith.constant 0 : index
    %c0_0 = arith.constant 0 : index
    %0 = vector.load %arg2[%c0, %c0_0] : memref<256x16xf32, #tpu.memory_space<vmem>>, vector<256x16xf32>
    %c0_1 = arith.constant 0 : index
    %c0_2 = arith.constant 0 : index
    %1 = vector.load %arg1[%c0_1, %c0_2] : memref<16x512xf32, #tpu.memory_space<vmem>>, vector<16x512xf32>
    %cst = arith.constant dense<0.000000e+00> : vector<256x512xf32>
    %2 = tpu.matmul %0, %1, %cst {dimension_numbers = #tpu.dot_dimension_numbers<[1], [0], [0], [1], [0, 0, 1, 1], [], []>} : vector<256x16xf32>, vector<16x512xf32>, vector<256x512xf32> -> vector<256x512xf32>
    %c0_3 = arith.constant 0 : index
    %c0_4 = arith.constant 0 : index
    %3 = vector.load %arg3[%c0_3, %c0_4] : memref<256x1xf32, #tpu.memory_space<vmem>>, vector<256x1xf32>
    %4 = vector.broadcast %3 : vector<256x1xf32> to vector<256x512xf32>
    %5 = arith.addf %2, %4 : vector<256x512xf32>
    %6 = math.absf %5 : vector<256x512xf32>
    %cst_5 = arith.constant 0.707106769 : f32
    %7 = vector.broadcast %cst_5 : f32 to vector<256x512xf32>
    %8 = arith.mulf %6, %7 : vector<256x512xf32>
    %cst_6 = arith.constant 0.327591091 : f32
    %9 = vector.broadcast %cst_6 : f32 to vector<256x512xf32>
    %10 = arith.mulf %9, %8 : vector<256x512xf32>
    %cst_7 = arith.constant 1.000000e+00 : f32
    %11 = vector.broadcast %cst_7 : f32 to vector<256x512xf32>
    %12 = arith.addf %11, %10 : vector<256x512xf32>
    %13 = tpu.reciprocal %12 {approx = true} : vector<256x512xf32> -> vector<256x512xf32>
    %cst_8 = arith.constant 1.06140542 : f32
    %14 = vector.broadcast %cst_8 : f32 to vector<256x512xf32>
    %15 = arith.mulf %14, %13 : vector<256x512xf32>
    %cst_9 = arith.constant 1.45315206 : f32
    %16 = vector.broadcast %cst_9 : f32 to vector<256x512xf32>
    %17 = arith.subf %15, %16 : vector<256x512xf32>
    %18 = arith.mulf %17, %13 : vector<256x512xf32>
    %cst_10 = arith.constant 1.42141378 : f32
    %19 = vector.broadcast %cst_10 : f32 to vector<256x512xf32>
    %20 = arith.addf %18, %19 : vector<256x512xf32>
    %21 = arith.mulf %20, %13 : vector<256x512xf32>
    %cst_11 = arith.constant 0.284496725 : f32
    %22 = vector.broadcast %cst_11 : f32 to vector<256x512xf32>
    %23 = arith.subf %21, %22 : vector<256x512xf32>
    %24 = arith.mulf %23, %13 : vector<256x512xf32>
    %cst_12 = arith.constant 0.254829586 : f32
    %25 = vector.broadcast %cst_12 : f32 to vector<256x512xf32>
    %26 = arith.addf %24, %25 : vector<256x512xf32>
    %27 = arith.mulf %26, %13 : vector<256x512xf32>
    %cst_13 = arith.constant 0.000000e+00 : f32
    %28 = vector.broadcast %cst_13 : f32 to vector<256x512xf32>
    %29 = arith.subf %28, %8 : vector<256x512xf32>
    %30 = arith.mulf %29, %8 : vector<256x512xf32>
    %31 = math.exp %30 : vector<256x512xf32>
    %32 = arith.mulf %27, %31 : vector<256x512xf32>
    %cst_14 = arith.constant 1.000000e+00 : f32
    %33 = vector.broadcast %cst_14 : f32 to vector<256x512xf32>
    %34 = arith.subf %33, %32 : vector<256x512xf32>
    %35 = arith.mulf %6, %34 : vector<256x512xf32>
    %36 = arith.addf %5, %35 : vector<256x512xf32>
    %cst_15 = arith.constant 5.000000e-01 : f32
    %37 = vector.broadcast %cst_15 : f32 to vector<256x512xf32>
    %38 = arith.mulf %37, %36 : vector<256x512xf32>
    %c0_16 = arith.constant 0 : index
    %c0_17 = arith.constant 0 : index
    %39 = vector.load %arg4[%c0_16, %c0_17] : memref<2x256xf32, #tpu.memory_space<vmem>>, vector<2x256xf32>
    %cst_18 = arith.constant dense<0.000000e+00> : vector<2x512xf32>
    %40 = tpu.matmul %39, %38, %cst_18 {dimension_numbers = #tpu.dot_dimension_numbers<[1], [0], [0], [1], [0, 0, 1, 1], [], []>} : vector<2x256xf32>, vector<256x512xf32>, vector<2x512xf32> -> vector<2x512xf32>
    %c0_19 = arith.constant 0 : index
    %c0_20 = arith.constant 0 : index
    %41 = vector.load %arg5[%c0_19, %c0_20] : memref<2x1xf32, #tpu.memory_space<vmem>>, vector<2x1xf32>
    %42 = vector.broadcast %41 : vector<2x1xf32> to vector<2x512xf32>
    %43 = arith.addf %40, %42 : vector<2x512xf32>
    %c0_21 = arith.constant 0 : index
    %c0_22 = arith.constant 0 : index
    %44 = vector.load %arg6[%c0_21, %c0_22] : memref<2x512xf32, #tpu.memory_space<vmem>>, vector<2x512xf32>
    tpu.vector_store %arg6[%c0_21, %c0_22], %43 {strides = array<i32>} : memref<2x512xf32, #tpu.memory_space<vmem>>, vector<2x512xf32>,
    return
  }
  func.func @transform_0(%arg0: i32) -> (i32, i32) {
    %c0_i32 = arith.constant 0 : i32
    %c0_i32_0 = arith.constant 0 : i32
    return %c0_i32, %arg0 : i32, i32
  }
  func.func @transform_1(%arg0: i32) -> (i32, i32) {
    %c0_i32 = arith.constant 0 : i32
    %c0_i32_0 = arith.constant 0 : i32
    %c0_i32_1 = arith.constant 0 : i32
    return %c0_i32, %c0_i32_0 : i32, i32
  }
  func.func @transform_2(%arg0: i32) -> (i32, i32) {
    %c0_i32 = arith.constant 0 : i32
    %c0_i32_0 = arith.constant 0 : i32
    %c0_i32_1 = arith.constant 0 : i32
    return %c0_i32, %c0_i32_0 : i32, i32
  }
  func.func @transform_3(%arg0: i32) -> (i32, i32) {
    %c0_i32 = arith.constant 0 : i32
    %c0_i32_0 = arith.constant 0 : i32
    %c0_i32_1 = arith.constant 0 : i32
    return %c0_i32, %c0_i32_0 : i32, i32
  }
  func.func @transform_4(%arg0: i32) -> (i32, i32) {
    %c0_i32 = arith.constant 0 : i32
    %c0_i32_0 = arith.constant 0 : i32
    %c0_i32_1 = arith.constant 0 : i32
    return %c0_i32, %c0_i32_0 : i32, i32
  }
  func.func @transform_5(%arg0: i32) -> (i32, i32) {
    %c0_i32 = arith.constant 0 : i32
    %c0_i32_0 = arith.constant 0 : i32
    return %c0_i32, %arg0 : i32, i32
  }
}

</mosaic_0001>

<bundles_post_ra>
// kernel: fno2d_forward.12
= control target key start
LH: loop header
LB: loop body
LE: loop exit
PB: predicated region body
PF: predicated region fallthrough
CT: control target
= control target key end

     0   :  { %vm39_vm0 = vcmask 1044480   ;;  %vm32_vm1 = vcmask 39936   ;;  %v229_v3 = vmov 0.0   ;;  %v230_v8 = vmov 0   ;;  %s303_s0 = inlined_call_operand.vmem [shape: f32[5,512], index: 0, kind: input, shape index: {}]   ;;  %s304_s1 = inlined_call_operand.vmem [shape: f32[16,5], index: 1, kind: input, shape index: {}]   ;;  %s305_s2 = inlined_call_operand.vmem [shape: f32[16,1], index: 2, kind: input, shape index: {}]   ;;  %s306_s3 = inlined_call_operand.vmem [shape: f32[16,512], index: 3, kind: output, shape index: {}]  }
   0x1   :  { %v17_v0 = vld [vmem:[%s303_s0 + $0x8] sm:$0x1f]  ;;  %v19_v1 = vld [vmem:[%s303_s0 + $0x18] sm:$0x1f]  ;;  %v16_v2 = vld [vmem:[%s303_s0] sm:$0x1f]  ;;  %116 = vmatprep.mubr.f32.mxu0 %v229_v3  ;;  %193 = vmatprep.mubr.f32.mxu1 %v229_v3 }
   0x2   :  { %218 = vmatprep.subr.msk.mxu0 %vm39_vm0, %v17_v0  ;;  %222 = vmatprep.subr.msk.mxu1 %vm39_vm0, %v19_v1  ;;  %v18_v4 = vld [vmem:[%s303_s0 + $0x10] sm:$0x1f]  ;;  %v14_v5 = vld [vmem:[%s304_s1] sm:$0xff]  ;;  %v15_v7 = vld [vmem:[%s304_s1 + $0x8] sm:$0xff] }
   0x3   :  { %219 = vmatpush1.msk.msra.mxu0 %vm39_vm0, %v16_v2  ;;  %223 = vmatpush1.msk.msra.mxu1 %vm39_vm0, %v18_v4  ;;  %v20_v6 = vld [vmem:[%s305_s2] sm:$0xff]  ;;  %v21_v9 = vld [vmem:[%s305_s2 + $0x8] sm:$0xff] }
   0x4   :  { %220 = vmatmul.mubr.msk.f32.vlgmr.msra.gmra.mrb[0].mxu0 %vm32_vm1, %v14_v5  ;;  %224 = vmatmul.mubr.msk.f32.vlgmr.msra.gmra.mrb[0].mxu1 %vm32_vm1, %v14_v5 }
   0x5   :  { %122 = vmatprep.mubr.f32.mxu0 %v229_v3  ;;  %199 = vmatprep.mubr.f32.mxu1 %v229_v3 }
   0x6   :  { %228 = vset.pattern.permute.xlu0 %v230_v8 }
   0x7   :  { %24 = vperm.xlu0 %228, %v20_v6  }
   0x8   :  { %221 = vmatmul.mubr.msk.f32.gmra.mrb[2].mxu0 %vm32_vm1, %v15_v7  ;;  %225 = vmatmul.mubr.msk.f32.gmra.mrb[2].mxu1 %vm32_vm1, %v15_v7 }
   0xb   :  { %29 = vperm.xlu0 %228, %v21_v9  }
  0x86   :  { %v25_v10 = vpop.permute.xlu0 %24 }
  0x8a   :  { %v30_v19 = vpop.permute.xlu0 %29 }
  0xd7   :  { %v118_v11 = vpop.f32.mrb[0].mxu0  ;;  %v195_v12 = vpop.f32.mrb[0].mxu1 }
  0xd8   :  { %v119_v13 = vadd.f32 %v118_v11, %v25_v10  ;;  %v196_v14 = vadd.f32 %v195_v12, %v25_v10  ;;  %v120_v15 = vpop.f32.mrb[1].mxu0  ;;  %v197_v16 = vpop.f32.mrb[1].mxu1 }
  0xd9   :  { %v121_v17 = vadd.f32 %v120_v15, %v25_v10  ;;  %v198_v18 = vadd.f32 %v197_v16, %v25_v10 }
  0xda   :  { %206 = vst [vmem:[%s306_s3] sm:$0xff] %v119_v13  ;;  %208 = vst [vmem:[%s306_s3 + $0x10] sm:$0xff] %v196_v14 }
  0xdb   :  { %207 = vst [vmem:[%s306_s3 + $0x8] sm:$0xff] %v121_v17  ;;  %209 = vst [vmem:[%s306_s3 + $0x18] sm:$0xff] %v198_v18  ;;  %v124_v20 = vpop.f32.mrb[2].mxu0  ;;  %v201_v21 = vpop.f32.mrb[2].mxu1 }
  0xdc   :  { %v125_v22 = vadd.f32 %v124_v20, %v30_v19  ;;  %v202_v23 = vadd.f32 %v201_v21, %v30_v19  ;;  %v126_v24 = vpop.f32.mrb[3].mxu0  ;;  %v203_v25 = vpop.f32.mrb[3].mxu1 }
  0xdd   :  { %v127_v26 = vadd.f32 %v126_v24, %v30_v19  ;;  %v204_v27 = vadd.f32 %v203_v25, %v30_v19 }
  0xde   :  { %210 = vst [vmem:[%s306_s3 + $0x20] sm:$0xff] %v125_v22  ;;  %212 = vst [vmem:[%s306_s3 + $0x30] sm:$0xff] %v202_v23 }
  0xdf   :  { %211 = vst [vmem:[%s306_s3 + $0x28] sm:$0xff] %v127_v26  ;;  %213 = vst [vmem:[%s306_s3 + $0x38] sm:$0xff] %v204_v27 }

// kernel: fno2d_forward.13
= control target key start
LH: loop header
LB: loop body
LE: loop exit
PB: predicated region body
PF: predicated region fallthrough
CT: control target
= control target key end

     0   :  { %s1742_s1 = inlined_call_operand.vmem [shape: f32[4,256,256], index: 1, kind: input, shape index: {}]   ;;  %s1743_s0 = inlined_call_operand.vmem [shape: f32[4,2,256], index: 0, kind: input, shape index: {}]   ;;  %s1744_s2 = inlined_call_operand.vmem [shape: f32[4,2,256], index: 2, kind: output, shape index: {}]  }
   0x1   :  { %v16_v0 = vld [vmem:[%s1742_s1 + $0x8] sm:$0xff]  ;;  %v18_v1 = vld [vmem:[%s1742_s1 + $0x18] sm:$0xff]  ;;  %v15_v5 = vld [vmem:[%s1742_s1] sm:$0xff] }
   0x2   :  { %v80_v2 = vld [vmem:[%s1742_s1 + $0x208] sm:$0xff]  ;;  %v659_v3 = vpack.c.bf16 %v18_v1, %v16_v0  ;;  %v82_v4 = vld [vmem:[%s1742_s1 + $0x218] sm:$0xff]  ;;  %v17_v6 = vld [vmem:[%s1742_s1 + $0x10] sm:$0xff] }
   0x3   :  { %v723_v7 = vpack.c.bf16 %v82_v4, %v80_v2  ;;  %v661_v8 = vpack.c.bf16 %v17_v6, %v15_v5  ;;  %v79_v9 = vld [vmem:[%s1742_s1 + $0x200] sm:$0xff]  ;;  %v81_v10 = vld [vmem:[%s1742_s1 + $0x210] sm:$0xff]  ;;  %v20_v11 = vld [vmem:[%s1742_s1 + $0x28] sm:$0xff] }
   0x4   :  { %660 = vmatprep.subr.bf16.mxu0 %v659_v3  ;;  %v725_v12 = vpack.c.bf16 %v81_v10, %v79_v9  ;;  %v22_v13 = vld [vmem:[%s1742_s1 + $0x38] sm:$0xff]  ;;  %v84_v14 = vld [vmem:[%s1742_s1 + $0x228] sm:$0xff]  ;;  %v19_v18 = vld [vmem:[%s1742_s1 + $0x20] sm:$0xff] }
   0x5   :  { %v86_v15 = vld [vmem:[%s1742_s1 + $0x238] sm:$0xff]  ;;  %724 = vmatprep.subr.bf16.mxu1 %v723_v7  ;;  %662 = vmatpush1.bf16.msra.mxu0 %v661_v8  ;;  %v663_v16 = vpack.c.bf16 %v22_v13, %v20_v11  ;;  %v21_v19 = vld [vmem:[%s1742_s1 + $0x30] sm:$0xff]  ;;  %v83_v20 = vld [vmem:[%s1742_s1 + $0x220] sm:$0xff] }
   0x6   :  { %v727_v17 = vpack.c.bf16 %v86_v15, %v84_v14  ;;  %726 = vmatpush1.bf16.msra.mxu1 %v725_v12  ;;  %v665_v21 = vpack.c.bf16 %v21_v19, %v19_v18  ;;  %v85_v22 = vld [vmem:[%s1742_s1 + $0x230] sm:$0xff]  ;;  %v24_v23 = vld [vmem:[%s1742_s1 + $0x48] sm:$0xff]  ;;  %v26_v24 = vld [vmem:[%s1742_s1 + $0x58] sm:$0xff] }
   0x7   :  { %664 = vmatprep.subr.bf16.mxu0 %v663_v16  ;;  %v729_v25 = vpack.c.bf16 %v85_v22, %v83_v20  ;;  %v667_v26 = vpack.c.bf16 %v26_v24, %v24_v23  ;;  %v88_v27 = vld [vmem:[%s1742_s1 + $0x248] sm:$0xff]  ;;  %v90_v28 = vld [vmem:[%s1742_s1 + $0x258] sm:$0xff]  ;;  %v23_v29 = vld [vmem:[%s1742_s1 + $0x40] sm:$0xff] }
   0x8   :  { %728 = vmatprep.subr.bf16.mxu1 %v727_v17  ;;  %v731_v30 = vpack.c.bf16 %v90_v28, %v88_v27  ;;  %v25_v31 = vld [vmem:[%s1742_s1 + $0x50] sm:$0xff]  ;;  %v87_v32 = vld [vmem:[%s1742_s1 + $0x240] sm:$0xff]  ;;  %v28_v35 = vld [vmem:[%s1742_s1 + $0x68] sm:$0xff] }
   0x9   :  { %v89_v33 = vld [vmem:[%s1742_s1 + $0x250] sm:$0xff]  ;;  %666 = vmatpush1.bf16.msra.mxu0 %v665_v21  ;;  %v669_v34 = vpack.c.bf16 %v25_v31, %v23_v29  ;;  %v30_v36 = vld [vmem:[%s1742_s1 + $0x78] sm:$0xff]  ;;  %v92_v37 = vld [vmem:[%s1742_s1 + $0x268] sm:$0xff] }
   0xa   :  { %730 = vmatpush1.bf16.msra.mxu1 %v729_v25  ;;  %668 = vmatprep.subr.bf16.mxu0 %v667_v26  ;;  %v733_v38 = vpack.c.bf16 %v89_v33, %v87_v32  ;;  %v671_v39 = vpack.c.bf16 %v30_v36, %v28_v35  ;;  %v94_v40 = vld [vmem:[%s1742_s1 + $0x278] sm:$0xff]  ;;  %v27_v41 = vld [vmem:[%s1742_s1 + $0x60] sm:$0xff]  ;;  %v29_v42 = vld [vmem:[%s1742_s1 + $0x70] sm:$0xff] }
   0xb   :  { %732 = vmatprep.subr.bf16.mxu1 %v731_v30  ;;  %v735_v43 = vpack.c.bf16 %v94_v40, %v92_v37  ;;  %v91_v44 = vld [vmem:[%s1742_s1 + $0x260] sm:$0xff]  ;;  %v93_v45 = vld [vmem:[%s1742_s1 + $0x270] sm:$0xff]  ;;  %v32_v46 = vld [vmem:[%s1742_s1 + $0x88] sm:$0xff]  ;;  %v673_v50 = vpack.c.bf16 %v29_v42, %v27_v41 }
   0xc   :  { %v34_v47 = vld [vmem:[%s1742_s1 + $0x98] sm:$0xff]  ;;  %v96_v48 = vld [vmem:[%s1742_s1 + $0x288] sm:$0xff]  ;;  %v737_v51 = vpack.c.bf16 %v93_v45, %v91_v44  ;;  %v31_v53 = vld [vmem:[%s1742_s1 + $0x80] sm:$0xff] }
   0xd   :  { %v98_v49 = vld [vmem:[%s1742_s1 + $0x298] sm:$0xff]  ;;  %670 = vmatpush1.bf16.msra.mxu0 %v669_v34  ;;  %v675_v52 = vpack.c.bf16 %v34_v47, %v32_v46  ;;  %v33_v54 = vld [vmem:[%s1742_s1 + $0x90] sm:$0xff]  ;;  %v95_v55 = vld [vmem:[%s1742_s1 + $0x280] sm:$0xff] }
   0xe   :  { %734 = vmatpush1.bf16.msra.mxu1 %v733_v38  ;;  %672 = vmatprep.subr.bf16.mxu0 %v671_v39  ;;  %v739_v56 = vpack.c.bf16 %v98_v49, %v96_v48  ;;  %v97_v57 = vld [vmem:[%s1742_s1 + $0x290] sm:$0xff]  ;;  %v36_v58 = vld [vmem:[%s1742_s1 + $0xa8] sm:$0xff]  ;;  %v38_v59 = vld [vmem:[%s1742_s1 + $0xb8] sm:$0xff]  ;;  %v677_v62 = vpack.c.bf16 %v33_v54, %v31_v53 }
   0xf   :  { %736 = vmatprep.subr.bf16.mxu1 %v735_v43  ;;  %v100_v60 = vld [vmem:[%s1742_s1 + $0x2a8] sm:$0xff]  ;;  %v102_v61 = vld [vmem:[%s1742_s1 + $0x2b8] sm:$0xff]  ;;  %v741_v63 = vpack.c.bf16 %v97_v57, %v95_v55  ;;  %v679_v0 = vpack.c.bf16 %v38_v59, %v36_v58  ;;  %v35_v1 = vld [vmem:[%s1742_s1 + $0xa0] sm:$0xff] }
  0x10   :  { %v37_v2 = vld [vmem:[%s1742_s1 + $0xb0] sm:$0xff]  ;;  %v99_v3 = vld [vmem:[%s1742_s1 + $0x2a0] sm:$0xff]  ;;  %v743_v4 = vpack.c.bf16 %v102_v61, %v100_v60  ;;  %v40_v6 = vld [vmem:[%s1742_s1 + $0xc8] sm:$0xff] }
  0x11   :  { %674 = vmatpush1.bf16.msra.mxu0 %v673_v50  ;;  %v101_v5 = vld [vmem:[%s1742_s1 + $0x2b0] sm:$0xff]  ;;  %v42_v7 = vld [vmem:[%s1742_s1 + $0xd8] sm:$0xff]  ;;  %v104_v8 = vld [vmem:[%s1742_s1 + $0x2c8] sm:$0xff]  ;;  %v681_v10 = vpack.c.bf16 %v37_v2, %v35_v1 }
  0x12   :  { %738 = vmatpush1.bf16.msra.mxu1 %v737_v51  ;;  %676 = vmatprep.subr.bf16.mxu0 %v675_v52  ;;  %v106_v9 = vld [vmem:[%s1742_s1 + $0x2d8] sm:$0xff]  ;;  %v745_v11 = vpack.c.bf16 %v101_v5, %v99_v3  ;;  %v683_v12 = vpack.c.bf16 %v42_v7, %v40_v6  ;;  %v39_v13 = vld [vmem:[%s1742_s1 + $0xc0] sm:$0xff]  ;;  %v41_v14 = vld [vmem:[%s1742_s1 + $0xd0] sm:$0xff] }
  0x13   :  { %740 = vmatprep.subr.bf16.mxu1 %v739_v56  ;;  %v103_v15 = vld [vmem:[%s1742_s1 + $0x2c0] sm:$0xff]  ;;  %v747_v16 = vpack.c.bf16 %v106_v9, %v104_v8  ;;  %v105_v17 = vld [vmem:[%s1742_s1 + $0x2d0] sm:$0xff]  ;;  %v44_v18 = vld [vmem:[%s1742_s1 + $0xe8] sm:$0xff]  ;;  %v685_v22 = vpack.c.bf16 %v41_v14, %v39_v13 }
  0x14   :  { %v46_v19 = vld [vmem:[%s1742_s1 + $0xf8] sm:$0xff]  ;;  %v108_v20 = vld [vmem:[%s1742_s1 + $0x2e8] sm:$0xff]  ;;  %v749_v23 = vpack.c.bf16 %v105_v17, %v103_v15  ;;  %v43_v25 = vld [vmem:[%s1742_s1 + $0xe0] sm:$0xff] }
  0x15   :  { %678 = vmatpush1.bf16.msra.mxu0 %v677_v62  ;;  %v110_v21 = vld [vmem:[%s1742_s1 + $0x2f8] sm:$0xff]  ;;  %v687_v24 = vpack.c.bf16 %v46_v19, %v44_v18  ;;  %v45_v26 = vld [vmem:[%s1742_s1 + $0xf0] sm:$0xff]  ;;  %v107_v27 = vld [vmem:[%s1742_s1 + $0x2e0] sm:$0xff] }
  0x16   :  { %742 = vmatpush1.bf16.msra.mxu1 %v741_v63  ;;  %680 = vmatprep.subr.bf16.mxu0 %v679_v0  ;;  %v751_v28 = vpack.c.bf16 %v110_v21, %v108_v20  ;;  %v109_v29 = vld [vmem:[%s1742_s1 + $0x2f0] sm:$0xff]  ;;  %v48_v30 = vld [vmem:[%s1742_s1 + $0x108] sm:$0xff]  ;;  %v50_v31 = vld [vmem:[%s1742_s1 + $0x118] sm:$0xff]  ;;  %v689_v34 = vpack.c.bf16 %v45_v26, %v43_v25 }
  0x17   :  { %744 = vmatprep.subr.bf16.mxu1 %v743_v4  ;;  %v112_v32 = vld [vmem:[%s1742_s1 + $0x308] sm:$0xff]  ;;  %v114_v33 = vld [vmem:[%s1742_s1 + $0x318] sm:$0xff]  ;;  %v753_v35 = vpack.c.bf16 %v109_v29, %v107_v27  ;;  %v691_v36 = vpack.c.bf16 %v50_v31, %v48_v30  ;;  %v47_v37 = vld [vmem:[%s1742_s1 + $0x100] sm:$0xff] }
  0x18   :  { %v49_v38 = vld [vmem:[%s1742_s1 + $0x110] sm:$0xff]  ;;  %v111_v39 = vld [vmem:[%s1742_s1 + $0x300] sm:$0xff]  ;;  %v755_v40 = vpack.c.bf16 %v114_v33, %v112_v32  ;;  %v52_v42 = vld [vmem:[%s1742_s1 + $0x128] sm:$0xff] }
  0x19   :  { %682 = vmatpush1.bf16.msra.mxu0 %v681_v10  ;;  %v113_v41 = vld [vmem:[%s1742_s1 + $0x310] sm:$0xff]  ;;  %v54_v43 = vld [vmem:[%s1742_s1 + $0x138] sm:$0xff]  ;;  %v116_v44 = vld [vmem:[%s1742_s1 + $0x328] sm:$0xff]  ;;  %v693_v46 = vpack.c.bf16 %v49_v38, %v47_v37 }
  0x1a   :  { %746 = vmatpush1.bf16.msra.mxu1 %v745_v11  ;;  %684 = vmatprep.subr.bf16.mxu0 %v683_v12  ;;  %v118_v45 = vld [vmem:[%s1742_s1 + $0x338] sm:$0xff]  ;;  %v757_v47 = vpack.c.bf16 %v113_v41, %v111_v39  ;;  %v695_v48 = vpack.c.bf16 %v54_v43, %v52_v42  ;;  %v51_v49 = vld [vmem:[%s1742_s1 + $0x120] sm:$0xff]  ;;  %v53_v50 = vld [vmem:[%s1742_s1 + $0x130] sm:$0xff] }
  0x1b   :  { %748 = vmatprep.subr.bf16.mxu1 %v747_v16  ;;  %v115_v51 = vld [vmem:[%s1742_s1 + $0x320] sm:$0xff]  ;;  %v759_v52 = vpack.c.bf16 %v118_v45, %v116_v44  ;;  %v117_v53 = vld [vmem:[%s1742_s1 + $0x330] sm:$0xff]  ;;  %v56_v54 = vld [vmem:[%s1742_s1 + $0x148] sm:$0xff]  ;;  %v697_v58 = vpack.c.bf16 %v53_v50, %v51_v49 }
  0x1c   :  { %v58_v55 = vld [vmem:[%s1742_s1 + $0x158] sm:$0xff]  ;;  %v120_v56 = vld [vmem:[%s1742_s1 + $0x348] sm:$0xff]  ;;  %v761_v59 = vpack.c.bf16 %v117_v53, %v115_v51  ;;  %v55_v61 = vld [vmem:[%s1742_s1 + $0x140] sm:$0xff] }
  0x1d   :  { %686 = vmatpush1.bf16.msra.mxu0 %v685_v22  ;;  %v122_v57 = vld [vmem:[%s1742_s1 + $0x358] sm:$0xff]  ;;  %v699_v60 = vpack.c.bf16 %v58_v55, %v56_v54  ;;  %v57_v62 = vld [vmem:[%s1742_s1 + $0x150] sm:$0xff]  ;;  %v119_v63 = vld [vmem:[%s1742_s1 + $0x340] sm:$0xff] }
  0x1e   :  { %750 = vmatpush1.bf16.msra.mxu1 %v749_v23  ;;  %688 = vmatprep.subr.bf16.mxu0 %v687_v24  ;;  %v763_v0 = vpack.c.bf16 %v122_v57, %v120_v56  ;;  %v121_v1 = vld [vmem:[%s1742_s1 + $0x350] sm:$0xff]  ;;  %v60_v2 = vld [vmem:[%s1742_s1 + $0x168] sm:$0xff]  ;;  %v62_v3 = vld [vmem:[%s1742_s1 + $0x178] sm:$0xff]  ;;  %v701_v6 = vpack.c.bf16 %v57_v62, %v55_v61 }
  0x1f   :  { %752 = vmatprep.subr.bf16.mxu1 %v751_v28  ;;  %v124_v4 = vld [vmem:[%s1742_s1 + $0x368] sm:$0xff]  ;;  %v126_v5 = vld [vmem:[%s1742_s1 + $0x378] sm:$0xff]  ;;  %v59_v7 = vld [vmem:[%s1742_s1 + $0x160] sm:$0xff]  ;;  %v765_v8 = vpack.c.bf16 %v121_v1, %v119_v63  ;;  %v703_v9 = vpack.c.bf16 %v62_v3, %v60_v2 }
  0x20   :  { %v61_v10 = vld [vmem:[%s1742_s1 + $0x170] sm:$0xff]  ;;  %v123_v11 = vld [vmem:[%s1742_s1 + $0x360] sm:$0xff]  ;;  %v767_v13 = vpack.c.bf16 %v126_v5, %v124_v4  ;;  %v64_v14 = vld [vmem:[%s1742_s1 + $0x188] sm:$0xff] }
  0x21   :  { %690 = vmatpush1.bf16.msra.mxu0 %v689_v34  ;;  %v125_v12 = vld [vmem:[%s1742_s1 + $0x370] sm:$0xff]  ;;  %v66_v15 = vld [vmem:[%s1742_s1 + $0x198] sm:$0xff]  ;;  %v1227_v16 = vld.sshfl [vmem:[%s1743_s0] sm:$0x33 pattern:$0x76325410]  ;;  %v705_v21 = vpack.c.bf16 %v61_v10, %v59_v7 }
  0x22   :  { %754 = vmatpush1.bf16.msra.mxu1 %v753_v35  ;;  %692 = vmatprep.subr.bf16.mxu0 %v691_v36  ;;  %v128_v17 = vld [vmem:[%s1742_s1 + $0x388] sm:$0xff]  ;;  %v130_v18 = vld [vmem:[%s1742_s1 + $0x398] sm:$0xff]  ;;  %v279_v19 = vcombine.high %v1227_v16, %v1227_v16  ;;  %v1240_v20 = vld.sshfl [vmem:[%s1743_s0 + $0x4] sm:$0x33 pattern:$0x76325410]  ;;  %v769_v23 = vpack.c.bf16 %v125_v12, %v123_v11  ;;  %v707_v24 = vpack.c.bf16 %v66_v15, %v64_v14 }
  0x23   :  { %756 = vmatprep.subr.bf16.mxu1 %v755_v40  ;;  %v361_v22 = vcombine.high %v1240_v20, %v1240_v20  ;;  %v63_v25 = vld [vmem:[%s1742_s1 + $0x180] sm:$0xff]  ;;  %v65_v26 = vld [vmem:[%s1742_s1 + $0x190] sm:$0xff]  ;;  %v771_v28 = vpack.c.bf16 %v130_v18, %v128_v17  ;;  %v68_v30 = vld [vmem:[%s1742_s1 + $0x1a8] sm:$0xff] }
  0x24   :  { %v127_v27 = vld [vmem:[%s1742_s1 + $0x380] sm:$0xff]  ;;  %v129_v29 = vld [vmem:[%s1742_s1 + $0x390] sm:$0xff]  ;;  %v70_v31 = vld [vmem:[%s1742_s1 + $0x1b8] sm:$0xff]  ;;  %346 = vmatprep.mubr.f32.mxu0 %v279_v19  ;;  %v709_v34 = vpack.c.bf16 %v65_v26, %v63_v25 }
  0x25   :  { %694 = vmatpush1.bf16.msra.mxu0 %v693_v46  ;;  %v132_v32 = vld [vmem:[%s1742_s1 + $0x3a8] sm:$0xff]  ;;  %v134_v33 = vld [vmem:[%s1742_s1 + $0x3b8] sm:$0xff]  ;;  %428 = vmatprep.mubr.f32.mxu1 %v361_v22  ;;  %v773_v35 = vpack.c.bf16 %v129_v29, %v127_v27  ;;  %v711_v36 = vpack.c.bf16 %v70_v31, %v68_v30  ;;  %v67_v37 = vld [vmem:[%s1742_s1 + $0x1a0] sm:$0xff] }
  0x26   :  { %758 = vmatpush1.bf16.msra.mxu1 %v757_v47  ;;  %696 = vmatprep.subr.bf16.mxu0 %v695_v48  ;;  %v69_v38 = vld [vmem:[%s1742_s1 + $0x1b0] sm:$0xff]  ;;  %v131_v39 = vld [vmem:[%s1742_s1 + $0x3a0] sm:$0xff]  ;;  %v775_v40 = vpack.c.bf16 %v134_v33, %v132_v32  ;;  %v72_v42 = vld [vmem:[%s1742_s1 + $0x1c8] sm:$0xff] }
  0x27   :  { %760 = vmatprep.subr.bf16.mxu1 %v759_v52  ;;  %v133_v41 = vld [vmem:[%s1742_s1 + $0x3b0] sm:$0xff]  ;;  %v74_v43 = vld [vmem:[%s1742_s1 + $0x1d8] sm:$0xff]  ;;  %v136_v44 = vld [vmem:[%s1742_s1 + $0x3c8] sm:$0xff]  ;;  %v713_v46 = vpack.c.bf16 %v69_v38, %v67_v37 }
  0x28   :  { %v138_v45 = vld [vmem:[%s1742_s1 + $0x3d8] sm:$0xff]  ;;  %v777_v47 = vpack.c.bf16 %v133_v41, %v131_v39  ;;  %v715_v48 = vpack.c.bf16 %v74_v43, %v72_v42  ;;  %v71_v49 = vld [vmem:[%s1742_s1 + $0x1c0] sm:$0xff]  ;;  %v73_v50 = vld [vmem:[%s1742_s1 + $0x1d0] sm:$0xff] }
  0x29   :  { %698 = vmatpush1.bf16.msra.mxu0 %v697_v58  ;;  %v135_v51 = vld [vmem:[%s1742_s1 + $0x3c0] sm:$0xff]  ;;  %v779_v52 = vpack.c.bf16 %v138_v45, %v136_v44  ;;  %v137_v53 = vld [vmem:[%s1742_s1 + $0x3d0] sm:$0xff]  ;;  %v76_v54 = vld [vmem:[%s1742_s1 + $0x1e8] sm:$0xff]  ;;  %v717_v58 = vpack.c.bf16 %v73_v50, %v71_v49 }
  0x2a   :  { %762 = vmatpush1.bf16.msra.mxu1 %v761_v59  ;;  %700 = vmatprep.subr.bf16.mxu0 %v699_v60  ;;  %v78_v55 = vld [vmem:[%s1742_s1 + $0x1f8] sm:$0xff]  ;;  %v140_v56 = vld [vmem:[%s1742_s1 + $0x3e8] sm:$0xff]  ;;  %v781_v59 = vpack.c.bf16 %v137_v53, %v135_v51  ;;  %v75_v61 = vld [vmem:[%s1742_s1 + $0x1e0] sm:$0xff] }
  0x2b   :  { %764 = vmatprep.subr.bf16.mxu1 %v763_v0  ;;  %v142_v57 = vld [vmem:[%s1742_s1 + $0x3f8] sm:$0xff]  ;;  %v719_v60 = vpack.c.bf16 %v78_v55, %v76_v54  ;;  %v77_v62 = vld [vmem:[%s1742_s1 + $0x1f0] sm:$0xff]  ;;  %v139_v63 = vld [vmem:[%s1742_s1 + $0x3e0] sm:$0xff] }
  0x2c   :  { %v783_v0 = vpack.c.bf16 %v142_v57, %v140_v56  ;;  %v141_v1 = vld [vmem:[%s1742_s1 + $0x3f0] sm:$0xff]  ;;  %v144_v2 = vld [vmem:[%s1742_s1 + $0x408] sm:$0xff]  ;;  %v146_v3 = vld [vmem:[%s1742_s1 + $0x418] sm:$0xff] }
  0x2d   :  { %702 = vmatpush1.bf16.msra.mxu0 %v701_v6  ;;  %v208_v4 = vld [vmem:[%s1742_s1 + $0x608] sm:$0xff]  ;;  %v210_v5 = vld [vmem:[%s1742_s1 + $0x618] sm:$0xff]  ;;  %v721_v6 = vpack.c.bf16 %v77_v62, %v75_v61  ;;  %v785_v7 = vpack.c.bf16 %v141_v1, %v139_v63  ;;  %v145_v10 = vld [vmem:[%s1742_s1 + $0x410] sm:$0xff] }
  0x2e   :  { %766 = vmatpush1.bf16.msra.mxu1 %v765_v8  ;;  %704 = vmatprep.subr.bf16.mxu0 %v703_v9  ;;  %v787_v8 = vpack.c.bf16 %v146_v3, %v144_v2  ;;  %v143_v9 = vld [vmem:[%s1742_s1 + $0x400] sm:$0xff]  ;;  %v851_v12 = vpack.c.bf16 %v210_v5, %v208_v4  ;;  %v148_v14 = vld [vmem:[%s1742_s1 + $0x428] sm:$0xff]  ;;  %v150_v15 = vld [vmem:[%s1742_s1 + $0x438] sm:$0xff] }
  0x2f   :  { %768 = vmatprep.subr.bf16.mxu1 %v767_v13  ;;  %v207_v11 = vld [vmem:[%s1742_s1 + $0x600] sm:$0xff]  ;;  %v209_v13 = vld [vmem:[%s1742_s1 + $0x610] sm:$0xff]  ;;  %v212_v17 = vld [vmem:[%s1742_s1 + $0x628] sm:$0xff]  ;;  %v789_v19 = vpack.c.bf16 %v145_v10, %v143_v9  ;;  %v791_v22 = vpack.c.bf16 %v150_v15, %v148_v14 }
  0x30   :  { %v214_v18 = vld [vmem:[%s1742_s1 + $0x638] sm:$0xff]  ;;  %v211_v25 = vld [vmem:[%s1742_s1 + $0x620] sm:$0xff]  ;;  %v213_v27 = vld [vmem:[%s1742_s1 + $0x630] sm:$0xff] }
  0x31   :  { %706 = vmatpush1.bf16.msra.mxu0 %v705_v21  ;;  %v853_v21 = vpack.c.bf16 %v209_v13, %v207_v11  ;;  %v855_v26 = vpack.c.bf16 %v214_v18, %v212_v17  ;;  %v154_v29 = vld [vmem:[%s1742_s1 + $0x458] sm:$0xff]  ;;  %v216_v30 = vld [vmem:[%s1742_s1 + $0x648] sm:$0xff]  ;;  %v857_v33 = vpack.c.bf16 %v213_v27, %v211_v25  ;;  %v217_v37 = vld [vmem:[%s1742_s1 + $0x650] sm:$0xff] }
  0x32   :  { %770 = vmatpush1.bf16.msra.mxu1 %v769_v23  ;;  %708 = vmatprep.subr.bf16.mxu0 %v707_v24  ;;  %v147_v23 = vld [vmem:[%s1742_s1 + $0x420] sm:$0xff]  ;;  %v149_v24 = vld [vmem:[%s1742_s1 + $0x430] sm:$0xff]  ;;  %v218_v31 = vld [vmem:[%s1742_s1 + $0x658] sm:$0xff] }
  0x33   :  { %772 = vmatprep.subr.bf16.mxu1 %v771_v28  ;;  %v152_v28 = vld [vmem:[%s1742_s1 + $0x448] sm:$0xff]  ;;  %v793_v32 = vpack.c.bf16 %v149_v24, %v147_v23  ;;  %v158_v39 = vld [vmem:[%s1742_s1 + $0x478] sm:$0xff]  ;;  %v155_v45 = vld [vmem:[%s1742_s1 + $0x460] sm:$0xff] }
  0x34   :  { %v156_v38 = vld [vmem:[%s1742_s1 + $0x468] sm:$0xff]  ;;  %v222_v41 = vld [vmem:[%s1742_s1 + $0x678] sm:$0xff]  ;;  %v221_v49 = vld [vmem:[%s1742_s1 + $0x670] sm:$0xff] }
  0x35   :  { %710 = vmatpush1.bf16.msra.mxu0 %v709_v34  ;;  %v795_v34 = vpack.c.bf16 %v154_v29, %v152_v28  ;;  %v799_v44 = vpack.c.bf16 %v158_v39, %v156_v38  ;;  %v160_v50 = vld [vmem:[%s1742_s1 + $0x488] sm:$0xff]  ;;  %v162_v51 = vld [vmem:[%s1742_s1 + $0x498] sm:$0xff]  ;;  %v159_v57 = vld [vmem:[%s1742_s1 + $0x480] sm:$0xff] }
  0x36   :  { %774 = vmatpush1.bf16.msra.mxu1 %v773_v35  ;;  %712 = vmatprep.subr.bf16.mxu0 %v711_v36  ;;  %v153_v35 = vld [vmem:[%s1742_s1 + $0x450] sm:$0xff]  ;;  %v215_v36 = vld [vmem:[%s1742_s1 + $0x640] sm:$0xff]  ;;  %v226_v53 = vld [vmem:[%s1742_s1 + $0x698] sm:$0xff]  ;;  %v803_v56 = vpack.c.bf16 %v162_v51, %v160_v50 }
  0x37   :  { %776 = vmatprep.subr.bf16.mxu1 %v775_v40  ;;  %v220_v40 = vld [vmem:[%s1742_s1 + $0x668] sm:$0xff]  ;;  %v861_v43 = vpack.c.bf16 %v217_v37, %v215_v36  ;;  %v225_v61 = vld [vmem:[%s1742_s1 + $0x690] sm:$0xff]  ;;  %v166_v63 = vld [vmem:[%s1742_s1 + $0x4b8] sm:$0xff] }
  0x38   :  { %v164_v62 = vld [vmem:[%s1742_s1 + $0x4a8] sm:$0xff]  ;;  %v230_v1 = vld [vmem:[%s1742_s1 + $0x6b8] sm:$0xff]  ;;  %v163_v5 = vld [vmem:[%s1742_s1 + $0x4a0] sm:$0xff] }
  0x39   :  { %714 = vmatpush1.bf16.msra.mxu0 %v713_v46  ;;  %v157_v46 = vld [vmem:[%s1742_s1 + $0x470] sm:$0xff]  ;;  %v807_v4 = vpack.c.bf16 %v166_v63, %v164_v62  ;;  %v168_v10 = vld [vmem:[%s1742_s1 + $0x4c8] sm:$0xff]  ;;  %v170_v11 = vld [vmem:[%s1742_s1 + $0x4d8] sm:$0xff] }
  0x3a   :  { %778 = vmatpush1.bf16.msra.mxu1 %v777_v47  ;;  %716 = vmatprep.subr.bf16.mxu0 %v715_v48  ;;  %v219_v47 = vld [vmem:[%s1742_s1 + $0x660] sm:$0xff]  ;;  %v863_v48 = vpack.c.bf16 %v222_v41, %v220_v40  ;;  %v801_v54 = vpack.c.bf16 %v157_v46, %v155_v45  ;;  %v229_v9 = vld [vmem:[%s1742_s1 + $0x6b0] sm:$0xff]  ;;  %v234_v13 = vld [vmem:[%s1742_s1 + $0x6d8] sm:$0xff]  ;;  %v811_v18 = vpack.c.bf16 %v170_v11, %v168_v10 }
  0x3b   :  { %780 = vmatprep.subr.bf16.mxu1 %v779_v52  ;;  %v224_v52 = vld [vmem:[%s1742_s1 + $0x688] sm:$0xff]  ;;  %v865_v55 = vpack.c.bf16 %v221_v49, %v219_v47  ;;  %v167_v15 = vld [vmem:[%s1742_s1 + $0x4c0] sm:$0xff]  ;;  %v174_v25 = vld [vmem:[%s1742_s1 + $0x4f8] sm:$0xff] }
  0x3c   :  { %v172_v24 = vld [vmem:[%s1742_s1 + $0x4e8] sm:$0xff]  ;;  %v238_v28 = vld [vmem:[%s1742_s1 + $0x6f8] sm:$0xff]  ;;  %v235_v36 = vld [vmem:[%s1742_s1 + $0x6e0] sm:$0xff] }
  0x3d   :  { %718 = vmatpush1.bf16.msra.mxu0 %v717_v58  ;;  %v161_v58 = vld [vmem:[%s1742_s1 + $0x490] sm:$0xff]  ;;  %v236_v27 = vld [vmem:[%s1742_s1 + $0x6e8] sm:$0xff]  ;;  %v178_v39 = vld [vmem:[%s1742_s1 + $0x518] sm:$0xff] }
  0x3e   :  { %782 = vmatpush1.bf16.msra.mxu1 %v781_v59  ;;  %720 = vmatprep.subr.bf16.mxu0 %v719_v60  ;;  %v223_v59 = vld [vmem:[%s1742_s1 + $0x680] sm:$0xff]  ;;  %v867_v60 = vpack.c.bf16 %v226_v53, %v224_v52  ;;  %v805_v2 = vpack.c.bf16 %v161_v58, %v159_v57  ;;  %v237_v37 = vld [vmem:[%s1742_s1 + $0x6f0] sm:$0xff]  ;;  %v176_v38 = vld [vmem:[%s1742_s1 + $0x508] sm:$0xff] }
  0x3f   :  { %784 = vmatprep.subr.bf16.mxu1 %v783_v0  ;;  %v228_v0 = vld [vmem:[%s1742_s1 + $0x6a8] sm:$0xff]  ;;  %v869_v3 = vpack.c.bf16 %v225_v61, %v223_v59  ;;  %v242_v41 = vld [vmem:[%s1742_s1 + $0x718] sm:$0xff]  ;;  %v175_v45 = vld [vmem:[%s1742_s1 + $0x500] sm:$0xff] }
  0x40   :  { %v240_v40 = vld [vmem:[%s1742_s1 + $0x708] sm:$0xff]  ;;  %v177_v46 = vld [vmem:[%s1742_s1 + $0x510] sm:$0xff]  ;;  %v239_v47 = vld [vmem:[%s1742_s1 + $0x700] sm:$0xff] }
  0x41   :  { %722 = vmatpush1.bf16.msra.mxu0 %v721_v6  ;;  %v165_v6 = vld [vmem:[%s1742_s1 + $0x4b0] sm:$0xff]  ;;  %v180_v50 = vld [vmem:[%s1742_s1 + $0x528] sm:$0xff]  ;;  %v182_v51 = vld [vmem:[%s1742_s1 + $0x538] sm:$0xff] }
  0x42   :  { %786 = vmatpush1.bf16.msra.mxu1 %v785_v7  ;;  %788 = vmatprep.subr.bf16.mxu0 %v787_v8  ;;  %v227_v7 = vld [vmem:[%s1742_s1 + $0x6a0] sm:$0xff]  ;;  %v871_v8 = vpack.c.bf16 %v230_v1, %v228_v0  ;;  %v809_v14 = vpack.c.bf16 %v165_v6, %v163_v5  ;;  %v241_v49 = vld [vmem:[%s1742_s1 + $0x710] sm:$0xff]  ;;  %v244_v52 = vld [vmem:[%s1742_s1 + $0x728] sm:$0xff] }
  0x43   :  { %852 = vmatprep.subr.bf16.mxu1 %v851_v12  ;;  %v232_v12 = vld [vmem:[%s1742_s1 + $0x6c8] sm:$0xff]  ;;  %v873_v17 = vpack.c.bf16 %v229_v9, %v227_v7  ;;  %v246_v53 = vld [vmem:[%s1742_s1 + $0x738] sm:$0xff]  ;;  %v179_v57 = vld [vmem:[%s1742_s1 + $0x520] sm:$0xff] }
  0x44   :  { %347 = vmatmul.mubr.f32.vlgmr.msra.gmra.mrb[0].mxu0 %v1227_v16  ;;  %v151_v16 = vld [vmem:[%s1742_s1 + $0x440] sm:$0xff]  ;;  %v875_v23 = vpack.c.bf16 %v234_v13, %v232_v12  ;;  %v181_v58 = vld [vmem:[%s1742_s1 + $0x530] sm:$0xff]  ;;  %v184_v62 = vld [vmem:[%s1742_s1 + $0x548] sm:$0xff] }
  0x45   :  { %429 = vmatmul.mubr.f32.vlgmr.msra.gmra.mrb[0].mxu1 %v1240_v20  ;;  %790 = vmatpush1.bf16.msra.mxu0 %v789_v19  ;;  %v859_v20 = vpack.c.bf16 %v218_v31, %v216_v30  ;;  %v797_v42 = vpack.c.bf16 %v153_v35, %v151_v16  ;;  %v169_v19 = vld [vmem:[%s1742_s1 + $0x4d0] sm:$0xff]  ;;  %v1520_v30 = vld.sshfl [vmem:[%s1743_s0 + $0xc] sm:$0x33 pattern:$0x76325410]  ;;  %v171_v16 = vld [vmem:[%s1742_s1 + $0x4e0] sm:$0xff] }
  0x46   :  { %854 = vmatpush1.bf16.msra.mxu1 %v853_v21  ;;  %792 = vmatprep.subr.bf16.mxu0 %v791_v22  ;;  %v231_v21 = vld [vmem:[%s1742_s1 + $0x6c0] sm:$0xff]  ;;  %v233_v22 = vld [vmem:[%s1742_s1 + $0x6d0] sm:$0xff]  ;;  %v813_v31 = vpack.c.bf16 %v169_v19, %v167_v15  ;;  %v186_v63 = vld [vmem:[%s1742_s1 + $0x558] sm:$0xff] }
  0x47   :  { %856 = vmatprep.subr.bf16.mxu1 %v855_v26  ;;  %v1507_v26 = vld.sshfl [vmem:[%s1743_s0 + $0x8] sm:$0x33 pattern:$0x76325410]  ;;  %v173_v35 = vld [vmem:[%s1742_s1 + $0x4f0] sm:$0xff]  ;;  %v243_v59 = vld [vmem:[%s1742_s1 + $0x720] sm:$0xff] }
  0x48   :  { %v443_v29 = vcombine.high %v1507_v26, %v1507_v26  ;;  %v245_v61 = vld [vmem:[%s1742_s1 + $0x730] sm:$0xff]  ;;  %v248_v0 = vld [vmem:[%s1742_s1 + $0x748] sm:$0xff]  ;;  %v250_v1 = vld [vmem:[%s1742_s1 + $0x758] sm:$0xff] }
  0x49   :  { %794 = vmatpush1.bf16.msra.mxu0 %v793_v32  ;;  %v525_v32 = vcombine.high %v1520_v30, %v1520_v30  ;;  %v183_v5 = vld [vmem:[%s1742_s1 + $0x540] sm:$0xff]  ;;  %v185_v6 = vld [vmem:[%s1742_s1 + $0x550] sm:$0xff]  ;;  %v188_v10 = vld [vmem:[%s1742_s1 + $0x568] sm:$0xff] }
  0x4a   :  { %858 = vmatpush1.bf16.msra.mxu1 %v857_v33  ;;  %796 = vmatprep.subr.bf16.mxu0 %v795_v34  ;;  %v877_v33 = vpack.c.bf16 %v233_v22, %v231_v21  ;;  %v815_v34 = vpack.c.bf16 %v174_v25, %v172_v24  ;;  %v247_v7 = vld [vmem:[%s1742_s1 + $0x740] sm:$0xff]  ;;  %v249_v9 = vld [vmem:[%s1742_s1 + $0x750] sm:$0xff]  ;;  %v190_v11 = vld [vmem:[%s1742_s1 + $0x578] sm:$0xff] }
  0x4b   :  { %860 = vmatprep.subr.bf16.mxu1 %v859_v20  ;;  %v879_v20 = vpack.c.bf16 %v238_v28, %v236_v27  ;;  %510 = vmatprep.mubr.f32.mxu0 %v443_v29  ;;  %v252_v12 = vld [vmem:[%s1742_s1 + $0x768] sm:$0xff]  ;;  %v254_v13 = vld [vmem:[%s1742_s1 + $0x778] sm:$0xff]  ;;  %v893_v15 = vpack.c.bf16 %v249_v9, %v247_v7  ;;  %v189_v19 = vld [vmem:[%s1742_s1 + $0x570] sm:$0xff] }
  0x4c   :  { %592 = vmatprep.mubr.f32.mxu1 %v525_v32  ;;  %v251_v21 = vld [vmem:[%s1742_s1 + $0x760] sm:$0xff]  ;;  %v895_v22 = vpack.c.bf16 %v254_v13, %v252_v12  ;;  %v192_v24 = vld [vmem:[%s1742_s1 + $0x588] sm:$0xff]  ;;  %v194_v25 = vld [vmem:[%s1742_s1 + $0x598] sm:$0xff] }
  0x4d   :  { %798 = vmatpush1.bf16.msra.mxu0 %v797_v42  ;;  %v817_v42 = vpack.c.bf16 %v173_v35, %v171_v16  ;;  %v256_v27 = vld [vmem:[%s1742_s1 + $0x788] sm:$0xff]  ;;  %v258_v28 = vld [vmem:[%s1742_s1 + $0x798] sm:$0xff]  ;;  %v835_v32 = vpack.c.bf16 %v194_v25, %v192_v24  ;;  %v255_v16 = vld [vmem:[%s1742_s1 + $0x780] sm:$0xff] }
  0x4e   :  { %862 = vmatpush1.bf16.msra.mxu1 %v861_v43  ;;  %800 = vmatprep.subr.bf16.mxu0 %v799_v44  ;;  %v881_v43 = vpack.c.bf16 %v237_v37, %v235_v36  ;;  %v819_v44 = vpack.c.bf16 %v178_v39, %v176_v38  ;;  %v899_v35 = vpack.c.bf16 %v258_v28, %v256_v27  ;;  %v257_v36 = vld [vmem:[%s1742_s1 + $0x790] sm:$0xff]  ;;  %v198_v37 = vld [vmem:[%s1742_s1 + $0x5b8] sm:$0xff]  ;;  %v260_v38 = vld [vmem:[%s1742_s1 + $0x7a8] sm:$0xff] }
  0x4f   :  { %864 = vmatprep.subr.bf16.mxu1 %v863_v48  ;;  %v883_v48 = vpack.c.bf16 %v242_v41, %v240_v40  ;;  %v262_v39 = vld [vmem:[%s1742_s1 + $0x7b8] sm:$0xff]  ;;  %v901_v41 = vpack.c.bf16 %v257_v36, %v255_v16  ;;  %v269_v7 = vld [vmem:[%s1742_s1 + $0x7f0] sm:$0xff] }
  0x51   :  { %802 = vmatpush1.bf16.msra.mxu0 %v801_v54  ;;  %v821_v54 = vpack.c.bf16 %v177_v46, %v175_v45  ;;  %v259_v45 = vld [vmem:[%s1742_s1 + $0x7a0] sm:$0xff]  ;;  %v903_v46 = vpack.c.bf16 %v262_v39, %v260_v38 }
  0x52   :  { %866 = vmatpush1.bf16.msra.mxu1 %v865_v55  ;;  %804 = vmatprep.subr.bf16.mxu0 %v803_v56  ;;  %v885_v55 = vpack.c.bf16 %v241_v49, %v239_v47  ;;  %v823_v56 = vpack.c.bf16 %v182_v51, %v180_v50  ;;  %v261_v47 = vld [vmem:[%s1742_s1 + $0x7b0] sm:$0xff]  ;;  %v202_v49 = vld [vmem:[%s1742_s1 + $0x5d8] sm:$0xff]  ;;  %v264_v50 = vld [vmem:[%s1742_s1 + $0x7c8] sm:$0xff] }
  0x53   :  { %868 = vmatprep.subr.bf16.mxu1 %v867_v60  ;;  %v887_v60 = vpack.c.bf16 %v246_v53, %v244_v52  ;;  %v266_v51 = vld [vmem:[%s1742_s1 + $0x7d8] sm:$0xff]  ;;  %v905_v53 = vpack.c.bf16 %v261_v47, %v259_v45 }
  0x55   :  { %806 = vmatpush1.bf16.msra.mxu0 %v805_v2  ;;  %v825_v2 = vpack.c.bf16 %v181_v58, %v179_v57  ;;  %v263_v57 = vld [vmem:[%s1742_s1 + $0x7c0] sm:$0xff]  ;;  %v907_v58 = vpack.c.bf16 %v266_v51, %v264_v50 }
  0x56   :  { %870 = vmatpush1.bf16.msra.mxu1 %v869_v3  ;;  %808 = vmatprep.subr.bf16.mxu0 %v807_v4  ;;  %v889_v3 = vpack.c.bf16 %v245_v61, %v243_v59  ;;  %v827_v4 = vpack.c.bf16 %v186_v63, %v184_v62  ;;  %v265_v59 = vld [vmem:[%s1742_s1 + $0x7d0] sm:$0xff]  ;;  %v206_v61 = vld [vmem:[%s1742_s1 + $0x5f8] sm:$0xff]  ;;  %v268_v62 = vld [vmem:[%s1742_s1 + $0x7e8] sm:$0xff] }
  0x57   :  { %872 = vmatprep.subr.bf16.mxu1 %v871_v8  ;;  %v891_v8 = vpack.c.bf16 %v250_v1, %v248_v0  ;;  %v270_v63 = vld [vmem:[%s1742_s1 + $0x7f8] sm:$0xff]  ;;  %v909_v1 = vpack.c.bf16 %v265_v59, %v263_v57 }
  0x59   :  { %810 = vmatpush1.bf16.msra.mxu0 %v809_v14  ;;  %v829_v14 = vpack.c.bf16 %v185_v6, %v183_v5  ;;  %v911_v5 = vpack.c.bf16 %v270_v63, %v268_v62  ;;  %v267_v6 = vld [vmem:[%s1742_s1 + $0x7e0] sm:$0xff] }
  0x5a   :  { %874 = vmatpush1.bf16.msra.mxu1 %v873_v17  ;;  %812 = vmatprep.subr.bf16.mxu0 %v811_v18  ;;  %v831_v17 = vpack.c.bf16 %v190_v11, %v188_v10  ;;  %v187_v18 = vld [vmem:[%s1742_s1 + $0x560] sm:$0xff]  ;;  %v913_v9 = vpack.c.bf16 %v269_v7, %v267_v6 }
  0x5b   :  { %876 = vmatprep.subr.bf16.mxu1 %v875_v23  ;;  %v253_v23 = vld [vmem:[%s1742_s1 + $0x770] sm:$0xff]  ;;  %v833_v29 = vpack.c.bf16 %v189_v19, %v187_v18 }
  0x5d   :  { %814 = vmatpush1.bf16.msra.mxu0 %v813_v31  ;;  %v897_v31 = vpack.c.bf16 %v253_v23, %v251_v21 }
  0x5e   :  { %878 = vmatpush1.bf16.msra.mxu1 %v877_v33  ;;  %816 = vmatprep.subr.bf16.mxu0 %v815_v34  ;;  %v191_v33 = vld [vmem:[%s1742_s1 + $0x580] sm:$0xff]  ;;  %v193_v34 = vld [vmem:[%s1742_s1 + $0x590] sm:$0xff] }
  0x5f   :  { %880 = vmatprep.subr.bf16.mxu1 %v879_v20  ;;  %v196_v20 = vld [vmem:[%s1742_s1 + $0x5a8] sm:$0xff]  ;;  %v837_v40 = vpack.c.bf16 %v193_v34, %v191_v33 }
  0x61   :  { %818 = vmatpush1.bf16.msra.mxu0 %v817_v42  ;;  %v839_v42 = vpack.c.bf16 %v198_v37, %v196_v20 }
  0x62   :  { %882 = vmatpush1.bf16.msra.mxu1 %v881_v43  ;;  %820 = vmatprep.subr.bf16.mxu0 %v819_v44  ;;  %v195_v43 = vld [vmem:[%s1742_s1 + $0x5a0] sm:$0xff]  ;;  %v197_v44 = vld [vmem:[%s1742_s1 + $0x5b0] sm:$0xff] }
  0x63   :  { %884 = vmatprep.subr.bf16.mxu1 %v883_v48  ;;  %v200_v48 = vld [vmem:[%s1742_s1 + $0x5c8] sm:$0xff]  ;;  %v841_v52 = vpack.c.bf16 %v197_v44, %v195_v43 }
  0x65   :  { %822 = vmatpush1.bf16.msra.mxu0 %v821_v54  ;;  %v843_v54 = vpack.c.bf16 %v202_v49, %v200_v48 }
  0x66   :  { %886 = vmatpush1.bf16.msra.mxu1 %v885_v55  ;;  %824 = vmatprep.subr.bf16.mxu0 %v823_v56  ;;  %v199_v55 = vld [vmem:[%s1742_s1 + $0x5c0] sm:$0xff]  ;;  %v201_v56 = vld [vmem:[%s1742_s1 + $0x5d0] sm:$0xff] }
  0x67   :  { %888 = vmatprep.subr.bf16.mxu1 %v887_v60  ;;  %v204_v60 = vld [vmem:[%s1742_s1 + $0x5e8] sm:$0xff]  ;;  %v845_v0 = vpack.c.bf16 %v201_v56, %v199_v55 }
  0x69   :  { %826 = vmatpush1.bf16.msra.mxu0 %v825_v2  ;;  %v847_v2 = vpack.c.bf16 %v206_v61, %v204_v60 }
  0x6a   :  { %890 = vmatpush1.bf16.msra.mxu1 %v889_v3  ;;  %828 = vmatprep.subr.bf16.mxu0 %v827_v4  ;;  %v203_v3 = vld [vmem:[%s1742_s1 + $0x5e0] sm:$0xff]  ;;  %v205_v4 = vld [vmem:[%s1742_s1 + $0x5f0] sm:$0xff] }
  0x6b   :  { %892 = vmatprep.subr.bf16.mxu1 %v891_v8  ;;  %v849_v8 = vpack.c.bf16 %v205_v4, %v203_v3 }
  0x6d   :  { %830 = vmatpush1.bf16.msra.mxu0 %v829_v14 }
  0x6e   :  { %894 = vmatpush1.bf16.msra.mxu1 %v893_v15  ;;  %832 = vmatprep.subr.bf16.mxu0 %v831_v17 }
  0x6f   :  { %896 = vmatprep.subr.bf16.mxu1 %v895_v22 }
  0x71   :  { %834 = vmatpush1.bf16.msra.mxu0 %v833_v29 }
  0x72   :  { %898 = vmatpush1.bf16.msra.mxu1 %v897_v31  ;;  %836 = vmatprep.subr.bf16.mxu0 %v835_v32 }
  0x73   :  { %900 = vmatprep.subr.bf16.mxu1 %v899_v35 }
  0x75   :  { %838 = vmatpush1.bf16.msra.mxu0 %v837_v40 }
  0x76   :  { %902 = vmatpush1.bf16.msra.mxu1 %v901_v41  ;;  %840 = vmatprep.subr.bf16.mxu0 %v839_v42 }
  0x77   :  { %904 = vmatprep.subr.bf16.mxu1 %v903_v46 }
  0x79   :  { %842 = vmatpush1.bf16.msra.mxu0 %v841_v52 }
  0x7a   :  { %906 = vmatpush1.bf16.msra.mxu1 %v905_v53  ;;  %844 = vmatprep.subr.bf16.mxu0 %v843_v54 }
  0x7b   :  { %908 = vmatprep.subr.bf16.mxu1 %v907_v58 }
  0x7d   :  { %846 = vmatpush1.bf16.msra.mxu0 %v845_v0 }
  0x7e   :  { %910 = vmatpush1.bf16.msra.mxu1 %v909_v1  ;;  %848 = vmatprep.subr.bf16.mxu0 %v847_v2 }
  0x7f   :  { %912 = vmatprep.subr.bf16.mxu1 %v911_v5 }
  0x81   :  { %850 = vmatpush1.bf16.msra.mxu0 %v849_v8 }
  0x82   :  { %914 = vmatpush1.bf16.msra.mxu1 %v913_v9 }
  0x84   :  { %511 = vmatmul.mubr.f32.vlgmr.msra.gmra.mrb[2].mxu0 %v1507_v26 }
  0x85   :  { %593 = vmatmul.mubr.f32.vlgmr.msra.gmra.mrb[2].mxu1 %v1520_v30 }
 0x117   :  { %v348_v10 = vpop.f32.mrb[0].mxu0 }
 0x118   :  { %v430_v11 = vpop.f32.mrb[0].mxu1  ;;  %v350_v12 = vpop.f32.mrb[1].mxu0 }
 0x119   :  { %v607_v13 = vcombine.low %v348_v10, %v350_v12  ;;  %v432_v14 = vpop.f32.mrb[1].mxu1 }
 0x11a   :  { %v615_v15 = vcombine.low %v430_v11, %v432_v14 }
 0x11b   :  { %655 = vst.sshfl [vmem:[%s1744_s2] sm:$0x33 pattern:$0x76325410] %v607_v13 }
 0x11c   :  { %656 = vst.sshfl [vmem:[%s1744_s2 + $0x4] sm:$0x33 pattern:$0x76325410] %v615_v15 }
 0x157   :  { %v512_v17 = vpop.f32.mrb[2].mxu0 }
 0x158   :  { %v594_v18 = vpop.f32.mrb[2].mxu1  ;;  %v514_v19 = vpop.f32.mrb[3].mxu0 }
 0x159   :  { %v623_v26 = vcombine.low %v512_v17, %v514_v19  ;;  %v596_v21 = vpop.f32.mrb[3].mxu1 }
 0x15a   :  { %v631_v30 = vcombine.low %v594_v18, %v596_v21 }
 0x15b   :  { %657 = vst.sshfl [vmem:[%s1744_s2 + $0x8] sm:$0x33 pattern:$0x76325410] %v623_v26 }
 0x15c   :  { %658 = vst.sshfl [vmem:[%s1744_s2 + $0xc] sm:$0x33 pattern:$0x76325410] %v631_v30 }

// kernel: reverse.10
= control target key start
LH: loop header
LB: loop body
LE: loop exit
PB: predicated region body
PF: predicated region fallthrough
CT: control target
= control target key end

     0   :  { %s584_s0 = inlined_call_operand.vmem [shape: f32[16,2,25,12], index: 0, kind: input, shape index: {}]   ;;  %s585_s1 = inlined_call_operand.vmem [shape: f32[16,2,25,12], index: 1, kind: output, shape index: {}]  }
   0x1   :  { %v192_v0 = vld [vmem:[%s584_s0 + $0xb0] sm:$0xff]  ;;  %v195_v2 = vld [vmem:[%s584_s0 + $0xa0] sm:$0xff]  ;;  %v238_v24 = vld [vmem:[%s584_s0 + $0xb8] sm:$0xff] }
   0x2   :  { %v193_v1 = vld [vmem:[%s584_s0 + $0x170] sm:$0xff]  ;;  %4 = vst [vmem:[%s585_s1] sm:$0xff] %v192_v0  ;;  %196 = vst [vmem:[%s585_s1 + $0x10] sm:$0xff] %v195_v2  ;;  %v197_v3 = vld [vmem:[%s584_s0 + $0x160] sm:$0xff] }
   0x3   :  { %194 = vst [vmem:[%s585_s1 + $0xc0] sm:$0xff] %v193_v1  ;;  %v199_v4 = vld [vmem:[%s584_s0 + $0x90] sm:$0xff]  ;;  %198 = vst [vmem:[%s585_s1 + $0xd0] sm:$0xff] %v197_v3  ;;  %v203_v6 = vld [vmem:[%s584_s0 + $0x80] sm:$0xff] }
   0x4   :  { %v201_v5 = vld [vmem:[%s584_s0 + $0x150] sm:$0xff]  ;;  %200 = vst [vmem:[%s585_s1 + $0x20] sm:$0xff] %v199_v4  ;;  %v205_v7 = vld [vmem:[%s584_s0 + $0x140] sm:$0xff]  ;;  %204 = vst [vmem:[%s585_s1 + $0x30] sm:$0xff] %v203_v6 }
   0x5   :  { %202 = vst [vmem:[%s585_s1 + $0xe0] sm:$0xff] %v201_v5  ;;  %v207_v8 = vld [vmem:[%s584_s0 + $0x70] sm:$0xff]  ;;  %206 = vst [vmem:[%s585_s1 + $0xf0] sm:$0xff] %v205_v7  ;;  %v211_v10 = vld [vmem:[%s584_s0 + $0x60] sm:$0xff] }
   0x6   :  { %208 = vst [vmem:[%s585_s1 + $0x40] sm:$0xff] %v207_v8  ;;  %v209_v9 = vld [vmem:[%s584_s0 + $0x130] sm:$0xff]  ;;  %v213_v11 = vld [vmem:[%s584_s0 + $0x120] sm:$0xff]  ;;  %212 = vst [vmem:[%s585_s1 + $0x50] sm:$0xff] %v211_v10 }
   0x7   :  { %210 = vst [vmem:[%s585_s1 + $0x100] sm:$0xff] %v209_v9  ;;  %214 = vst [vmem:[%s585_s1 + $0x110] sm:$0xff] %v213_v11  ;;  %v215_v12 = vld [vmem:[%s584_s0 + $0x50] sm:$0xff]  ;;  %v219_v14 = vld [vmem:[%s584_s0 + $0x40] sm:$0xff] }
   0x8   :  { %v217_v13 = vld [vmem:[%s584_s0 + $0x110] sm:$0xff]  ;;  %216 = vst [vmem:[%s585_s1 + $0x60] sm:$0xff] %v215_v12  ;;  %220 = vst [vmem:[%s585_s1 + $0x70] sm:$0xff] %v219_v14  ;;  %v221_v15 = vld [vmem:[%s584_s0 + $0x100] sm:$0xff] }
   0x9   :  { %218 = vst [vmem:[%s585_s1 + $0x120] sm:$0xff] %v217_v13  ;;  %v223_v16 = vld [vmem:[%s584_s0 + $0x30] sm:$0xff]  ;;  %222 = vst [vmem:[%s585_s1 + $0x130] sm:$0xff] %v221_v15  ;;  %v227_v18 = vld [vmem:[%s584_s0 + $0x20] sm:$0xff] }
   0xa   :  { %v225_v17 = vld [vmem:[%s584_s0 + $0xf0] sm:$0xff]  ;;  %224 = vst [vmem:[%s585_s1 + $0x80] sm:$0xff] %v223_v16  ;;  %v229_v19 = vld [vmem:[%s584_s0 + $0xe0] sm:$0xff]  ;;  %228 = vst [vmem:[%s585_s1 + $0x90] sm:$0xff] %v227_v18 }
   0xb   :  { %226 = vst [vmem:[%s585_s1 + $0x140] sm:$0xff] %v225_v17  ;;  %v231_v20 = vld [vmem:[%s584_s0 + $0x10] sm:$0xff]  ;;  %230 = vst [vmem:[%s585_s1 + $0x150] sm:$0xff] %v229_v19  ;;  %v89_v22 = vld [vmem:[%s584_s0] sm:$0xff] }
   0xc   :  { %232 = vst [vmem:[%s585_s1 + $0xa0] sm:$0xff] %v231_v20  ;;  %v233_v21 = vld [vmem:[%s584_s0 + $0xd0] sm:$0xff]  ;;  %v236_v23 = vld [vmem:[%s584_s0 + $0xc0] sm:$0xff]  ;;  %235 = vst [vmem:[%s585_s1 + $0xb0] sm:$0xff] %v89_v22 }
   0xd   :  { %234 = vst [vmem:[%s585_s1 + $0x160] sm:$0xff] %v233_v21  ;;  %237 = vst [vmem:[%s585_s1 + $0x170] sm:$0xff] %v236_v23  ;;  %v240_v25 = vld [vmem:[%s584_s0 + $0x178] sm:$0xff]  ;;  %v242_v26 = vld [vmem:[%s584_s0 + $0xa8] sm:$0xff] }
   0xe   :  { %239 = vst [vmem:[%s585_s1 + $0x8] sm:$0xff] %v238_v24  ;;  %241 = vst [vmem:[%s585_s1 + $0xc8] sm:$0xff] %v240_v25  ;;  %v244_v27 = vld [vmem:[%s584_s0 + $0x168] sm:$0xff]  ;;  %v246_v28 = vld [vmem:[%s584_s0 + $0x98] sm:$0xff] }
   0xf   :  { %243 = vst [vmem:[%s585_s1 + $0x18] sm:$0xff] %v242_v26  ;;  %v248_v29 = vld [vmem:[%s584_s0 + $0x158] sm:$0xff]  ;;  %245 = vst [vmem:[%s585_s1 + $0xd8] sm:$0xff] %v244_v27  ;;  %v250_v30 = vld [vmem:[%s584_s0 + $0x88] sm:$0xff] }
  0x10   :  { %247 = vst [vmem:[%s585_s1 + $0x28] sm:$0xff] %v246_v28  ;;  %249 = vst [vmem:[%s585_s1 + $0xe8] sm:$0xff] %v248_v29  ;;  %v252_v31 = vld [vmem:[%s584_s0 + $0x148] sm:$0xff]  ;;  %v254_v32 = vld [vmem:[%s584_s0 + $0x78] sm:$0xff] }
  0x11   :  { %251 = vst [vmem:[%s585_s1 + $0x38] sm:$0xff] %v250_v30  ;;  %253 = vst [vmem:[%s585_s1 + $0xf8] sm:$0xff] %v252_v31  ;;  %v256_v33 = vld [vmem:[%s584_s0 + $0x138] sm:$0xff]  ;;  %v258_v34 = vld [vmem:[%s584_s0 + $0x68] sm:$0xff] }
  0x12   :  { %255 = vst [vmem:[%s585_s1 + $0x48] sm:$0xff] %v254_v32  ;;  %v260_v35 = vld [vmem:[%s584_s0 + $0x128] sm:$0xff]  ;;  %257 = vst [vmem:[%s585_s1 + $0x108] sm:$0xff] %v256_v33  ;;  %v262_v36 = vld [vmem:[%s584_s0 + $0x58] sm:$0xff] }
  0x13   :  { %259 = vst [vmem:[%s585_s1 + $0x58] sm:$0xff] %v258_v34  ;;  %261 = vst [vmem:[%s585_s1 + $0x118] sm:$0xff] %v260_v35  ;;  %v264_v37 = vld [vmem:[%s584_s0 + $0x118] sm:$0xff]  ;;  %v266_v38 = vld [vmem:[%s584_s0 + $0x48] sm:$0xff] }
  0x14   :  { %263 = vst [vmem:[%s585_s1 + $0x68] sm:$0xff] %v262_v36  ;;  %265 = vst [vmem:[%s585_s1 + $0x128] sm:$0xff] %v264_v37  ;;  %v268_v39 = vld [vmem:[%s584_s0 + $0x108] sm:$0xff]  ;;  %v270_v40 = vld [vmem:[%s584_s0 + $0x38] sm:$0xff] }
  0x15   :  { %267 = vst [vmem:[%s585_s1 + $0x78] sm:$0xff] %v266_v38  ;;  %v272_v41 = vld [vmem:[%s584_s0 + $0xf8] sm:$0xff]  ;;  %269 = vst [vmem:[%s585_s1 + $0x138] sm:$0xff] %v268_v39  ;;  %v274_v42 = vld [vmem:[%s584_s0 + $0x28] sm:$0xff] }
  0x16   :  { %271 = vst [vmem:[%s585_s1 + $0x88] sm:$0xff] %v270_v40  ;;  %273 = vst [vmem:[%s585_s1 + $0x148] sm:$0xff] %v272_v41  ;;  %v276_v43 = vld [vmem:[%s584_s0 + $0xe8] sm:$0xff]  ;;  %v278_v44 = vld [vmem:[%s584_s0 + $0x18] sm:$0xff] }
  0x17   :  { %275 = vst [vmem:[%s585_s1 + $0x98] sm:$0xff] %v274_v42  ;;  %277 = vst [vmem:[%s585_s1 + $0x158] sm:$0xff] %v276_v43  ;;  %v280_v45 = vld [vmem:[%s584_s0 + $0xd8] sm:$0xff]  ;;  %v282_v46 = vld [vmem:[%s584_s0 + $0x8] sm:$0xff] }
  0x18   :  { %279 = vst [vmem:[%s585_s1 + $0xa8] sm:$0xff] %v278_v44  ;;  %v284_v47 = vld [vmem:[%s584_s0 + $0xc8] sm:$0xff]  ;;  %281 = vst [vmem:[%s585_s1 + $0x168] sm:$0xff] %v280_v45 }
  0x19   :  { %283 = vst [vmem:[%s585_s1 + $0xb8] sm:$0xff] %v282_v46  ;;  %285 = vst [vmem:[%s585_s1 + $0x178] sm:$0xff] %v284_v47 }

// kernel: fno2d_forward.14
= control target key start
LH: loop header
LB: loop body
LE: loop exit
PB: predicated region body
PF: predicated region fallthrough
CT: control target
= control target key end

     0   :  { %v1122_v3 = vmov 0.0   ;;  %v1123_v6 = vmov 0   ;;  %vm51_vm0 = vcmask 130048   ;;  %s1751_s0 = inlined_call_operand.vmem [shape: f32[16,1280], index: 0, kind: input, shape index: {}]   ;;  %s1752_s1 = inlined_call_operand.vmem [shape: f32[16,16], index: 1, kind: input, shape index: {}]   ;;  %s1753_s2 = inlined_call_operand.vmem [shape: f32[16,1], index: 2, kind: input, shape index: {}]   ;;  %s1754_s3 = inlined_call_operand.vmem [shape: f32[16,1280], index: 3, kind: input, shape index: {}]   ;;  %s1755_s4 = inlined_call_operand.vmem [shape: f32[16,1280], index: 4, kind: output, shape index: {}]  }
   0x1   :  { %v20_v0 = vld [vmem:[%s1751_s0 + $0x8] sm:$0xff]  ;;  %v30_v1 = vld [vmem:[%s1751_s0 + $0x58] sm:$0xff]  ;;  %v19_v2 = vld [vmem:[%s1751_s0] sm:$0xff]  ;;  %122 = vmatprep.mubr.f32.mxu0 %v1122_v3  ;;  %128 = vmatprep.mubr.f32.mxu1 %v1122_v3 }
   0x2   :  { %v1017_v4 = vpack.c.bf16 %v30_v1, %v20_v0  ;;  %v29_v5 = vld [vmem:[%s1751_s0 + $0x50] sm:$0xff]  ;;  %1041 = vset.pattern.permute.xlu0 %v1123_v6  ;;  %v17_v8 = vld [vmem:[%s1752_s1] sm:$0xff]  ;;  %v18_v9 = vld [vmem:[%s1752_s1 + $0x8] sm:$0xff] }
   0x3   :  { %v1019_v7 = vpack.c.bf16 %v29_v5, %v19_v2  ;;  %v22_v10 = vld [vmem:[%s1751_s0 + $0x18] sm:$0xff]  ;;  %v32_v11 = vld [vmem:[%s1751_s0 + $0x68] sm:$0xff]  ;;  %v21_v15 = vld [vmem:[%s1751_s0 + $0x10] sm:$0xff] }
   0x4   :  { %v24_v12 = vld [vmem:[%s1751_s0 + $0x28] sm:$0xff]  ;;  %1018 = vmatprep.subr.bf16.mxu0 %v1017_v4  ;;  %1037 = vmatprep.subr.bf16.mxu1 %v1017_v4  ;;  %v1021_v13 = vpack.c.bf16 %v32_v11, %v22_v10  ;;  %v34_v14 = vld [vmem:[%s1751_s0 + $0x78] sm:$0xff]  ;;  %v31_v16 = vld [vmem:[%s1751_s0 + $0x60] sm:$0xff] }
   0x5   :  { %1020 = vmatpush1.bf16.msra.mxu0 %v1019_v7  ;;  %1038 = vmatpush1.bf16.msra.mxu1 %v1019_v7  ;;  %v1025_v17 = vpack.c.bf16 %v34_v14, %v24_v12  ;;  %v1023_v18 = vpack.c.bf16 %v31_v16, %v21_v15  ;;  %v23_v19 = vld [vmem:[%s1751_s0 + $0x20] sm:$0xff]  ;;  %v33_v20 = vld [vmem:[%s1751_s0 + $0x70] sm:$0xff]  ;;  %v26_v21 = vld [vmem:[%s1751_s0 + $0x38] sm:$0xff] }
   0x6   :  { %1022 = vmatprep.subr.bf16.mxu1 %v1021_v13  ;;  %v1027_v22 = vpack.c.bf16 %v33_v20, %v23_v19  ;;  %v36_v23 = vld [vmem:[%s1751_s0 + $0x88] sm:$0xff]  ;;  %v38_v25 = vld [vmem:[%s1751_s0 + $0x98] sm:$0xff]  ;;  %v25_v28 = vld [vmem:[%s1751_s0 + $0x30] sm:$0xff] }
   0x7   :  { %v28_v24 = vld [vmem:[%s1751_s0 + $0x48] sm:$0xff]  ;;  %1026 = vmatprep.subr.bf16.mxu0 %v1025_v17  ;;  %v1029_v26 = vpack.c.bf16 %v36_v23, %v26_v21  ;;  %v35_v29 = vld [vmem:[%s1751_s0 + $0x80] sm:$0xff]  ;;  %v37_v31 = vld [vmem:[%s1751_s0 + $0x90] sm:$0xff] }
   0x8   :  { %v1033_v27 = vpack.c.bf16 %v38_v25, %v28_v24  ;;  %v27_v30 = vld [vmem:[%s1751_s0 + $0x40] sm:$0xff]  ;;  %967 = vmatmul.mubr.msk.f32.vlgmr.msra.gmra.mrb[0].mxu0 %vm51_vm0, %v17_v8  ;;  %968 = vmatmul.mubr.msk.f32.vlgmr.msra.gmra.mrb[0].mxu1 %vm51_vm0, %v18_v9  ;;  %v1031_v32 = vpack.c.bf16 %v35_v29, %v25_v28  ;;  %v40_v35 = vld [vmem:[%s1753_s2 + $0x8] sm:$0xff]  ;;  %v453_v41 = vld [vmem:[%s1754_s3 + $0x50] sm:$0xff] }
   0x9   :  { %1024 = vmatpush1.bf16.msra.mxu1 %v1023_v18  ;;  %1028 = vmatpush1.bf16.msra.mxu0 %v1027_v22  ;;  %v1035_v33 = vpack.c.bf16 %v37_v31, %v27_v30  ;;  %v39_v34 = vld [vmem:[%s1753_s2] sm:$0xff]  ;;  %v444_v45 = vld [vmem:[%s1754_s3 + $0x8] sm:$0xff]  ;;  %v454_v47 = vld [vmem:[%s1754_s3 + $0x58] sm:$0xff] }
   0xa   :  { %199 = vmatprep.mubr.f32.mxu1 %v1122_v3  ;;  %276 = vmatprep.mubr.f32.mxu0 %v1122_v3  ;;  %v443_v39 = vld [vmem:[%s1754_s3] sm:$0xff]  ;;  %v445_v52 = vld [vmem:[%s1754_s3 + $0x10] sm:$0xff]  ;;  %v446_v58 = vld [vmem:[%s1754_s3 + $0x18] sm:$0xff] }
   0xb   :  { %1030 = vmatprep.subr.bf16.mxu1 %v1029_v26  ;;  %1034 = vmatprep.subr.bf16.mxu0 %v1033_v27  ;;  %v447_v57 = vld [vmem:[%s1754_s3 + $0x20] sm:$0xff]  ;;  %v448_v59 = vld [vmem:[%s1754_s3 + $0x28] sm:$0xff] }
   0xc   :  { %969 = vmatmul.mubr.msk.f32.vlgmr.msra.gmra.mrb[2].mxu1 %vm51_vm0, %v17_v8  ;;  %971 = vmatmul.mubr.msk.f32.vlgmr.msra.gmra.mrb[2].mxu0 %vm51_vm0, %v17_v8 }
   0xd   :  { %1032 = vmatpush1.bf16.msra.mxu1 %v1031_v32  ;;  %1036 = vmatpush1.bf16.msra.mxu0 %v1035_v33 }
   0xe   :  { %205 = vmatprep.mubr.f32.mxu1 %v1122_v3  ;;  %282 = vmatprep.mubr.f32.mxu0 %v1122_v3 }
   0xf   :  { %43 = vperm.xlu0 %1041, %v39_v34  }
  0x10   :  { %970 = vmatmul.mubr.msk.f32.gmra.mrb[4].mxu1 %vm51_vm0, %v18_v9  ;;  %972 = vmatmul.mubr.msk.f32.gmra.mrb[4].mxu0 %vm51_vm0, %v18_v9 }
  0x11   :  { %353 = vmatprep.mubr.f32.mxu1 %v1122_v3  ;;  %430 = vmatprep.mubr.f32.mxu0 %v1122_v3 }
  0x13   :  { %48 = vperm.xlu0 %1041, %v40_v35  }
  0x14   :  { %973 = vmatmul.mubr.msk.f32.vlgmr.msra.gmra.mrb[6].mxu1 %vm51_vm0, %v17_v8  ;;  %975 = vmatmul.mubr.msk.f32.vlgmr.msra.gmra.mrb[6].mxu0 %vm51_vm0, %v17_v8 }
  0x15   :  { %359 = vmatprep.mubr.f32.mxu1 %v1122_v3  ;;  %436 = vmatprep.mubr.f32.mxu0 %v1122_v3 }
  0x18   :  { %974 = vmatmul.mubr.msk.f32.gmra.mrb[8].mxu1 %vm51_vm0, %v18_v9  ;;  %976 = vmatmul.mubr.msk.f32.gmra.mrb[8].mxu0 %vm51_vm0, %v18_v9 }
  0x8e   :  { %v1241_v36 = vpop.permute.xlu0 %43 }
  0x92   :  { %v1243_v37 = vpop.permute.xlu0 %48 }
  0xdb   :  { %v124_v38 = vpop.f32.mrb[0].mxu0  ;;  %v130_v40 = vpop.f32.mrb[0].mxu1 }
  0xdc   :  { %v125_v42 = vadd.f32 %v124_v38, %v1241_v36  ;;  %v131_v43 = vadd.f32 %v130_v40, %v1243_v37  ;;  %v126_v44 = vpop.f32.mrb[1].mxu0  ;;  %v132_v46 = vpop.f32.mrb[1].mxu1 }
  0xdd   :  { %v127_v48 = vadd.f32 %v126_v44, %v1241_v36  ;;  %v133_v49 = vadd.f32 %v132_v46, %v1243_v37 }
  0xde   :  { %v1261_v50 = vadd.f32 %v443_v39, %v125_v42  ;;  %v1263_v51 = vadd.f32 %v453_v41, %v131_v43 }
  0xdf   :  { %v1268_v53 = vadd.f32 %v444_v45, %v127_v48  ;;  %v1270_v54 = vadd.f32 %v454_v47, %v133_v49  ;;  %v201_v55 = vpop.f32.mrb[2].mxu1  ;;  %v278_v56 = vpop.f32.mrb[2].mxu0 }
  0xe0   :  { %v483_v60 = vand.u32 2147483647, %v1261_v50  ;;  %v493_v61 = vand.u32 2147483647, %v1263_v51  ;;  %v202_v62 = vadd.f32 %v201_v55, %v1241_v36  ;;  %v279_v63 = vadd.f32 %v278_v56, %v1241_v36  ;;  %v203_v0 = vpop.f32.mrb[3].mxu1  ;;  %v280_v1 = vpop.f32.mrb[3].mxu0 }
  0xe1   :  { %v484_v2 = vand.u32 2147483647, %v1268_v53  ;;  %v494_v3 = vand.u32 2147483647, %v1270_v54  ;;  %v204_v4 = vadd.f32 %v203_v0, %v1241_v36  ;;  %v281_v5 = vadd.f32 %v280_v1, %v1241_v36 }
  0xe2   :  { %v503_v6 = vmul.f32 0.70710677, %v483_v60  ;;  %v513_v7 = vmul.f32 0.70710677, %v493_v61  ;;  %v1293_v8 = vadd.f32 %v445_v52, %v202_v62  ;;  %v1295_v9 = vadd.f32 %v447_v57, %v279_v63 }
  0xe3   :  { %v504_v10 = vmul.f32 0.70710677, %v484_v2  ;;  %v514_v11 = vmul.f32 0.70710677, %v494_v3  ;;  %v1301_v12 = vadd.f32 %v446_v58, %v204_v4  ;;  %v1303_v13 = vadd.f32 %v448_v59, %v281_v5  ;;  %v207_v14 = vpop.f32.mrb[4].mxu1  ;;  %v284_v15 = vpop.f32.mrb[4].mxu0 }
  0xe4   :  { %v523_v16 = vmul.f32 0.3275911, %v503_v6  ;;  %v763_v17 = vsub.f32 0.0, %v503_v6  ;;  %v533_v18 = vmul.f32 0.3275911, %v513_v7  ;;  %v773_v19 = vsub.f32 0.0, %v513_v7 }
  0xe5   :  { %v524_v20 = vmul.f32 0.3275911, %v504_v10  ;;  %v764_v21 = vsub.f32 0.0, %v504_v10  ;;  %v534_v22 = vmul.f32 0.3275911, %v514_v11  ;;  %v774_v23 = vsub.f32 0.0, %v514_v11 }
  0xe6   :  { %v543_v24 = vadd.f32 1.0, %v523_v16  ;;  %v783_v25 = vmul.f32 %v763_v17, %v503_v6  ;;  %v553_v26 = vadd.f32 1.0, %v533_v18  ;;  %v793_v27 = vmul.f32 %v773_v19, %v513_v7  ;;  %v1305_v28 = vpop.f32.mrb[5].mxu1  ;;  %v1307_v29 = vpop.f32.mrb[5].mxu0  ;;  %v455_v16 = vld [vmem:[%s1754_s3 + $0x60] sm:$0xff]  ;;  %v457_v17 = vld [vmem:[%s1754_s3 + $0x70] sm:$0xff] }
  0xe7   :  { %v544_v30 = vadd.f32 1.0, %v524_v20  ;;  %v784_v31 = vmul.f32 %v764_v21, %v504_v10  ;;  %v554_v32 = vadd.f32 1.0, %v534_v22  ;;  %v794_v33 = vmul.f32 %v774_v23, %v514_v11  ;;  %v1309_v34 = vpop.f32.mrb[6].mxu1  ;;  %v1311_v35 = vpop.f32.mrb[6].mxu0 }
  0xe8   :  { %1042 = vrcp.f32 %v543_v24  ;;  %v803_v38 = vmul.f32 1.442695, %v783_v25  ;;  %v823_v39 = vmul.f32 1.442695, %v793_v27  ;;  %v1761_v40 = vand.u32 2147483647, %v1293_v8 }
  0xe9   :  { %1044 = vrcp.f32 %v553_v26  ;;  %v805_v41 = vmul.f32 1.442695, %v784_v31  ;;  %v825_v42 = vmul.f32 1.442695, %v794_v33  ;;  %v1760_v43 = vand.u32 2147483647, %v1295_v9 }
  0xea   :  { %1046 = vpow2.f32 %v803_v38  ;;  %v505_v44 = vmul.f32 0.70710677, %v1761_v40  ;;  %v1759_v45 = vand.u32 2147483647, %v1301_v12  ;;  %v1758_v46 = vand.u32 2147483647, %v1303_v13 }
  0xeb   :  { %1048 = vpow2.f32 %v823_v39  ;;  %v507_v47 = vmul.f32 0.70710677, %v1760_v43  ;;  %v208_v48 = vadd.f32 %v207_v14, %v1243_v37  ;;  %v285_v49 = vadd.f32 %v284_v15, %v1243_v37  ;;  %v1323_v52 = vpop.f32.mrb[7].mxu1  ;;  %v1325_v55 = vpop.f32.mrb[7].mxu0  ;;  %v456_v38 = vld [vmem:[%s1754_s3 + $0x68] sm:$0xff] }
  0xec   :  { %1050 = vrcp.f32 %v544_v30  ;;  %v525_v56 = vmul.f32 0.3275911, %v505_v44  ;;  %v765_v57 = vsub.f32 0.0, %v505_v44  ;;  %v506_v58 = vmul.f32 0.70710677, %v1759_v45  ;;  %v1329_v59 = vpop.f32.mrb[8].mxu1 }
  0xed   :  { %1052 = vpow2.f32 %v805_v41  ;;  %v527_v62 = vmul.f32 0.3275911, %v507_v47  ;;  %v767_v63 = vsub.f32 0.0, %v507_v47  ;;  %v508_v0 = vmul.f32 0.70710677, %v1758_v46  ;;  %v1333_v1 = vpop.f32.mrb[8].mxu0 }
  0xee   :  { %1054 = vrcp.f32 %v554_v32  ;;  %v545_v4 = vadd.f32 1.0, %v525_v56  ;;  %v785_v5 = vmul.f32 %v765_v57, %v505_v44  ;;  %v526_v6 = vmul.f32 0.3275911, %v506_v58  ;;  %v1335_v7 = vpop.f32.mrb[9].mxu1  ;;  %v1337_v10 = vpop.f32.mrb[9].mxu0 }
  0xef   :  { %1056 = vpow2.f32 %v825_v42  ;;  %v547_v11 = vadd.f32 1.0, %v527_v62  ;;  %v787_v14 = vmul.f32 %v767_v63, %v507_v47  ;;  %v766_v15 = vsub.f32 0.0, %v506_v58 }
  0xf0   :  { %1058 = vrcp.f32 %v545_v4  ;;  %v807_v18 = vmul.f32 1.442695, %v785_v5  ;;  %v546_v19 = vadd.f32 1.0, %v526_v6  ;;  %v528_v20 = vmul.f32 0.3275911, %v508_v0 }
  0xf1   :  { %1060 = vrcp.f32 %v547_v11  ;;  %v811_v21 = vmul.f32 1.442695, %v787_v14  ;;  %v786_v22 = vmul.f32 %v766_v15, %v506_v58  ;;  %v768_v23 = vsub.f32 0.0, %v508_v0 }
  0xf2   :  { %v1345_v24 = vpop.eup %1042  ;;  %1062 = vpow2.f32 %v807_v18  ;;  %v548_v25 = vadd.f32 1.0, %v528_v20  ;;  %v1347_v26 = vadd.f32 %v455_v16, %v208_v48  ;;  %v1349_v27 = vadd.f32 %v457_v17, %v285_v49 }
  0xf3   :  { %v1351_v30 = vpop.eup %1044  ;;  %v583_v31 = vmul.f32 1.0614054, %v1345_v24  ;;  %1064 = vpow2.f32 %v811_v21  ;;  %v809_v32 = vmul.f32 1.442695, %v786_v22  ;;  %v788_v33 = vmul.f32 %v768_v23, %v508_v0 }
  0xf4   :  { %v1357_v39 = vpop.eup %1046  ;;  %v593_v41 = vmul.f32 1.0614054, %v1351_v30  ;;  %1066 = vrcp.f32 %v546_v19  ;;  %v1757_v42 = vand.u32 2147483647, %v1347_v26  ;;  %v1756_v44 = vand.u32 2147483647, %v1349_v27 }
  0xf5   :  { %v1362_v47 = vpop.eup %1048  ;;  %v977_v48 = vadd.f32 -1.4531521, %v583_v31  ;;  %1068 = vpow2.f32 %v809_v32  ;;  %v813_v49 = vmul.f32 1.442695, %v788_v33  ;;  %v210_v56 = vadd.f32 %v1305_v28, %v1243_v37 }
  0xf6   :  { %v1366_v57 = vpop.eup %1050  ;;  %v987_v58 = vadd.f32 -1.4531521, %v593_v41  ;;  %1070 = vrcp.f32 %v548_v25  ;;  %v515_v62 = vmul.f32 0.70710677, %v1757_v42  ;;  %v517_v63 = vmul.f32 0.70710677, %v1756_v44 }
  0xf7   :  { %v1372_v0 = vpop.eup %1052  ;;  %v623_v4 = vmul.f32 %v1345_v24, %v977_v48  ;;  %v584_v5 = vmul.f32 1.0614054, %v1366_v57  ;;  %1072 = vpow2.f32 %v813_v49  ;;  %v1376_v6 = vadd.f32 %v456_v38, %v210_v56 }
  0xf8   :  { %v1378_v28 = vpop.eup %1054  ;;  %v633_v11 = vmul.f32 %v1351_v30, %v987_v58  ;;  %v535_v14 = vmul.f32 0.3275911, %v515_v62  ;;  %v775_v15 = vsub.f32 0.0, %v515_v62  ;;  %v537_v16 = vmul.f32 0.3275911, %v517_v63 }
  0xf9   :  { %v1381_v17 = vpop.eup %1056  ;;  %v643_v18 = vadd.f32 1.4214138, %v623_v4  ;;  %v978_v19 = vadd.f32 -1.4531521, %v584_v5  ;;  %v594_v20 = vmul.f32 1.0614054, %v1378_v28  ;;  %v1386_v21 = vadd.f32 %v1307_v29, %v1243_v37 }
  0xfa   :  { %v1388_v22 = vpop.eup %1058  ;;  %v653_v23 = vadd.f32 1.4214138, %v633_v11  ;;  %v555_v25 = vadd.f32 1.0, %v535_v14  ;;  %v795_v31 = vmul.f32 %v775_v15, %v515_v62  ;;  %v557_v32 = vadd.f32 1.0, %v537_v16 }
  0xfb   :  { %v1390_v33 = vpop.eup %1060  ;;  %v663_v38 = vmul.f32 %v1345_v24, %v643_v18  ;;  %v624_v41 = vmul.f32 %v1366_v57, %v978_v19  ;;  %v988_v48 = vadd.f32 -1.4531521, %v594_v20  ;;  %v585_v49 = vmul.f32 1.0614054, %v1388_v22 }
  0xfc   :  { %v1395_v56 = vpop.eup %1062  ;;  %v673_v29 = vmul.f32 %v1351_v30, %v653_v23  ;;  %v587_v58 = vmul.f32 1.0614054, %v1390_v33  ;;  %1074 = vrcp.f32 %v555_v25  ;;  %v827_v4 = vmul.f32 1.442695, %v795_v31 }
  0xfd   :  { %v1399_v5 = vpop.eup %1064  ;;  %v997_v62 = vadd.f32 -0.28449672, %v663_v38  ;;  %v644_v11 = vadd.f32 1.4214138, %v624_v41  ;;  %v634_v14 = vmul.f32 %v1378_v28, %v988_v48  ;;  %v979_v15 = vadd.f32 -1.4531521, %v585_v49 }
  0xfe   :  { %v1402_v16 = vpop.eup %1066  ;;  %v1007_v18 = vadd.f32 -0.28449672, %v673_v29  ;;  %v981_v19 = vadd.f32 -1.4531521, %v587_v58  ;;  %1076 = vpow2.f32 %v827_v4  ;;  %v777_v20 = vsub.f32 0.0, %v517_v63 }
  0xff   :  { %v1404_v44 = vpop.eup %1068  ;;  %v703_v23 = vmul.f32 %v1345_v24, %v997_v62  ;;  %v664_v25 = vmul.f32 %v1366_v57, %v644_v11  ;;  %v654_v31 = vadd.f32 1.4214138, %v634_v14  ;;  %v625_v42 = vmul.f32 %v1388_v22, %v979_v15 }
 0x100   :  { %v1409_v38 = vpop.eup %1070  ;;  %v713_v41 = vmul.f32 %v1351_v30, %v1007_v18  ;;  %v627_v48 = vmul.f32 %v1390_v33, %v981_v19  ;;  %v586_v49 = vmul.f32 1.0614054, %v1402_v16  ;;  %1078 = vrcp.f32 %v557_v32 }
 0x101   :  { %v1414_v29 = vpop.eup %1072  ;;  %v723_v58 = vadd.f32 0.2548296, %v703_v23  ;;  %v998_v4 = vadd.f32 -0.28449672, %v664_v25  ;;  %v674_v62 = vmul.f32 %v1378_v28, %v654_v31  ;;  %v645_v46 = vadd.f32 1.4214138, %v625_v42 }
 0x102   :  { %v733_v11 = vadd.f32 0.2548296, %v713_v41  ;;  %v647_v14 = vadd.f32 1.4214138, %v627_v48  ;;  %v980_v45 = vadd.f32 -1.4531521, %v586_v49  ;;  %v1417_v15 = vmul.f32 %v777_v20, %v517_v63 }
 0x103   :  { %v743_v43 = vmul.f32 %v1345_v24, %v723_v58  ;;  %v704_v18 = vmul.f32 %v1366_v57, %v998_v4  ;;  %v1008_v19 = vadd.f32 -0.28449672, %v674_v62  ;;  %v665_v40 = vmul.f32 %v1388_v22, %v645_v46 }
 0x104   :  { %v753_v32 = vmul.f32 %v1351_v30, %v733_v11  ;;  %v667_v23 = vmul.f32 %v1390_v33, %v647_v14  ;;  %v626_v25 = vmul.f32 %v1402_v16, %v980_v45  ;;  %v588_v42 = vmul.f32 1.0614054, %v1409_v38 }
 0x105   :  { %v843_v31 = vmul.f32 %v1357_v39, %v743_v43  ;;  %v724_v41 = vadd.f32 0.2548296, %v704_v18  ;;  %v714_v63 = vmul.f32 %v1378_v28, %v1008_v19  ;;  %v999_v20 = vadd.f32 -0.28449672, %v665_v40 }
 0x106   :  { %v1428_v24 = vpop.eup %1074  ;;  %v853_v48 = vmul.f32 %v1362_v47, %v753_v32  ;;  %v1001_v49 = vadd.f32 -0.28449672, %v667_v23  ;;  %v646_v46 = vadd.f32 1.4214138, %v626_v25  ;;  %v982_v58 = vadd.f32 -1.4531521, %v588_v42 }
 0x107   :  { %v863_v30 = vsub.f32 1.0, %v843_v31  ;;  %v744_v4 = vmul.f32 %v1366_v57, %v724_v41  ;;  %v734_v62 = vadd.f32 0.2548296, %v714_v63  ;;  %v705_v45 = vmul.f32 %v1388_v22, %v999_v20 }
 0x108   :  { %v1433_v11 = vpop.eup %1076  ;;  %v873_v43 = vsub.f32 1.0, %v853_v48  ;;  %v707_v39 = vmul.f32 %v1390_v33, %v1001_v49  ;;  %v666_v40 = vmul.f32 %v1402_v16, %v646_v46  ;;  %v628_v14 = vmul.f32 %v1409_v38, %v982_v58 }
 0x109   :  { %v883_v47 = vmul.f32 %v863_v30, %v483_v60  ;;  %v844_v18 = vmul.f32 %v1372_v0, %v744_v4  ;;  %v754_v19 = vmul.f32 %v1378_v28, %v734_v62  ;;  %v725_v57 = vadd.f32 0.2548296, %v705_v45 }
 0x10a   :  { %v1442_v32 = vpop.eup %1078  ;;  %v893_v23 = vmul.f32 %v873_v43, %v493_v61  ;;  %v727_v25 = vadd.f32 0.2548296, %v707_v39  ;;  %v1000_v42 = vadd.f32 -0.28449672, %v666_v40  ;;  %v648_v31 = vadd.f32 1.4214138, %v628_v14 }
 0x10b   :  { %v903_v41 = vadd.f32 %v883_v47, %v1261_v50  ;;  %v864_v63 = vsub.f32 1.0, %v844_v18  ;;  %v854_v20 = vmul.f32 %v1381_v17, %v754_v19  ;;  %v745_v60 = vmul.f32 %v1388_v22, %v725_v57 }
 0x10c   :  { %v913_v0 = vadd.f32 %v893_v23, %v1263_v51  ;;  %v747_v28 = vmul.f32 %v1390_v33, %v727_v25  ;;  %v706_v48 = vmul.f32 %v1402_v16, %v1000_v42  ;;  %v668_v49 = vmul.f32 %v1409_v38, %v648_v31 }
 0x10d   :  { %v923_v46 = vmul.f32 0.5, %v903_v41  ;;  %v884_v61 = vmul.f32 %v864_v63, %v484_v2  ;;  %v874_v58 = vsub.f32 1.0, %v854_v20  ;;  %v845_v50 = vmul.f32 %v1395_v56, %v745_v60  ;;  %v458_v20 = vld [vmem:[%s1754_s3 + $0x78] sm:$0xff] }
 0x10e   :  { %v933_v30 = vmul.f32 0.5, %v913_v0  ;;  %v847_v17 = vmul.f32 %v1399_v5, %v747_v28  ;;  %v726_v4 = vadd.f32 0.2548296, %v706_v48  ;;  %v1002_v22 = vadd.f32 -0.28449672, %v668_v49  ;;  %v449_v49 = vld [vmem:[%s1754_s3 + $0x30] sm:$0xff] }
 0x10f   :  { %943 = vst [vmem:[%s1755_s4] sm:$0xff] %v923_v46  ;;  %v904_v51 = vadd.f32 %v884_v61, %v1268_v53  ;;  %v894_v33 = vmul.f32 %v874_v58, %v494_v3  ;;  %v865_v62 = vsub.f32 1.0, %v845_v50  ;;  %v595_v2 = vmul.f32 1.0614054, %v1428_v24 }
 0x110   :  { %953 = vst [vmem:[%s1755_s4 + $0x50] sm:$0xff] %v933_v30  ;;  %v867_v56 = vsub.f32 1.0, %v847_v17  ;;  %v746_v5 = vmul.f32 %v1402_v16, %v726_v4  ;;  %v708_v45 = vmul.f32 %v1409_v38, %v1002_v22  ;;  %v597_v43 = vmul.f32 1.0614054, %v1442_v32 }
 0x111   :  { %v924_v39 = vmul.f32 0.5, %v904_v51  ;;  %v914_v53 = vadd.f32 %v894_v33, %v1270_v54  ;;  %v1762_v40 = vand.u32 2147483647, %v1293_v8  ;;  %v989_v14 = vadd.f32 -1.4531521, %v595_v2 }
 0x112   :  { %v1763_v47 = vand.u32 2147483647, %v1295_v9  ;;  %v846_v19 = vmul.f32 %v1404_v44, %v746_v5  ;;  %v728_v57 = vadd.f32 0.2548296, %v708_v45  ;;  %v991_v23 = vadd.f32 -1.4531521, %v597_v43 }
 0x113   :  { %v885_v3 = vmul.f32 %v865_v62, %v1762_v40  ;;  %944 = vst [vmem:[%s1755_s4 + $0x8] sm:$0xff] %v924_v39  ;;  %v934_v16 = vmul.f32 0.5, %v914_v53  ;;  %v635_v54 = vmul.f32 %v1428_v24, %v989_v14  ;;  %v831_v42 = vmul.f32 1.442695, %v1417_v15 }
 0x114   :  { %v887_v18 = vmul.f32 %v867_v56, %v1763_v47  ;;  %v866_v41 = vsub.f32 1.0, %v846_v19  ;;  %v748_v63 = vmul.f32 %v1409_v38, %v728_v57  ;;  %v637_v44 = vmul.f32 %v1442_v32, %v991_v23 }
 0x115   :  { %v905_v25 = vadd.f32 %v885_v3, %v1293_v8  ;;  %954 = vst [vmem:[%s1755_s4 + $0x58] sm:$0xff] %v934_v16  ;;  %v655_v60 = vadd.f32 1.4214138, %v635_v54  ;;  %1080 = vpow2.f32 %v831_v42  ;;  %v496_v15 = vand.u32 2147483647, %v1376_v6 }
 0x116   :  { %v907_v31 = vadd.f32 %v887_v18, %v1295_v9  ;;  %v1764_v9 = vand.u32 2147483647, %v1301_v12  ;;  %v848_v38 = vmul.f32 %v1414_v29, %v748_v63  ;;  %v657_v48 = vadd.f32 1.4214138, %v637_v44 }
 0x117   :  { %v925_v8 = vmul.f32 0.5, %v905_v25  ;;  %v675_v46 = vmul.f32 %v1428_v24, %v655_v60  ;;  %v516_v61 = vmul.f32 0.70710677, %v496_v15  ;;  %v1505_v58 = vadd.f32 %v458_v20, %v1386_v21 }
 0x118   :  { %v927_v0 = vmul.f32 0.5, %v907_v31  ;;  %v886_v28 = vmul.f32 %v866_v41, %v1764_v9  ;;  %v356_v29 = vadd.f32 %v1309_v34, %v1241_v36  ;;  %v868_v30 = vsub.f32 1.0, %v848_v38  ;;  %v451_v34 = vld [vmem:[%s1754_s3 + $0x40] sm:$0xff] }
 0x119   :  { %945 = vst [vmem:[%s1755_s4 + $0x10] sm:$0xff] %v925_v8  ;;  %v677_v17 = vmul.f32 %v1442_v32, %v657_v48  ;;  %v433_v4 = vadd.f32 %v1311_v35, %v1241_v36  ;;  %v1009_v22 = vadd.f32 -0.28449672, %v675_v46  ;;  %v536_v51 = vmul.f32 0.3275911, %v516_v61  ;;  %v450_v8 = vld [vmem:[%s1754_s3 + $0x38] sm:$0xff] }
 0x11a   :  { %947 = vst [vmem:[%s1755_s4 + $0x20] sm:$0xff] %v927_v0  ;;  %v906_v50 = vadd.f32 %v886_v28, %v1301_v12  ;;  %v776_v33 = vsub.f32 0.0, %v516_v61  ;;  %v1516_v21 = vadd.f32 %v449_v49, %v356_v29  ;;  %v1765_v2 = vand.u32 2147483647, %v1303_v13  ;;  %v452_v46 = vld [vmem:[%s1754_s3 + $0x48] sm:$0xff] }
 0x11b   :  { %v1011_v12 = vadd.f32 -0.28449672, %v677_v17  ;;  %v498_v5 = vand.u32 2147483647, %v1505_v58  ;;  %v715_v45 = vmul.f32 %v1428_v24, %v1009_v22  ;;  %v556_v43 = vadd.f32 1.0, %v536_v51 }
 0x11c   :  { %v926_v62 = vmul.f32 0.5, %v906_v50  ;;  %v888_v56 = vmul.f32 %v868_v30, %v1765_v2  ;;  %v796_v35 = vmul.f32 %v776_v33, %v516_v61  ;;  %v489_v39 = vand.u32 2147483647, %v1516_v21 }
 0x11d   :  { %v717_v40 = vmul.f32 %v1442_v32, %v1011_v12  ;;  %v518_v3 = vmul.f32 0.70710677, %v498_v5  ;;  %v1533_v14 = vadd.f32 %v451_v34, %v433_v4  ;;  %v735_v47 = vadd.f32 0.2548296, %v715_v45 }
 0x11e   :  { %946 = vst [vmem:[%s1755_s4 + $0x18] sm:$0xff] %v926_v62  ;;  %v908_v53 = vadd.f32 %v888_v56, %v1303_v13  ;;  %1082 = vrcp.f32 %v556_v43  ;;  %v829_v18 = vmul.f32 1.442695, %v796_v35  ;;  %v509_v19 = vmul.f32 0.70710677, %v489_v39 }
 0x11f   :  { %v737_v23 = vadd.f32 0.2548296, %v717_v40  ;;  %v538_v16 = vmul.f32 0.3275911, %v518_v3  ;;  %v778_v25 = vsub.f32 0.0, %v518_v3  ;;  %v1081_v54 = vpop.eup %1080  ;;  %v755_v13 = vmul.f32 %v1428_v24, %v735_v47 }
 0x120   :  { %v928_v57 = vmul.f32 0.5, %v908_v53  ;;  %1084 = vpow2.f32 %v829_v18  ;;  %v529_v42 = vmul.f32 0.3275911, %v509_v19  ;;  %v769_v31 = vsub.f32 0.0, %v509_v19 }
 0x121   :  { %v757_v41 = vmul.f32 %v1442_v32, %v737_v23  ;;  %v558_v63 = vadd.f32 1.0, %v538_v16  ;;  %v798_v44 = vmul.f32 %v778_v25, %v518_v3  ;;  %v491_v20 = vand.u32 2147483647, %v1533_v14 }
 0x122   :  { %948 = vst [vmem:[%s1755_s4 + $0x28] sm:$0xff] %v928_v57  ;;  %v855_v60 = vmul.f32 %v1433_v11, %v755_v13  ;;  %v549_v24 = vadd.f32 1.0, %v529_v42  ;;  %v789_v0 = vmul.f32 %v769_v31, %v509_v19  ;;  %v358_v9 = vadd.f32 %v1323_v52, %v1241_v36 }
 0x123   :  { %v857_v28 = vmul.f32 %v1081_v54, %v757_v41  ;;  %1086 = vrcp.f32 %v558_v63  ;;  %v833_v38 = vmul.f32 1.442695, %v798_v44  ;;  %v511_v32 = vmul.f32 0.70710677, %v491_v20 }
 0x124   :  { %v875_v48 = vsub.f32 1.0, %v855_v60  ;;  %1088 = vrcp.f32 %v549_v24  ;;  %v1551_v49 = vadd.f32 %v450_v8, %v358_v9  ;;  %v815_v61 = vmul.f32 1.442695, %v789_v0 }
 0x125   :  { %v877_v11 = vsub.f32 1.0, %v857_v28  ;;  %v531_v29 = vmul.f32 0.3275911, %v511_v32  ;;  %v771_v50 = vsub.f32 0.0, %v511_v32  ;;  %v1766_v52 = vand.u32 2147483647, %v1347_v26 }
 0x126   :  { %1090 = vpow2.f32 %v833_v38  ;;  %v490_v17 = vand.u32 2147483647, %v1551_v49  ;;  %v435_v4 = vadd.f32 %v1325_v55, %v1241_v36  ;;  %v1767_v22 = vand.u32 2147483647, %v1349_v27  ;;  %v459_v36 = vld [vmem:[%s1754_s3 + $0x80] sm:$0xff] }
 0x127   :  { %v895_v30 = vmul.f32 %v875_v48, %v1766_v52  ;;  %v551_v33 = vadd.f32 1.0, %v531_v29  ;;  %v791_v34 = vmul.f32 %v771_v50, %v511_v32  ;;  %v362_v62 = vadd.f32 %v1329_v59, %v1243_v37  ;;  %v460_v32 = vld [vmem:[%s1754_s3 + $0x88] sm:$0xff] }
 0x128   :  { %v897_v51 = vmul.f32 %v877_v11, %v1767_v22  ;;  %v1565_v2 = vpop.eup %1082  ;;  %v510_v12 = vmul.f32 0.70710677, %v490_v17  ;;  %v1570_v45 = vadd.f32 %v452_v46, %v435_v4  ;;  %v439_v55 = vadd.f32 %v1333_v1, %v1243_v37 }
 0x129   :  { %v915_v56 = vadd.f32 %v895_v30, %v1347_v26  ;;  %v596_v59 = vmul.f32 1.0614054, %v1565_v2  ;;  %1092 = vrcp.f32 %v551_v33  ;;  %v819_v35 = vmul.f32 1.442695, %v791_v34  ;;  %v461_v26 = vld [vmem:[%s1754_s3 + $0x90] sm:$0xff] }
 0x12a   :  { %v917_v43 = vadd.f32 %v897_v51, %v1349_v27  ;;  %v1582_v53 = vpop.eup %1084  ;;  %v530_v3 = vmul.f32 0.3275911, %v510_v12  ;;  %v770_v47 = vsub.f32 0.0, %v510_v12  ;;  %v492_v18 = vand.u32 2147483647, %v1570_v45 }
 0x12b   :  { %v935_v40 = vmul.f32 0.5, %v915_v56  ;;  %v990_v57 = vadd.f32 -1.4531521, %v596_v59  ;;  %1094 = vpow2.f32 %v815_v61  ;;  %v1585_v1 = vadd.f32 %v459_v36, %v362_v62 }
 0x12c   :  { %v937_v19 = vmul.f32 0.5, %v917_v43  ;;  %1096 = vpow2.f32 %v819_v35  ;;  %v550_v27 = vadd.f32 1.0, %v530_v3  ;;  %v512_v23 = vmul.f32 0.70710677, %v492_v18 }
 0x12d   :  { %955 = vst [vmem:[%s1755_s4 + $0x60] sm:$0xff] %v935_v40  ;;  %v1592_v16 = vpop.eup %1086  ;;  %v636_v25 = vmul.f32 %v1565_v2, %v990_v57  ;;  %v790_v54 = vmul.f32 %v770_v47, %v510_v12  ;;  %v499_v13 = vand.u32 2147483647, %v1585_v1  ;;  %v1599_v42 = vadd.f32 %v461_v26, %v439_v55 }
 0x12e   :  { %957 = vst [vmem:[%s1755_s4 + $0x70] sm:$0xff] %v937_v19  ;;  %v1601_v31 = vpop.eup %1088  ;;  %v598_v41 = vmul.f32 1.0614054, %v1592_v16  ;;  %1098 = vrcp.f32 %v550_v27  ;;  %v532_v63 = vmul.f32 0.3275911, %v512_v23  ;;  %v772_v60 = vsub.f32 0.0, %v512_v23 }
 0x12f   :  { %v656_v44 = vadd.f32 1.4214138, %v636_v25  ;;  %v589_v8 = vmul.f32 1.0614054, %v1601_v31  ;;  %v364_v24 = vadd.f32 %v1335_v7, %v1243_v37  ;;  %v519_v38 = vmul.f32 0.70710677, %v499_v13 }
 0x130   :  { %v1607_v0 = vpop.eup %1090  ;;  %v992_v9 = vadd.f32 -1.4531521, %v598_v41  ;;  %v552_v28 = vadd.f32 1.0, %v532_v63  ;;  %v1616_v48 = vadd.f32 %v1337_v10, %v1243_v37  ;;  %v817_v61 = vmul.f32 1.442695, %v790_v54 }
 0x131   :  { %v676_v46 = vmul.f32 %v1565_v2, %v656_v44  ;;  %v983_v11 = vadd.f32 -1.4531521, %v589_v8  ;;  %v501_v7 = vand.u32 2147483647, %v1599_v42  ;;  %v539_v50 = vmul.f32 0.3275911, %v519_v38 }
 0x132   :  { %v638_v29 = vmul.f32 %v1592_v16, %v992_v9  ;;  %1100 = vrcp.f32 %v552_v28  ;;  %v779_v52 = vsub.f32 0.0, %v519_v38  ;;  %v792_v51 = vmul.f32 %v772_v60, %v512_v23 }
 0x133   :  { %v1621_v30 = vpop.eup %1092  ;;  %v1010_v4 = vadd.f32 -0.28449672, %v676_v46  ;;  %v629_v22 = vmul.f32 %v1601_v31, %v983_v11  ;;  %v521_v37 = vmul.f32 0.70710677, %v501_v7  ;;  %v559_v34 = vadd.f32 1.0, %v539_v50 }
 0x134   :  { %v658_v10 = vadd.f32 1.4214138, %v638_v29  ;;  %v591_v33 = vmul.f32 1.0614054, %v1621_v30  ;;  %v1627_v62 = vadd.f32 %v460_v32, %v364_v24  ;;  %1102 = vpow2.f32 %v817_v61 }
 0x135   :  { %v1095_v56 = vpop.eup %1094  ;;  %v716_v12 = vmul.f32 %v1565_v2, %v1010_v4  ;;  %v649_v36 = vadd.f32 1.4214138, %v629_v22  ;;  %v541_v55 = vmul.f32 0.3275911, %v521_v37  ;;  %1104 = vrcp.f32 %v559_v34 }
 0x136   :  { %v1630_v43 = vpop.eup %1096  ;;  %v678_v59 = vmul.f32 %v1592_v16, %v658_v10  ;;  %v985_v35 = vadd.f32 -1.4531521, %v591_v33  ;;  %v799_v26 = vmul.f32 %v779_v52, %v519_v38  ;;  %v821_v47 = vmul.f32 1.442695, %v792_v51 }
 0x137   :  { %v736_v40 = vadd.f32 0.2548296, %v716_v12  ;;  %v669_v3 = vmul.f32 %v1601_v31, %v649_v36  ;;  %v561_v19 = vadd.f32 1.0, %v541_v55  ;;  %v781_v25 = vsub.f32 0.0, %v521_v37  ;;  %v462_v55 = vld [vmem:[%s1754_s3 + $0x98] sm:$0xff] }
 0x138   :  { %v1634_v57 = vpop.eup %1098  ;;  %v1012_v27 = vadd.f32 -0.28449672, %v678_v59  ;;  %v631_v23 = vmul.f32 %v1621_v30, %v985_v35  ;;  %v500_v54 = vand.u32 2147483647, %v1627_v62  ;;  %v835_v24 = vmul.f32 1.442695, %v799_v26 }
 0x139   :  { %v756_v41 = vmul.f32 %v1565_v2, %v736_v40  ;;  %v1003_v63 = vadd.f32 -0.28449672, %v669_v3  ;;  %v590_v44 = vmul.f32 1.0614054, %v1634_v57  ;;  %1106 = vrcp.f32 %v561_v19 }
 0x13a   :  { %v718_v8 = vmul.f32 %v1592_v16, %v1012_v27  ;;  %v651_v60 = vadd.f32 1.4214138, %v631_v23  ;;  %v1643_v9 = vmul.f32 0.70710677, %v500_v54  ;;  %1108 = vpow2.f32 %v821_v47 }
 0x13b   :  { %v856_v28 = vmul.f32 %v1582_v53, %v756_v41  ;;  %v709_v38 = vmul.f32 %v1601_v31, %v1003_v63  ;;  %v984_v32 = vadd.f32 -1.4531521, %v590_v44  ;;  %v801_v61 = vmul.f32 %v781_v25, %v521_v37 }
 0x13c   :  { %v1647_v46 = vpop.eup %1100  ;;  %v738_v2 = vadd.f32 0.2548296, %v718_v8  ;;  %v671_v11 = vmul.f32 %v1621_v30, %v651_v60  ;;  %v540_v29 = vmul.f32 0.3275911, %v1643_v9  ;;  %1110 = vpow2.f32 %v835_v24 }
 0x13d   :  { %v876_v50 = vsub.f32 1.0, %v856_v28  ;;  %v729_v52 = vadd.f32 0.2548296, %v709_v38  ;;  %v630_v4 = vmul.f32 %v1634_v57, %v984_v32  ;;  %v592_v22 = vmul.f32 1.0614054, %v1647_v46 }
 0x13e   :  { %v758_v53 = vmul.f32 %v1592_v16, %v738_v2  ;;  %v1005_v51 = vadd.f32 -0.28449672, %v671_v11  ;;  %v560_v10 = vadd.f32 1.0, %v540_v29  ;;  %v1103_v33 = vpop.eup %1102  ;;  %v839_v26 = vmul.f32 1.442695, %v801_v61 }
 0x13f   :  { %v896_v34 = vmul.f32 %v876_v50, %v496_v15  ;;  %v749_v12 = vmul.f32 %v1601_v31, %v729_v52  ;;  %v650_v37 = vadd.f32 1.4214138, %v630_v4  ;;  %v986_v36 = vadd.f32 -1.4531521, %v592_v22  ;;  %v1660_v59 = vpop.eup %1104 }
 0x140   :  { %v858_v35 = vmul.f32 %v1607_v0, %v758_v53  ;;  %v711_v16 = vmul.f32 %v1621_v30, %v1005_v51  ;;  %1112 = vrcp.f32 %v560_v10  ;;  %v599_v27 = vmul.f32 1.0614054, %v1660_v59 }
 0x141   :  { %v916_v40 = vadd.f32 %v896_v34, %v1376_v6  ;;  %v849_v3 = vmul.f32 %v1095_v56, %v749_v12  ;;  %v670_v15 = vmul.f32 %v1634_v57, %v650_v37  ;;  %v632_v31 = vmul.f32 %v1647_v46, %v986_v36 }
 0x142   :  { %v878_v47 = vsub.f32 1.0, %v858_v35  ;;  %v731_v19 = vadd.f32 0.2548296, %v711_v16  ;;  %v1669_v23 = vadd.f32 %v462_v55, %v1616_v48  ;;  %v993_v8 = vadd.f32 -1.4531521, %v599_v27 }
 0x143   :  { %v1671_v25 = vpop.eup %1106  ;;  %v936_v0 = vmul.f32 0.5, %v916_v40  ;;  %v869_v41 = vsub.f32 1.0, %v849_v3  ;;  %v1004_v63 = vadd.f32 -0.28449672, %v670_v15  ;;  %v652_v44 = vadd.f32 1.4214138, %v632_v31 }
 0x144   :  { %v898_v6 = vmul.f32 %v878_v47, %v498_v5  ;;  %v751_v56 = vmul.f32 %v1621_v30, %v731_v19  ;;  %v601_v60 = vmul.f32 1.0614054, %v1671_v25  ;;  %v1109_v24 = vpop.eup %1108  ;;  %v780_v32 = vsub.f32 0.0, %v1643_v9 }
 0x145   :  { %956 = vst [vmem:[%s1755_s4 + $0x68] sm:$0xff] %v936_v0  ;;  %v889_v48 = vmul.f32 %v869_v41, %v489_v39  ;;  %v710_v28 = vmul.f32 %v1634_v57, %v1004_v63  ;;  %v672_v38 = vmul.f32 %v1647_v46, %v652_v44  ;;  %v639_v2 = vmul.f32 %v1660_v59, %v993_v8 }
 0x146   :  { %v918_v5 = vadd.f32 %v898_v6, %v1505_v58  ;;  %v851_v30 = vmul.f32 %v1630_v43, %v751_v56  ;;  %v995_v11 = vadd.f32 -1.4531521, %v601_v60  ;;  %1114 = vpow2.f32 %v839_v26  ;;  %v1111_v52 = vpop.eup %1110 }
 0x147   :  { %v909_v61 = vadd.f32 %v889_v48, %v1516_v21  ;;  %v730_v29 = vadd.f32 0.2548296, %v710_v28  ;;  %v1006_v50 = vadd.f32 -0.28449672, %v672_v38  ;;  %v659_v22 = vadd.f32 1.4214138, %v639_v2 }
 0x148   :  { %v938_v39 = vmul.f32 0.5, %v918_v5  ;;  %v871_v4 = vsub.f32 1.0, %v851_v30  ;;  %v641_v53 = vmul.f32 %v1671_v25, %v995_v11  ;;  %v502_v43 = vand.u32 2147483647, %v1669_v23 }
 0x149   :  { %v929_v51 = vmul.f32 0.5, %v909_v61  ;;  %v750_v10 = vmul.f32 %v1634_v57, %v730_v29  ;;  %v712_v58 = vmul.f32 %v1647_v46, %v1006_v50  ;;  %v679_v12 = vmul.f32 %v1660_v59, %v659_v22 }
 0x14a   :  { %v1113_v34 = vpop.eup %1112  ;;  %958 = vst [vmem:[%s1755_s4 + $0x78] sm:$0xff] %v938_v39  ;;  %v891_v21 = vmul.f32 %v871_v4, %v491_v20  ;;  %v661_v37 = vadd.f32 1.4214138, %v641_v53  ;;  %v800_v36 = vmul.f32 %v780_v32, %v1643_v9  ;;  %v522_v16 = vmul.f32 0.70710677, %v502_v43 }
 0x14b   :  { %949 = vst [vmem:[%s1755_s4 + $0x30] sm:$0xff] %v929_v51  ;;  %v850_v57 = vmul.f32 %v1103_v33, %v750_v10  ;;  %v732_v55 = vadd.f32 0.2548296, %v712_v58  ;;  %v600_v35 = vmul.f32 1.0614054, %v1113_v34 }
 0x14c   :  { %v911_v26 = vadd.f32 %v891_v21, %v1533_v14  ;;  %v1013_v40 = vadd.f32 -0.28449672, %v679_v12  ;;  %v681_v20 = vmul.f32 %v1671_v25, %v661_v37  ;;  %v542_v9 = vmul.f32 0.3275911, %v522_v16 }
 0x14d   :  { %v870_v3 = vsub.f32 1.0, %v850_v57  ;;  %v752_v15 = vmul.f32 %v1647_v46, %v732_v55  ;;  %v994_v31 = vadd.f32 -1.4531521, %v600_v35  ;;  %v837_v33 = vmul.f32 1.442695, %v800_v36 }
 0x14e   :  { %v931_v47 = vmul.f32 0.5, %v911_v26  ;;  %v719_v19 = vmul.f32 %v1660_v59, %v1013_v40  ;;  %v1015_v27 = vadd.f32 -0.28449672, %v681_v20  ;;  %v562_v44 = vadd.f32 1.0, %v542_v9 }
 0x14f   :  { %v890_v0 = vmul.f32 %v870_v3, %v490_v17  ;;  %v852_v41 = vmul.f32 %v1109_v24, %v752_v15  ;;  %v640_v63 = vmul.f32 %v1113_v34, %v994_v31  ;;  %v782_v29 = vsub.f32 0.0, %v522_v16 }
 0x150   :  { %951 = vst [vmem:[%s1755_s4 + $0x40] sm:$0xff] %v931_v47  ;;  %v739_v14 = vadd.f32 0.2548296, %v719_v19  ;;  %v721_v46 = vmul.f32 %v1671_v25, %v1015_v27  ;;  %v1115_v6 = vpop.eup %1114  ;;  %1116 = vrcp.f32 %v562_v44 }
 0x151   :  { %v910_v56 = vadd.f32 %v890_v0, %v1551_v49  ;;  %v872_v8 = vsub.f32 1.0, %v852_v41  ;;  %v660_v60 = vadd.f32 1.4214138, %v640_v63  ;;  %1118 = vpow2.f32 %v837_v33 }
 0x152   :  { %v759_v48 = vmul.f32 %v1660_v59, %v739_v14  ;;  %v741_v28 = vadd.f32 0.2548296, %v721_v46  ;;  %v802_v22 = vmul.f32 %v782_v29, %v522_v16 }
 0x153   :  { %v930_v17 = vmul.f32 0.5, %v910_v56  ;;  %v892_v24 = vmul.f32 %v872_v8, %v492_v18  ;;  %v680_v38 = vmul.f32 %v1113_v34, %v660_v60 }
 0x154   :  { %v859_v32 = vmul.f32 %v1111_v52, %v759_v48  ;;  %v761_v5 = vmul.f32 %v1671_v25, %v741_v28 }
 0x155   :  { %950 = vst [vmem:[%s1755_s4 + $0x38] sm:$0xff] %v930_v17  ;;  %v912_v49 = vadd.f32 %v892_v24, %v1570_v45  ;;  %v1014_v30 = vadd.f32 -0.28449672, %v680_v38 }
 0x156   :  { %v879_v2 = vsub.f32 1.0, %v859_v32  ;;  %v861_v11 = vmul.f32 %v1115_v6, %v761_v5 }
 0x157   :  { %v932_v59 = vmul.f32 0.5, %v912_v49  ;;  %v720_v61 = vmul.f32 %v1113_v34, %v1014_v30 }
 0x158   :  { %v899_v50 = vmul.f32 %v879_v2, %v499_v13  ;;  %v881_v18 = vsub.f32 1.0, %v861_v11 }
 0x159   :  { %952 = vst [vmem:[%s1755_s4 + $0x48] sm:$0xff] %v932_v59  ;;  %v740_v25 = vadd.f32 0.2548296, %v720_v61 }
 0x15a   :  { %v919_v52 = vadd.f32 %v899_v50, %v1585_v1  ;;  %v901_v45 = vmul.f32 %v881_v18, %v501_v7  ;;  %v1117_v39 = vpop.eup %1116  ;;  %v841_v1 = vmul.f32 1.442695, %v802_v22 }
 0x15b   :  { %v760_v4 = vmul.f32 %v1113_v34, %v740_v25  ;;  %v1119_v53 = vpop.eup %1118  ;;  %v602_v58 = vmul.f32 1.0614054, %v1117_v39 }
 0x15c   :  { %v939_v51 = vmul.f32 0.5, %v919_v52  ;;  %v921_v10 = vadd.f32 %v901_v45, %v1599_v42  ;;  %1120 = vpow2.f32 %v841_v1 }
 0x15d   :  { %v860_v13 = vmul.f32 %v1119_v53, %v760_v4  ;;  %v996_v12 = vadd.f32 -1.4531521, %v602_v58 }
 0x15e   :  { %959 = vst [vmem:[%s1755_s4 + $0x80] sm:$0xff] %v939_v51  ;;  %v941_v21 = vmul.f32 0.5, %v921_v10 }
 0x15f   :  { %v880_v37 = vsub.f32 1.0, %v860_v13  ;;  %v642_v7 = vmul.f32 %v1117_v39, %v996_v12 }
 0x160   :  { %961 = vst [vmem:[%s1755_s4 + $0x90] sm:$0xff] %v941_v21 }
 0x161   :  { %v900_v34 = vmul.f32 %v880_v37, %v500_v54  ;;  %v662_v36 = vadd.f32 1.4214138, %v642_v7 }
 0x163   :  { %v920_v42 = vadd.f32 %v900_v34, %v1627_v62  ;;  %v682_v57 = vmul.f32 %v1117_v39, %v662_v36 }
 0x165   :  { %v940_v55 = vmul.f32 0.5, %v920_v42  ;;  %v1016_v35 = vadd.f32 -0.28449672, %v682_v57 }
 0x166   :  { %v1121_v20 = vpop.eup %1120 }
 0x167   :  { %960 = vst [vmem:[%s1755_s4 + $0x88] sm:$0xff] %v940_v55  ;;  %v722_v16 = vmul.f32 %v1117_v39, %v1016_v35 }
 0x169   :  { %v742_v26 = vadd.f32 0.2548296, %v722_v16 }
 0x16b   :  { %v762_v40 = vmul.f32 %v1117_v39, %v742_v26 }
 0x16d   :  { %v862_v3 = vmul.f32 %v1121_v20, %v762_v40 }
 0x16f   :  { %v882_v15 = vsub.f32 1.0, %v862_v3 }
 0x171   :  { %v902_v54 = vmul.f32 %v882_v15, %v502_v43 }
 0x173   :  { %v922_v31 = vadd.f32 %v902_v54, %v1669_v23 }
 0x175   :  { %v942_v62 = vmul.f32 0.5, %v922_v31 }
 0x177   :  { %962 = vst [vmem:[%s1755_s4 + $0x98] sm:$0xff] %v942_v62 }

// kernel: fno2d_forward.22
= control target key start
LH: loop header
LB: loop body
LE: loop exit
PB: predicated region body
PF: predicated region fallthrough
CT: control target
= control target key end

     0   :  { %v542_v3 = vmov 0.0   ;;  %v543_v6 = vmov 0   ;;  %vm51_vm0 = vcmask 130048   ;;  %s805_s0 = inlined_call_operand.vmem [shape: f32[16,1280], index: 0, kind: input, shape index: {}]   ;;  %s806_s1 = inlined_call_operand.vmem [shape: f32[16,16], index: 1, kind: input, shape index: {}]   ;;  %s807_s2 = inlined_call_operand.vmem [shape: f32[16,1], index: 2, kind: input, shape index: {}]   ;;  %s808_s3 = inlined_call_operand.vmem [shape: f32[16,1280], index: 3, kind: input, shape index: {}]   ;;  %s809_s4 = inlined_call_operand.vmem [shape: f32[16,1280], index: 4, kind: output, shape index: {}]  }
   0x1   :  { %v20_v0 = vld [vmem:[%s805_s0 + $0x8] sm:$0xff]  ;;  %v30_v1 = vld [vmem:[%s805_s0 + $0x58] sm:$0xff]  ;;  %v19_v2 = vld [vmem:[%s805_s0] sm:$0xff]  ;;  %122 = vmatprep.mubr.f32.mxu0 %v542_v3  ;;  %128 = vmatprep.mubr.f32.mxu1 %v542_v3 }
   0x2   :  { %v517_v4 = vpack.c.bf16 %v30_v1, %v20_v0  ;;  %v29_v5 = vld [vmem:[%s805_s0 + $0x50] sm:$0xff]  ;;  %541 = vset.pattern.permute.xlu0 %v543_v6  ;;  %v17_v8 = vld [vmem:[%s806_s1] sm:$0xff]  ;;  %v18_v9 = vld [vmem:[%s806_s1 + $0x8] sm:$0xff] }
   0x3   :  { %v519_v7 = vpack.c.bf16 %v29_v5, %v19_v2  ;;  %v22_v10 = vld [vmem:[%s805_s0 + $0x18] sm:$0xff]  ;;  %v32_v11 = vld [vmem:[%s805_s0 + $0x68] sm:$0xff]  ;;  %v21_v15 = vld [vmem:[%s805_s0 + $0x10] sm:$0xff] }
   0x4   :  { %v24_v12 = vld [vmem:[%s805_s0 + $0x28] sm:$0xff]  ;;  %518 = vmatprep.subr.bf16.mxu0 %v517_v4  ;;  %537 = vmatprep.subr.bf16.mxu1 %v517_v4  ;;  %v521_v13 = vpack.c.bf16 %v32_v11, %v22_v10  ;;  %v34_v14 = vld [vmem:[%s805_s0 + $0x78] sm:$0xff]  ;;  %v31_v16 = vld [vmem:[%s805_s0 + $0x60] sm:$0xff] }
   0x5   :  { %520 = vmatpush1.bf16.msra.mxu0 %v519_v7  ;;  %538 = vmatpush1.bf16.msra.mxu1 %v519_v7  ;;  %v525_v17 = vpack.c.bf16 %v34_v14, %v24_v12  ;;  %v523_v18 = vpack.c.bf16 %v31_v16, %v21_v15  ;;  %v23_v19 = vld [vmem:[%s805_s0 + $0x20] sm:$0xff]  ;;  %v33_v20 = vld [vmem:[%s805_s0 + $0x70] sm:$0xff]  ;;  %v26_v21 = vld [vmem:[%s805_s0 + $0x38] sm:$0xff] }
   0x6   :  { %522 = vmatprep.subr.bf16.mxu1 %v521_v13  ;;  %v527_v22 = vpack.c.bf16 %v33_v20, %v23_v19  ;;  %v36_v23 = vld [vmem:[%s805_s0 + $0x88] sm:$0xff]  ;;  %v38_v25 = vld [vmem:[%s805_s0 + $0x98] sm:$0xff]  ;;  %v25_v28 = vld [vmem:[%s805_s0 + $0x30] sm:$0xff] }
   0x7   :  { %v28_v24 = vld [vmem:[%s805_s0 + $0x48] sm:$0xff]  ;;  %526 = vmatprep.subr.bf16.mxu0 %v525_v17  ;;  %v529_v26 = vpack.c.bf16 %v36_v23, %v26_v21  ;;  %v35_v29 = vld [vmem:[%s805_s0 + $0x80] sm:$0xff]  ;;  %v37_v31 = vld [vmem:[%s805_s0 + $0x90] sm:$0xff] }
   0x8   :  { %v533_v27 = vpack.c.bf16 %v38_v25, %v28_v24  ;;  %v27_v30 = vld [vmem:[%s805_s0 + $0x40] sm:$0xff]  ;;  %507 = vmatmul.mubr.msk.f32.vlgmr.msra.gmra.mrb[0].mxu0 %vm51_vm0, %v17_v8  ;;  %508 = vmatmul.mubr.msk.f32.vlgmr.msra.gmra.mrb[0].mxu1 %vm51_vm0, %v18_v9  ;;  %v531_v32 = vpack.c.bf16 %v35_v29, %v25_v28  ;;  %v40_v35 = vld [vmem:[%s807_s2 + $0x8] sm:$0xff]  ;;  %v453_v41 = vld [vmem:[%s808_s3 + $0x50] sm:$0xff] }
   0x9   :  { %524 = vmatpush1.bf16.msra.mxu1 %v523_v18  ;;  %528 = vmatpush1.bf16.msra.mxu0 %v527_v22  ;;  %v535_v33 = vpack.c.bf16 %v37_v31, %v27_v30  ;;  %v39_v34 = vld [vmem:[%s807_s2] sm:$0xff]  ;;  %v444_v45 = vld [vmem:[%s808_s3 + $0x8] sm:$0xff]  ;;  %v454_v47 = vld [vmem:[%s808_s3 + $0x58] sm:$0xff] }
   0xa   :  { %199 = vmatprep.mubr.f32.mxu1 %v542_v3  ;;  %276 = vmatprep.mubr.f32.mxu0 %v542_v3  ;;  %v443_v39 = vld [vmem:[%s808_s3] sm:$0xff]  ;;  %v445_v55 = vld [vmem:[%s808_s3 + $0x10] sm:$0xff]  ;;  %v446_v61 = vld [vmem:[%s808_s3 + $0x18] sm:$0xff] }
   0xb   :  { %530 = vmatprep.subr.bf16.mxu1 %v529_v26  ;;  %534 = vmatprep.subr.bf16.mxu0 %v533_v27  ;;  %v447_v57 = vld [vmem:[%s808_s3 + $0x20] sm:$0xff]  ;;  %v448_v63 = vld [vmem:[%s808_s3 + $0x28] sm:$0xff]  ;;  %v458_v15 = vld [vmem:[%s808_s3 + $0x78] sm:$0xff] }
   0xc   :  { %509 = vmatmul.mubr.msk.f32.vlgmr.msra.gmra.mrb[2].mxu1 %vm51_vm0, %v17_v8  ;;  %511 = vmatmul.mubr.msk.f32.vlgmr.msra.gmra.mrb[2].mxu0 %vm51_vm0, %v17_v8  ;;  %v455_v7 = vld [vmem:[%s808_s3 + $0x60] sm:$0xff]  ;;  %v456_v13 = vld [vmem:[%s808_s3 + $0x68] sm:$0xff]  ;;  %v449_v23 = vld [vmem:[%s808_s3 + $0x30] sm:$0xff] }
   0xd   :  { %532 = vmatpush1.bf16.msra.mxu1 %v531_v32  ;;  %536 = vmatpush1.bf16.msra.mxu0 %v535_v33  ;;  %v451_v25 = vld [vmem:[%s808_s3 + $0x40] sm:$0xff]  ;;  %v450_v29 = vld [vmem:[%s808_s3 + $0x38] sm:$0xff]  ;;  %v452_v31 = vld [vmem:[%s808_s3 + $0x48] sm:$0xff] }
   0xe   :  { %205 = vmatprep.mubr.f32.mxu1 %v542_v3  ;;  %282 = vmatprep.mubr.f32.mxu0 %v542_v3 }
   0xf   :  { %43 = vperm.xlu0 %541, %v39_v34  }
  0x10   :  { %510 = vmatmul.mubr.msk.f32.gmra.mrb[4].mxu1 %vm51_vm0, %v18_v9  ;;  %512 = vmatmul.mubr.msk.f32.gmra.mrb[4].mxu0 %vm51_vm0, %v18_v9 }
  0x11   :  { %353 = vmatprep.mubr.f32.mxu1 %v542_v3  ;;  %430 = vmatprep.mubr.f32.mxu0 %v542_v3 }
  0x13   :  { %48 = vperm.xlu0 %541, %v40_v35  }
  0x14   :  { %513 = vmatmul.mubr.msk.f32.vlgmr.msra.gmra.mrb[6].mxu1 %vm51_vm0, %v17_v8  ;;  %515 = vmatmul.mubr.msk.f32.vlgmr.msra.gmra.mrb[6].mxu0 %vm51_vm0, %v17_v8 }
  0x15   :  { %359 = vmatprep.mubr.f32.mxu1 %v542_v3  ;;  %436 = vmatprep.mubr.f32.mxu0 %v542_v3 }
  0x18   :  { %514 = vmatmul.mubr.msk.f32.gmra.mrb[8].mxu1 %vm51_vm0, %v18_v9  ;;  %516 = vmatmul.mubr.msk.f32.gmra.mrb[8].mxu0 %vm51_vm0, %v18_v9  ;;  %v457_v9 = vld [vmem:[%s808_s3 + $0x70] sm:$0xff] }
  0x8e   :  { %v661_v36 = vpop.permute.xlu0 %43 }
  0x92   :  { %v663_v37 = vpop.permute.xlu0 %48 }
  0xdb   :  { %v124_v38 = vpop.f32.mrb[0].mxu0  ;;  %v130_v40 = vpop.f32.mrb[0].mxu1 }
  0xdc   :  { %v125_v42 = vadd.f32 %v124_v38, %v661_v36  ;;  %v131_v43 = vadd.f32 %v130_v40, %v663_v37  ;;  %v126_v44 = vpop.f32.mrb[1].mxu0  ;;  %v132_v46 = vpop.f32.mrb[1].mxu1 }
  0xdd   :  { %v127_v48 = vadd.f32 %v126_v44, %v661_v36  ;;  %v133_v49 = vadd.f32 %v132_v46, %v663_v37  ;;  %v460_v46 = vld [vmem:[%s808_s3 + $0x88] sm:$0xff] }
  0xde   :  { %v463_v50 = vadd.f32 %v443_v39, %v125_v42  ;;  %v473_v51 = vadd.f32 %v453_v41, %v131_v43  ;;  %v459_v41 = vld [vmem:[%s808_s3 + $0x80] sm:$0xff]  ;;  %v461_v43 = vld [vmem:[%s808_s3 + $0x90] sm:$0xff] }
  0xdf   :  { %v464_v52 = vadd.f32 %v444_v45, %v127_v48  ;;  %v474_v53 = vadd.f32 %v454_v47, %v133_v49  ;;  %v201_v54 = vpop.f32.mrb[2].mxu1  ;;  %v278_v56 = vpop.f32.mrb[2].mxu0  ;;  %v462_v48 = vld [vmem:[%s808_s3 + $0x98] sm:$0xff] }
  0xe0   :  { %483 = vst [vmem:[%s809_s4] sm:$0xff] %v463_v50  ;;  %493 = vst [vmem:[%s809_s4 + $0x50] sm:$0xff] %v473_v51  ;;  %v202_v58 = vadd.f32 %v201_v54, %v661_v36  ;;  %v279_v59 = vadd.f32 %v278_v56, %v661_v36  ;;  %v203_v60 = vpop.f32.mrb[3].mxu1  ;;  %v280_v62 = vpop.f32.mrb[3].mxu0 }
  0xe1   :  { %484 = vst [vmem:[%s809_s4 + $0x8] sm:$0xff] %v464_v52  ;;  %494 = vst [vmem:[%s809_s4 + $0x58] sm:$0xff] %v474_v53  ;;  %v204_v0 = vadd.f32 %v203_v60, %v661_v36  ;;  %v281_v1 = vadd.f32 %v280_v62, %v661_v36 }
  0xe2   :  { %v465_v2 = vadd.f32 %v445_v55, %v202_v58  ;;  %v467_v3 = vadd.f32 %v447_v57, %v279_v59 }
  0xe3   :  { %v466_v4 = vadd.f32 %v446_v61, %v204_v0  ;;  %v468_v5 = vadd.f32 %v448_v63, %v281_v1  ;;  %v207_v6 = vpop.f32.mrb[4].mxu1  ;;  %v284_v8 = vpop.f32.mrb[4].mxu0 }
  0xe4   :  { %485 = vst [vmem:[%s809_s4 + $0x10] sm:$0xff] %v465_v2  ;;  %487 = vst [vmem:[%s809_s4 + $0x20] sm:$0xff] %v467_v3  ;;  %v208_v10 = vadd.f32 %v207_v6, %v663_v37  ;;  %v285_v11 = vadd.f32 %v284_v8, %v663_v37  ;;  %v209_v12 = vpop.f32.mrb[5].mxu1  ;;  %v286_v14 = vpop.f32.mrb[5].mxu0 }
  0xe5   :  { %486 = vst [vmem:[%s809_s4 + $0x18] sm:$0xff] %v466_v4  ;;  %488 = vst [vmem:[%s809_s4 + $0x28] sm:$0xff] %v468_v5  ;;  %v210_v16 = vadd.f32 %v209_v12, %v663_v37  ;;  %v287_v17 = vadd.f32 %v286_v14, %v663_v37 }
  0xe6   :  { %v475_v18 = vadd.f32 %v455_v7, %v208_v10  ;;  %v477_v19 = vadd.f32 %v457_v9, %v285_v11 }
  0xe7   :  { %v476_v20 = vadd.f32 %v456_v13, %v210_v16  ;;  %v478_v21 = vadd.f32 %v458_v15, %v287_v17  ;;  %v355_v22 = vpop.f32.mrb[6].mxu1  ;;  %v432_v24 = vpop.f32.mrb[6].mxu0 }
  0xe8   :  { %495 = vst [vmem:[%s809_s4 + $0x60] sm:$0xff] %v475_v18  ;;  %497 = vst [vmem:[%s809_s4 + $0x70] sm:$0xff] %v477_v19  ;;  %v356_v26 = vadd.f32 %v355_v22, %v661_v36  ;;  %v433_v27 = vadd.f32 %v432_v24, %v661_v36  ;;  %v357_v28 = vpop.f32.mrb[7].mxu1  ;;  %v434_v30 = vpop.f32.mrb[7].mxu0 }
  0xe9   :  { %496 = vst [vmem:[%s809_s4 + $0x68] sm:$0xff] %v476_v20  ;;  %498 = vst [vmem:[%s809_s4 + $0x78] sm:$0xff] %v478_v21  ;;  %v358_v32 = vadd.f32 %v357_v28, %v661_v36  ;;  %v435_v33 = vadd.f32 %v434_v30, %v661_v36 }
  0xea   :  { %v469_v34 = vadd.f32 %v449_v23, %v356_v26  ;;  %v471_v35 = vadd.f32 %v451_v25, %v433_v27 }
  0xeb   :  { %v470_v38 = vadd.f32 %v450_v29, %v358_v32  ;;  %v472_v39 = vadd.f32 %v452_v31, %v435_v33  ;;  %v361_v40 = vpop.f32.mrb[8].mxu1  ;;  %v438_v42 = vpop.f32.mrb[8].mxu0 }
  0xec   :  { %489 = vst [vmem:[%s809_s4 + $0x30] sm:$0xff] %v469_v34  ;;  %491 = vst [vmem:[%s809_s4 + $0x40] sm:$0xff] %v471_v35  ;;  %v362_v36 = vadd.f32 %v361_v40, %v663_v37  ;;  %v439_v44 = vadd.f32 %v438_v42, %v663_v37  ;;  %v363_v45 = vpop.f32.mrb[9].mxu1  ;;  %v440_v47 = vpop.f32.mrb[9].mxu0 }
  0xed   :  { %490 = vst [vmem:[%s809_s4 + $0x38] sm:$0xff] %v470_v38  ;;  %492 = vst [vmem:[%s809_s4 + $0x48] sm:$0xff] %v472_v39  ;;  %v364_v49 = vadd.f32 %v363_v45, %v663_v37  ;;  %v441_v50 = vadd.f32 %v440_v47, %v663_v37 }
  0xee   :  { %v479_v51 = vadd.f32 %v459_v41, %v362_v36  ;;  %v481_v52 = vadd.f32 %v461_v43, %v439_v44 }
  0xef   :  { %v480_v53 = vadd.f32 %v460_v46, %v364_v49  ;;  %v482_v54 = vadd.f32 %v462_v48, %v441_v50 }
  0xf0   :  { %499 = vst [vmem:[%s809_s4 + $0x80] sm:$0xff] %v479_v51  ;;  %501 = vst [vmem:[%s809_s4 + $0x90] sm:$0xff] %v481_v52 }
  0xf1   :  { %500 = vst [vmem:[%s809_s4 + $0x88] sm:$0xff] %v480_v53  ;;  %502 = vst [vmem:[%s809_s4 + $0x98] sm:$0xff] %v482_v54 }

// kernel: fno2d_forward.23
= control target key start
LH: loop header
LB: loop body
LE: loop exit
PB: predicated region body
PF: predicated region fallthrough
CT: control target
= control target key end

     0   :  { %v4968_v3 = vmov 0.0   ;;  %v4969_v8 = vmov 0   ;;  %vm252_vm0 = vcmask 130048   ;;  %s8945_s0 = inlined_call_operand.vmem [shape: f32[16,512], index: 0, kind: input, shape index: {}]   ;;  %s8946_s1 = inlined_call_operand.vmem [shape: f32[256,16], index: 1, kind: input, shape index: {}]   ;;  %s8947_s2 = inlined_call_operand.vmem [shape: f32[256,1], index: 2, kind: input, shape index: {}]   ;;  %s8948_s4 = inlined_call_operand.vmem [shape: f32[2,1], index: 4, kind: input, shape index: {}]   ;;  %s8949_s3 = inlined_call_operand.vmem [shape: f32[2,256], index: 3, kind: input, shape index: {}]   ;;  %s8950_s5 = inlined_call_operand.vmem [shape: f32[2,512], index: 5, kind: output, shape index: {}]  }
   0x1   :  { %v53_v0 = vld [vmem:[%s8945_s0 + $0x8] sm:$0xff]  ;;  %v55_v2 = vld [vmem:[%s8945_s0 + $0x18] sm:$0xff]  ;;  %413 = vmatprep.mubr.f32.mxu0 %v4968_v3  ;;  %670 = vmatprep.mubr.f32.mxu1 %v4968_v3  ;;  %v52_v6 = vld [vmem:[%s8945_s0] sm:$0xff] }
   0x2   :  { %v57_v1 = vld [vmem:[%s8945_s0 + $0x28] sm:$0xff]  ;;  %v59_v5 = vld [vmem:[%s8945_s0 + $0x38] sm:$0xff]  ;;  %v56_v7 = vld [vmem:[%s8945_s0 + $0x20] sm:$0xff]  ;;  %4454 = vset.pattern.permute.xlu0 %v4969_v8  ;;  %4455 = vset.pattern.permute.xlu1 %v4969_v8 }
   0x3   :  { %v4315_v4 = vpack.c.bf16 %v57_v1, %v53_v0  ;;  %v4319_v9 = vpack.c.bf16 %v59_v5, %v55_v2  ;;  %v4317_v10 = vpack.c.bf16 %v56_v7, %v52_v6  ;;  %v54_v11 = vld [vmem:[%s8945_s0 + $0x10] sm:$0xff]  ;;  %v20_v14 = vld [vmem:[%s8946_s1] sm:$0xff]  ;;  %v61_v16 = vld [vmem:[%s8947_s2 + $0x8] sm:$0xff] }
   0x4   :  { %v58_v12 = vld [vmem:[%s8945_s0 + $0x30] sm:$0xff]  ;;  %v60_v15 = vld [vmem:[%s8947_s2] sm:$0xff]  ;;  %v21_v18 = vld [vmem:[%s8946_s1 + $0x8] sm:$0xff] }
   0x5   :  { %4316 = vmatprep.subr.bf16.mxu0 %v4315_v4  ;;  %v4321_v13 = vpack.c.bf16 %v58_v12, %v54_v11  ;;  %4320 = vmatprep.subr.bf16.mxu1 %v4319_v9  ;;  %v62_v17 = vld [vmem:[%s8947_s2 + $0x10] sm:$0xff]  ;;  %v63_v19 = vld [vmem:[%s8947_s2 + $0x18] sm:$0xff]  ;;  %v64_v20 = vld [vmem:[%s8947_s2 + $0x20] sm:$0xff] }
   0x6   :  { %4318 = vmatpush1.bf16.msra.mxu0 %v4317_v10  ;;  %94 = vperm.xlu0 %4454, %v60_v15   ;;  %v22_v21 = vld [vmem:[%s8946_s1 + $0x10] sm:$0xff]  ;;  %v65_v22 = vld [vmem:[%s8947_s2 + $0x28] sm:$0xff]  ;;  %v23_v24 = vld [vmem:[%s8946_s1 + $0x18] sm:$0xff] }
   0x7   :  { %4322 = vmatpush1.bf16.msra.mxu1 %v4321_v13  ;;  %104 = vperm.xlu1 %4455, %v62_v17   ;;  %v66_v23 = vld [vmem:[%s8947_s2 + $0x30] sm:$0xff]  ;;  %v67_v25 = vld [vmem:[%s8947_s2 + $0x38] sm:$0xff]  ;;  %v68_v26 = vld [vmem:[%s8947_s2 + $0x40] sm:$0xff] }
   0x8   :  { %v24_v27 = vld [vmem:[%s8946_s1 + $0x20] sm:$0xff]  ;;  %v69_v28 = vld [vmem:[%s8947_s2 + $0x48] sm:$0xff]  ;;  %v70_v29 = vld [vmem:[%s8947_s2 + $0x50] sm:$0xff] }
   0x9   :  { %3994 = vmatmul.mubr.msk.f32.vlgmr.msra.gmra.mrb[0].mxu0 %vm252_vm0, %v20_v14  ;;  %v25_v30 = vld [vmem:[%s8946_s1 + $0x28] sm:$0xff]  ;;  %v71_v31 = vld [vmem:[%s8947_s2 + $0x58] sm:$0xff]  ;;  %v72_v32 = vld [vmem:[%s8947_s2 + $0x60] sm:$0xff] }
   0xa   :  { %4026 = vmatmul.mubr.msk.f32.vlgmr.msra.gmra.mrb[0].mxu1 %vm252_vm0, %v20_v14  ;;  %419 = vmatprep.mubr.f32.mxu0 %v4968_v3  ;;  %v26_v33 = vld [vmem:[%s8946_s1 + $0x30] sm:$0xff]  ;;  %v73_v34 = vld [vmem:[%s8947_s2 + $0x68] sm:$0xff]  ;;  %v27_v36 = vld [vmem:[%s8946_s1 + $0x38] sm:$0xff] }
   0xb   :  { %676 = vmatprep.mubr.f32.mxu1 %v4968_v3  ;;  %99 = vperm.xlu0 %4454, %v61_v16   ;;  %v74_v35 = vld [vmem:[%s8947_s2 + $0x70] sm:$0xff]  ;;  %v75_v37 = vld [vmem:[%s8947_s2 + $0x78] sm:$0xff]  ;;  %v76_v38 = vld [vmem:[%s8947_s2 + $0x80] sm:$0xff] }
   0xc   :  { %109 = vperm.xlu1 %4455, %v63_v19   ;;  %v28_v39 = vld [vmem:[%s8946_s1 + $0x40] sm:$0xff]  ;;  %v77_v40 = vld [vmem:[%s8947_s2 + $0x88] sm:$0xff]  ;;  %v78_v41 = vld [vmem:[%s8947_s2 + $0x90] sm:$0xff] }
   0xd   :  { %3995 = vmatmul.mubr.msk.f32.gmra.mrb[2].mxu0 %vm252_vm0, %v21_v18  ;;  %v29_v42 = vld [vmem:[%s8946_s1 + $0x48] sm:$0xff]  ;;  %v79_v43 = vld [vmem:[%s8947_s2 + $0x98] sm:$0xff]  ;;  %v80_v44 = vld [vmem:[%s8947_s2 + $0xa0] sm:$0xff] }
   0xe   :  { %4027 = vmatmul.mubr.msk.f32.gmra.mrb[2].mxu1 %vm252_vm0, %v21_v18  ;;  %425 = vmatprep.mubr.f32.mxu0 %v4968_v3  ;;  %v30_v45 = vld [vmem:[%s8946_s1 + $0x50] sm:$0xff]  ;;  %v81_v46 = vld [vmem:[%s8947_s2 + $0xa8] sm:$0xff]  ;;  %v31_v48 = vld [vmem:[%s8946_s1 + $0x58] sm:$0xff] }
   0xf   :  { %682 = vmatprep.mubr.f32.mxu1 %v4968_v3  ;;  %114 = vperm.xlu0 %4454, %v64_v20   ;;  %v82_v47 = vld [vmem:[%s8947_s2 + $0xb0] sm:$0xff]  ;;  %v83_v49 = vld [vmem:[%s8947_s2 + $0xb8] sm:$0xff]  ;;  %v84_v50 = vld [vmem:[%s8947_s2 + $0xc0] sm:$0xff] }
  0x10   :  { %119 = vperm.xlu1 %4455, %v65_v22   ;;  %v32_v51 = vld [vmem:[%s8946_s1 + $0x60] sm:$0xff]  ;;  %v85_v52 = vld [vmem:[%s8947_s2 + $0xc8] sm:$0xff]  ;;  %v86_v53 = vld [vmem:[%s8947_s2 + $0xd0] sm:$0xff] }
  0x11   :  { %3996 = vmatmul.mubr.msk.f32.gmra.mrb[4].mxu0 %vm252_vm0, %v22_v21  ;;  %v33_v54 = vld [vmem:[%s8946_s1 + $0x68] sm:$0xff]  ;;  %v87_v55 = vld [vmem:[%s8947_s2 + $0xd8] sm:$0xff]  ;;  %v88_v56 = vld [vmem:[%s8947_s2 + $0xe0] sm:$0xff] }
  0x12   :  { %4028 = vmatmul.mubr.msk.f32.gmra.mrb[4].mxu1 %vm252_vm0, %v22_v21  ;;  %431 = vmatprep.mubr.f32.mxu0 %v4968_v3  ;;  %v34_v57 = vld [vmem:[%s8946_s1 + $0x70] sm:$0xff]  ;;  %v89_v58 = vld [vmem:[%s8947_s2 + $0xe8] sm:$0xff]  ;;  %v35_v60 = vld [vmem:[%s8946_s1 + $0x78] sm:$0xff] }
  0x13   :  { %688 = vmatprep.mubr.f32.mxu1 %v4968_v3  ;;  %124 = vperm.xlu0 %4454, %v66_v23   ;;  %v90_v59 = vld [vmem:[%s8947_s2 + $0xf0] sm:$0xff]  ;;  %v91_v61 = vld [vmem:[%s8947_s2 + $0xf8] sm:$0xff]  ;;  %v3808_v62 = vld [vmem:[%s8948_s4] sm:$0x3] }
  0x14   :  { %129 = vperm.xlu1 %4455, %v67_v25   ;;  %v36_v63 = vld [vmem:[%s8946_s1 + $0x80] sm:$0xff]  ;;  %v37_v0 = vld [vmem:[%s8946_s1 + $0x88] sm:$0xff]  ;;  %v38_v1 = vld [vmem:[%s8946_s1 + $0x90] sm:$0xff] }
  0x15   :  { %3997 = vmatmul.mubr.msk.f32.gmra.mrb[6].mxu0 %vm252_vm0, %v23_v24  ;;  %v39_v2 = vld [vmem:[%s8946_s1 + $0x98] sm:$0xff]  ;;  %v40_v4 = vld [vmem:[%s8946_s1 + $0xa0] sm:$0xff]  ;;  %v41_v5 = vld [vmem:[%s8946_s1 + $0xa8] sm:$0xff] }
  0x16   :  { %4029 = vmatmul.mubr.msk.f32.gmra.mrb[6].mxu1 %vm252_vm0, %v23_v24  ;;  %437 = vmatprep.mubr.f32.mxu0 %v4968_v3  ;;  %v42_v6 = vld [vmem:[%s8946_s1 + $0xb0] sm:$0xff]  ;;  %v43_v7 = vld [vmem:[%s8946_s1 + $0xb8] sm:$0xff]  ;;  %v44_v8 = vld [vmem:[%s8946_s1 + $0xc0] sm:$0xff] }
  0x17   :  { %694 = vmatprep.mubr.f32.mxu1 %v4968_v3  ;;  %134 = vperm.xlu0 %4454, %v68_v26   ;;  %v45_v9 = vld [vmem:[%s8946_s1 + $0xc8] sm:$0xff]  ;;  %v46_v10 = vld [vmem:[%s8946_s1 + $0xd0] sm:$0xff]  ;;  %v47_v11 = vld [vmem:[%s8946_s1 + $0xd8] sm:$0xff] }
  0x18   :  { %139 = vperm.xlu1 %4455, %v69_v28   ;;  %v48_v12 = vld [vmem:[%s8946_s1 + $0xe0] sm:$0xff]  ;;  %v49_v13 = vld [vmem:[%s8946_s1 + $0xe8] sm:$0xff]  ;;  %v50_v14 = vld [vmem:[%s8946_s1 + $0xf0] sm:$0xff] }
  0x19   :  { %3998 = vmatmul.mubr.msk.f32.gmra.mrb[8].mxu0 %vm252_vm0, %v24_v27  ;;  %v51_v15 = vld [vmem:[%s8946_s1 + $0xf8] sm:$0xff] }
  0x1a   :  { %4030 = vmatmul.mubr.msk.f32.gmra.mrb[8].mxu1 %vm252_vm0, %v24_v27  ;;  %443 = vmatprep.mubr.f32.mxu0 %v4968_v3 }
  0x1b   :  { %700 = vmatprep.mubr.f32.mxu1 %v4968_v3  ;;  %144 = vperm.xlu0 %4454, %v70_v29  }
  0x1c   :  { %149 = vperm.xlu1 %4455, %v71_v31  }
  0x1d   :  { %3999 = vmatmul.mubr.msk.f32.gmra.mrb[10].mxu0 %vm252_vm0, %v25_v30 }
  0x1e   :  { %4031 = vmatmul.mubr.msk.f32.gmra.mrb[10].mxu1 %vm252_vm0, %v25_v30  ;;  %449 = vmatprep.mubr.f32.mxu0 %v4968_v3 }
  0x1f   :  { %706 = vmatprep.mubr.f32.mxu1 %v4968_v3  ;;  %154 = vperm.xlu0 %4454, %v72_v32  }
  0x20   :  { %159 = vperm.xlu1 %4455, %v73_v34  }
  0x21   :  { %4000 = vmatmul.mubr.msk.f32.gmra.mrb[12].mxu0 %vm252_vm0, %v26_v33 }
  0x22   :  { %4032 = vmatmul.mubr.msk.f32.gmra.mrb[12].mxu1 %vm252_vm0, %v26_v33  ;;  %455 = vmatprep.mubr.f32.mxu0 %v4968_v3 }
  0x23   :  { %712 = vmatprep.mubr.f32.mxu1 %v4968_v3  ;;  %164 = vperm.xlu0 %4454, %v74_v35  }
  0x24   :  { %169 = vperm.xlu1 %4455, %v75_v37  }
  0x25   :  { %4001 = vmatmul.mubr.msk.f32.gmra.mrb[14].mxu0 %vm252_vm0, %v27_v36 }
  0x26   :  { %4033 = vmatmul.mubr.msk.f32.gmra.mrb[14].mxu1 %vm252_vm0, %v27_v36  ;;  %461 = vmatprep.mubr.f32.mxu0 %v4968_v3 }
  0x27   :  { %718 = vmatprep.mubr.f32.mxu1 %v4968_v3  ;;  %174 = vperm.xlu0 %4454, %v76_v38  }
  0x28   :  { %179 = vperm.xlu1 %4455, %v77_v40  }
  0x29   :  { %4002 = vmatmul.mubr.msk.f32.gmra.mrb[16].mxu0 %vm252_vm0, %v28_v39 }
  0x2a   :  { %4034 = vmatmul.mubr.msk.f32.gmra.mrb[16].mxu1 %vm252_vm0, %v28_v39  ;;  %467 = vmatprep.mubr.f32.mxu0 %v4968_v3 }
  0x2b   :  { %724 = vmatprep.mubr.f32.mxu1 %v4968_v3  ;;  %184 = vperm.xlu0 %4454, %v78_v41  }
  0x2c   :  { %189 = vperm.xlu1 %4455, %v79_v43  }
  0x2d   :  { %4003 = vmatmul.mubr.msk.f32.gmra.mrb[18].mxu0 %vm252_vm0, %v29_v42 }
  0x2e   :  { %4035 = vmatmul.mubr.msk.f32.gmra.mrb[18].mxu1 %vm252_vm0, %v29_v42  ;;  %473 = vmatprep.mubr.f32.mxu0 %v4968_v3 }
  0x2f   :  { %730 = vmatprep.mubr.f32.mxu1 %v4968_v3  ;;  %194 = vperm.xlu0 %4454, %v80_v44  }
  0x30   :  { %199 = vperm.xlu1 %4455, %v81_v46  }
  0x31   :  { %4004 = vmatmul.mubr.msk.f32.gmra.mrb[20].mxu0 %vm252_vm0, %v30_v45 }
  0x32   :  { %4036 = vmatmul.mubr.msk.f32.gmra.mrb[20].mxu1 %vm252_vm0, %v30_v45  ;;  %479 = vmatprep.mubr.f32.mxu0 %v4968_v3 }
  0x33   :  { %736 = vmatprep.mubr.f32.mxu1 %v4968_v3  ;;  %204 = vperm.xlu0 %4454, %v82_v47  }
  0x34   :  { %209 = vperm.xlu1 %4455, %v83_v49  }
  0x35   :  { %4005 = vmatmul.mubr.msk.f32.gmra.mrb[22].mxu0 %vm252_vm0, %v31_v48 }
  0x36   :  { %4037 = vmatmul.mubr.msk.f32.gmra.mrb[22].mxu1 %vm252_vm0, %v31_v48  ;;  %485 = vmatprep.mubr.f32.mxu0 %v4968_v3 }
  0x37   :  { %742 = vmatprep.mubr.f32.mxu1 %v4968_v3  ;;  %214 = vperm.xlu0 %4454, %v84_v50  }
  0x38   :  { %219 = vperm.xlu1 %4455, %v85_v52  }
  0x39   :  { %4006 = vmatmul.mubr.msk.f32.gmra.mrb[24].mxu0 %vm252_vm0, %v32_v51 }
  0x3a   :  { %4038 = vmatmul.mubr.msk.f32.gmra.mrb[24].mxu1 %vm252_vm0, %v32_v51  ;;  %491 = vmatprep.mubr.f32.mxu0 %v4968_v3 }
  0x3b   :  { %748 = vmatprep.mubr.f32.mxu1 %v4968_v3  ;;  %224 = vperm.xlu0 %4454, %v86_v53  }
  0x3c   :  { %229 = vperm.xlu1 %4455, %v87_v55  }
  0x3d   :  { %4007 = vmatmul.mubr.msk.f32.gmra.mrb[26].mxu0 %vm252_vm0, %v33_v54 }
  0x3e   :  { %4039 = vmatmul.mubr.msk.f32.gmra.mrb[26].mxu1 %vm252_vm0, %v33_v54  ;;  %497 = vmatprep.mubr.f32.mxu0 %v4968_v3 }
  0x3f   :  { %754 = vmatprep.mubr.f32.mxu1 %v4968_v3  ;;  %234 = vperm.xlu0 %4454, %v88_v56  }
  0x40   :  { %239 = vperm.xlu1 %4455, %v89_v58  }
  0x41   :  { %4008 = vmatmul.mubr.msk.f32.gmra.mrb[28].mxu0 %vm252_vm0, %v34_v57 }
  0x42   :  { %4040 = vmatmul.mubr.msk.f32.gmra.mrb[28].mxu1 %vm252_vm0, %v34_v57  ;;  %503 = vmatprep.mubr.f32.mxu0 %v4968_v3 }
  0x43   :  { %760 = vmatprep.mubr.f32.mxu1 %v4968_v3  ;;  %244 = vperm.xlu0 %4454, %v90_v59  }
  0x44   :  { %249 = vperm.xlu1 %4455, %v91_v61  }
  0x45   :  { %4009 = vmatmul.mubr.msk.f32.gmra.mrb[30].mxu0 %vm252_vm0, %v35_v60 }
  0x46   :  { %4041 = vmatmul.mubr.msk.f32.gmra.mrb[30].mxu1 %vm252_vm0, %v35_v60  ;;  %509 = vmatprep.mubr.f32.mxu0 %v4968_v3 }
  0x47   :  { %766 = vmatprep.mubr.f32.mxu1 %v4968_v3  ;;  %3811 = vperm.xlu0 %4454, %v3808_v62  }
  0x49   :  { %4010 = vmatmul.mubr.msk.f32.gmra.mrb[32].mxu0 %vm252_vm0, %v36_v63 }
  0x4a   :  { %4042 = vmatmul.mubr.msk.f32.gmra.mrb[32].mxu1 %vm252_vm0, %v36_v63  ;;  %515 = vmatprep.mubr.f32.mxu0 %v4968_v3 }
  0x4b   :  { %772 = vmatprep.mubr.f32.mxu1 %v4968_v3 }
  0x4d   :  { %4011 = vmatmul.mubr.msk.f32.gmra.mrb[34].mxu0 %vm252_vm0, %v37_v0 }
  0x4e   :  { %4043 = vmatmul.mubr.msk.f32.gmra.mrb[34].mxu1 %vm252_vm0, %v37_v0  ;;  %521 = vmatprep.mubr.f32.mxu0 %v4968_v3 }
  0x4f   :  { %778 = vmatprep.mubr.f32.mxu1 %v4968_v3 }
  0x51   :  { %4012 = vmatmul.mubr.msk.f32.gmra.mrb[36].mxu0 %vm252_vm0, %v38_v1 }
  0x52   :  { %4044 = vmatmul.mubr.msk.f32.gmra.mrb[36].mxu1 %vm252_vm0, %v38_v1  ;;  %527 = vmatprep.mubr.f32.mxu0 %v4968_v3 }
  0x53   :  { %784 = vmatprep.mubr.f32.mxu1 %v4968_v3 }
  0x55   :  { %4013 = vmatmul.mubr.msk.f32.gmra.mrb[38].mxu0 %vm252_vm0, %v39_v2 }
  0x56   :  { %4045 = vmatmul.mubr.msk.f32.gmra.mrb[38].mxu1 %vm252_vm0, %v39_v2  ;;  %533 = vmatprep.mubr.f32.mxu0 %v4968_v3 }
  0x57   :  { %790 = vmatprep.mubr.f32.mxu1 %v4968_v3 }
  0x59   :  { %4014 = vmatmul.mubr.msk.f32.gmra.mrb[40].mxu0 %vm252_vm0, %v40_v4 }
  0x5a   :  { %4046 = vmatmul.mubr.msk.f32.gmra.mrb[40].mxu1 %vm252_vm0, %v40_v4  ;;  %539 = vmatprep.mubr.f32.mxu0 %v4968_v3 }
  0x5b   :  { %796 = vmatprep.mubr.f32.mxu1 %v4968_v3 }
  0x5d   :  { %4015 = vmatmul.mubr.msk.f32.gmra.mrb[42].mxu0 %vm252_vm0, %v41_v5 }
  0x5e   :  { %4047 = vmatmul.mubr.msk.f32.gmra.mrb[42].mxu1 %vm252_vm0, %v41_v5  ;;  %545 = vmatprep.mubr.f32.mxu0 %v4968_v3 }
  0x5f   :  { %802 = vmatprep.mubr.f32.mxu1 %v4968_v3 }
  0x61   :  { %4016 = vmatmul.mubr.msk.f32.gmra.mrb[44].mxu0 %vm252_vm0, %v42_v6 }
  0x62   :  { %4048 = vmatmul.mubr.msk.f32.gmra.mrb[44].mxu1 %vm252_vm0, %v42_v6  ;;  %551 = vmatprep.mubr.f32.mxu0 %v4968_v3 }
  0x63   :  { %808 = vmatprep.mubr.f32.mxu1 %v4968_v3 }
  0x65   :  { %4017 = vmatmul.mubr.msk.f32.gmra.mrb[46].mxu0 %vm252_vm0, %v43_v7 }
  0x66   :  { %4049 = vmatmul.mubr.msk.f32.gmra.mrb[46].mxu1 %vm252_vm0, %v43_v7  ;;  %557 = vmatprep.mubr.f32.mxu0 %v4968_v3 }
  0x67   :  { %814 = vmatprep.mubr.f32.mxu1 %v4968_v3 }
  0x69   :  { %4018 = vmatmul.mubr.msk.f32.gmra.mrb[48].mxu0 %vm252_vm0, %v44_v8 }
  0x6a   :  { %4050 = vmatmul.mubr.msk.f32.gmra.mrb[48].mxu1 %vm252_vm0, %v44_v8  ;;  %563 = vmatprep.mubr.f32.mxu0 %v4968_v3 }
  0x6b   :  { %820 = vmatprep.mubr.f32.mxu1 %v4968_v3 }
  0x6d   :  { %4019 = vmatmul.mubr.msk.f32.gmra.mrb[50].mxu0 %vm252_vm0, %v45_v9 }
  0x6e   :  { %4051 = vmatmul.mubr.msk.f32.gmra.mrb[50].mxu1 %vm252_vm0, %v45_v9  ;;  %569 = vmatprep.mubr.f32.mxu0 %v4968_v3 }
  0x6f   :  { %826 = vmatprep.mubr.f32.mxu1 %v4968_v3 }
  0x71   :  { %4020 = vmatmul.mubr.msk.f32.gmra.mrb[52].mxu0 %vm252_vm0, %v46_v10 }
  0x72   :  { %4052 = vmatmul.mubr.msk.f32.gmra.mrb[52].mxu1 %vm252_vm0, %v46_v10  ;;  %575 = vmatprep.mubr.f32.mxu0 %v4968_v3 }
  0x73   :  { %832 = vmatprep.mubr.f32.mxu1 %v4968_v3 }
  0x75   :  { %4021 = vmatmul.mubr.msk.f32.gmra.mrb[54].mxu0 %vm252_vm0, %v47_v11 }
  0x76   :  { %4053 = vmatmul.mubr.msk.f32.gmra.mrb[54].mxu1 %vm252_vm0, %v47_v11  ;;  %581 = vmatprep.mubr.f32.mxu0 %v4968_v3 }
  0x77   :  { %838 = vmatprep.mubr.f32.mxu1 %v4968_v3 }
  0x79   :  { %4022 = vmatmul.mubr.msk.f32.gmra.mrb[56].mxu0 %vm252_vm0, %v48_v12 }
  0x7a   :  { %4054 = vmatmul.mubr.msk.f32.gmra.mrb[56].mxu1 %vm252_vm0, %v48_v12  ;;  %587 = vmatprep.mubr.f32.mxu0 %v4968_v3 }
  0x7b   :  { %844 = vmatprep.mubr.f32.mxu1 %v4968_v3 }
  0x7d   :  { %4023 = vmatmul.mubr.msk.f32.gmra.mrb[58].mxu0 %vm252_vm0, %v49_v13 }
  0x7e   :  { %4055 = vmatmul.mubr.msk.f32.gmra.mrb[58].mxu1 %vm252_vm0, %v49_v13  ;;  %593 = vmatprep.mubr.f32.mxu0 %v4968_v3 }
  0x7f   :  { %850 = vmatprep.mubr.f32.mxu1 %v4968_v3 }
  0x81   :  { %4024 = vmatmul.mubr.msk.f32.gmra.mrb[60].mxu0 %vm252_vm0, %v50_v14 }
  0x82   :  { %4056 = vmatmul.mubr.msk.f32.gmra.mrb[60].mxu1 %vm252_vm0, %v50_v14  ;;  %599 = vmatprep.mubr.f32.mxu0 %v4968_v3 }
  0x83   :  { %856 = vmatprep.mubr.f32.mxu1 %v4968_v3 }
  0x85   :  { %4025 = vmatmul.mubr.msk.f32.gmra.mrb[62].mxu0 %vm252_vm0, %v51_v15  ;;  %v95_v16 = vpop.permute.xlu0 %94 }
  0x86   :  { %4057 = vmatmul.mubr.msk.f32.gmra.mrb[62].mxu1 %vm252_vm0, %v51_v15  ;;  %v5408_v1 = vpop.permute.xlu1 %104 }
  0x8a   :  { %v100_v35 = vpop.permute.xlu0 %99 }
  0xdc   :  { %v415_v17 = vpop.f32.mrb[0].mxu0 }
  0xdd   :  { %v5348_v18 = vadd.f32 %v415_v17, %v95_v16  ;;  %v672_v19 = vpop.f32.mrb[0].mxu1  ;;  %v417_v20 = vpop.f32.mrb[1].mxu0 }
  0xde   :  { %v5350_v21 = vadd.f32 %v672_v19, %v95_v16  ;;  %v5352_v22 = vadd.f32 %v417_v20, %v95_v16  ;;  %v674_v23 = vpop.f32.mrb[1].mxu1 }
  0xdf   :  { %v8960_v24 = vand.u32 2147483647, %v5348_v18  ;;  %v5355_v25 = vadd.f32 %v674_v23, %v95_v16 }
  0xe0   :  { %v8959_v3 = vand.u32 2147483647, %v5350_v21  ;;  %v8956_v26 = vand.u32 2147483647, %v5352_v22  ;;  %v421_v27 = vpop.f32.mrb[2].mxu0 }
  0xe1   :  { %v991_v28 = vmul.f32 0.70710677, %v8960_v24  ;;  %v8955_v29 = vand.u32 2147483647, %v5355_v25  ;;  %v678_v30 = vpop.f32.mrb[2].mxu1  ;;  %v423_v31 = vpop.f32.mrb[3].mxu0  ;;  %v5373_v40 = vadd.f32 %v421_v27, %v100_v35 }
  0xe2   :  { %v993_v32 = vmul.f32 0.70710677, %v8959_v3  ;;  %v5366_v33 = vmul.f32 0.70710677, %v8956_v26  ;;  %v680_v34 = vpop.f32.mrb[3].mxu1  ;;  %v5376_v43 = vadd.f32 %v678_v30, %v100_v35  ;;  %v5378_v44 = vadd.f32 %v423_v31, %v100_v35 }
  0xe3   :  { %v1119_v36 = vmul.f32 0.3275911, %v991_v28  ;;  %v5370_v37 = vmul.f32 0.70710677, %v8955_v29  ;;  %v5380_v48 = vadd.f32 %v680_v34, %v100_v35  ;;  %v2655_v52 = vsub.f32 0.0, %v991_v28 }
  0xe4   :  { %v1121_v38 = vmul.f32 0.3275911, %v993_v32  ;;  %v1120_v39 = vmul.f32 0.3275911, %v5366_v33  ;;  %v427_v45 = vpop.f32.mrb[4].mxu0  ;;  %v2657_v4 = vsub.f32 0.0, %v993_v32 }
  0xe5   :  { %v1247_v41 = vadd.f32 1.0, %v1119_v36  ;;  %v1122_v42 = vmul.f32 0.3275911, %v5370_v37  ;;  %v684_v46 = vpop.f32.mrb[4].mxu1  ;;  %v5382_v49 = vpop.f32.mrb[5].mxu0  ;;  %v2783_v2 = vmul.f32 %v2655_v52, %v991_v28  ;;  %v5419_v10 = vadd.f32 %v427_v45, %v5408_v1 }
  0xe6   :  { %v1249_v47 = vadd.f32 1.0, %v1121_v38  ;;  %v5384_v50 = vpop.f32.mrb[5].mxu1  ;;  %v1248_v51 = vadd.f32 1.0, %v1120_v39  ;;  %v8958_v53 = vand.u32 2147483647, %v5373_v40  ;;  %v2656_v12 = vsub.f32 0.0, %v5366_v33 }
  0xe7   :  { %4456 = vrcp.f32 %v1247_v41  ;;  %v1250_v54 = vadd.f32 1.0, %v1122_v42  ;;  %v8957_v55 = vand.u32 2147483647, %v5376_v43  ;;  %v8954_v56 = vand.u32 2147483647, %v5378_v44 }
  0xe8   :  { %4458 = vrcp.f32 %v1249_v47  ;;  %v995_v57 = vmul.f32 0.70710677, %v8958_v53  ;;  %v8953_v58 = vand.u32 2147483647, %v5380_v48  ;;  %v5392_v59 = vpop.f32.mrb[6].mxu0  ;;  %v5430_v20 = vadd.f32 %v684_v46, %v5408_v1 }
  0xe9   :  { %v5394_v60 = vpop.f32.mrb[6].mxu1  ;;  %4460 = vrcp.f32 %v1248_v51  ;;  %v5398_v61 = vmul.f32 0.70710677, %v8957_v55  ;;  %v5402_v62 = vmul.f32 0.70710677, %v8954_v56  ;;  %v5404_v63 = vpop.f32.mrb[7].mxu0  ;;  %v2785_v23 = vmul.f32 %v2657_v4, %v993_v32 }
  0xea   :  { %v5406_v0 = vpop.f32.mrb[7].mxu1  ;;  %v1123_v5 = vmul.f32 0.3275911, %v995_v57  ;;  %v5412_v6 = vmul.f32 0.70710677, %v8953_v58  ;;  %4462 = vrcp.f32 %v1250_v54  ;;  %v2659_v16 = vsub.f32 0.0, %v995_v57 }
  0xeb   :  { %v1125_v8 = vmul.f32 0.3275911, %v5398_v61  ;;  %v1124_v9 = vmul.f32 0.3275911, %v5402_v62  ;;  %v2911_v31 = vmul.f32 1.442695, %v2783_v2  ;;  %v2784_v32 = vmul.f32 %v2656_v12, %v5366_v33 }
  0xec   :  { %v5414_v7 = vpop.f32.mrb[8].mxu0  ;;  %v1251_v13 = vadd.f32 1.0, %v1123_v5  ;;  %v1126_v19 = vmul.f32 0.3275911, %v5412_v6  ;;  %v2658_v34 = vsub.f32 0.0, %v5370_v37  ;;  %v2787_v47 = vmul.f32 %v2659_v16, %v995_v57 }
  0xed   :  { %v5421_v11 = vpop.f32.mrb[8].mxu1  ;;  %v5424_v14 = vpop.f32.mrb[9].mxu0  ;;  %v1253_v17 = vadd.f32 1.0, %v1125_v8  ;;  %v1252_v27 = vadd.f32 1.0, %v1124_v9  ;;  %v8951_v35 = vand.u32 2147483647, %v5419_v10 }
  0xee   :  { %v5426_v15 = vpop.f32.mrb[9].mxu1  ;;  %4464 = vrcp.f32 %v1251_v13  ;;  %v1254_v41 = vadd.f32 1.0, %v1126_v19  ;;  %v2661_v51 = vsub.f32 0.0, %v5398_v61  ;;  %v8952_v52 = vand.u32 2147483647, %v5430_v20 }
  0xef   :  { %4466 = vrcp.f32 %v1253_v17  ;;  %v2915_v2 = vmul.f32 1.442695, %v2785_v23  ;;  %v5456_v8 = vmul.f32 %v2658_v34, %v5370_v37  ;;  %v2660_v9 = vsub.f32 0.0, %v5402_v62 }
  0xf0   :  { %v5432_v28 = vpop.f32.mrb[10].mxu0  ;;  %4468 = vrcp.f32 %v1252_v27  ;;  %v5461_v57 = vmul.f32 0.70710677, %v8951_v35  ;;  %v5469_v17 = vmul.f32 0.70710677, %v8952_v52  ;;  %v2662_v26 = vsub.f32 0.0, %v5412_v6 }
  0xf1   :  { %v5434_v30 = vpop.eup %4456  ;;  %v5438_v36 = vpop.f32.mrb[10].mxu1  ;;  %4470 = vrcp.f32 %v1254_v41  ;;  %v5478_v34 = vmul.f32 1.442695, %v2784_v32 }
  0xf2   :  { %v5440_v38 = vpop.eup %4458  ;;  %v1503_v39 = vmul.f32 1.0614054, %v5434_v30  ;;  %v5444_v42 = vpop.f32.mrb[11].mxu0  ;;  %4472 = vpow2.f32 %v2911_v31  ;;  %v1127_v58 = vmul.f32 0.3275911, %v5461_v57 }
  0xf3   :  { %v5446_v45 = vpop.f32.mrb[11].mxu1  ;;  %v1505_v46 = vmul.f32 1.0614054, %v5440_v38  ;;  %v5453_v5 = vpop.eup %4460  ;;  %4474 = vpow2.f32 %v2915_v2  ;;  %v1129_v56 = vmul.f32 0.3275911, %v5469_v17 }
  0xf4   :  { %v4058_v54 = vadd.f32 -1.4531521, %v1503_v39  ;;  %v5451_v4 = vpop.f32.mrb[12].mxu0  ;;  %v1504_v16 = vmul.f32 1.0614054, %v5453_v5  ;;  %v5475_v23 = vpop.eup %4462  ;;  %v1255_v53 = vadd.f32 1.0, %v1127_v58 }
  0xf5   :  { %v4060_v33 = vadd.f32 -1.4531521, %v1505_v46  ;;  %v5463_v12 = vpop.f32.mrb[12].mxu1  ;;  %v5471_v19 = vpop.f32.mrb[13].mxu0  ;;  %v2919_v39 = vmul.f32 1.442695, %v2787_v47  ;;  %v2789_v46 = vmul.f32 %v2661_v51, %v5398_v61  ;;  %v2788_v61 = vmul.f32 %v2660_v9, %v5402_v62 }
  0xf6   :  { %v1759_v13 = vmul.f32 %v5434_v30, %v4058_v54  ;;  %9118 = vst [vmem:[#allocation2_spill] sm:$0xff] %v5471_v19  ;;  %v5473_v37 = vpop.f32.mrb[13].mxu1  ;;  %v4059_v41 = vadd.f32 -1.4531521, %v1504_v16  ;;  %v1506_v35 = vmul.f32 1.0614054, %v5475_v23 }
  0xf7   :  { %9119 = vst [vmem:[#allocation3_spill] sm:$0xff] %v5473_v37  ;;  %v1761_v27 = vmul.f32 %v5440_v38, %v4060_v33  ;;  %v1257_v3 = vadd.f32 1.0, %v1129_v56  ;;  %4476 = vpow2.f32 %v2919_v39 }
  0xf8   :  { %v1887_v54 = vadd.f32 1.4214138, %v1759_v13  ;;  %v5484_v29 = vpop.eup %4464  ;;  %v1760_v32 = vmul.f32 %v5453_v5, %v4059_v41  ;;  %v4061_v47 = vadd.f32 -1.4531521, %v1506_v35  ;;  %v5489_v51 = vpop.f32.mrb[14].mxu0 }
  0xf9   :  { %v1889_v52 = vadd.f32 1.4214138, %v1761_v27  ;;  %9120 = vst [vmem:[#allocation4_spill] sm:$0xff] %v5489_v51  ;;  %v5491_v31 = vpop.f32.mrb[14].mxu1  ;;  %v5493_v13 = vpop.eup %4466  ;;  %v1507_v16 = vmul.f32 1.0614054, %v5484_v29 }
  0xfa   :  { %v2015_v33 = vmul.f32 %v5434_v30, %v1887_v54  ;;  %9121 = vst [vmem:[#allocation5_spill] sm:$0xff] %v5491_v31  ;;  %v2923_v27 = vmul.f32 1.442695, %v2789_v46  ;;  %v1888_v54 = vadd.f32 1.4214138, %v1760_v32  ;;  %v1762_v41 = vmul.f32 %v5475_v23, %v4061_v47  ;;  %v5500_v24 = vpop.eup %4468  ;;  %v5512_v39 = vpop.f32.mrb[15].mxu0 }
  0xfb   :  { %v2017_v2 = vmul.f32 %v5440_v38, %v1889_v52  ;;  %v1509_v35 = vmul.f32 1.0614054, %v5493_v13  ;;  %v4062_v9 = vadd.f32 -1.4531521, %v1507_v16  ;;  %v1508_v32 = vmul.f32 1.0614054, %v5500_v24  ;;  %v5507_v47 = vpop.eup %4470 }
  0xfc   :  { %v4186_v55 = vadd.f32 -0.28449672, %v2015_v33  ;;  %v2016_v52 = vmul.f32 %v5453_v5, %v1888_v54  ;;  %v1890_v51 = vadd.f32 1.4214138, %v1762_v41  ;;  %4478 = vpow2.f32 %v2923_v27  ;;  %v4473_v54 = vpop.eup %4472  ;;  %9122 = vst [vmem:[#allocation6_spill] sm:$0xff] %v5512_v39 }
  0xfd   :  { %v4188_v62 = vadd.f32 -0.28449672, %v2017_v2  ;;  %v4064_v46 = vadd.f32 -1.4531521, %v1509_v35  ;;  %v1763_v33 = vmul.f32 %v5484_v29, %v4062_v9  ;;  %v4063_v19 = vadd.f32 -1.4531521, %v1508_v32  ;;  %v4475_v9 = vpop.eup %4474 }
  0xfe   :  { %v2271_v31 = vmul.f32 %v5434_v30, %v4186_v55  ;;  %v4187_v58 = vadd.f32 -0.28449672, %v2016_v52  ;;  %4480 = vrcp.f32 %v1255_v53  ;;  %v2018_v35 = vmul.f32 %v5475_v23, %v1890_v51 }
  0xff   :  { %v2273_v37 = vmul.f32 %v5440_v38, %v4188_v62  ;;  %v1765_v56 = vmul.f32 %v5493_v13, %v4064_v46  ;;  %v1891_v55 = vadd.f32 1.4214138, %v1763_v33  ;;  %4482 = vrcp.f32 %v1257_v3  ;;  %v5522_v3 = vpop.f32.mrb[15].mxu1 }
 0x100   :  { %v2399_v2 = vadd.f32 0.2548296, %v2271_v31  ;;  %v1764_v27 = vmul.f32 %v5500_v24, %v4063_v19  ;;  %v2917_v53 = vmul.f32 1.442695, %v5456_v8  ;;  %v2663_v51 = vsub.f32 0.0, %v5461_v57 }
 0x101   :  { %v2401_v16 = vadd.f32 0.2548296, %v2273_v37  ;;  %v1893_v62 = vadd.f32 1.4214138, %v1765_v56  ;;  %v2019_v52 = vmul.f32 %v5484_v29, %v1891_v55  ;;  %v1510_v37 = vmul.f32 1.0614054, %v5507_v47 }
 0x102   :  { %v2527_v41 = vmul.f32 %v5434_v30, %v2399_v2  ;;  %v2790_v30 = vmul.f32 %v2662_v26, %v5412_v6  ;;  %v2272_v32 = vmul.f32 %v5453_v5, %v4187_v58  ;;  %4484 = vpow2.f32 %v5478_v34 }
 0x103   :  { %v2529_v31 = vmul.f32 %v5440_v38, %v2401_v16  ;;  %v2021_v46 = vmul.f32 %v5493_v13, %v1893_v62  ;;  %v4190_v38 = vadd.f32 -0.28449672, %v2019_v52  ;;  %v4065_v2 = vadd.f32 -1.4531521, %v1510_v37 }
 0x104   :  { %v3167_v33 = vmul.f32 %v4473_v54, %v2527_v41  ;;  %v4189_v19 = vadd.f32 -0.28449672, %v2018_v35  ;;  %v1892_v55 = vadd.f32 1.4214138, %v1764_v27  ;;  %v2921_v62 = vmul.f32 1.442695, %v2788_v61  ;;  %v4477_v41 = vpop.eup %4476 }
 0x105   :  { %v3169_v56 = vmul.f32 %v4475_v9, %v2529_v31  ;;  %v4192_v16 = vadd.f32 -0.28449672, %v2021_v46  ;;  %v2275_v8 = vmul.f32 %v5484_v29, %v4190_v38  ;;  %v1766_v6 = vmul.f32 %v5507_v47, %v4065_v2 }
 0x106   :  { %v2925_v39 = vmul.f32 1.442695, %v2790_v30  ;;  %v2665_v54 = vsub.f32 0.0, %v5469_v17  ;;  %v3295_v58 = vsub.f32 1.0, %v3167_v33  ;;  %v2400_v52 = vadd.f32 0.2548296, %v2272_v32  ;;  %v4479_v34 = vpop.eup %4478 }
 0x107   :  { %v2277_v26 = vmul.f32 %v5493_v13, %v4192_v16  ;;  %v2403_v37 = vadd.f32 0.2548296, %v2275_v8  ;;  %v2791_v9 = vmul.f32 %v2663_v51, %v5461_v57  ;;  %v3297_v35 = vsub.f32 1.0, %v3169_v56 }
 0x108   :  { %v2274_v31 = vmul.f32 %v5475_v23, %v4189_v19  ;;  %4486 = vpow2.f32 %v2917_v53  ;;  %v5532_v61 = vpop.eup %4480  ;;  %v2020_v30 = vmul.f32 %v5500_v24, %v1892_v55  ;;  %v5538_v33 = vadd.f32 %v5382_v49, %v5408_v1 }
 0x109   :  { %v2405_v27 = vadd.f32 0.2548296, %v2277_v26  ;;  %v2531_v46 = vmul.f32 %v5484_v29, %v2403_v37  ;;  %4488 = vpow2.f32 %v2921_v62  ;;  %v5540_v32 = vpop.eup %4482  ;;  %v1894_v51 = vadd.f32 1.4214138, %v1766_v6  ;;  %v5550_v26 = vpop.f32.mrb[16].mxu0 }
 0x10a   :  { %4490 = vpow2.f32 %v2925_v39  ;;  %v2793_v53 = vmul.f32 %v2665_v54, %v5469_v17  ;;  %v9123_v38 = vand.u32 2147483647, %v5348_v18  ;;  %v2528_v29 = vmul.f32 %v5453_v5, %v2400_v52 }
 0x10b   :  { %v2533_v57 = vmul.f32 %v5493_v13, %v2405_v27  ;;  %v3171_v56 = vmul.f32 %v4477_v41, %v2531_v46  ;;  %v2927_v19 = vmul.f32 1.442695, %v2791_v9  ;;  %v9124_v16 = vand.u32 2147483647, %v5350_v21  ;;  %v5552_v13 = vpop.f32.mrb[16].mxu1 }
 0x10c   :  { %v3423_v2 = vmul.f32 %v3295_v58, %v9123_v38  ;;  %v2402_v49 = vadd.f32 0.2548296, %v2274_v31  ;;  %v1511_v62 = vmul.f32 1.0614054, %v5532_v61  ;;  %v4191_v17 = vadd.f32 -0.28449672, %v2020_v30  ;;  %v4485_v54 = vpop.eup %4484 }
 0x10d   :  { %v3425_v8 = vmul.f32 %v3297_v35, %v9124_v16  ;;  %v3173_v55 = vmul.f32 %v4479_v34, %v2533_v57  ;;  %v3299_v39 = vsub.f32 1.0, %v3171_v56  ;;  %v1513_v6 = vmul.f32 1.0614054, %v5540_v32 }
 0x10e   :  { %v5557_v5 = vadd.f32 %v5384_v50, %v5408_v1  ;;  %v2022_v58 = vmul.f32 %v5507_v47, %v1894_v51  ;;  %v4066_v52 = vadd.f32 -1.4531521, %v1511_v62  ;;  %v2931_v37 = vmul.f32 1.442695, %v2793_v53 }
 0x10f   :  { %v3301_v41 = vsub.f32 1.0, %v3173_v55  ;;  %v3551_v9 = vadd.f32 %v3423_v2, %v5348_v18  ;;  %v3168_v34 = vmul.f32 %v4485_v54, %v2528_v29  ;;  %v9125_v35 = vand.u32 2147483647, %v5373_v40  ;;  %v5572_v2 = vpop.f32.mrb[17].mxu0  ;;  %v5574_v29 = vpop.f32.mrb[17].mxu1 }
 0x110   :  { %v4068_v27 = vadd.f32 -1.4531521, %v1513_v6  ;;  %v3553_v46 = vadd.f32 %v3425_v8, %v5350_v21  ;;  %v9126_v30 = vand.u32 2147483647, %v5376_v43  ;;  %v1767_v50 = vmul.f32 %v5532_v61, %v4066_v52 }
 0x111   :  { %v3427_v31 = vmul.f32 %v3299_v39, %v9125_v35  ;;  %v8962_v1 = vand.u32 2147483647, %v5538_v33  ;;  %v2530_v51 = vmul.f32 %v5475_v23, %v2402_v49  ;;  %v2276_v18 = vmul.f32 %v5500_v24, %v4191_v17 }
 0x112   :  { %v3429_v57 = vmul.f32 %v3301_v41, %v9126_v30  ;;  %v1769_v38 = vmul.f32 %v5540_v32, %v4068_v27  ;;  %v4487_v21 = vpop.eup %4486  ;;  %v4193_v16 = vadd.f32 -0.28449672, %v2022_v58  ;;  %v1895_v8 = vadd.f32 1.4214138, %v1767_v50  ;;  %v110_v30 = vpop.permute.xlu1 %109 }
 0x113   :  { %v3555_v53 = vadd.f32 %v3427_v31, %v5373_v40  ;;  %v5579_v55 = vmul.f32 0.70710677, %v8962_v1  ;;  %v4489_v23 = vpop.eup %4488  ;;  %v5581_v49 = vmul.f32 0.5, %v3551_v9  ;;  %v8961_v39 = vand.u32 2147483647, %v5557_v5 }
 0x114   :  { %v3557_v56 = vadd.f32 %v3429_v57, %v5376_v43  ;;  %v1897_v62 = vadd.f32 1.4214138, %v1769_v38  ;;  %v4491_v17 = vpop.eup %4490  ;;  %v5586_v6 = vmul.f32 0.5, %v3553_v46  ;;  %v2023_v43 = vmul.f32 %v5532_v61, %v1895_v8 }
 0x115   :  { %9127 = vst [vmem:[#allocation7_spill] sm:$0xff] %v5581_v49  ;;  %v5583_v40 = vmul.f32 0.5, %v3555_v53  ;;  %v1128_v41 = vmul.f32 0.3275911, %v5579_v55  ;;  %v2404_v52 = vadd.f32 0.2548296, %v2276_v18  ;;  %4492 = vpow2.f32 %v2927_v19 }
 0x116   :  { %9129 = vst [vmem:[#allocation9_spill] sm:$0xff] %v5586_v6  ;;  %v5588_v54 = vmul.f32 0.5, %v3557_v56  ;;  %v2025_v9 = vmul.f32 %v5540_v32, %v1897_v62  ;;  %v2278_v31 = vmul.f32 %v5507_v47, %v4193_v16  ;;  %v4194_v27 = vadd.f32 -0.28449672, %v2023_v43  ;;  %v5610_v43 = vpop.f32.mrb[18].mxu0 }
 0x117   :  { %9128 = vst [vmem:[#allocation8_spill] sm:$0xff] %v5583_v40  ;;  %v1256_v46 = vadd.f32 1.0, %v1128_v41  ;;  %v3296_v57 = vsub.f32 1.0, %v3168_v34  ;;  %4494 = vpow2.f32 %v2931_v37  ;;  %v1002_v53 = vmul.f32 0.70710677, %v8961_v39  ;;  %9131 = vst [vmem:[#allocation11_spill] sm:$0xff] %v5610_v43 }
 0x118   :  { %9130 = vst [vmem:[#allocation10_spill] sm:$0xff] %v5588_v54  ;;  %v4196_v50 = vadd.f32 -0.28449672, %v2025_v9  ;;  %v3170_v38 = vmul.f32 %v4487_v21, %v2530_v51  ;;  %v2279_v18 = vmul.f32 %v5532_v61, %v4194_v27  ;;  %v5602_v19 = vadd.f32 %v5392_v59, %v110_v30 }
 0x119   :  { %4496 = vrcp.f32 %v1256_v46  ;;  %v2532_v56 = vmul.f32 %v5500_v24, %v2404_v52  ;;  %v1130_v8 = vmul.f32 0.3275911, %v1002_v53  ;;  %v2406_v62 = vadd.f32 0.2548296, %v2278_v31 }
 0x11a   :  { %v2281_v16 = vmul.f32 %v5540_v32, %v4196_v50  ;;  %v8966_v34 = vand.u32 2147483647, %v5602_v19  ;;  %v5608_v37 = vadd.f32 %v5394_v60, %v110_v30  ;;  %v9132_v51 = vand.u32 2147483647, %v5352_v22 }
 0x11b   :  { %v2407_v41 = vadd.f32 0.2548296, %v2279_v18  ;;  %v1258_v59 = vadd.f32 1.0, %v1130_v8  ;;  %v3298_v27 = vsub.f32 1.0, %v3170_v38  ;;  %v5618_v31 = vadd.f32 %v5404_v63, %v110_v30 }
 0x11c   :  { %v3424_v21 = vmul.f32 %v3296_v57, %v9132_v51  ;;  %v2409_v9 = vadd.f32 0.2548296, %v2281_v16  ;;  %v1003_v24 = vmul.f32 0.70710677, %v8966_v34  ;;  %v8965_v52 = vand.u32 2147483647, %v5608_v37 }
 0x11d   :  { %v3172_v46 = vmul.f32 %v4489_v23, %v2532_v56  ;;  %4498 = vrcp.f32 %v1258_v59  ;;  %v5621_v60 = vadd.f32 %v5406_v0, %v110_v30  ;;  %v2534_v50 = vmul.f32 %v5507_v47, %v2406_v62  ;;  %v5637_v59 = vpop.f32.mrb[18].mxu1 }
 0x11e   :  { %v2664_v57 = vsub.f32 0.0, %v5579_v55  ;;  %v1131_v18 = vmul.f32 0.3275911, %v1003_v24  ;;  %v5627_v38 = vmul.f32 0.70710677, %v8965_v52  ;;  %v2535_v8 = vmul.f32 %v5532_v61, %v2407_v41  ;;  %9134 = vst [vmem:[#allocation12_spill] sm:$0xff] %v5637_v59 }
 0x11f   :  { %v4493_v16 = vpop.eup %4492  ;;  %v2537_v63 = vmul.f32 %v5540_v32, %v2409_v9  ;;  %v8963_v23 = vand.u32 2147483647, %v5618_v31  ;;  %v8964_v56 = vand.u32 2147483647, %v5621_v60  ;;  %v3552_v0 = vadd.f32 %v3424_v21, %v5352_v22 }
 0x120   :  { %v9133_v47 = vand.u32 2147483647, %v5355_v25  ;;  %v1259_v62 = vadd.f32 1.0, %v1131_v18  ;;  %v1133_v51 = vmul.f32 0.3275911, %v5627_v38  ;;  %v3300_v58 = vsub.f32 1.0, %v3172_v46 }
 0x121   :  { %v4495_v35 = vpop.eup %4494  ;;  %v2666_v39 = vsub.f32 0.0, %v1002_v53  ;;  %v5641_v61 = vmul.f32 0.70710677, %v8963_v23  ;;  %v5645_v32 = vmul.f32 0.70710677, %v8964_v56  ;;  %v3174_v21 = vmul.f32 %v4491_v17, %v2534_v50 }
 0x122   :  { %v3426_v30 = vmul.f32 %v3298_v27, %v9133_v47  ;;  %v2792_v41 = vmul.f32 %v2664_v57, %v5579_v55  ;;  %4500 = vrcp.f32 %v1259_v62  ;;  %v1261_v9 = vadd.f32 1.0, %v1133_v51 }
 0x123   :  { %v5647_v22 = vpop.eup %4496  ;;  %v3175_v27 = vmul.f32 %v4493_v16, %v2535_v8  ;;  %v3177_v18 = vmul.f32 %v4495_v35, %v2537_v63  ;;  %v1132_v47 = vmul.f32 0.3275911, %v5641_v61  ;;  %v5652_v1 = vmul.f32 0.5, %v3552_v0  ;;  %v5662_v16 = vpop.permute.xlu0 %114 }
 0x124   :  { %v1512_v46 = vmul.f32 1.0614054, %v5647_v22  ;;  %v1134_v23 = vmul.f32 0.3275911, %v5645_v32  ;;  %v9136_v56 = vand.u32 2147483647, %v5378_v44  ;;  %v2794_v6 = vmul.f32 %v2666_v39, %v1002_v53 }
 0x125   :  { %9135 = vst [vmem:[#allocation13_spill] sm:$0xff] %v5652_v1  ;;  %4502 = vrcp.f32 %v1261_v9  ;;  %v5658_v55 = vadd.f32 %v3426_v30, %v5355_v25  ;;  %v2667_v17 = vsub.f32 0.0, %v1003_v24  ;;  %v1260_v50 = vadd.f32 1.0, %v1132_v47  ;;  %v5695_v47 = vpop.f32.mrb[19].mxu0 }
 0x126   :  { %v3428_v52 = vmul.f32 %v3300_v58, %v9136_v56  ;;  %v4067_v34 = vadd.f32 -1.4531521, %v1512_v46  ;;  %v1262_v35 = vadd.f32 1.0, %v1134_v23  ;;  %v3302_v8 = vsub.f32 1.0, %v3174_v21  ;;  %9140 = vst [vmem:[#allocation14_spill] sm:$0xff] %v5695_v47 }
 0x127   :  { %v5660_v57 = vpop.eup %4498  ;;  %v3303_v63 = vsub.f32 1.0, %v3175_v27  ;;  %v3305_v0 = vsub.f32 1.0, %v3177_v18  ;;  %v2929_v62 = vmul.f32 1.442695, %v2792_v41  ;;  %4504 = vrcp.f32 %v1260_v50 }
 0x128   :  { %v1768_v51 = vmul.f32 %v5647_v22, %v4067_v34  ;;  %v1514_v58 = vmul.f32 1.0614054, %v5660_v57  ;;  %v5668_v25 = vadd.f32 %v5414_v7, %v5662_v16  ;;  %v5671_v39 = vadd.f32 %v3428_v52, %v5378_v44 }
 0x129   :  { %v2933_v53 = vmul.f32 1.442695, %v2794_v6  ;;  %4506 = vrcp.f32 %v1262_v35  ;;  %v5675_v23 = vadd.f32 %v5421_v11, %v5662_v16  ;;  %v2795_v30 = vmul.f32 %v2667_v17, %v1003_v24 }
 0x12a   :  { %v4069_v56 = vadd.f32 -1.4531521, %v1514_v58  ;;  %v2669_v34 = vsub.f32 0.0, %v5627_v38  ;;  %v8969_v21 = vand.u32 2147483647, %v5668_v25  ;;  %4508 = vpow2.f32 %v2929_v62 }
 0x12b   :  { %v9137_v41 = vand.u32 2147483647, %v5380_v48  ;;  %v9138_v7 = vand.u32 2147483647, %v5419_v10  ;;  %v8968_v6 = vand.u32 2147483647, %v5675_v23  ;;  %4510 = vpow2.f32 %v2933_v53 }
 0x12c   :  { %v5686_v52 = vpop.eup %4500  ;;  %v9139_v11 = vand.u32 2147483647, %v5430_v20  ;;  %v1896_v24 = vadd.f32 1.4214138, %v1768_v51  ;;  %v1770_v18 = vmul.f32 %v5660_v57, %v4069_v56  ;;  %v5693_v46 = vmul.f32 0.70710677, %v8969_v21 }
 0x12d   :  { %v5681_v9 = vmul.f32 %v3302_v8, %v9137_v41  ;;  %v3431_v44 = vmul.f32 %v3303_v63, %v9138_v7  ;;  %v1515_v17 = vmul.f32 1.0614054, %v5686_v52  ;;  %v2668_v50 = vsub.f32 0.0, %v5641_v61 }
 0x12e   :  { %v3433_v27 = vmul.f32 %v3305_v0, %v9139_v11  ;;  %v5701_v35 = vmul.f32 0.70710677, %v8968_v6  ;;  %v1898_v8 = vadd.f32 1.4214138, %v1770_v18  ;;  %v2935_v63 = vmul.f32 1.442695, %v2795_v30 }
 0x12f   :  { %v2797_v0 = vmul.f32 %v2669_v34, %v5627_v38  ;;  %v1135_v62 = vmul.f32 0.3275911, %v5693_v46  ;;  %v5705_v51 = vpop.eup %4502  ;;  %v3559_v58 = vadd.f32 %v3431_v44, %v5419_v10  ;;  %v4070_v56 = vadd.f32 -1.4531521, %v1515_v17 }
 0x130   :  { %v1137_v53 = vmul.f32 0.3275911, %v5701_v35  ;;  %v5711_v41 = vadd.f32 %v5424_v14, %v5662_v16  ;;  %v3561_v7 = vadd.f32 %v3433_v27, %v5430_v20  ;;  %v2024_v11 = vmul.f32 %v5647_v22, %v1896_v24 }
 0x131   :  { %v1517_v30 = vmul.f32 1.0614054, %v5705_v51  ;;  %v1263_v38 = vadd.f32 1.0, %v1135_v62  ;;  %v2026_v34 = vmul.f32 %v5660_v57, %v1898_v8  ;;  %v1771_v18 = vmul.f32 %v5686_v52, %v4070_v56  ;;  %v5719_v17 = vpop.eup %4504  ;;  %v5728_v56 = vpop.f32.mrb[19].mxu1 }
 0x132   :  { %v2796_v10 = vmul.f32 %v2668_v50, %v5641_v61  ;;  %v1265_v44 = vadd.f32 1.0, %v1137_v53  ;;  %v2939_v21 = vmul.f32 1.442695, %v2797_v0  ;;  %v2670_v14 = vsub.f32 0.0, %v5645_v32  ;;  %9141 = vst [vmem:[#allocation15_spill] sm:$0xff] %v5728_v56  ;;  %v5778_v43 = vpop.f32.mrb[20].mxu1 }
 0x133   :  { %v4072_v6 = vadd.f32 -1.4531521, %v1517_v30  ;;  %4512 = vrcp.f32 %v1263_v38  ;;  %v5722_v20 = vpop.eup %4506  ;;  %v1899_v27 = vadd.f32 1.4214138, %v1771_v18  ;;  %v1516_v24 = vmul.f32 1.0614054, %v5719_v17 }
 0x134   :  { %4514 = vrcp.f32 %v1265_v44  ;;  %v4195_v62 = vadd.f32 -0.28449672, %v2024_v11  ;;  %v1518_v50 = vmul.f32 1.0614054, %v5722_v20  ;;  %v5730_v0 = vpop.eup %4508  ;;  %v4197_v53 = vadd.f32 -0.28449672, %v2026_v34 }
 0x135   :  { %4516 = vpow2.f32 %v2935_v63  ;;  %v1773_v61 = vmul.f32 %v5705_v51, %v4072_v6  ;;  %v2027_v30 = vmul.f32 %v5686_v52, %v1899_v27  ;;  %v4071_v38 = vadd.f32 -1.4531521, %v1516_v24  ;;  %v5737_v63 = vpop.eup %4510 }
 0x136   :  { %v2937_v18 = vmul.f32 1.442695, %v2796_v10  ;;  %v5733_v54 = vmul.f32 0.5, %v3559_v58  ;;  %v5735_v44 = vmul.f32 0.5, %v3561_v7  ;;  %v4073_v11 = vadd.f32 -1.4531521, %v1518_v50 }
 0x137   :  { %v1901_v8 = vadd.f32 1.4214138, %v1773_v61  ;;  %v4198_v6 = vadd.f32 -0.28449672, %v2027_v30  ;;  %4518 = vpow2.f32 %v2939_v21  ;;  %v1772_v49 = vmul.f32 %v5719_v17, %v4071_v38  ;;  %v5750_v21 = vpop.permute.xlu1 %119 }
 0x138   :  { %9142 = vst [vmem:[#allocation16_spill] sm:$0xff] %v5733_v54  ;;  %9143 = vst [vmem:[#allocation17_spill] sm:$0xff] %v5735_v44  ;;  %v2798_v40 = vmul.f32 %v2670_v14, %v5645_v32  ;;  %v2280_v34 = vmul.f32 %v5647_v22, %v4195_v62  ;;  %v1774_v10 = vmul.f32 %v5722_v20, %v4073_v11  ;;  %v9144_v58 = vand.u32 2147483647, %v5711_v41 }
 0x139   :  { %v2029_v27 = vmul.f32 %v5705_v51, %v1901_v8  ;;  %v2282_v24 = vmul.f32 %v5660_v57, %v4197_v53  ;;  %v2283_v61 = vmul.f32 %v5686_v52, %v4198_v6  ;;  %v1900_v50 = vadd.f32 1.4214138, %v1772_v49 }
 0x13a   :  { %v5746_v7 = vmul.f32 0.70710677, %v9144_v58  ;;  %4520 = vpow2.f32 %v2937_v18  ;;  %v2671_v32 = vsub.f32 0.0, %v5693_v46  ;;  %v5756_v8 = vadd.f32 %v5426_v15, %v5662_v16 }
 0x13b   :  { %v4200_v30 = vadd.f32 -0.28449672, %v2029_v27  ;;  %v2411_v62 = vadd.f32 0.2548296, %v2283_v61  ;;  %v1902_v38 = vadd.f32 1.4214138, %v1774_v10  ;;  %v5760_v53 = vadd.f32 %v5432_v28, %v5750_v21 }
 0x13c   :  { %v1136_v14 = vmul.f32 0.3275911, %v5746_v7  ;;  %v2941_v11 = vmul.f32 1.442695, %v2798_v40  ;;  %v2408_v18 = vadd.f32 0.2548296, %v2280_v34  ;;  %v2028_v27 = vmul.f32 %v5719_v17, %v1900_v50 }
 0x13d   :  { %v5762_v49 = vpop.eup %4512  ;;  %v2285_v6 = vmul.f32 %v5705_v51, %v4200_v30  ;;  %v2410_v56 = vadd.f32 0.2548296, %v2282_v24  ;;  %v2539_v15 = vmul.f32 %v5686_v52, %v2411_v62  ;;  %v2673_v40 = vsub.f32 0.0, %v5701_v35  ;;  %v5771_v10 = vpop.f32.mrb[20].mxu0 }
 0x13e   :  { %v1264_v58 = vadd.f32 1.0, %v1136_v14  ;;  %v5766_v1 = vpop.eup %4514  ;;  %v1519_v16 = vmul.f32 1.0614054, %v5762_v49  ;;  %9145 = vst [vmem:[#allocation18_spill] sm:$0xff] %v5771_v10  ;;  %v2799_v34 = vmul.f32 %v2671_v32, %v5693_v46  ;;  %v2030_v47 = vmul.f32 %v5722_v20, %v1902_v38 }
 0x13f   :  { %v4517_v28 = vpop.eup %4516  ;;  %v2413_v61 = vadd.f32 0.2548296, %v2285_v6  ;;  %v1521_v30 = vmul.f32 1.0614054, %v5766_v1  ;;  %v4199_v62 = vadd.f32 -0.28449672, %v2028_v27  ;;  %v2536_v6 = vmul.f32 %v5647_v22, %v2408_v18 }
 0x140   :  { %v3179_v14 = vmul.f32 %v4517_v28, %v2539_v15  ;;  %v4074_v24 = vadd.f32 -1.4531521, %v1519_v16  ;;  %4522 = vrcp.f32 %v1264_v58  ;;  %v2801_v50 = vmul.f32 %v2673_v40, %v5701_v35 }
 0x141   :  { %v2541_v52 = vmul.f32 %v5705_v51, %v2413_v61  ;;  %4524 = vpow2.f32 %v2941_v11  ;;  %v4076_v59 = vadd.f32 -1.4531521, %v1521_v30  ;;  %v4519_v10 = vpop.eup %4518  ;;  %v2538_v15 = vmul.f32 %v5660_v57, %v2410_v56 }
 0x142   :  { %v3307_v46 = vsub.f32 1.0, %v3179_v14  ;;  %v1775_v32 = vmul.f32 %v5762_v49, %v4074_v24  ;;  %v5787_v51 = vadd.f32 %v5438_v36, %v5750_v21  ;;  %v9146_v27 = vand.u32 2147483647, %v5602_v19 }
 0x143   :  { %v3181_v38 = vmul.f32 %v4519_v10, %v2541_v52  ;;  %v1777_v58 = vmul.f32 %v5766_v1, %v4076_v59  ;;  %v4201_v28 = vadd.f32 -0.28449672, %v2030_v47  ;;  %v2943_v18 = vmul.f32 1.442695, %v2799_v34  ;;  %v5796_v59 = vpop.f32.mrb[21].mxu0  ;;  %v5801_v47 = vpop.f32.mrb[21].mxu1 }
 0x144   :  { %v4521_v11 = vpop.eup %4520  ;;  %v3435_v16 = vmul.f32 %v3307_v46, %v9146_v27  ;;  %v1903_v22 = vadd.f32 1.4214138, %v1775_v32  ;;  %v2284_v30 = vmul.f32 %v5719_v17, %v4199_v62  ;;  %v9147_v57 = vand.u32 2147483647, %v5756_v8 }
 0x145   :  { %v3309_v61 = vsub.f32 1.0, %v3181_v38  ;;  %v1905_v35 = vadd.f32 1.4214138, %v1777_v58  ;;  %v3176_v36 = vmul.f32 %v5730_v0, %v2536_v6  ;;  %v2947_v14 = vmul.f32 1.442695, %v2801_v50 }
 0x146   :  { %v5794_v56 = vmul.f32 0.70710677, %v9147_v57  ;;  %v3563_v40 = vadd.f32 %v3435_v16, %v5602_v19  ;;  %v2031_v10 = vmul.f32 %v5762_v49, %v1903_v22  ;;  %v3178_v34 = vmul.f32 %v5737_v63, %v2538_v15 }
 0x147   :  { %v9148_v24 = vand.u32 2147483647, %v5608_v37  ;;  %v2033_v62 = vmul.f32 %v5766_v1, %v1905_v35  ;;  %v2286_v0 = vmul.f32 %v5722_v20, %v4201_v28  ;;  %4526 = vpow2.f32 %v2943_v18 }
 0x148   :  { %v1138_v46 = vmul.f32 0.3275911, %v5794_v56  ;;  %v5808_v32 = vmul.f32 0.5, %v3563_v40  ;;  %v4202_v6 = vadd.f32 -0.28449672, %v2031_v10  ;;  %v3304_v63 = vsub.f32 1.0, %v3176_v36 }
 0x149   :  { %v3437_v52 = vmul.f32 %v3309_v61, %v9148_v24  ;;  %v2412_v50 = vadd.f32 0.2548296, %v2284_v30  ;;  %v4204_v38 = vadd.f32 -0.28449672, %v2033_v62  ;;  %4528 = vpow2.f32 %v2947_v14 }
 0x14a   :  { %9149 = vst [vmem:[#allocation19_spill] sm:$0xff] %v5808_v32  ;;  %v1266_v58 = vadd.f32 1.0, %v1138_v46  ;;  %v5812_v27 = vpop.eup %4522  ;;  %v2287_v16 = vmul.f32 %v5762_v49, %v4202_v6  ;;  %v3306_v61 = vsub.f32 1.0, %v3178_v34  ;;  %v2414_v18 = vadd.f32 0.2548296, %v2286_v0 }
 0x14b   :  { %v3565_v19 = vadd.f32 %v3437_v52, %v5608_v37  ;;  %v4525_v22 = vpop.eup %4524  ;;  %v2289_v28 = vmul.f32 %v5766_v1, %v4204_v38  ;;  %v1520_v37 = vmul.f32 1.0614054, %v5812_v27  ;;  %v2672_v30 = vsub.f32 0.0, %v5746_v7  ;;  %v5848_v38 = vpop.f32.mrb[22].mxu0 }
 0x14c   :  { %4530 = vrcp.f32 %v1266_v58  ;;  %v5824_v57 = vadd.f32 %v5444_v42, %v5750_v21  ;;  %v2540_v40 = vmul.f32 %v5719_v17, %v2412_v50  ;;  %v2415_v10 = vadd.f32 0.2548296, %v2287_v16 }
 0x14d   :  { %v5817_v35 = vmul.f32 0.5, %v3565_v19  ;;  %v4075_v14 = vadd.f32 -1.4531521, %v1520_v37  ;;  %v5830_v34 = vmul.f32 0.5, %v5658_v55  ;;  %v3558_v24 = vadd.f32 %v5681_v9, %v5380_v48 }
 0x14e   :  { %v9152_v52 = vand.u32 2147483647, %v5538_v33  ;;  %v8978_v46 = vand.u32 2147483647, %v5760_v53  ;;  %v9153_v42 = vand.u32 2147483647, %v5557_v5  ;;  %v2800_v55 = vmul.f32 %v2672_v30, %v5746_v7 }
 0x14f   :  { %9150 = vst [vmem:[#allocation20_spill] sm:$0xff] %v5817_v35  ;;  %9151 = vst [vmem:[#allocation21_spill] sm:$0xff] %v5830_v34  ;;  %v2417_v6 = vadd.f32 0.2548296, %v2289_v28  ;;  %v1776_v19 = vmul.f32 %v5812_v27, %v4075_v14  ;;  %v8974_v17 = vand.u32 2147483647, %v5787_v51  ;;  %v3180_v58 = vmul.f32 %v4521_v11, %v2540_v40 }
 0x150   :  { %v3432_v62 = vmul.f32 %v3304_v63, %v9152_v52  ;;  %v3434_v0 = vmul.f32 %v3306_v61, %v9153_v42  ;;  %v5842_v50 = vmul.f32 0.5, %v5671_v39  ;;  %v1011_v48 = vmul.f32 0.70710677, %v8978_v46  ;;  %v5856_v39 = vpop.f32.mrb[22].mxu1 }
 0x151   :  { %v8973_v9 = vand.u32 2147483647, %v5824_v57  ;;  %v2542_v63 = vmul.f32 %v5722_v20, %v2414_v18  ;;  %v2543_v16 = vmul.f32 %v5762_v49, %v2415_v10  ;;  %v5854_v61 = vmul.f32 0.70710677, %v8974_v17  ;;  %v4527_v28 = vpop.eup %4526 }
 0x152   :  { %9154 = vst [vmem:[#allocation22_spill] sm:$0xff] %v5842_v50  ;;  %v5858_v7 = vmul.f32 0.5, %v3558_v24  ;;  %v3560_v37 = vadd.f32 %v3432_v62, %v5538_v33  ;;  %v1139_v30 = vmul.f32 0.3275911, %v1011_v48  ;;  %v3562_v20 = vadd.f32 %v3434_v0, %v5557_v5  ;;  %v5870_v33 = vpop.permute.xlu0 %124  ;;  %v6001_v50 = vpop.permute.xlu1 %129 }
 0x153   :  { %v5863_v14 = vmul.f32 0.70710677, %v8973_v9  ;;  %v1904_v11 = vadd.f32 1.4214138, %v1776_v19  ;;  %v2674_v49 = vsub.f32 0.0, %v5794_v56  ;;  %v4529_v40 = vpop.eup %4528  ;;  %v2545_v10 = vmul.f32 %v5766_v1, %v2417_v6 }
 0x154   :  { %9155 = vst [vmem:[#allocation23_spill] sm:$0xff] %v5858_v7  ;;  %v1141_v18 = vmul.f32 0.3275911, %v5854_v61  ;;  %v2945_v52 = vmul.f32 1.442695, %v2800_v55  ;;  %v1267_v24 = vadd.f32 1.0, %v1139_v30  ;;  %v3182_v36 = vmul.f32 %v4525_v22, %v2542_v63 }
 0x155   :  { %v1140_v42 = vmul.f32 0.3275911, %v5863_v14  ;;  %v3308_v62 = vsub.f32 1.0, %v3180_v58  ;;  %v3183_v15 = vmul.f32 %v4527_v28, %v2543_v16  ;;  %v5876_v0 = vadd.f32 %v5446_v45, %v5750_v21  ;;  %v5889_v28 = vpop.f32.mrb[23].mxu0 }
 0x156   :  { %v1269_v9 = vadd.f32 1.0, %v1141_v18  ;;  %v5872_v17 = vpop.eup %4530  ;;  %4532 = vrcp.f32 %v1267_v24  ;;  %v5880_v1 = vadd.f32 %v5451_v4, %v5870_v33  ;;  %v2032_v6 = vmul.f32 %v5812_v27, %v1904_v11 }
 0x157   :  { %v1268_v5 = vadd.f32 1.0, %v1140_v42  ;;  %v1522_v19 = vmul.f32 1.0614054, %v5872_v17  ;;  %v2802_v22 = vmul.f32 %v2674_v49, %v5794_v56  ;;  %v5885_v55 = vmul.f32 0.5, %v3560_v37 }
 0x158   :  { %4534 = vrcp.f32 %v1269_v9  ;;  %v5887_v58 = vmul.f32 0.5, %v3562_v20  ;;  %v3185_v63 = vmul.f32 %v4529_v40, %v2545_v10  ;;  %v3310_v16 = vsub.f32 1.0, %v3182_v36 }
 0x159   :  { %9156 = vst [vmem:[#allocation24_spill] sm:$0xff] %v5885_v55  ;;  %4536 = vpow2.f32 %v2945_v52  ;;  %v3311_v45 = vsub.f32 1.0, %v3183_v15  ;;  %v2675_v21 = vsub.f32 0.0, %v1011_v48  ;;  %v9158_v4 = vand.u32 2147483647, %v5618_v31  ;;  %v9159_v15 = vld [vmem:[#allocation2_spill] sm:$0xff] }
 0x15a   :  { %9157 = vst [vmem:[#allocation25_spill] sm:$0xff] %v5887_v58  ;;  %4538 = vrcp.f32 %v1268_v5  ;;  %v4077_v11 = vadd.f32 -1.4531521, %v1522_v19  ;;  %v8976_v18 = vand.u32 2147483647, %v5876_v0  ;;  %v5897_v20 = vadd.f32 %v5463_v12, %v5870_v33  ;;  %v9164_v58 = vld [vmem:[#allocation3_spill] sm:$0xff] }
 0x15b   :  { %v3436_v30 = vmul.f32 %v3308_v62, %v9158_v4  ;;  %v8975_v56 = vand.u32 2147483647, %v5880_v1  ;;  %v4203_v9 = vadd.f32 -0.28449672, %v2032_v6  ;;  %v2949_v37 = vmul.f32 1.442695, %v2802_v22 }
 0x15c   :  { %v5901_v36 = vadd.f32 %v9159_v15, %v5870_v33  ;;  %v3313_v49 = vsub.f32 1.0, %v3185_v63  ;;  %v2677_v40 = vsub.f32 0.0, %v5854_v61  ;;  %v5906_v10 = vmul.f32 0.70710677, %v8976_v18  ;;  %v5925_v15 = vpop.f32.mrb[23].mxu1 }
 0x15d   :  { %v5910_v52 = vmul.f32 0.70710677, %v8975_v56  ;;  %v9160_v24 = vand.u32 2147483647, %v5621_v60  ;;  %v9161_v12 = vand.u32 2147483647, %v5668_v25  ;;  %v2803_v5 = vmul.f32 %v2675_v21, %v1011_v48 }
 0x15e   :  { %v8977_v6 = vand.u32 2147483647, %v5897_v20  ;;  %v5920_v19 = vadd.f32 %v3436_v30, %v5618_v31  ;;  %v1778_v22 = vmul.f32 %v5872_v17, %v4077_v11  ;;  %v1142_v63 = vmul.f32 0.3275911, %v5906_v10 }
 0x15f   :  { %v5914_v42 = vmul.f32 %v3310_v16, %v9160_v24  ;;  %v3439_v62 = vmul.f32 %v3311_v45, %v9161_v12  ;;  %v1143_v4 = vmul.f32 0.3275911, %v5910_v52  ;;  %v2288_v16 = vmul.f32 %v5812_v27, %v4203_v9 }
 0x160   :  { %4540 = vpow2.f32 %v2949_v37  ;;  %v5930_v45 = vmul.f32 0.70710677, %v8977_v6  ;;  %v5933_v21 = vpop.eup %4532  ;;  %v9162_v31 = vand.u32 2147483647, %v5675_v23  ;;  %v2805_v11 = vmul.f32 %v2677_v40, %v5854_v61 }
 0x161   :  { %v1270_v24 = vadd.f32 1.0, %v1142_v63  ;;  %v1271_v12 = vadd.f32 1.0, %v1143_v4  ;;  %v3567_v9 = vadd.f32 %v3439_v62, %v5668_v25  ;;  %v1523_v37 = vmul.f32 1.0614054, %v5933_v21 }
 0x162   :  { %v3441_v30 = vmul.f32 %v3313_v49, %v9162_v31  ;;  %v5938_v56 = vpop.eup %4534  ;;  %v2951_v18 = vmul.f32 1.442695, %v2803_v5  ;;  %v2676_v6 = vsub.f32 0.0, %v5863_v14  ;;  %v1906_v48 = vadd.f32 1.4214138, %v1778_v22 }
 0x163   :  { %v4537_v46 = vpop.eup %4536  ;;  %v1525_v44 = vmul.f32 1.0614054, %v5938_v56  ;;  %4542 = vrcp.f32 %v1270_v24  ;;  %v1145_v49 = vmul.f32 0.3275911, %v5930_v45  ;;  %v2416_v61 = vadd.f32 0.2548296, %v2288_v16 }
 0x164   :  { %v5945_v31 = vpop.eup %4538  ;;  %v4078_v40 = vadd.f32 -1.4531521, %v1523_v37  ;;  %4544 = vrcp.f32 %v1271_v12  ;;  %v9163_v63 = vand.u32 2147483647, %v5901_v36  ;;  %v3569_v62 = vadd.f32 %v3441_v30, %v5675_v23 }
 0x165   :  { %v4080_v5 = vadd.f32 -1.4531521, %v1525_v44  ;;  %v2955_v4 = vmul.f32 1.442695, %v2805_v11  ;;  %v1524_v22 = vmul.f32 1.0614054, %v5945_v31  ;;  %4546 = vpow2.f32 %v2951_v18 }
 0x166   :  { %v5949_v25 = vmul.f32 0.70710677, %v9163_v63  ;;  %v1779_v35 = vmul.f32 %v5933_v21, %v4078_v40  ;;  %v1273_v24 = vadd.f32 1.0, %v1145_v49  ;;  %v5956_v54 = vadd.f32 %v9164_v58, %v5870_v33 }
 0x167   :  { %v2034_v16 = vmul.f32 %v5872_v17, %v1906_v48  ;;  %v1781_v12 = vmul.f32 %v5938_v56, %v4080_v5  ;;  %v4079_v37 = vadd.f32 -1.4531521, %v1524_v22  ;;  %v2804_v63 = vmul.f32 %v2676_v6, %v5863_v14  ;;  %v5978_v22 = vpop.f32.mrb[24].mxu0 }
 0x168   :  { %v2544_v23 = vmul.f32 %v5812_v27, %v2416_v61  ;;  %v1907_v44 = vadd.f32 1.4214138, %v1779_v35  ;;  %4548 = vrcp.f32 %v1273_v24  ;;  %v1144_v30 = vmul.f32 0.3275911, %v5949_v25  ;;  %9166 = vst [vmem:[#allocation3_spill] sm:$0xff] %v5978_v22 }
 0x169   :  { %v5963_v11 = vmul.f32 0.5, %v3567_v9  ;;  %v1909_v18 = vadd.f32 1.4214138, %v1781_v12  ;;  %4550 = vpow2.f32 %v2955_v4  ;;  %v1780_v33 = vmul.f32 %v5945_v31, %v4079_v37 }
 0x16a   :  { %v5966_v58 = vpop.eup %4540  ;;  %v2035_v48 = vmul.f32 %v5933_v21, %v1907_v44  ;;  %v2678_v49 = vsub.f32 0.0, %v5906_v10  ;;  %v1272_v40 = vadd.f32 1.0, %v1144_v30  ;;  %v8982_v14 = vand.u32 2147483647, %v5956_v54 }
 0x16b   :  { %9165 = vst [vmem:[#allocation2_spill] sm:$0xff] %v5963_v11  ;;  %v4205_v27 = vadd.f32 -0.28449672, %v2034_v16  ;;  %v2037_v35 = vmul.f32 %v5938_v56, %v1909_v18  ;;  %v1908_v6 = vadd.f32 1.4214138, %v1780_v33  ;;  %v5972_v9 = vmul.f32 %v4537_v46, %v2544_v23 }
 0x16c   :  { %v2953_v61 = vmul.f32 1.442695, %v2804_v63  ;;  %v4206_v5 = vadd.f32 -0.28449672, %v2035_v48  ;;  %4552 = vrcp.f32 %v1272_v40  ;;  %v5976_v4 = vmul.f32 0.70710677, %v8982_v14 }
 0x16d   :  { %v5980_v24 = vpop.eup %4542  ;;  %v5982_v12 = vmul.f32 0.5, %v3569_v62  ;;  %v4208_v37 = vadd.f32 -0.28449672, %v2037_v35  ;;  %v2036_v16 = vmul.f32 %v5945_v31, %v1908_v6  ;;  %v2679_v44 = vsub.f32 0.0, %v5910_v52 }
 0x16e   :  { %v5986_v63 = vpop.eup %4544  ;;  %v2291_v46 = vmul.f32 %v5933_v21, %v4206_v5  ;;  %v1526_v23 = vmul.f32 1.0614054, %v5980_v24  ;;  %v2806_v30 = vmul.f32 %v2678_v49, %v5906_v10  ;;  %v1146_v18 = vmul.f32 0.3275911, %v5976_v4 }
 0x16f   :  { %9167 = vst [vmem:[#allocation26_spill] sm:$0xff] %v5982_v12  ;;  %v2290_v33 = vmul.f32 %v5872_v17, %v4205_v27  ;;  %v2293_v62 = vmul.f32 %v5938_v56, %v4208_v37  ;;  %4554 = vpow2.f32 %v2953_v61  ;;  %v1527_v48 = vmul.f32 1.0614054, %v5986_v63  ;;  %v4547_v40 = vpop.eup %4546 }
 0x170   :  { %v2419_v6 = vadd.f32 0.2548296, %v2291_v46  ;;  %v4081_v14 = vadd.f32 -1.4531521, %v1526_v23  ;;  %v1274_v32 = vadd.f32 1.0, %v1146_v18  ;;  %v2807_v10 = vmul.f32 %v2679_v44, %v5910_v52  ;;  %v6006_v18 = vpop.f32.mrb[24].mxu1 }
 0x171   :  { %v2421_v5 = vadd.f32 0.2548296, %v2293_v62  ;;  %v4207_v55 = vadd.f32 -0.28449672, %v2036_v16  ;;  %v4082_v7 = vadd.f32 -1.4531521, %v1527_v48 }
 0x172   :  { %v5997_v49 = vpop.eup %4548  ;;  %v2547_v27 = vmul.f32 %v5933_v21, %v2419_v6  ;;  %v1782_v37 = vmul.f32 %v5980_v24, %v4081_v14  ;;  %v2957_v61 = vmul.f32 1.442695, %v2806_v30  ;;  %4556 = vrcp.f32 %v1274_v32  ;;  %9168 = vst [vmem:[#allocation27_spill] sm:$0xff] %v6006_v18  ;;  %v9169_v14 = vld [vmem:[#allocation4_spill] sm:$0xff] }
 0x173   :  { %v4551_v34 = vpop.eup %4550  ;;  %v2418_v35 = vadd.f32 0.2548296, %v2290_v33  ;;  %v2549_v46 = vmul.f32 %v5938_v56, %v2421_v5  ;;  %v1783_v23 = vmul.f32 %v5986_v63, %v4082_v7  ;;  %v1529_v16 = vmul.f32 1.0614054, %v5997_v49  ;;  %v6018_v5 = vpop.f32.mrb[25].mxu0 }
 0x174   :  { %v3187_v52 = vmul.f32 %v4547_v40, %v2547_v27  ;;  %v1910_v44 = vadd.f32 1.4214138, %v1782_v37  ;;  %v2681_v21 = vsub.f32 0.0, %v5930_v45  ;;  %v6011_v30 = vadd.f32 %v9169_v14, %v6001_v50  ;;  %9170 = vst [vmem:[#allocation4_spill] sm:$0xff] %v6018_v5 }
 0x175   :  { %v3189_v32 = vmul.f32 %v4551_v34, %v2549_v46  ;;  %v2292_v62 = vmul.f32 %v5945_v31, %v4207_v55  ;;  %v1911_v33 = vadd.f32 1.4214138, %v1783_v23  ;;  %v4084_v48 = vadd.f32 -1.4531521, %v1529_v16 }
 0x176   :  { %v6014_v56 = vpop.eup %4552  ;;  %v3315_v7 = vsub.f32 1.0, %v3187_v52  ;;  %v2038_v6 = vmul.f32 %v5980_v24, %v1910_v44  ;;  %4558 = vpow2.f32 %v2957_v61  ;;  %v2546_v27 = vmul.f32 %v5872_v17, %v2418_v35 }
 0x177   :  { %v3317_v37 = vsub.f32 1.0, %v3189_v32  ;;  %v2039_v14 = vmul.f32 %v5986_v63, %v1911_v33  ;;  %v1785_v34 = vmul.f32 %v5997_v49, %v4084_v48  ;;  %v9171_v55 = vand.u32 2147483647, %v5760_v53 }
 0x178   :  { %v2959_v23 = vmul.f32 1.442695, %v2807_v10  ;;  %v2809_v16 = vmul.f32 %v2681_v21, %v5930_v45  ;;  %v1528_v52 = vmul.f32 1.0614054, %v6014_v56  ;;  %v9172_v44 = vand.u32 2147483647, %v5787_v51 }
 0x179   :  { %v3443_v46 = vmul.f32 %v3315_v7, %v9171_v55  ;;  %v4555_v61 = vpop.eup %4554  ;;  %v2420_v5 = vadd.f32 0.2548296, %v2292_v62  ;;  %v4209_v18 = vadd.f32 -0.28449672, %v2038_v6  ;;  %v1913_v17 = vadd.f32 1.4214138, %v1785_v34 }
 0x17a   :  { %v3445_v40 = vmul.f32 %v3317_v37, %v9172_v44  ;;  %v4210_v32 = vadd.f32 -0.28449672, %v2039_v14  ;;  %v4083_v33 = vadd.f32 -1.4531521, %v1528_v52  ;;  %v9173_v48 = vand.u32 2147483647, %v6011_v30 }
 0x17b   :  { %v3571_v35 = vadd.f32 %v3443_v46, %v5760_v53  ;;  %v3186_v10 = vmul.f32 %v5966_v58, %v2546_v27  ;;  %v2041_v21 = vmul.f32 %v5997_v49, %v1913_v17  ;;  %v2680_v7 = vsub.f32 0.0, %v5949_v25  ;;  %v9180_v27 = vld [vmem:[#allocation6_spill] sm:$0xff] }
 0x17c   :  { %v6032_v22 = vmul.f32 0.70710677, %v9173_v48  ;;  %v3573_v45 = vadd.f32 %v3445_v40, %v5787_v51  ;;  %v6038_v37 = vpop.eup %4556  ;;  %v2963_v6 = vmul.f32 1.442695, %v2809_v16  ;;  %v1784_v53 = vmul.f32 %v6014_v56, %v4083_v33  ;;  %v6048_v40 = vpop.f32.mrb[25].mxu1 }
 0x17d   :  { %v6040_v62 = vmul.f32 0.5, %v3571_v35  ;;  %v2548_v55 = vmul.f32 %v5945_v31, %v2420_v5  ;;  %v2294_v58 = vmul.f32 %v5980_v24, %v4209_v18  ;;  %v4212_v51 = vadd.f32 -0.28449672, %v2041_v21  ;;  %v9176_v21 = vld [vmem:[#allocation5_spill] sm:$0xff] }
 0x17e   :  { %v1147_v14 = vmul.f32 0.3275911, %v6032_v22  ;;  %v6044_v34 = vmul.f32 0.5, %v3573_v45  ;;  %v2295_v46 = vmul.f32 %v5986_v63, %v4210_v32  ;;  %v1912_v52 = vadd.f32 1.4214138, %v1784_v53 }
 0x17f   :  { %9174 = vst [vmem:[#allocation28_spill] sm:$0xff] %v6040_v62  ;;  %v1530_v16 = vmul.f32 1.0614054, %v6038_v37  ;;  %v3314_v44 = vsub.f32 1.0, %v3186_v10  ;;  %4560 = vpow2.f32 %v2959_v23  ;;  %v2808_v31 = vmul.f32 %v2680_v7, %v5949_v25 }
 0x180   :  { %9175 = vst [vmem:[#allocation29_spill] sm:$0xff] %v6044_v34  ;;  %v4559_v5 = vpop.eup %4558  ;;  %v2297_v18 = vmul.f32 %v5997_v49, %v4212_v51  ;;  %v2040_v35 = vmul.f32 %v6014_v56, %v1912_v52  ;;  %v2682_v33 = vsub.f32 0.0, %v5976_v4  ;;  %v1275_v48 = vadd.f32 1.0, %v1147_v14 }
 0x181   :  { %v3188_v45 = vmul.f32 %v4555_v61, %v2548_v55  ;;  %4562 = vpow2.f32 %v2963_v6  ;;  %v4085_v32 = vadd.f32 -1.4531521, %v1530_v16  ;;  %v6062_v10 = vadd.f32 %v9176_v21, %v6001_v50 }
 0x182   :  { %v9177_v53 = vand.u32 2147483647, %v5711_v41  ;;  %v9178_v23 = vsub.f32 1.0, %v5972_v9  ;;  %v2422_v7 = vadd.f32 0.2548296, %v2294_v58  ;;  %4564 = vrcp.f32 %v1275_v48  ;;  %v6078_v58 = vpop.f32.mrb[26].mxu0 }
 0x183   :  { %v2423_v17 = vadd.f32 0.2548296, %v2295_v46  ;;  %v3566_v51 = vadd.f32 %v5914_v42, %v5621_v60  ;;  %v9179_v14 = vand.u32 2147483647, %v5756_v8  ;;  %v2961_v6 = vmul.f32 1.442695, %v2808_v31 }
 0x184   :  { %v3440_v25 = vmul.f32 %v9178_v23, %v9177_v53  ;;  %v8987_v55 = vand.u32 2147483647, %v6062_v10  ;;  %v2425_v52 = vadd.f32 0.2548296, %v2297_v18  ;;  %v4211_v16 = vadd.f32 -0.28449672, %v2040_v35 }
 0x185   :  { %v3442_v61 = vmul.f32 %v3314_v44, %v9179_v14  ;;  %v2810_v21 = vmul.f32 %v2682_v33, %v5976_v4  ;;  %v6076_v9 = vadd.f32 %v9180_v27, %v6001_v50  ;;  %v6081_v46 = vmul.f32 0.5, %v5920_v19  ;;  %v6086_v31 = vpop.f32.mrb[26].mxu1 }
 0x186   :  { %v3316_v60 = vsub.f32 1.0, %v3188_v45  ;;  %v1786_v42 = vmul.f32 %v6038_v37, %v4085_v32  ;;  %v1021_v44 = vmul.f32 0.70710677, %v8987_v55  ;;  %v3568_v18 = vadd.f32 %v3440_v25, %v5711_v41 }
 0x187   :  { %9181 = vst [vmem:[#allocation5_spill] sm:$0xff] %v6081_v46  ;;  %v2550_v4 = vmul.f32 %v5980_v24, %v2422_v7  ;;  %v2551_v27 = vmul.f32 %v5986_v63, %v2423_v17  ;;  %v8986_v35 = vand.u32 2147483647, %v6076_v9  ;;  %v6092_v33 = vmul.f32 0.5, %v3566_v51 }
 0x188   :  { %v3570_v19 = vadd.f32 %v3442_v61, %v5756_v8  ;;  %v2683_v48 = vsub.f32 0.0, %v6032_v22  ;;  %v1149_v45 = vmul.f32 0.3275911, %v1021_v44  ;;  %v2553_v32 = vmul.f32 %v5997_v49, %v2425_v52 }
 0x189   :  { %9182 = vst [vmem:[#allocation6_spill] sm:$0xff] %v6092_v33  ;;  %v2296_v53 = vmul.f32 %v6014_v56, %v4211_v16  ;;  %4566 = vpow2.f32 %v2961_v6  ;;  %v2965_v23 = vmul.f32 1.442695, %v2810_v21  ;;  %v4561_v41 = vpop.eup %4560  ;;  %v9183_v24 = vand.u32 2147483647, %v5824_v57  ;;  %v135_v6 = vpop.permute.xlu0 %134 }
 0x18a   :  { %v1914_v63 = vadd.f32 1.4214138, %v1786_v42  ;;  %v1277_v17 = vadd.f32 1.0, %v1149_v45  ;;  %v6102_v7 = vmul.f32 0.70710677, %v8986_v35  ;;  %v6104_v8 = vmul.f32 0.5, %v3568_v18 }
 0x18b   :  { %v3444_v25 = vmul.f32 %v3316_v60, %v9183_v24  ;;  %v3190_v51 = vmul.f32 %v4559_v5, %v2550_v4  ;;  %v3191_v14 = vmul.f32 %v4561_v41, %v2551_v27  ;;  %v6108_v49 = vadd.f32 %v5522_v3, %v6001_v50  ;;  %v4563_v61 = vpop.eup %4562  ;;  %v6119_v4 = vpop.f32.mrb[27].mxu0 }
 0x18c   :  { %9184 = vst [vmem:[#allocation30_spill] sm:$0xff] %v6104_v8  ;;  %v6110_v52 = vmul.f32 0.5, %v3570_v19  ;;  %v2811_v16 = vmul.f32 %v2683_v48, %v6032_v22  ;;  %4568 = vrcp.f32 %v1277_v17  ;;  %v1148_v21 = vmul.f32 0.3275911, %v6102_v7  ;;  %v6114_v60 = vpop.eup %4564 }
 0x18d   :  { %v3193_v42 = vmul.f32 %v4563_v61, %v2553_v32  ;;  %v2424_v18 = vadd.f32 0.2548296, %v2296_v53  ;;  %4570 = vpow2.f32 %v2965_v23  ;;  %v6117_v5 = vadd.f32 %v5550_v26, %v135_v6  ;;  %v6142_v61 = vpop.f32.mrb[27].mxu1 }
 0x18e   :  { %9185 = vst [vmem:[#allocation31_spill] sm:$0xff] %v6110_v52  ;;  %v3572_v3 = vadd.f32 %v3444_v25, %v5824_v57  ;;  %v2042_v50 = vmul.f32 %v6038_v37, %v1914_v63  ;;  %v1531_v27 = vmul.f32 1.0614054, %v6114_v60  ;;  %v1276_v22 = vadd.f32 1.0, %v1148_v21 }
 0x18f   :  { %v3318_v19 = vsub.f32 1.0, %v3190_v51  ;;  %v3319_v48 = vsub.f32 1.0, %v3191_v14  ;;  %v2685_v45 = vsub.f32 0.0, %v1021_v44  ;;  %v8984_v41 = vand.u32 2147483647, %v6108_v49 }
 0x190   :  { %v4086_v32 = vadd.f32 -1.4531521, %v1531_v27  ;;  %v2967_v53 = vmul.f32 1.442695, %v2811_v16  ;;  %4572 = vrcp.f32 %v1276_v22  ;;  %v8985_v26 = vand.u32 2147483647, %v6117_v5 }
 0x191   :  { %v3321_v23 = vsub.f32 1.0, %v3193_v42  ;;  %v2552_v24 = vmul.f32 %v6014_v56, %v2424_v18  ;;  %v6129_v57 = vmul.f32 0.70710677, %v8984_v41  ;;  %v6132_v25 = vadd.f32 %v5552_v13, %v135_v6 }
 0x192   :  { %v4213_v63 = vadd.f32 -0.28449672, %v2042_v50  ;;  %v1787_v17 = vmul.f32 %v6114_v60, %v4086_v32  ;;  %v6137_v51 = vmul.f32 0.70710677, %v8985_v26  ;;  %v6140_v14 = vadd.f32 %v5572_v2, %v135_v6 }
 0x193   :  { %v4567_v56 = vpop.eup %4566  ;;  %v6144_v16 = vmul.f32 0.5, %v3572_v3  ;;  %v9187_v21 = vand.u32 2147483647, %v5876_v0  ;;  %v2813_v13 = vmul.f32 %v2685_v45, %v1021_v44  ;;  %v1150_v18 = vmul.f32 0.3275911, %v6129_v57 }
 0x194   :  { %v9188_v50 = vand.u32 2147483647, %v5880_v1  ;;  %v1915_v22 = vadd.f32 1.4214138, %v1787_v17  ;;  %4574 = vpow2.f32 %v2967_v53  ;;  %v1151_v32 = vmul.f32 0.3275911, %v6137_v51 }
 0x195   :  { %9186 = vst [vmem:[#allocation32_spill] sm:$0xff] %v6144_v16  ;;  %v3446_v42 = vmul.f32 %v3318_v19, %v9187_v21  ;;  %v9189_v2 = vand.u32 2147483647, %v5897_v20  ;;  %v3192_v26 = vmul.f32 %v4567_v56, %v2552_v24  ;;  %v1278_v35 = vadd.f32 1.0, %v1150_v18 }
 0x196   :  { %v3447_v27 = vmul.f32 %v3319_v48, %v9188_v50  ;;  %v8989_v3 = vand.u32 2147483647, %v6132_v25  ;;  %v6155_v55 = vpop.eup %4568  ;;  %v2298_v44 = vmul.f32 %v6038_v37, %v4213_v63  ;;  %v2043_v19 = vmul.f32 %v6114_v60, %v1915_v22 }
 0x197   :  { %v3449_v41 = vmul.f32 %v3321_v23, %v9189_v2  ;;  %v1279_v45 = vadd.f32 1.0, %v1151_v32  ;;  %v8988_v48 = vand.u32 2147483647, %v6140_v14  ;;  %v6160_v17 = vpop.eup %4570  ;;  %v1533_v53 = vmul.f32 1.0614054, %v6155_v55 }
 0x198   :  { %v2971_v21 = vmul.f32 1.442695, %v2813_v13  ;;  %v2684_v23 = vsub.f32 0.0, %v6102_v7  ;;  %4576 = vrcp.f32 %v1278_v35  ;;  %v4214_v24 = vadd.f32 -0.28449672, %v2043_v19  ;;  %v6179_v35 = vpop.f32.mrb[28].mxu0 }
 0x199   :  { %4578 = vrcp.f32 %v1279_v45  ;;  %v6166_v56 = vmul.f32 0.70710677, %v8989_v3  ;;  %v6169_v63 = vadd.f32 %v5574_v29, %v135_v6  ;;  %v6172_v18 = vadd.f32 %v3446_v42, %v5876_v0 }
 0x19a   :  { %v3575_v50 = vadd.f32 %v3447_v27, %v5880_v1  ;;  %v4088_v22 = vadd.f32 -1.4531521, %v1533_v53  ;;  %v6177_v13 = vmul.f32 0.70710677, %v8988_v48  ;;  %v6181_v32 = vpop.eup %4572  ;;  %v3577_v2 = vadd.f32 %v3449_v41, %v5897_v20 }
 0x19b   :  { %v3320_v19 = vsub.f32 1.0, %v3192_v26  ;;  %v2299_v29 = vmul.f32 %v6114_v60, %v4214_v24  ;;  %v1153_v6 = vmul.f32 0.3275911, %v6166_v56  ;;  %v2426_v0 = vadd.f32 0.2548296, %v2298_v44 }
 0x19c   :  { %v1789_v42 = vmul.f32 %v6155_v55, %v4088_v22  ;;  %v1532_v1 = vmul.f32 1.0614054, %v6181_v32  ;;  %v1152_v27 = vmul.f32 0.3275911, %v6177_v13  ;;  %v2812_v53 = vmul.f32 %v2684_v23, %v6102_v7 }
 0x19d   :  { %v2427_v45 = vadd.f32 0.2548296, %v2299_v29  ;;  %v1281_v48 = vadd.f32 1.0, %v1153_v6  ;;  %v8992_v3 = vand.u32 2147483647, %v6169_v63  ;;  %4580 = vpow2.f32 %v2971_v21  ;;  %v6198_v29 = vpop.f32.mrb[28].mxu1  ;;  %v6204_v6 = vpop.permute.xlu1 %139 }
 0x19e   :  { %v1917_v12 = vadd.f32 1.4214138, %v1789_v42  ;;  %v4087_v20 = vadd.f32 -1.4531521, %v1532_v1  ;;  %v1280_v41 = vadd.f32 1.0, %v1152_v27  ;;  %v4575_v26 = vpop.eup %4574  ;;  %v6200_v7 = vmul.f32 0.5, %v3575_v50 }
 0x19f   :  { %v9190_v24 = vand.u32 2147483647, %v5901_v36  ;;  %v2555_v22 = vmul.f32 %v6114_v60, %v2427_v45  ;;  %4582 = vrcp.f32 %v1281_v48  ;;  %v6196_v34 = vmul.f32 0.70710677, %v8992_v3 }
 0x1a0   :  { %9191 = vst [vmem:[#allocation33_spill] sm:$0xff] %v6200_v7  ;;  %v2045_v23 = vmul.f32 %v6155_v55, %v1917_v12  ;;  %v1788_v21 = vmul.f32 %v6181_v32, %v4087_v20  ;;  %4584 = vrcp.f32 %v1280_v41  ;;  %v6206_v42 = vmul.f32 0.5, %v3577_v2 }
 0x1a1   :  { %v3448_v44 = vmul.f32 %v3320_v19, %v9190_v24  ;;  %v2554_v60 = vmul.f32 %v6038_v37, %v2426_v0  ;;  %v3195_v48 = vmul.f32 %v4575_v26, %v2555_v22  ;;  %v1154_v19 = vmul.f32 0.3275911, %v6196_v34  ;;  %v9193_v24 = vld [vmem:[#allocation11_spill] sm:$0xff] }
 0x1a2   :  { %9192 = vst [vmem:[#allocation34_spill] sm:$0xff] %v6206_v42  ;;  %v6210_v1 = vpop.eup %4576  ;;  %v4216_v27 = vadd.f32 -0.28449672, %v2045_v23  ;;  %v1916_v45 = vadd.f32 1.4214138, %v1788_v21  ;;  %v6214_v12 = vadd.f32 %v9193_v24, %v6204_v6  ;;  %v2686_v22 = vsub.f32 0.0, %v6129_v57 }
 0x1a3   :  { %v2969_v50 = vmul.f32 1.442695, %v2812_v53  ;;  %v6216_v20 = vpop.eup %4578  ;;  %v6219_v41 = vadd.f32 %v3448_v44, %v5901_v36  ;;  %v3323_v2 = vsub.f32 1.0, %v3195_v48  ;;  %v1534_v37 = vmul.f32 1.0614054, %v6210_v1 }
 0x1a4   :  { %v1282_v0 = vadd.f32 1.0, %v1154_v19  ;;  %v2301_v26 = vmul.f32 %v6155_v55, %v4216_v27  ;;  %v1535_v23 = vmul.f32 1.0614054, %v6216_v20  ;;  %v8995_v53 = vand.u32 2147483647, %v6214_v12 }
 0x1a5   :  { %v9194_v21 = vand.u32 2147483647, %v6011_v30  ;;  %v4089_v3 = vadd.f32 -1.4531521, %v1534_v37  ;;  %v2687_v11 = vsub.f32 0.0, %v6137_v51  ;;  %v3194_v36 = vmul.f32 %v6160_v17, %v2554_v60 }
 0x1a6   :  { %4586 = vrcp.f32 %v1282_v0  ;;  %v2429_v44 = vadd.f32 0.2548296, %v2301_v26  ;;  %v2044_v48 = vmul.f32 %v6181_v32, %v1916_v45  ;;  %v4090_v19 = vadd.f32 -1.4531521, %v1535_v23  ;;  %v6244_v45 = vpop.f32.mrb[29].mxu0 }
 0x1a7   :  { %v3451_v24 = vmul.f32 %v3323_v2, %v9194_v21  ;;  %v1790_v62 = vmul.f32 %v6210_v1, %v4089_v3  ;;  %v6235_v52 = vmul.f32 0.70710677, %v8995_v53  ;;  %v9195_v2 = vld [vmem:[#allocation12_spill] sm:$0xff]  ;;  %v4581_v21 = vpop.eup %4580  ;;  %4588 = vpow2.f32 %v2969_v50  ;;  %9196 = vst [vmem:[#allocation11_spill] sm:$0xff] %v6244_v45 }
 0x1a8   :  { %v6239_v37 = vadd.f32 %v9195_v2, %v6204_v6  ;;  %v2557_v0 = vmul.f32 %v6155_v55, %v2429_v44  ;;  %v2814_v17 = vmul.f32 %v2686_v22, %v6129_v57  ;;  %v1791_v60 = vmul.f32 %v6216_v20, %v4090_v19 }
 0x1a9   :  { %v3579_v27 = vadd.f32 %v3451_v24, %v6011_v30  ;;  %v6246_v30 = vpop.eup %4582  ;;  %v1918_v26 = vadd.f32 1.4214138, %v1790_v62  ;;  %v2815_v23 = vmul.f32 %v2687_v11, %v6137_v51  ;;  %v1155_v24 = vmul.f32 0.3275911, %v6235_v52 }
 0x1aa   :  { %v6252_v2 = vpop.eup %4584  ;;  %v3197_v53 = vmul.f32 %v4581_v21, %v2557_v0  ;;  %v4215_v55 = vadd.f32 -0.28449672, %v2044_v48  ;;  %v1919_v50 = vadd.f32 1.4214138, %v1791_v60  ;;  %v1537_v57 = vmul.f32 1.0614054, %v6246_v30 }
 0x1ab   :  { %v6248_v3 = vmul.f32 0.5, %v3579_v27  ;;  %v1536_v44 = vmul.f32 1.0614054, %v6252_v2  ;;  %v1283_v19 = vadd.f32 1.0, %v1155_v24  ;;  %v8998_v27 = vand.u32 2147483647, %v6239_v37 }
 0x1ac   :  { %v3325_v62 = vsub.f32 1.0, %v3197_v53  ;;  %v2046_v11 = vmul.f32 %v6210_v1, %v1918_v26  ;;  %v2047_v51 = vmul.f32 %v6216_v20, %v1919_v50  ;;  %v4092_v16 = vadd.f32 -1.4531521, %v1537_v57 }
 0x1ad   :  { %9197 = vst [vmem:[#allocation12_spill] sm:$0xff] %v6248_v3  ;;  %v2975_v8 = vmul.f32 1.442695, %v2815_v23  ;;  %v2689_v48 = vsub.f32 0.0, %v6166_v56  ;;  %v4091_v21 = vadd.f32 -1.4531521, %v1536_v44  ;;  %4590 = vrcp.f32 %v1283_v19 }
 0x1ae   :  { %v3322_v0 = vsub.f32 1.0, %v3194_v36  ;;  %v9198_v60 = vand.u32 2147483647, %v6062_v10  ;;  %v4218_v7 = vadd.f32 -0.28449672, %v2047_v51  ;;  %v1793_v24 = vmul.f32 %v6246_v30, %v4092_v16 }
 0x1af   :  { %v2973_v53 = vmul.f32 1.442695, %v2814_v17  ;;  %v1792_v26 = vmul.f32 %v6252_v2, %v4091_v21  ;;  %v2688_v50 = vsub.f32 0.0, %v6177_v13  ;;  %v6271_v23 = vmul.f32 0.70710677, %v8998_v27 }
 0x1b0   :  { %v3453_v22 = vmul.f32 %v3325_v62, %v9198_v60  ;;  %v6265_v3 = vpop.eup %4586  ;;  %v2300_v36 = vmul.f32 %v6181_v32, %v4215_v55  ;;  %v4217_v44 = vadd.f32 -0.28449672, %v2046_v11  ;;  %v1921_v19 = vadd.f32 1.4214138, %v1793_v24 }
 0x1b1   :  { %v2303_v62 = vmul.f32 %v6216_v20, %v4218_v7  ;;  %4592 = vpow2.f32 %v2975_v8  ;;  %v2817_v16 = vmul.f32 %v2689_v48, %v6166_v56  ;;  %v1538_v17 = vmul.f32 1.0614054, %v6265_v3  ;;  %v4589_v51 = vpop.eup %4588 }
 0x1b2   :  { %v3581_v57 = vadd.f32 %v3453_v22, %v6062_v10  ;;  %v2049_v60 = vmul.f32 %v6246_v30, %v1921_v19  ;;  %v2690_v27 = vsub.f32 0.0, %v6196_v34  ;;  %v2691_v10 = vsub.f32 0.0, %v6235_v52  ;;  %v6283_v22 = vpop.f32.mrb[29].mxu1 }
 0x1b3   :  { %9200 = vst [vmem:[#allocation36_spill] sm:$0xff] %v6283_v22  ;;  %v9201_v55 = vand.u32 2147483647, %v5956_v54  ;;  %v1920_v7 = vadd.f32 1.4214138, %v1792_v26  ;;  %v2816_v19 = vmul.f32 %v2688_v50, %v6177_v13  ;;  %4594 = vpow2.f32 %v2973_v53 }
 0x1b4   :  { %v6278_v21 = vmul.f32 0.5, %v3581_v57  ;;  %v4093_v8 = vadd.f32 -1.4531521, %v1538_v17  ;;  %v1157_v56 = vmul.f32 0.3275911, %v6271_v23  ;;  %v2302_v57 = vmul.f32 %v6210_v1, %v4217_v44 }
 0x1b5   :  { %v3450_v11 = vmul.f32 %v3322_v0, %v9201_v55  ;;  %v2428_v24 = vadd.f32 0.2548296, %v2300_v36  ;;  %v2431_v33 = vadd.f32 0.2548296, %v2303_v62  ;;  %v4220_v46 = vadd.f32 -0.28449672, %v2049_v60 }
 0x1b6   :  { %9199 = vst [vmem:[#allocation35_spill] sm:$0xff] %v6278_v21  ;;  %v1285_v45 = vadd.f32 1.0, %v1157_v56  ;;  %v6293_v22 = vmul.f32 0.5, %v6172_v18  ;;  %v2979_v0 = vmul.f32 1.442695, %v2817_v16  ;;  %v2818_v26 = vmul.f32 %v2690_v27, %v6196_v34  ;;  %v6418_v21 = vpop.permute.xlu1 %149 }
 0x1b7   :  { %v2819_v17 = vmul.f32 %v2691_v10, %v6235_v52  ;;  %v6297_v55 = vpop.eup %4590  ;;  %v6300_v36 = vmul.f32 0.5, %v6219_v41  ;;  %v2048_v44 = vmul.f32 %v6252_v2, %v1920_v7  ;;  %v1794_v13 = vmul.f32 %v6265_v3, %v4093_v8  ;;  %v9204_v41 = vld [vmem:[#allocation14_spill] sm:$0xff] }
 0x1b8   :  { %9202 = vst [vmem:[#allocation37_spill] sm:$0xff] %v6293_v22  ;;  %4596 = vrcp.f32 %v1285_v45  ;;  %v2556_v53 = vmul.f32 %v6181_v32, %v2428_v24  ;;  %v2430_v50 = vadd.f32 0.2548296, %v2302_v57  ;;  %v2977_v18 = vmul.f32 1.442695, %v2816_v19 }
 0x1b9   :  { %9203 = vst [vmem:[#allocation38_spill] sm:$0xff] %v6300_v36  ;;  %v1539_v62 = vmul.f32 1.0614054, %v6297_v55  ;;  %v3578_v34 = vadd.f32 %v3450_v11, %v5956_v54  ;;  %v2559_v52 = vmul.f32 %v6216_v20, %v2431_v33  ;;  %v2305_v27 = vmul.f32 %v6246_v30, %v4220_v46 }
 0x1ba   :  { %v6311_v16 = vadd.f32 %v9204_v41, %v6204_v6  ;;  %4598 = vpow2.f32 %v2979_v0  ;;  %v2981_v60 = vmul.f32 1.442695, %v2818_v26  ;;  %v2983_v45 = vmul.f32 1.442695, %v2819_v17  ;;  %v9206_v26 = vld [vmem:[#allocation15_spill] sm:$0xff] }
 0x1bb   :  { %v4094_v10 = vadd.f32 -1.4531521, %v1539_v62  ;;  %v4593_v7 = vpop.eup %4592  ;;  %v4219_v32 = vadd.f32 -0.28449672, %v2048_v44  ;;  %v1922_v8 = vadd.f32 1.4214138, %v1794_v13  ;;  %v3196_v24 = vmul.f32 %v4589_v51, %v2556_v53 }
 0x1bc   :  { %v9000_v56 = vand.u32 2147483647, %v6311_v16  ;;  %v2558_v54 = vmul.f32 %v6210_v1, %v2430_v50  ;;  %4600 = vpow2.f32 %v2977_v18  ;;  %v3199_v46 = vmul.f32 %v4593_v7, %v2559_v52  ;;  %v6336_v52 = vpop.permute.xlu0 %144 }
 0x1bd   :  { %v1795_v33 = vmul.f32 %v6297_v55, %v4094_v10  ;;  %v2433_v20 = vadd.f32 0.2548296, %v2305_v27  ;;  %v2693_v11 = vsub.f32 0.0, %v6271_v23  ;;  %v6321_v19 = vmul.f32 0.5, %v3578_v34  ;;  %v4595_v1 = vpop.eup %4594 }
 0x1be   :  { %v6319_v57 = vmul.f32 0.70710677, %v9000_v56  ;;  %4602 = vpow2.f32 %v2981_v60  ;;  %v6325_v51 = vadd.f32 %v9206_v26, %v6204_v6  ;;  %v2304_v17 = vmul.f32 %v6252_v2, %v4219_v32  ;;  %v9207_v32 = vld [vmem:[#allocation18_spill] sm:$0xff] }
 0x1bf   :  { %9205 = vst [vmem:[#allocation14_spill] sm:$0xff] %v6321_v19  ;;  %v1923_v0 = vadd.f32 1.4214138, %v1795_v33  ;;  %v2050_v44 = vmul.f32 %v6265_v3, %v1922_v8  ;;  %4604 = vpow2.f32 %v2983_v45  ;;  %v3324_v53 = vsub.f32 1.0, %v3196_v24  ;;  %v6349_v33 = vpop.f32.mrb[30].mxu0 }
 0x1c0   :  { %v1156_v13 = vmul.f32 0.3275911, %v6319_v57  ;;  %v6330_v50 = vmul.f32 %v4595_v1, %v2558_v54  ;;  %v8999_v62 = vand.u32 2147483647, %v6325_v51  ;;  %v3327_v6 = vsub.f32 1.0, %v3199_v46  ;;  %v6357_v1 = vpop.f32.mrb[31].mxu0 }
 0x1c1   :  { %v2051_v18 = vmul.f32 %v6297_v55, %v1923_v0  ;;  %v2561_v27 = vmul.f32 %v6246_v30, %v2433_v20  ;;  %v2821_v41 = vmul.f32 %v2693_v11, %v6271_v23  ;;  %v6347_v8 = vadd.f32 %v9207_v32, %v6336_v52  ;;  %v6351_v30 = vpop.f32.mrb[30].mxu1 }
 0x1c2   :  { %v6334_v34 = vpop.eup %4596  ;;  %v1284_v60 = vadd.f32 1.0, %v1156_v13  ;;  %v6343_v7 = vmul.f32 0.70710677, %v8999_v62  ;;  %v2432_v24 = vadd.f32 0.2548296, %v2304_v17  ;;  %v3326_v13 = vsub.f32 1.0, %v6330_v50 }
 0x1c3   :  { %v4222_v10 = vadd.f32 -0.28449672, %v2051_v18  ;;  %v1541_v45 = vmul.f32 1.0614054, %v6334_v34  ;;  %v4221_v54 = vadd.f32 -0.28449672, %v2050_v44  ;;  %v6370_v50 = vadd.f32 %v5778_v43, %v6336_v52 }
 0x1c4   :  { %4606 = vrcp.f32 %v1284_v60  ;;  %v4599_v23 = vpop.eup %4598  ;;  %v9208_v46 = vand.u32 2147483647, %v6076_v9  ;;  %v1158_v26 = vmul.f32 0.3275911, %v6343_v7  ;;  %v9209_v17 = vand.u32 2147483647, %v6117_v5 }
 0x1c5   :  { %v2307_v11 = vmul.f32 %v6297_v55, %v4222_v10  ;;  %v4096_v0 = vadd.f32 -1.4531521, %v1541_v45  ;;  %v3201_v18 = vmul.f32 %v4599_v23, %v2561_v27  ;;  %v2987_v60 = vmul.f32 1.442695, %v2821_v41  ;;  %v6364_v10 = vpop.f32.mrb[31].mxu1 }
 0x1c6   :  { %v3452_v20 = vmul.f32 %v3324_v53, %v9208_v46  ;;  %v3455_v44 = vmul.f32 %v3327_v6, %v9209_v17  ;;  %v4601_v32 = vpop.eup %4600  ;;  %v1286_v56 = vadd.f32 1.0, %v1158_v26  ;;  %v9003_v53 = vand.u32 2147483647, %v6347_v8 }
 0x1c7   :  { %v2435_v48 = vadd.f32 0.2548296, %v2307_v11  ;;  %v1797_v62 = vmul.f32 %v6334_v34, %v4096_v0  ;;  %v2560_v45 = vmul.f32 %v6252_v2, %v2432_v24  ;;  %v2306_v46 = vmul.f32 %v6265_v3, %v4221_v54 }
 0x1c8   :  { %v6374_v6 = vadd.f32 %v5796_v59, %v6336_v52  ;;  %v6376_v27 = vpop.eup %4602  ;;  %4608 = vrcp.f32 %v1286_v56  ;;  %v6381_v11 = vmul.f32 0.70710677, %v9003_v53  ;;  %v3583_v24 = vadd.f32 %v3455_v44, %v6117_v5 }
 0x1c9   :  { %v2563_v41 = vmul.f32 %v6297_v55, %v2435_v48  ;;  %v1925_v23 = vadd.f32 1.4214138, %v1797_v62  ;;  %v4605_v2 = vpop.eup %4604  ;;  %4610 = vpow2.f32 %v2987_v60  ;;  %v9002_v43 = vand.u32 2147483647, %v6370_v50 }
 0x1ca   :  { %v9001_v54 = vand.u32 2147483647, %v6374_v6  ;;  %v3329_v59 = vsub.f32 1.0, %v3201_v18  ;;  %v1159_v48 = vmul.f32 0.3275911, %v6381_v11  ;;  %v3200_v55 = vmul.f32 %v4601_v32, %v2560_v45 }
 0x1cb   :  { %v3203_v0 = vmul.f32 %v4605_v2, %v2563_v41  ;;  %v2053_v26 = vmul.f32 %v6334_v34, %v1925_v23  ;;  %v2434_v56 = vadd.f32 0.2548296, %v2306_v46  ;;  %v6390_v62 = vmul.f32 0.70710677, %v9002_v43  ;;  %v6399_v41 = vpop.f32.mrb[32].mxu0 }
 0x1cc   :  { %v6394_v5 = vmul.f32 0.70710677, %v9001_v54  ;;  %v6397_v17 = vadd.f32 %v3452_v20, %v6076_v9  ;;  %v1287_v60 = vadd.f32 1.0, %v1159_v48  ;;  %v9210_v32 = vand.u32 2147483647, %v6108_v49 }
 0x1cd   :  { %v3331_v44 = vsub.f32 1.0, %v3203_v0  ;;  %v4224_v18 = vadd.f32 -0.28449672, %v2053_v26  ;;  %v2692_v46 = vsub.f32 0.0, %v6319_v57  ;;  %v1161_v2 = vmul.f32 0.3275911, %v6390_v62 }
 0x1ce   :  { %v6401_v23 = vpop.eup %4606  ;;  %v3454_v45 = vmul.f32 %v3326_v13, %v9210_v32  ;;  %v1160_v54 = vmul.f32 0.3275911, %v6394_v5  ;;  %v9211_v43 = vand.u32 2147483647, %v6214_v12  ;;  %4612 = vrcp.f32 %v1287_v60  ;;  %v6412_v26 = vpop.f32.mrb[32].mxu1 }
 0x1cf   :  { %v2309_v20 = vmul.f32 %v6334_v34, %v4224_v18  ;;  %v1540_v0 = vmul.f32 1.0614054, %v6401_v23  ;;  %v6414_v48 = vmul.f32 0.5, %v3583_v24  ;;  %v9213_v13 = vand.u32 2147483647, %v6132_v25 }
 0x1d0   :  { %v3459_v9 = vmul.f32 %v3331_v44, %v9211_v43  ;;  %v3328_v53 = vsub.f32 1.0, %v3200_v55  ;;  %v1289_v42 = vadd.f32 1.0, %v1161_v2  ;;  %v1288_v44 = vadd.f32 1.0, %v1160_v54 }
 0x1d1   :  { %9212 = vst [vmem:[#allocation15_spill] sm:$0xff] %v6414_v48  ;;  %v3457_v32 = vmul.f32 %v3329_v59, %v9213_v13  ;;  %v2437_v36 = vadd.f32 0.2548296, %v2309_v20  ;;  %v4095_v43 = vadd.f32 -1.4531521, %v1540_v0  ;;  %v2562_v18 = vmul.f32 %v6265_v3, %v2434_v56 }
 0x1d2   :  { %v3587_v19 = vadd.f32 %v3459_v9, %v6214_v12  ;;  %v2820_v60 = vmul.f32 %v2692_v46, %v6319_v57  ;;  %v6425_v24 = vadd.f32 %v5801_v47, %v6336_v52  ;;  %v6429_v59 = vadd.f32 %v5848_v38, %v6418_v21  ;;  %v6431_v55 = vpop.eup %4608 }
 0x1d3   :  { %v2565_v12 = vmul.f32 %v6334_v34, %v2437_v36  ;;  %v1796_v54 = vmul.f32 %v6401_v23, %v4095_v43  ;;  %4614 = vrcp.f32 %v1289_v42  ;;  %v4611_v3 = vpop.eup %4610  ;;  %v6438_v57 = vadd.f32 %v3454_v45, %v6108_v49  ;;  %v6445_v36 = vpop.f32.mrb[33].mxu0 }
 0x1d4   :  { %v6433_v2 = vmul.f32 0.5, %v3587_v19  ;;  %v1542_v47 = vmul.f32 1.0614054, %v6431_v55  ;;  %v2694_v52 = vsub.f32 0.0, %v6343_v7  ;;  %v9006_v38 = vand.u32 2147483647, %v6425_v24 }
 0x1d5   :  { %v3205_v19 = vmul.f32 %v4611_v3, %v2565_v12  ;;  %v1924_v46 = vadd.f32 1.4214138, %v1796_v54  ;;  %4616 = vrcp.f32 %v1288_v44  ;;  %v9215_v42 = vand.u32 2147483647, %v6140_v14 }
 0x1d6   :  { %9214 = vst [vmem:[#allocation18_spill] sm:$0xff] %v6433_v2  ;;  %v4097_v9 = vadd.f32 -1.4531521, %v1542_v47  ;;  %v6451_v49 = vmul.f32 0.70710677, %v9006_v38  ;;  %v3585_v20 = vadd.f32 %v3457_v32, %v6132_v25  ;;  %v6456_v0 = vmul.f32 %v6376_v27, %v2562_v18 }
 0x1d7   :  { %v3456_v34 = vmul.f32 %v3328_v53, %v9215_v42  ;;  %v9007_v45 = vand.u32 2147483647, %v6429_v59  ;;  %v3333_v13 = vsub.f32 1.0, %v3205_v19  ;;  %v2985_v43 = vmul.f32 1.442695, %v2820_v60 }
 0x1d8   :  { %v1798_v44 = vmul.f32 %v6431_v55, %v4097_v9  ;;  %v1162_v12 = vmul.f32 0.3275911, %v6451_v49  ;;  %v6466_v54 = vadd.f32 %v5856_v39, %v6418_v21  ;;  %v6468_v3 = vpop.eup %4612  ;;  %v9216_v25 = vand.u32 2147483647, %v6239_v37 }
 0x1d9   :  { %v6462_v53 = vmul.f32 0.70710677, %v9007_v45  ;;  %v2822_v32 = vmul.f32 %v2694_v52, %v6343_v7  ;;  %v2695_v18 = vsub.f32 0.0, %v6381_v11  ;;  %v6476_v60 = vadd.f32 %v5889_v28, %v6418_v21 }
 0x1da   :  { %v3461_v27 = vmul.f32 %v3333_v13, %v9216_v25  ;;  %v2052_v47 = vmul.f32 %v6401_v23, %v1924_v46  ;;  %v1926_v19 = vadd.f32 1.4214138, %v1798_v44  ;;  %v1543_v42 = vmul.f32 1.0614054, %v6468_v3 }
 0x1db   :  { %v1290_v39 = vadd.f32 1.0, %v1162_v12  ;;  %v6480_v9 = vmul.f32 0.5, %v3585_v20  ;;  %v3330_v56 = vsub.f32 1.0, %v6456_v0  ;;  %v1163_v7 = vmul.f32 0.3275911, %v6462_v53  ;;  %v6493_v0 = vpop.f32.mrb[33].mxu1 }
 0x1dc   :  { %v3589_v13 = vadd.f32 %v3461_v27, %v6239_v37  ;;  %v2054_v52 = vmul.f32 %v6431_v55, %v1926_v19  ;;  %v4098_v25 = vadd.f32 -1.4531521, %v1543_v42  ;;  %v2823_v44 = vmul.f32 %v2695_v18, %v6381_v11  ;;  %9219 = vst [vmem:[#allocation41_spill] sm:$0xff] %v6493_v0 }
 0x1dd   :  { %9217 = vst [vmem:[#allocation39_spill] sm:$0xff] %v6480_v9  ;;  %4618 = vrcp.f32 %v1290_v39  ;;  %v6487_v38 = vpop.eup %4614  ;;  %v1291_v20 = vadd.f32 1.0, %v1163_v7  ;;  %v4223_v37 = vadd.f32 -0.28449672, %v2052_v47  ;;  %v2989_v27 = vmul.f32 1.442695, %v2822_v32 }
 0x1de   :  { %v6489_v46 = vmul.f32 0.5, %v3589_v13  ;;  %v1799_v45 = vmul.f32 %v6468_v3, %v4098_v25  ;;  %v1545_v19 = vmul.f32 1.0614054, %v6487_v38  ;;  %v4225_v13 = vadd.f32 -0.28449672, %v2054_v52 }
 0x1df   :  { %v6497_v42 = vpop.eup %4616  ;;  %v2697_v28 = vsub.f32 0.0, %v6390_v62  ;;  %4620 = vrcp.f32 %v1291_v20  ;;  %v3584_v11 = vadd.f32 %v3456_v34, %v6140_v14  ;;  %v2991_v32 = vmul.f32 1.442695, %v2823_v44 }
 0x1e0   :  { %9218 = vst [vmem:[#allocation40_spill] sm:$0xff] %v6489_v46  ;;  %v1927_v18 = vadd.f32 1.4214138, %v1799_v45  ;;  %v4100_v7 = vadd.f32 -1.4531521, %v1545_v19  ;;  %4622 = vpow2.f32 %v2985_v43  ;;  %v2308_v52 = vmul.f32 %v6401_v23, %v4223_v37 }
 0x1e1   :  { %v1544_v47 = vmul.f32 1.0614054, %v6497_v42  ;;  %v9220_v25 = vand.u32 2147483647, %v6466_v54  ;;  %v9221_v48 = vand.u32 2147483647, %v6476_v60  ;;  %4624 = vpow2.f32 %v2989_v27 }
 0x1e2   :  { %v2055_v39 = vmul.f32 %v6468_v3, %v1927_v18  ;;  %v1801_v20 = vmul.f32 %v6487_v38, %v4100_v7  ;;  %v2696_v34 = vsub.f32 0.0, %v6394_v5  ;;  %v2310_v44 = vmul.f32 %v6431_v55, %v4225_v13 }
 0x1e3   :  { %v1037_v12 = vmul.f32 0.70710677, %v9220_v25  ;;  %v6508_v2 = vmul.f32 0.70710677, %v9221_v48  ;;  %v4099_v14 = vadd.f32 -1.4531521, %v1544_v47  ;;  %4626 = vpow2.f32 %v2991_v32 }
 0x1e4   :  { %v4226_v19 = vadd.f32 -0.28449672, %v2055_v39  ;;  %v1929_v25 = vadd.f32 1.4214138, %v1801_v20  ;;  %v2825_v37 = vmul.f32 %v2697_v28, %v6390_v62  ;;  %v2698_v18 = vsub.f32 0.0, %v6451_v49 }
 0x1e5   :  { %v1165_v45 = vmul.f32 0.3275911, %v1037_v12  ;;  %v1164_v43 = vmul.f32 0.3275911, %v6508_v2  ;;  %v1800_v48 = vmul.f32 %v6497_v42, %v4099_v14  ;;  %v2436_v27 = vadd.f32 0.2548296, %v2308_v52 }
 0x1e6   :  { %v2311_v47 = vmul.f32 %v6468_v3, %v4226_v19  ;;  %v2057_v46 = vmul.f32 %v6487_v38, %v1929_v25  ;;  %v2699_v22 = vsub.f32 0.0, %v6462_v53  ;;  %v6525_v39 = vmul.f32 0.5, %v6397_v17 }
 0x1e7   :  { %v1293_v9 = vadd.f32 1.0, %v1165_v45  ;;  %v6519_v7 = vpop.eup %4618  ;;  %v1292_v32 = vadd.f32 1.0, %v1164_v43  ;;  %v9223_v62 = vand.u32 2147483647, %v6169_v63  ;;  %v2438_v20 = vadd.f32 0.2548296, %v2310_v44 }
 0x1e8   :  { %9222 = vst [vmem:[#allocation42_spill] sm:$0xff] %v6525_v39  ;;  %v1546_v13 = vmul.f32 1.0614054, %v6519_v7  ;;  %v1928_v14 = vadd.f32 1.4214138, %v1800_v48  ;;  %v2824_v52 = vmul.f32 %v2696_v34, %v6394_v5  ;;  %v6534_v19 = vmul.f32 0.5, %v6438_v57 }
 0x1e9   :  { %4628 = vrcp.f32 %v1293_v9  ;;  %v3458_v28 = vmul.f32 %v3330_v56, %v9223_v62  ;;  %v6531_v45 = vpop.eup %4620  ;;  %v6536_v25 = vmul.f32 0.5, %v3584_v11  ;;  %v4228_v17 = vadd.f32 -0.28449672, %v2057_v46 }
 0x1ea   :  { %9224 = vst [vmem:[#allocation43_spill] sm:$0xff] %v6534_v19  ;;  %v2826_v39 = vmul.f32 %v2698_v18, %v6451_v49  ;;  %v2564_v9 = vmul.f32 %v6401_v23, %v2436_v27  ;;  %v2439_v43 = vadd.f32 0.2548296, %v2311_v47  ;;  %v2995_v0 = vmul.f32 1.442695, %v2825_v37  ;;  %v4623_v44 = vpop.eup %4622 }
 0x1eb   :  { %9225 = vst [vmem:[#allocation44_spill] sm:$0xff] %v6536_v25  ;;  %v2827_v56 = vmul.f32 %v2699_v22, %v6462_v53  ;;  %v4101_v48 = vadd.f32 -1.4531521, %v1546_v13  ;;  %v1547_v5 = vmul.f32 1.0614054, %v6531_v45  ;;  %v2701_v34 = vsub.f32 0.0, %v1037_v12  ;;  %v4625_v49 = vpop.eup %4624 }
 0x1ec   :  { %4630 = vrcp.f32 %v1292_v32  ;;  %v3586_v57 = vadd.f32 %v3458_v28, %v6169_v63  ;;  %v2566_v11 = vmul.f32 %v6431_v55, %v2438_v20  ;;  %v2056_v46 = vmul.f32 %v6497_v42, %v1928_v14  ;;  %v6551_v63 = vpop.f32.mrb[34].mxu0 }
 0x1ed   :  { %v2993_v62 = vmul.f32 1.442695, %v2824_v52  ;;  %v2313_v23 = vmul.f32 %v6487_v38, %v4228_v17  ;;  %v2997_v18 = vmul.f32 1.442695, %v2826_v39  ;;  %v4102_v37 = vadd.f32 -1.4531521, %v1547_v5  ;;  %v4627_v55 = vpop.eup %4626  ;;  %v155_v5 = vpop.permute.xlu0 %154 }
 0x1ee   :  { %v6548_v22 = vadd.f32 %v5925_v15, %v6418_v21  ;;  %v3204_v53 = vmul.f32 %v4623_v44, %v2564_v9  ;;  %v2567_v27 = vmul.f32 %v6468_v3, %v2439_v43  ;;  %4632 = vpow2.f32 %v2995_v0 }
 0x1ef   :  { %v2999_v47 = vmul.f32 1.442695, %v2827_v56  ;;  %v1802_v13 = vmul.f32 %v6519_v7, %v4101_v48  ;;  %v1803_v32 = vmul.f32 %v6531_v45, %v4102_v37  ;;  %v2829_v28 = vmul.f32 %v2701_v34, %v1037_v12 }
 0x1f0   :  { %v9012_v39 = vand.u32 2147483647, %v6548_v22  ;;  %v6556_v20 = vmul.f32 0.5, %v3586_v57  ;;  %v3206_v14 = vmul.f32 %v4625_v49, %v2566_v11  ;;  %v4227_v15 = vadd.f32 -0.28449672, %v2056_v46 }
 0x1f1   :  { %4634 = vpow2.f32 %v2993_v62  ;;  %v2441_v3 = vadd.f32 0.2548296, %v2313_v23  ;;  %v1931_v0 = vadd.f32 1.4214138, %v1803_v32  ;;  %v3332_v17 = vsub.f32 1.0, %v3204_v53  ;;  %v6569_v62 = vpop.f32.mrb[34].mxu1 }
 0x1f2   :  { %9226 = vst [vmem:[#allocation45_spill] sm:$0xff] %v6556_v20  ;;  %4636 = vpow2.f32 %v2997_v18  ;;  %v6562_v52 = vmul.f32 0.70710677, %v9012_v39  ;;  %v3207_v9 = vmul.f32 %v4627_v55, %v2567_v27  ;;  %v1930_v43 = vadd.f32 1.4214138, %v1802_v13  ;;  %v9227_v53 = vld [vmem:[#allocation3_spill] sm:$0xff] }
 0x1f3   :  { %v6558_v21 = vpop.eup %4628  ;;  %4638 = vpow2.f32 %v2999_v47  ;;  %v2059_v56 = vmul.f32 %v6531_v45, %v1931_v0  ;;  %v3003_v44 = vmul.f32 1.442695, %v2829_v28  ;;  %v3334_v34 = vsub.f32 1.0, %v3206_v14  ;;  %v9228_v32 = vld [vmem:[#allocation27_spill] sm:$0xff]  ;;  %v6596_v19 = vpop.f32.mrb[35].mxu1 }
 0x1f4   :  { %v1549_v12 = vmul.f32 1.0614054, %v6558_v21  ;;  %v1166_v48 = vmul.f32 0.3275911, %v6562_v52  ;;  %v2312_v57 = vmul.f32 %v6497_v42, %v4227_v15  ;;  %v2700_v46 = vsub.f32 0.0, %v6508_v2 }
 0x1f5   :  { %v2569_v23 = vmul.f32 %v6487_v38, %v2441_v3  ;;  %v4230_v18 = vadd.f32 -0.28449672, %v2059_v56  ;;  %v6575_v27 = vadd.f32 %v9227_v53, %v155_v5  ;;  %v3335_v47 = vsub.f32 1.0, %v3207_v9  ;;  %v6586_v3 = vpop.f32.mrb[35].mxu0 }
 0x1f6   :  { %v4104_v11 = vadd.f32 -1.4531521, %v1549_v12  ;;  %v6571_v49 = vpop.eup %4630  ;;  %v1294_v37 = vadd.f32 1.0, %v1166_v48  ;;  %v6580_v28 = vadd.f32 %v9228_v32, %v155_v5  ;;  %v9229_v14 = vand.u32 2147483647, %v6311_v16 }
 0x1f7   :  { %v1548_v13 = vmul.f32 1.0614054, %v6571_v49  ;;  %v2058_v0 = vmul.f32 %v6519_v7, %v1930_v43  ;;  %v2315_v38 = vmul.f32 %v6531_v45, %v4230_v18  ;;  %v9230_v9 = vand.u32 2147483647, %v6325_v51 }
 0x1f8   :  { %v1805_v55 = vmul.f32 %v6558_v21, %v4104_v11  ;;  %v3460_v15 = vmul.f32 %v3332_v17, %v9229_v14  ;;  %4640 = vrcp.f32 %v1294_v37  ;;  %v4633_v12 = vpop.eup %4632  ;;  %v2828_v11 = vmul.f32 %v2700_v46, %v6508_v2 }
 0x1f9   :  { %v3462_v56 = vmul.f32 %v3334_v34, %v9230_v9  ;;  %4642 = vpow2.f32 %v3003_v44  ;;  %v3209_v53 = vmul.f32 %v4633_v12, %v2569_v23  ;;  %v2440_v32 = vadd.f32 0.2548296, %v2312_v57 }
 0x1fa   :  { %v1933_v48 = vadd.f32 1.4214138, %v1805_v55  ;;  %v2443_v39 = vadd.f32 0.2548296, %v2315_v38  ;;  %v9016_v17 = vand.u32 2147483647, %v6575_v27  ;;  %v3588_v2 = vadd.f32 %v3460_v15, %v6311_v16 }
 0x1fb   :  { %v4635_v14 = vpop.eup %4634  ;;  %v9231_v43 = vand.u32 2147483647, %v6347_v8  ;;  %v4103_v20 = vadd.f32 -1.4531521, %v1548_v13  ;;  %v9013_v25 = vand.u32 2147483647, %v6580_v28  ;;  %v2568_v16 = vmul.f32 %v6497_v42, %v2440_v32 }
 0x1fc   :  { %v2061_v37 = vmul.f32 %v6558_v21, %v1933_v48  ;;  %v6598_v34 = vpop.eup %4636  ;;  %v4229_v44 = vadd.f32 -0.28449672, %v2058_v0  ;;  %v2571_v57 = vmul.f32 %v6531_v45, %v2443_v39  ;;  %v6604_v46 = vmul.f32 0.70710677, %v9016_v17 }
 0x1fd   :  { %v3463_v18 = vmul.f32 %v3335_v47, %v9231_v43  ;;  %v4639_v23 = vpop.eup %4638  ;;  %v3590_v47 = vadd.f32 %v3462_v56, %v6325_v51  ;;  %v6607_v13 = vmul.f32 1.442695, %v2828_v11  ;;  %v6611_v38 = vmul.f32 0.70710677, %v9013_v25  ;;  %v9232_v43 = vld [vmem:[#allocation4_spill] sm:$0xff] }
 0x1fe   :  { %v4232_v55 = vadd.f32 -0.28449672, %v2061_v37  ;;  %v3337_v12 = vsub.f32 1.0, %v3209_v53  ;;  %v3211_v15 = vmul.f32 %v4639_v23, %v2571_v57  ;;  %v1167_v45 = vmul.f32 0.3275911, %v6604_v46 }
 0x1ff   :  { %v3591_v39 = vadd.f32 %v3463_v18, %v6347_v8  ;;  %v1804_v9 = vmul.f32 %v6571_v49, %v4103_v20  ;;  %v1169_v51 = vmul.f32 0.3275911, %v6611_v38  ;;  %v2314_v56 = vmul.f32 %v6519_v7, %v4229_v44 }
 0x200   :  { %v2317_v0 = vmul.f32 %v6558_v21, %v4232_v55  ;;  %v3339_v48 = vsub.f32 1.0, %v3211_v15  ;;  %v1295_v11 = vadd.f32 1.0, %v1167_v45  ;;  %v6621_v37 = vadd.f32 %v9232_v43, %v155_v5 }
 0x201   :  { %v2702_v42 = vsub.f32 0.0, %v6562_v52  ;;  %v1297_v32 = vadd.f32 1.0, %v1169_v51  ;;  %v6625_v57 = vadd.f32 %v6048_v40, %v155_v5  ;;  %v9233_v20 = vand.u32 2147483647, %v6370_v50  ;;  %v6635_v51 = vpop.f32.mrb[36].mxu0  ;;  %v6637_v40 = vpop.f32.mrb[36].mxu1 }
 0x202   :  { %v2445_v53 = vadd.f32 0.2548296, %v2317_v0  ;;  %v6627_v8 = vpop.eup %4640  ;;  %v3208_v23 = vmul.f32 %v4635_v14, %v2568_v16  ;;  %v9234_v44 = vand.u32 2147483647, %v6429_v59  ;;  %4644 = vrcp.f32 %v1295_v11  ;;  %v6643_v16 = vpop.permute.xlu1 %159 }
 0x203   :  { %v3465_v18 = vmul.f32 %v3337_v12, %v9233_v20  ;;  %v4643_v15 = vpop.eup %4642  ;;  %v1932_v0 = vadd.f32 1.4214138, %v1804_v9  ;;  %v1550_v43 = vmul.f32 1.0614054, %v6627_v8  ;;  %4646 = vrcp.f32 %v1297_v32 }
 0x204   :  { %v3467_v55 = vmul.f32 %v3339_v48, %v9234_v44  ;;  %v2573_v45 = vmul.f32 %v6558_v21, %v2445_v53  ;;  %v6639_v5 = vmul.f32 0.5, %v3591_v39  ;;  %v2442_v25 = vadd.f32 0.2548296, %v2314_v56 }
 0x205   :  { %v9015_v12 = vand.u32 2147483647, %v6621_v37  ;;  %v4105_v11 = vadd.f32 -1.4531521, %v1550_v43  ;;  %v2830_v21 = vmul.f32 %v2702_v42, %v6562_v52  ;;  %v9014_v9 = vand.u32 2147483647, %v6625_v57 }
 0x206   :  { %9235 = vst [vmem:[#allocation3_spill] sm:$0xff] %v6639_v5  ;;  %v3595_v14 = vadd.f32 %v3467_v55, %v6429_v59  ;;  %v3213_v48 = vmul.f32 %v4643_v15, %v2573_v45  ;;  %v3593_v53 = vadd.f32 %v3465_v18, %v6370_v50  ;;  %v6656_v59 = vadd.f32 %v6078_v58, %v6643_v16  ;;  %v6670_v58 = vpop.f32.mrb[37].mxu0 }
 0x207   :  { %v6652_v39 = vmul.f32 0.70710677, %v9015_v12  ;;  %v2060_v20 = vmul.f32 %v6571_v49, %v1932_v0  ;;  %v1806_v44 = vmul.f32 %v6627_v8, %v4105_v11  ;;  %v6662_v52 = vmul.f32 0.70710677, %v9014_v9 }
 0x208   :  { %v6648_v32 = vmul.f32 0.5, %v3595_v14  ;;  %v3341_v56 = vsub.f32 1.0, %v3213_v48  ;;  %v6664_v50 = vmul.f32 0.5, %v3588_v2  ;;  %v9018_v55 = vand.u32 2147483647, %v6656_v59 }
 0x209   :  { %v1168_v18 = vmul.f32 0.3275911, %v6652_v39  ;;  %v6672_v15 = vmul.f32 0.5, %v3590_v47  ;;  %v9239_v45 = vand.u32 2147483647, %v6466_v54  ;;  %v3336_v48 = vsub.f32 1.0, %v3208_v23 }
 0x20a   :  { %9236 = vst [vmem:[#allocation27_spill] sm:$0xff] %v6648_v32  ;;  %9237 = vst [vmem:[#allocation4_spill] sm:$0xff] %v6664_v50  ;;  %v1934_v43 = vadd.f32 1.4214138, %v1806_v44  ;;  %v1170_v14 = vmul.f32 0.3275911, %v6662_v52  ;;  %v2570_v2 = vmul.f32 %v6519_v7, %v2442_v25  ;;  %v6708_v50 = vadd.f32 %v6086_v31, %v6643_v16 }
 0x20b   :  { %9238 = vst [vmem:[#allocation46_spill] sm:$0xff] %v6672_v15  ;;  %v3469_v0 = vmul.f32 %v3341_v56, %v9239_v45  ;;  %v1296_v11 = vadd.f32 1.0, %v1168_v18  ;;  %v6680_v42 = vmul.f32 0.70710677, %v9018_v55  ;;  %v6682_v9 = vmul.f32 0.5, %v3593_v53 }
 0x20c   :  { %v4231_v47 = vadd.f32 -0.28449672, %v2060_v20  ;;  %v3005_v17 = vmul.f32 1.442695, %v2830_v21  ;;  %v6685_v5 = vpop.eup %4644  ;;  %v2062_v56 = vmul.f32 %v6627_v8, %v1934_v43  ;;  %v1298_v44 = vadd.f32 1.0, %v1170_v14  ;;  %v6696_v20 = vpop.f32.mrb[37].mxu1 }
 0x20d   :  { %9240 = vst [vmem:[#allocation47_spill] sm:$0xff] %v6682_v9  ;;  %v3597_v12 = vadd.f32 %v3469_v0, %v6466_v54  ;;  %4648 = vrcp.f32 %v1296_v11  ;;  %v1171_v23 = vmul.f32 0.3275911, %v6680_v42  ;;  %v6689_v7 = vpop.eup %4646  ;;  %v1551_v18 = vmul.f32 1.0614054, %v6685_v5 }
 0x20e   :  { %v2703_v53 = vsub.f32 0.0, %v6604_v46  ;;  %v2705_v54 = vsub.f32 0.0, %v6611_v38  ;;  %v9242_v21 = vand.u32 2147483647, %v6374_v6  ;;  %4650 = vpow2.f32 %v6607_v13 }
 0x20f   :  { %v6691_v25 = vmul.f32 0.5, %v3597_v12  ;;  %v1553_v0 = vmul.f32 1.0614054, %v6689_v7  ;;  %v1299_v43 = vadd.f32 1.0, %v1171_v23  ;;  %v3210_v14 = vmul.f32 %v6598_v34, %v2570_v2 }
 0x210   :  { %v3464_v45 = vmul.f32 %v3336_v48, %v9242_v21  ;;  %v2316_v11 = vmul.f32 %v6571_v49, %v4231_v47  ;;  %v4106_v55 = vadd.f32 -1.4531521, %v1551_v18  ;;  %v4233_v32 = vadd.f32 -0.28449672, %v2062_v56 }
 0x211   :  { %9241 = vst [vmem:[#allocation48_spill] sm:$0xff] %v6691_v25  ;;  %v4108_v15 = vadd.f32 -1.4531521, %v1553_v0  ;;  %4652 = vrcp.f32 %v1298_v44  ;;  %v2831_v48 = vmul.f32 %v2703_v53, %v6604_v46  ;;  %v2833_v34 = vmul.f32 %v2705_v54, %v6611_v38 }
 0x212   :  { %4654 = vpow2.f32 %v3005_v17  ;;  %v1807_v13 = vmul.f32 %v6685_v5, %v4106_v55  ;;  %v3592_v2 = vadd.f32 %v3464_v45, %v6374_v6  ;;  %v9020_v47 = vand.u32 2147483647, %v6708_v50 }
 0x213   :  { %v1809_v23 = vmul.f32 %v6689_v7, %v4108_v15  ;;  %4656 = vrcp.f32 %v1299_v43  ;;  %v2444_v56 = vadd.f32 0.2548296, %v2316_v11  ;;  %v6718_v31 = vadd.f32 %v6119_v4, %v6643_v16  ;;  %v6741_v11 = vpop.f32.mrb[38].mxu0 }
 0x214   :  { %v1935_v44 = vadd.f32 1.4214138, %v1807_v13  ;;  %v6722_v17 = vadd.f32 %v6142_v61, %v6643_v16  ;;  %v3338_v46 = vsub.f32 1.0, %v3210_v14  ;;  %v2318_v38 = vmul.f32 %v6627_v8, %v4233_v32  ;;  %9244 = vst [vmem:[#allocation50_spill] sm:$0xff] %v6741_v11 }
 0x215   :  { %v1937_v55 = vadd.f32 1.4214138, %v1809_v23  ;;  %v6727_v6 = vmul.f32 0.70710677, %v9020_v47  ;;  %v3007_v18 = vmul.f32 1.442695, %v2831_v48  ;;  %v2572_v0 = vmul.f32 %v6571_v49, %v2444_v56 }
 0x216   :  { %v2063_v15 = vmul.f32 %v6685_v5, %v1935_v44  ;;  %v3011_v53 = vmul.f32 1.442695, %v2833_v34  ;;  %v9021_v54 = vand.u32 2147483647, %v6718_v31  ;;  %v2704_v61 = vsub.f32 0.0, %v6652_v39 }
 0x217   :  { %v6731_v4 = vpop.eup %4648  ;;  %v2065_v21 = vmul.f32 %v6689_v7, %v1937_v55  ;;  %v1173_v16 = vmul.f32 0.3275911, %v6727_v6  ;;  %v9024_v32 = vand.u32 2147483647, %v6722_v17  ;;  %v6737_v45 = vmul.f32 0.5, %v3592_v2 }
 0x218   :  { %v4234_v43 = vadd.f32 -0.28449672, %v2063_v15  ;;  %v1552_v14 = vmul.f32 1.0614054, %v6731_v4  ;;  %v4651_v13 = vpop.eup %4650  ;;  %v9245_v48 = vand.u32 2147483647, %v6425_v24  ;;  %4658 = vpow2.f32 %v3007_v18 }
 0x219   :  { %9243 = vst [vmem:[#allocation49_spill] sm:$0xff] %v6737_v45  ;;  %v2446_v23 = vadd.f32 0.2548296, %v2318_v38  ;;  %v1301_v44 = vadd.f32 1.0, %v1173_v16  ;;  %v6747_v55 = vmul.f32 0.70710677, %v9021_v54  ;;  %v2832_v47 = vmul.f32 %v2704_v61, %v6652_v39  ;;  %v6769_v45 = vpop.permute.xlu0 %164 }
 0x21a   :  { %v3466_v34 = vmul.f32 %v3338_v46, %v9245_v48  ;;  %v4236_v2 = vadd.f32 -0.28449672, %v2065_v21  ;;  %v4107_v12 = vadd.f32 -1.4531521, %v1552_v14  ;;  %v2707_v49 = vsub.f32 0.0, %v6680_v42 }
 0x21b   :  { %v6750_v56 = vpop.eup %4652  ;;  %v2319_v15 = vmul.f32 %v6685_v5, %v4234_v43  ;;  %4660 = vrcp.f32 %v1301_v44  ;;  %v1172_v46 = vmul.f32 0.3275911, %v6747_v55  ;;  %v3212_v16 = vmul.f32 %v4651_v13, %v2572_v0 }
 0x21c   :  { %v4655_v38 = vpop.eup %4654  ;;  %v1554_v48 = vmul.f32 1.0614054, %v6750_v56  ;;  %v2706_v54 = vsub.f32 0.0, %v6662_v52  ;;  %v6759_v18 = vmul.f32 0.70710677, %v9024_v32  ;;  %v3594_v14 = vadd.f32 %v3466_v34, %v6425_v24 }
 0x21d   :  { %v6761_v21 = vpop.eup %4656  ;;  %v2574_v43 = vmul.f32 %v6627_v8, %v2446_v23  ;;  %v1808_v39 = vmul.f32 %v6731_v4, %v4107_v12  ;;  %v1300_v61 = vadd.f32 1.0, %v1172_v46  ;;  %v2321_v44 = vmul.f32 %v6689_v7, %v4236_v2 }
 0x21e   :  { %4662 = vpow2.f32 %v3011_v53  ;;  %v4109_v0 = vadd.f32 -1.4531521, %v1554_v48  ;;  %v2835_v13 = vmul.f32 %v2707_v49, %v6680_v42  ;;  %v2447_v9 = vadd.f32 0.2548296, %v2319_v15 }
 0x21f   :  { %v3009_v25 = vmul.f32 1.442695, %v2832_v47  ;;  %v1555_v32 = vmul.f32 1.0614054, %v6761_v21  ;;  %4664 = vrcp.f32 %v1300_v61  ;;  %v3340_v11 = vsub.f32 1.0, %v3212_v16 }
 0x220   :  { %v2834_v24 = vmul.f32 %v2706_v54, %v6662_v52  ;;  %v2709_v8 = vsub.f32 0.0, %v6727_v6  ;;  %v1174_v12 = vmul.f32 0.3275911, %v6759_v18  ;;  %v3214_v34 = vmul.f32 %v4655_v38, %v2574_v43  ;;  %v6786_v43 = vpop.f32.mrb[38].mxu1 }
 0x221   :  { %v1936_v23 = vadd.f32 1.4214138, %v1808_v39  ;;  %v4110_v53 = vadd.f32 -1.4531521, %v1555_v32  ;;  %v6776_v42 = vadd.f32 %v6179_v35, %v6769_v45  ;;  %v2449_v47 = vadd.f32 0.2548296, %v2321_v44 }
 0x222   :  { %v1810_v2 = vmul.f32 %v6750_v56, %v4109_v0  ;;  %v3015_v49 = vmul.f32 1.442695, %v2835_v13  ;;  %v1302_v15 = vadd.f32 1.0, %v1174_v12  ;;  %v6779_v46 = vmul.f32 0.5, %v3594_v14  ;;  %v4659_v16 = vpop.eup %4658 }
 0x223   :  { %v2575_v52 = vmul.f32 %v6685_v5, %v2447_v9  ;;  %4666 = vpow2.f32 %v3009_v25  ;;  %v1811_v54 = vmul.f32 %v6761_v21, %v4110_v53  ;;  %v9247_v38 = vand.u32 2147483647, %v6476_v60 }
 0x224   :  { %9246 = vst [vmem:[#allocation51_spill] sm:$0xff] %v6779_v46  ;;  %v3013_v48 = vmul.f32 1.442695, %v2834_v24  ;;  %v2837_v35 = vmul.f32 %v2709_v8, %v6727_v6  ;;  %4668 = vrcp.f32 %v1302_v15  ;;  %v3342_v61 = vsub.f32 1.0, %v3214_v34 }
 0x225   :  { %v3468_v32 = vmul.f32 %v3340_v11, %v9247_v38  ;;  %v6788_v39 = vpop.eup %4660  ;;  %v2064_v14 = vmul.f32 %v6731_v4, %v1936_v23  ;;  %v1939_v44 = vadd.f32 1.4214138, %v1811_v54  ;;  %v9026_v5 = vand.u32 2147483647, %v6776_v42  ;;  %v6815_v38 = vpop.f32.mrb[39].mxu0 }
 0x226   :  { %v2577_v9 = vmul.f32 %v6689_v7, %v2449_v47  ;;  %v1938_v25 = vadd.f32 1.4214138, %v1810_v2  ;;  %4670 = vpow2.f32 %v3015_v49  ;;  %v1557_v11 = vmul.f32 1.0614054, %v6788_v39  ;;  %9249 = vst [vmem:[#allocation52_spill] sm:$0xff] %v6815_v38 }
 0x227   :  { %v3215_v0 = vmul.f32 %v4659_v16, %v2575_v52  ;;  %v2067_v6 = vmul.f32 %v6761_v21, %v1939_v44  ;;  %v6797_v13 = vmul.f32 0.70710677, %v9026_v5  ;;  %v6801_v24 = vadd.f32 %v6198_v29, %v6769_v45 }
 0x228   :  { %v4663_v8 = vpop.eup %4662  ;;  %v6804_v12 = vadd.f32 %v3468_v32, %v6476_v60  ;;  %v4112_v7 = vadd.f32 -1.4531521, %v1557_v11  ;;  %v3019_v34 = vmul.f32 1.442695, %v2837_v35  ;;  %v2708_v23 = vsub.f32 0.0, %v6747_v55 }
 0x229   :  { %v6807_v53 = vpop.eup %4664  ;;  %v9248_v47 = vand.u32 2147483647, %v6548_v22  ;;  %v4235_v49 = vadd.f32 -0.28449672, %v2064_v14  ;;  %v4238_v15 = vadd.f32 -0.28449672, %v2067_v6  ;;  %v3217_v54 = vmul.f32 %v4663_v8, %v2577_v9 }
 0x22a   :  { %v1175_v52 = vmul.f32 0.3275911, %v6797_v13  ;;  %v2066_v29 = vmul.f32 %v6750_v56, %v1938_v25  ;;  %v1813_v16 = vmul.f32 %v6788_v39, %v4112_v7  ;;  %v1556_v60 = vmul.f32 1.0614054, %v6807_v53 }
 0x22b   :  { %v3470_v2 = vmul.f32 %v3342_v61, %v9248_v47  ;;  %v3343_v32 = vsub.f32 1.0, %v3215_v0  ;;  %v2323_v35 = vmul.f32 %v6761_v21, %v4238_v15  ;;  %v9025_v11 = vand.u32 2147483647, %v6801_v24 }
 0x22c   :  { %v1303_v44 = vadd.f32 1.0, %v1175_v52  ;;  %v1941_v61 = vadd.f32 1.4214138, %v1813_v16  ;;  %4672 = vpow2.f32 %v3019_v34  ;;  %v4111_v14 = vadd.f32 -1.4531521, %v1556_v60 }
 0x22d   :  { %v2836_v6 = vmul.f32 %v2708_v23, %v6747_v55  ;;  %v4667_v9 = vpop.eup %4666  ;;  %v2320_v25 = vmul.f32 %v6731_v4, %v4235_v49  ;;  %v2451_v8 = vadd.f32 0.2548296, %v2323_v35  ;;  %v6823_v7 = vmul.f32 0.70710677, %v9025_v11 }
 0x22e   :  { %4674 = vrcp.f32 %v1303_v44  ;;  %v6825_v0 = vpop.eup %4668  ;;  %v3345_v47 = vsub.f32 1.0, %v3217_v54  ;;  %v4237_v15 = vadd.f32 -0.28449672, %v2066_v29  ;;  %v2069_v52 = vmul.f32 %v6788_v39, %v1941_v61 }
 0x22f   :  { %v1812_v34 = vmul.f32 %v6807_v53, %v4111_v14  ;;  %v9250_v16 = vand.u32 2147483647, %v6575_v27  ;;  %v2579_v23 = vmul.f32 %v6761_v21, %v2451_v8  ;;  %v1558_v49 = vmul.f32 1.0614054, %v6825_v0  ;;  %v6835_v14 = vpop.f32.mrb[39].mxu1 }
 0x230   :  { %v1177_v60 = vmul.f32 0.3275911, %v6823_v7  ;;  %v4671_v35 = vpop.eup %4670  ;;  %4676 = vpow2.f32 %v3013_v48  ;;  %v4240_v44 = vadd.f32 -0.28449672, %v2069_v52  ;;  %v2710_v54 = vsub.f32 0.0, %v6759_v18 }
 0x231   :  { %v3471_v55 = vmul.f32 %v3343_v32, %v9250_v16  ;;  %v1940_v11 = vadd.f32 1.4214138, %v1812_v34  ;;  %v2448_v29 = vadd.f32 0.2548296, %v2320_v25  ;;  %v3219_v5 = vmul.f32 %v4671_v35, %v2579_v23 }
 0x232   :  { %v4113_v61 = vadd.f32 -1.4531521, %v1558_v49  ;;  %v1305_v46 = vadd.f32 1.0, %v1177_v60  ;;  %v6838_v32 = vadd.f32 %v3470_v2, %v6548_v22  ;;  %v9251_v21 = vand.u32 2147483647, %v6580_v28  ;;  %v9252_v22 = vld [vmem:[#allocation11_spill] sm:$0xff] }
 0x233   :  { %v2322_v16 = vmul.f32 %v6750_v56, %v4237_v15  ;;  %v2325_v48 = vmul.f32 %v6788_v39, %v4240_v44  ;;  %v3599_v52 = vadd.f32 %v3471_v55, %v6575_v27  ;;  %v3347_v34 = vsub.f32 1.0, %v3219_v5  ;;  %v9254_v27 = vld [vmem:[#allocation36_spill] sm:$0xff] }
 0x234   :  { %v3473_v8 = vmul.f32 %v3345_v47, %v9251_v21  ;;  %v3017_v38 = vmul.f32 1.442695, %v2836_v6  ;;  %4678 = vrcp.f32 %v1305_v46  ;;  %v2068_v23 = vmul.f32 %v6807_v53, %v1940_v11  ;;  %v6859_v46 = vpop.f32.mrb[40].mxu0  ;;  %v6871_v21 = vpop.f32.mrb[40].mxu1 }
 0x235   :  { %v2453_v25 = vadd.f32 0.2548296, %v2325_v48  ;;  %v2838_v49 = vmul.f32 %v2710_v54, %v6759_v18  ;;  %v6849_v2 = vadd.f32 %v9252_v22, %v6769_v45  ;;  %v2576_v47 = vmul.f32 %v6731_v4, %v2448_v29 }
 0x236   :  { %v9253_v15 = vand.u32 2147483647, %v6656_v59  ;;  %v1814_v35 = vmul.f32 %v6825_v0, %v4113_v61  ;;  %v6857_v5 = vadd.f32 %v9254_v27, %v6769_v45  ;;  %v4673_v11 = vpop.eup %4672  ;;  %v3601_v18 = vadd.f32 %v3473_v8, %v6580_v28 }
 0x237   :  { %v2450_v6 = vadd.f32 0.2548296, %v2322_v16  ;;  %v2581_v55 = vmul.f32 %v6788_v39, %v2453_v25  ;;  %v9027_v44 = vand.u32 2147483647, %v6849_v2  ;;  %v6866_v54 = vmul.f32 0.5, %v3599_v52  ;;  %v9257_v25 = vld [vmem:[#allocation13_spill] sm:$0xff] }
 0x238   :  { %v3475_v60 = vmul.f32 %v3347_v34, %v9253_v15  ;;  %v6864_v4 = vpop.eup %4674  ;;  %v2711_v61 = vsub.f32 0.0, %v6797_v13  ;;  %v4239_v34 = vadd.f32 -0.28449672, %v2068_v23  ;;  %v3216_v8 = vmul.f32 %v4667_v9, %v2576_v47 }
 0x239   :  { %9255 = vst [vmem:[#allocation11_spill] sm:$0xff] %v6866_v54  ;;  %v3221_v48 = vmul.f32 %v4673_v11, %v2581_v55  ;;  %v1559_v28 = vmul.f32 1.0614054, %v6864_v4  ;;  %v6876_v39 = vmul.f32 0.70710677, %v9027_v44  ;;  %4680 = vpow2.f32 %v3017_v38  ;;  %v6903_v11 = vpop.f32.mrb[41].mxu0  ;;  %v170_v44 = vpop.permute.xlu1 %169 }
 0x23a   :  { %v3603_v29 = vadd.f32 %v3475_v60, %v6656_v59  ;;  %v1942_v52 = vadd.f32 1.4214138, %v1814_v35  ;;  %v9258_v59 = vld [vmem:[#allocation22_spill] sm:$0xff]  ;;  %v4677_v15 = vpop.eup %4676  ;;  %v2578_v60 = vmul.f32 %v6750_v56, %v2450_v6  ;;  %v2839_v55 = vmul.f32 %v2711_v61, %v6797_v13 }
 0x23b   :  { %v4323_v22 = vpack.c.bf16 %v9258_v59, %v9257_v25  ;;  %v3349_v27 = vsub.f32 1.0, %v3221_v48  ;;  %v4114_v45 = vadd.f32 -1.4531521, %v1559_v28  ;;  %v1176_v23 = vmul.f32 0.3275911, %v6876_v39  ;;  %v9261_v28 = vld [vmem:[#allocation8_spill] sm:$0xff] }
 0x23c   :  { %v6878_v16 = vmul.f32 0.5, %v3603_v29  ;;  %v9259_v9 = vand.u32 2147483647, %v6857_v5  ;;  %v9260_v35 = vand.u32 2147483647, %v6708_v50  ;;  %v2324_v56 = vmul.f32 %v6807_v53, %v4239_v34  ;;  %v9262_v25 = vld [vmem:[#allocation7_spill] sm:$0xff] }
 0x23d   :  { %4324 = vmatprep.subr.bf16.mxu0 %v4323_v22  ;;  %v1815_v6 = vmul.f32 %v6864_v4, %v4114_v45  ;;  %v1304_v48 = vadd.f32 1.0, %v1176_v23  ;;  %v9263_v59 = vpack.c.bf16 %v9261_v28, %v9262_v25  ;;  %v6900_v13 = vmul.f32 0.5, %v3601_v18  ;;  %9265 = vst [vmem:[#allocation22_spill] sm:$0xff] %v6903_v11  ;;  %v6909_v18 = vpop.f32.mrb[41].mxu1 }
 0x23e   :  { %9256 = vst [vmem:[#allocation36_spill] sm:$0xff] %v6878_v16  ;;  %v6889_v47 = vmul.f32 0.70710677, %v9259_v9  ;;  %v3477_v29 = vmul.f32 %v3349_v27, %v9260_v35  ;;  %v6898_v38 = vpop.eup %4678  ;;  %v3344_v61 = vsub.f32 1.0, %v3216_v8  ;;  %v2070_v9 = vmul.f32 %v6825_v0, %v1942_v52  ;;  %9266 = vst [vmem:[#allocation8_spill] sm:$0xff] %v6909_v18 }
 0x23f   :  { %4326 = vmatpush1.bf16.msra.mxu0 %v9263_v59  ;;  %9264 = vst [vmem:[#allocation13_spill] sm:$0xff] %v6900_v13  ;;  %v3021_v22 = vmul.f32 1.442695, %v2838_v49  ;;  %v3218_v27 = vmul.f32 %v4677_v15, %v2578_v60  ;;  %v1943_v35 = vadd.f32 1.4214138, %v1815_v6  ;;  %v2713_v28 = vsub.f32 0.0, %v6823_v7 }
 0x240   :  { %v3605_v34 = vadd.f32 %v3477_v29, %v6708_v50  ;;  %v1561_v45 = vmul.f32 1.0614054, %v6898_v38  ;;  %v3023_v23 = vmul.f32 1.442695, %v2839_v55  ;;  %4682 = vrcp.f32 %v1304_v48  ;;  %v9269_v29 = vld [vmem:[#allocation21_spill] sm:$0xff]  ;;  %v9270_v55 = vld [vmem:[#allocation23_spill] sm:$0xff] }
 0x241   :  { %v1178_v25 = vmul.f32 0.3275911, %v6889_v47  ;;  %v2452_v52 = vadd.f32 0.2548296, %v2324_v56  ;;  %v2071_v49 = vmul.f32 %v6864_v4, %v1943_v35  ;;  %v9268_v15 = vand.u32 2147483647, %v6621_v37 }
 0x242   :  { %v6911_v8 = vmul.f32 0.5, %v3605_v34  ;;  %v4116_v59 = vadd.f32 -1.4531521, %v1561_v45  ;;  %v4241_v60 = vadd.f32 -0.28449672, %v2070_v9  ;;  %4684 = vpow2.f32 %v3021_v22 }
 0x243   :  { %v3472_v50 = vmul.f32 %v3344_v61, %v9268_v15  ;;  %v4387_v6 = vpack.c.bf16 %v9270_v55, %v9269_v29  ;;  %v3346_v48 = vsub.f32 1.0, %v3218_v27  ;;  %v4242_v16 = vadd.f32 -0.28449672, %v2071_v49  ;;  %v9271_v15 = vld [vmem:[#allocation10_spill] sm:$0xff]  ;;  %v9272_v49 = vld [vmem:[#allocation9_spill] sm:$0xff] }
 0x244   :  { %9267 = vst [vmem:[#allocation7_spill] sm:$0xff] %v6911_v8  ;;  %v1817_v34 = vmul.f32 %v6898_v38, %v4116_v59  ;;  %4686 = vpow2.f32 %v3023_v23  ;;  %v1306_v56 = vadd.f32 1.0, %v1178_v25  ;;  %v6922_v35 = vadd.f32 %v6349_v33, %v170_v44  ;;  %v4681_v23 = vpop.eup %4680 }
 0x245   :  { %4388 = vmatprep.subr.bf16.mxu1 %v4387_v6  ;;  %v6925_v61 = vadd.f32 %v6351_v30, %v170_v44  ;;  %v2580_v9 = vmul.f32 %v6807_v53, %v2452_v52  ;;  %v2327_v22 = vmul.f32 %v6864_v4, %v4242_v16  ;;  %v2841_v45 = vmul.f32 %v2713_v28, %v6823_v7 }
 0x246   :  { %v1945_v27 = vadd.f32 1.4214138, %v1817_v34  ;;  %v9273_v29 = vpack.c.bf16 %v9271_v15, %v9272_v49  ;;  %v2326_v25 = vmul.f32 %v6825_v0, %v4241_v60  ;;  %v9031_v33 = vand.u32 2147483647, %v6922_v35 }
 0x247   :  { %v9030_v59 = vand.u32 2147483647, %v6925_v61  ;;  %v6937_v30 = vadd.f32 %v6357_v1, %v170_v44  ;;  %v9274_v53 = vand.u32 2147483647, %v6625_v57  ;;  %v2455_v52 = vadd.f32 0.2548296, %v2327_v22  ;;  %v6950_v1 = vpop.permute.xlu0 %174 }
 0x248   :  { %4390 = vmatpush1.bf16.msra.mxu1 %v9273_v29  ;;  %v2073_v7 = vmul.f32 %v6898_v38, %v1945_v27  ;;  %v2712_v28 = vsub.f32 0.0, %v6876_v39  ;;  %4688 = vrcp.f32 %v1306_v56  ;;  %v1051_v55 = vmul.f32 0.70710677, %v9031_v33 }
 0x249   :  { %v3474_v16 = vmul.f32 %v3346_v48, %v9274_v53  ;;  %v6947_v60 = vmul.f32 0.70710677, %v9030_v59  ;;  %v9034_v6 = vand.u32 2147483647, %v6937_v30  ;;  %v3220_v34 = vmul.f32 %v4681_v23, %v2580_v9 }
 0x24a   :  { %v4244_v15 = vadd.f32 -0.28449672, %v2073_v7  ;;  %v3027_v48 = vmul.f32 1.442695, %v2841_v45  ;;  %v6953_v22 = vadd.f32 %v6364_v10, %v170_v44  ;;  %v6955_v27 = vpop.eup %4682  ;;  %v2454_v56 = vadd.f32 0.2548296, %v2326_v25 }
 0x24b   :  { %v1179_v49 = vmul.f32 0.3275911, %v1051_v55  ;;  %v1181_v29 = vmul.f32 0.3275911, %v6947_v60  ;;  %v6960_v53 = vadd.f32 %v6399_v41, %v6950_v1  ;;  %v3600_v54 = vadd.f32 %v3472_v50, %v6621_v37  ;;  %v6966_v10 = vpop.f32.mrb[42].mxu0  ;;  %v6968_v44 = vpop.f32.mrb[42].mxu1 }
 0x24c   :  { %v3602_v59 = vadd.f32 %v3474_v16, %v6625_v57  ;;  %v1560_v9 = vmul.f32 1.0614054, %v6955_v27  ;;  %v2714_v45 = vsub.f32 0.0, %v6889_v47  ;;  %9275 = vst [vmem:[#allocation21_spill] sm:$0xff] %v6966_v10  ;;  %9276 = vst [vmem:[#allocation23_spill] sm:$0xff] %v6968_v44  ;;  %v4685_v23 = vpop.eup %4684  ;;  %v2583_v25 = vmul.f32 %v6864_v4, %v2455_v52 }
 0x24d   :  { %v2840_v7 = vmul.f32 %v2712_v28, %v6876_v39  ;;  %v1307_v33 = vadd.f32 1.0, %v1179_v49  ;;  %v1052_v41 = vmul.f32 0.70710677, %v9034_v6  ;;  %v3348_v37 = vsub.f32 1.0, %v3220_v34 }
 0x24e   :  { %v2329_v57 = vmul.f32 %v6898_v38, %v4244_v15  ;;  %4690 = vpow2.f32 %v3027_v48  ;;  %v4687_v16 = vpop.eup %4686  ;;  %v1309_v13 = vadd.f32 1.0, %v1181_v29  ;;  %v6978_v4 = vmul.f32 0.5, %v6804_v12 }
 0x24f   :  { %4692 = vrcp.f32 %v1307_v33  ;;  %v1180_v8 = vmul.f32 0.3275911, %v1052_v41  ;;  %v2582_v39 = vmul.f32 %v6825_v0, %v2454_v56  ;;  %v4115_v52 = vadd.f32 -1.4531521, %v1560_v9 }
 0x250   :  { %9277 = vst [vmem:[#allocation10_spill] sm:$0xff] %v6978_v4  ;;  %v2842_v28 = vmul.f32 %v2714_v45, %v6889_v47  ;;  %v6983_v34 = vmul.f32 0.5, %v6838_v32  ;;  %v6985_v15 = vmul.f32 0.5, %v3600_v54  ;;  %v3223_v48 = vmul.f32 %v4687_v16, %v2583_v25 }
 0x251   :  { %v3025_v49 = vmul.f32 1.442695, %v2840_v7  ;;  %v6987_v33 = vmul.f32 0.5, %v3602_v59  ;;  %v9281_v29 = vand.u32 2147483647, %v6718_v31  ;;  %v1308_v12 = vadd.f32 1.0, %v1180_v8 }
 0x252   :  { %9278 = vst [vmem:[#allocation9_spill] sm:$0xff] %v6983_v34  ;;  %9279 = vst [vmem:[#allocation53_spill] sm:$0xff] %v6985_v15  ;;  %v2457_v44 = vadd.f32 0.2548296, %v2329_v57  ;;  %v6991_v50 = vpop.eup %4688  ;;  %v2715_v0 = vsub.f32 0.0, %v1051_v55  ;;  %4694 = vrcp.f32 %v1309_v13  ;;  %v3222_v9 = vmul.f32 %v4685_v23, %v2582_v39 }
 0x253   :  { %9280 = vst [vmem:[#allocation54_spill] sm:$0xff] %v6987_v33  ;;  %v3476_v6 = vmul.f32 %v3348_v37, %v9281_v29  ;;  %v9282_v47 = vand.u32 2147483647, %v6953_v22  ;;  %v9283_v32 = vand.u32 2147483647, %v6960_v53  ;;  %v1816_v59 = vmul.f32 %v6955_v27, %v4115_v52 }
 0x254   :  { %v3029_v45 = vmul.f32 1.442695, %v2842_v28  ;;  %v2717_v25 = vsub.f32 0.0, %v6947_v60  ;;  %v3351_v7 = vsub.f32 1.0, %v3223_v48  ;;  %4696 = vpow2.f32 %v3025_v49 }
 0x255   :  { %v6995_v56 = vmul.f32 0.70710677, %v9282_v47  ;;  %v6999_v54 = vmul.f32 0.70710677, %v9283_v32  ;;  %v3604_v37 = vadd.f32 %v3476_v6, %v6718_v31  ;;  %v2585_v57 = vmul.f32 %v6898_v38, %v2457_v44 }
 0x256   :  { %v1562_v16 = vmul.f32 1.0614054, %v6991_v50  ;;  %4698 = vrcp.f32 %v1308_v12  ;;  %v2843_v29 = vmul.f32 %v2715_v0, %v1051_v55  ;;  %v2716_v23 = vsub.f32 0.0, %v1052_v41 }
 0x257   :  { %v1182_v8 = vmul.f32 0.3275911, %v6995_v56  ;;  %v1183_v13 = vmul.f32 0.3275911, %v6999_v54  ;;  %v3350_v47 = vsub.f32 1.0, %v3222_v9  ;;  %4700 = vpow2.f32 %v3029_v45 }
 0x258   :  { %v4691_v28 = vpop.eup %4690  ;;  %v1944_v32 = vadd.f32 1.4214138, %v1816_v59  ;;  %v2845_v48 = vmul.f32 %v2717_v25, %v6947_v60  ;;  %v9284_v33 = vand.u32 2147483647, %v6776_v42  ;;  %v7015_v38 = vadd.f32 %v6412_v26, %v6950_v1 }
 0x259   :  { %v1310_v39 = vadd.f32 1.0, %v1182_v8  ;;  %v1311_v52 = vadd.f32 1.0, %v1183_v13  ;;  %v7009_v49 = vpop.eup %4692  ;;  %v7019_v55 = vadd.f32 %v6445_v36, %v6950_v1  ;;  %v7021_v6 = vmul.f32 0.5, %v3604_v37 }
 0x25a   :  { %v3479_v31 = vmul.f32 %v3351_v7, %v9284_v33  ;;  %v3225_v44 = vmul.f32 %v4691_v28, %v2585_v57  ;;  %v4117_v12 = vadd.f32 -1.4531521, %v1562_v16  ;;  %v1563_v60 = vmul.f32 1.0614054, %v7009_v49  ;;  %v7031_v7 = vpop.f32.mrb[43].mxu0  ;;  %v9288_v57 = vld [vmem:[#allocation24_spill] sm:$0xff] }
 0x25b   :  { %4702 = vrcp.f32 %v1310_v39  ;;  %9285 = vst [vmem:[#allocation55_spill] sm:$0xff] %v7021_v6  ;;  %v3031_v0 = vmul.f32 1.442695, %v2843_v29  ;;  %v2844_v9 = vmul.f32 %v2716_v23, %v1052_v41  ;;  %v9036_v33 = vand.u32 2147483647, %v7015_v38  ;;  %9287 = vst [vmem:[#allocation56_spill] sm:$0xff] %v7031_v7 }
 0x25c   :  { %4704 = vrcp.f32 %v1311_v52  ;;  %v9286_v59 = vand.u32 2147483647, %v6722_v17  ;;  %v2072_v26 = vmul.f32 %v6955_v27, %v1944_v32  ;;  %v3035_v25 = vmul.f32 1.442695, %v2845_v48  ;;  %v7033_v8 = vpop.eup %4694  ;;  %v9289_v16 = vld [vmem:[#allocation5_spill] sm:$0xff]  ;;  %v7092_v18 = vpop.f32.mrb[44].mxu0 }
 0x25d   :  { %v9035_v36 = vand.u32 2147483647, %v7019_v55  ;;  %v3607_v13 = vadd.f32 %v3479_v31, %v6776_v42  ;;  %v4118_v37 = vadd.f32 -1.4531521, %v1563_v60  ;;  %v7038_v41 = vmul.f32 0.70710677, %v9036_v33 }
 0x25e   :  { %v7027_v45 = vmul.f32 %v3350_v47, %v9286_v59  ;;  %v4327_v29 = vpack.c.bf16 %v9289_v16, %v9288_v57  ;;  %v3353_v23 = vsub.f32 1.0, %v3225_v44  ;;  %v1818_v39 = vmul.f32 %v6991_v50, %v4117_v12  ;;  %v7048_v47 = vpop.eup %4696  ;;  %v9290_v57 = vld [vmem:[#allocation19_spill] sm:$0xff]  ;;  %v9291_v16 = vld [vmem:[#allocation16_spill] sm:$0xff] }
 0x25f   :  { %v1565_v52 = vmul.f32 1.0614054, %v7033_v8  ;;  %v7046_v28 = vmul.f32 0.70710677, %v9035_v36  ;;  %v1819_v42 = vmul.f32 %v7009_v49, %v4118_v37  ;;  %v3033_v32 = vmul.f32 1.442695, %v2844_v9 }
 0x260   :  { %v2718_v48 = vsub.f32 0.0, %v6995_v56  ;;  %v1185_v31 = vmul.f32 0.3275911, %v7038_v41  ;;  %4328 = vmatprep.subr.bf16.mxu0 %v4327_v29  ;;  %v7053_v60 = vpop.eup %4698  ;;  %v4243_v44 = vadd.f32 -0.28449672, %v2072_v26  ;;  %4706 = vpow2.f32 %v3031_v0  ;;  %9297 = vst [vmem:[#allocation19_spill] sm:$0xff] %v7092_v18 }
 0x261   :  { %v4120_v12 = vadd.f32 -1.4531521, %v1565_v52  ;;  %v1184_v59 = vmul.f32 0.3275911, %v7046_v28  ;;  %v9292_v36 = vpack.c.bf16 %v9290_v57, %v9291_v16  ;;  %v7059_v33 = vmul.f32 0.5, %v3607_v13  ;;  %v7062_v15 = vpop.eup %4700 }
 0x262   :  { %v1947_v37 = vadd.f32 1.4214138, %v1819_v42  ;;  %v1564_v9 = vmul.f32 1.0614054, %v7053_v60  ;;  %v1313_v6 = vadd.f32 1.0, %v1185_v31  ;;  %4708 = vpow2.f32 %v3035_v25  ;;  %v7070_v42 = vpop.f32.mrb[43].mxu1 }
 0x263   :  { %4330 = vmatpush1.bf16.msra.mxu0 %v9292_v36  ;;  %9293 = vst [vmem:[#allocation24_spill] sm:$0xff] %v7059_v33  ;;  %v9294_v29 = vand.u32 2147483647, %v6801_v24  ;;  %v1946_v26 = vadd.f32 1.4214138, %v1818_v39  ;;  %v1821_v0 = vmul.f32 %v7033_v8, %v4120_v12  ;;  %v1312_v13 = vadd.f32 1.0, %v1184_v59 }
 0x264   :  { %v2075_v57 = vmul.f32 %v7009_v49, %v1947_v37  ;;  %v4119_v36 = vadd.f32 -1.4531521, %v1564_v9  ;;  %4710 = vrcp.f32 %v1313_v6  ;;  %9295 = vst [vmem:[#allocation5_spill] sm:$0xff] %v7070_v42  ;;  %v2328_v31 = vmul.f32 %v6955_v27, %v4243_v44  ;;  %v9296_v37 = vld [vmem:[#allocation41_spill] sm:$0xff] }
 0x265   :  { %v3481_v34 = vmul.f32 %v3353_v23, %v9294_v29  ;;  %v7067_v52 = vpop.eup %4702  ;;  %v1949_v4 = vadd.f32 1.4214138, %v1821_v0  ;;  %v2846_v39 = vmul.f32 %v2718_v48, %v6995_v56  ;;  %v7081_v6 = vadd.f32 %v9296_v37, %v6950_v1 }
 0x266   :  { %v7072_v16 = vpop.eup %4704  ;;  %v1566_v23 = vmul.f32 1.0614054, %v7067_v52  ;;  %v4246_v12 = vadd.f32 -0.28449672, %v2075_v57  ;;  %v1820_v25 = vmul.f32 %v7053_v60, %v4119_v36  ;;  %v2074_v59 = vmul.f32 %v6991_v50, %v1946_v26 }
 0x267   :  { %v1567_v29 = vmul.f32 1.0614054, %v7072_v16  ;;  %v2077_v9 = vmul.f32 %v7033_v8, %v1949_v4  ;;  %4712 = vpow2.f32 %v3033_v32  ;;  %v2719_v56 = vsub.f32 0.0, %v6999_v54 }
 0x268   :  { %v4121_v44 = vadd.f32 -1.4531521, %v1566_v23  ;;  %v2331_v0 = vmul.f32 %v7009_v49, %v4246_v12  ;;  %4714 = vrcp.f32 %v1312_v13  ;;  %v2456_v48 = vadd.f32 0.2548296, %v2328_v31 }
 0x269   :  { %v4122_v42 = vadd.f32 -1.4531521, %v1567_v29  ;;  %v4248_v57 = vadd.f32 -0.28449672, %v2077_v9  ;;  %v3037_v7 = vmul.f32 1.442695, %v2846_v39  ;;  %v3609_v32 = vadd.f32 %v3481_v34, %v6801_v24 }
 0x26a   :  { %v1822_v36 = vmul.f32 %v7067_v52, %v4121_v44  ;;  %v2459_v10 = vadd.f32 0.2548296, %v2331_v0  ;;  %v1948_v1 = vadd.f32 1.4214138, %v1820_v25  ;;  %v9037_v26 = vand.u32 2147483647, %v7081_v6  ;;  %v4707_v4 = vpop.eup %4706 }
 0x26b   :  { %v1823_v37 = vmul.f32 %v7072_v16, %v4122_v42  ;;  %v4245_v23 = vadd.f32 -0.28449672, %v2074_v59  ;;  %v2333_v12 = vmul.f32 %v7033_v8, %v4248_v57  ;;  %v2721_v39 = vsub.f32 0.0, %v7038_v41  ;;  %v9298_v34 = vld [vmem:[#allocation25_spill] sm:$0xff]  ;;  %v9299_v59 = vld [vmem:[#allocation6_spill] sm:$0xff] }
 0x26c   :  { %v1950_v29 = vadd.f32 1.4214138, %v1822_v36  ;;  %v2587_v13 = vmul.f32 %v7009_v49, %v2459_v10  ;;  %v7098_v25 = vmul.f32 0.70710677, %v9037_v26  ;;  %v4709_v42 = vpop.eup %4708  ;;  %v2584_v9 = vmul.f32 %v6955_v27, %v2456_v48 }
 0x26d   :  { %v1951_v31 = vadd.f32 1.4214138, %v1823_v37  ;;  %v2461_v44 = vadd.f32 0.2548296, %v2333_v12  ;;  %v2847_v24 = vmul.f32 %v2719_v56, %v6999_v54  ;;  %v4391_v0 = vpack.c.bf16 %v9299_v59, %v9298_v34 }
 0x26e   :  { %v7104_v57 = vpop.eup %4710  ;;  %v3227_v36 = vmul.f32 %v4707_v4, %v2587_v13  ;;  %v2076_v10 = vmul.f32 %v7053_v60, %v1948_v1  ;;  %v1186_v37 = vmul.f32 0.3275911, %v7098_v25  ;;  %v2330_v26 = vmul.f32 %v6991_v50, %v4245_v23  ;;  %v9300_v13 = vld [vmem:[#allocation20_spill] sm:$0xff]  ;;  %v9301_v1 = vld [vmem:[#allocation17_spill] sm:$0xff] }
 0x26f   :  { %v2079_v49 = vmul.f32 %v7072_v16, %v1951_v31  ;;  %v2589_v18 = vmul.f32 %v7033_v8, %v2461_v44  ;;  %v2078_v27 = vmul.f32 %v7067_v52, %v1950_v29  ;;  %v1569_v54 = vmul.f32 1.0614054, %v7104_v57  ;;  %4392 = vmatprep.subr.bf16.mxu1 %v4391_v0  ;;  %v7121_v29 = vpop.f32.mrb[44].mxu1 }
 0x270   :  { %v3355_v56 = vsub.f32 1.0, %v3227_v36  ;;  %v2849_v12 = vmul.f32 %v2721_v39, %v7038_v41  ;;  %v1314_v4 = vadd.f32 1.0, %v1186_v37  ;;  %v9302_v34 = vpack.c.bf16 %v9300_v13, %v9301_v1 }
 0x271   :  { %v4250_v48 = vadd.f32 -0.28449672, %v2079_v49  ;;  %v7117_v31 = vpop.eup %4712  ;;  %v7119_v59 = vmul.f32 0.5, %v3609_v32  ;;  %v3229_v23 = vmul.f32 %v4709_v42, %v2589_v18  ;;  %v3039_v8 = vmul.f32 1.442695, %v2847_v24  ;;  %v7130_v18 = vpop.f32.mrb[45].mxu0 }
 0x272   :  { %4394 = vmatpush1.bf16.msra.mxu1 %v9302_v34  ;;  %v4124_v44 = vadd.f32 -1.4531521, %v1569_v54  ;;  %v7123_v11 = vpop.eup %4714  ;;  %v3224_v0 = vmul.f32 %v7048_v47, %v2584_v9  ;;  %v9304_v41 = vand.u32 2147483647, %v6922_v35  ;;  %v4247_v36 = vadd.f32 -0.28449672, %v2076_v10 }
 0x273   :  { %9303 = vst [vmem:[#allocation16_spill] sm:$0xff] %v7119_v59  ;;  %4716 = vrcp.f32 %v1314_v4  ;;  %v3357_v49 = vsub.f32 1.0, %v3229_v23  ;;  %v4249_v37 = vadd.f32 -0.28449672, %v2078_v27  ;;  %v1568_v32 = vmul.f32 1.0614054, %v7123_v11 }
 0x274   :  { %v3483_v39 = vmul.f32 %v3355_v56, %v9304_v41  ;;  %v1825_v13 = vmul.f32 %v7104_v57, %v4124_v44  ;;  %v2458_v42 = vadd.f32 0.2548296, %v2330_v26  ;;  %v2335_v54 = vmul.f32 %v7072_v16, %v4250_v48  ;;  %v7136_v4 = vpop.f32.mrb[45].mxu1 }
 0x275   :  { %v3043_v1 = vmul.f32 1.442695, %v2849_v12  ;;  %v9305_v47 = vand.u32 2147483647, %v6925_v61  ;;  %4718 = vpow2.f32 %v3039_v8  ;;  %v4123_v56 = vadd.f32 -1.4531521, %v1568_v32 }
 0x276   :  { %v3611_v24 = vadd.f32 %v3483_v39, %v6922_v35  ;;  %v1953_v10 = vadd.f32 1.4214138, %v1825_v13  ;;  %v2332_v34 = vmul.f32 %v7053_v60, %v4247_v36  ;;  %4720 = vpow2.f32 %v3037_v7 }
 0x277   :  { %v3485_v9 = vmul.f32 %v3357_v49, %v9305_v47  ;;  %v2720_v26 = vsub.f32 0.0, %v7046_v28  ;;  %v2334_v48 = vmul.f32 %v7067_v52, %v4249_v37  ;;  %v1824_v23 = vmul.f32 %v7123_v11, %v4123_v56  ;;  %v180_v49 = vpop.permute.xlu1 %179 }
 0x278   :  { %v7138_v27 = vmul.f32 0.5, %v3611_v24  ;;  %v2081_v12 = vmul.f32 %v7104_v57, %v1953_v10  ;;  %v3352_v8 = vsub.f32 1.0, %v3224_v0  ;;  %v2586_v44 = vmul.f32 %v6991_v50, %v2458_v42 }
 0x279   :  { %v3613_v35 = vadd.f32 %v3485_v9, %v6925_v61  ;;  %v2463_v39 = vadd.f32 0.2548296, %v2335_v54  ;;  %4722 = vpow2.f32 %v3043_v1  ;;  %v1952_v13 = vadd.f32 1.4214138, %v1824_v23 }
 0x27a   :  { %9306 = vst [vmem:[#allocation41_spill] sm:$0xff] %v7138_v27  ;;  %v4252_v7 = vadd.f32 -0.28449672, %v2081_v12  ;;  %v2460_v61 = vadd.f32 0.2548296, %v2332_v34  ;;  %v2848_v37 = vmul.f32 %v2720_v26, %v7046_v28  ;;  %v7153_v32 = vadd.f32 %v6551_v63, %v180_v49 }
 0x27b   :  { %v7149_v36 = vmul.f32 0.5, %v3613_v35  ;;  %v7156_v0 = vadd.f32 %v6569_v62, %v180_v49  ;;  %v2462_v42 = vadd.f32 0.2548296, %v2334_v48  ;;  %v2080_v54 = vmul.f32 %v7123_v11, %v1952_v13 }
 0x27c   :  { %v2337_v24 = vmul.f32 %v7104_v57, %v4252_v7  ;;  %v3606_v1 = vadd.f32 %v7027_v45, %v6722_v17  ;;  %v2591_v28 = vmul.f32 %v7072_v16, %v2463_v39  ;;  %v9043_v63 = vand.u32 2147483647, %v7153_v32 }
 0x27d   :  { %9307 = vst [vmem:[#allocation25_spill] sm:$0xff] %v7149_v36  ;;  %v7162_v47 = vpop.eup %4716  ;;  %v9042_v62 = vand.u32 2147483647, %v7156_v0  ;;  %v9308_v9 = vand.u32 2147483647, %v6849_v2  ;;  %v3226_v56 = vmul.f32 %v7062_v15, %v2586_v44  ;;  %v7178_v45 = vadd.f32 %v6586_v3, %v180_v49 }
 0x27e   :  { %v2465_v34 = vadd.f32 0.2548296, %v2337_v24  ;;  %v1570_v26 = vmul.f32 1.0614054, %v7162_v47  ;;  %v4251_v35 = vadd.f32 -0.28449672, %v2080_v54  ;;  %v2588_v12 = vmul.f32 %v7053_v60, %v2460_v61 }
 0x27f   :  { %v3480_v10 = vmul.f32 %v3352_v8, %v9308_v9  ;;  %v1059_v48 = vmul.f32 0.70710677, %v9043_v63  ;;  %v1061_v17 = vmul.f32 0.70710677, %v9042_v62  ;;  %v4719_v16 = vpop.eup %4718  ;;  %v2590_v23 = vmul.f32 %v7067_v52, %v2462_v42 }
 0x280   :  { %v3041_v8 = vmul.f32 1.442695, %v2848_v37  ;;  %v2722_v15 = vsub.f32 0.0, %v7098_v25  ;;  %v4721_v44 = vpop.eup %4720  ;;  %v7183_v39 = vmul.f32 0.5, %v3606_v1  ;;  %v3231_v7 = vmul.f32 %v4719_v16, %v2591_v28 }
 0x281   :  { %v1187_v13 = vmul.f32 0.3275911, %v1059_v48  ;;  %v1189_v24 = vmul.f32 0.3275911, %v1061_v17  ;;  %v3608_v54 = vadd.f32 %v3480_v10, %v6849_v2  ;;  %v3354_v9 = vsub.f32 1.0, %v3226_v56  ;;  %v7198_v10 = vpop.f32.mrb[46].mxu0 }
 0x282   :  { %9309 = vst [vmem:[#allocation6_spill] sm:$0xff] %v7183_v39  ;;  %v2593_v3 = vmul.f32 %v7104_v57, %v2465_v34  ;;  %v4125_v50 = vadd.f32 -1.4531521, %v1570_v26  ;;  %v2336_v41 = vmul.f32 %v7123_v11, %v4251_v35  ;;  %v9041_v52 = vand.u32 2147483647, %v7178_v45  ;;  %v7200_v56 = vpop.f32.mrb[46].mxu1 }
 0x283   :  { %v1315_v60 = vadd.f32 1.0, %v1187_v13  ;;  %v1317_v61 = vadd.f32 1.0, %v1189_v24  ;;  %v4723_v37 = vpop.eup %4722  ;;  %v3228_v42 = vmul.f32 %v7117_v31, %v2588_v12  ;;  %v3230_v1 = vmul.f32 %v4721_v44, %v2590_v23 }
 0x284   :  { %4724 = vpow2.f32 %v3041_v8  ;;  %v2850_v28 = vmul.f32 %v2722_v15, %v7098_v25  ;;  %v3359_v16 = vsub.f32 1.0, %v3231_v7  ;;  %v7193_v2 = vmul.f32 0.70710677, %v9041_v52  ;;  %v7208_v15 = vpop.f32.mrb[47].mxu0  ;;  %v9321_v52 = vld [vmem:[#allocation37_spill] sm:$0xff] }
 0x285   :  { %4726 = vrcp.f32 %v1315_v60  ;;  %v7196_v57 = vadd.f32 %v6596_v19, %v180_v49  ;;  %v3233_v34 = vmul.f32 %v4723_v37, %v2593_v3  ;;  %v1826_v31 = vmul.f32 %v7162_v47, %v4125_v50  ;;  %v185_v19 = vpop.permute.xlu0 %184  ;;  %v7316_v27 = vpop.f32.mrb[48].mxu0 }
 0x286   :  { %v2723_v26 = vsub.f32 0.0, %v1059_v48  ;;  %4728 = vrcp.f32 %v1317_v61  ;;  %v7203_v35 = vmul.f32 0.5, %v3608_v54  ;;  %v9311_v25 = vand.u32 2147483647, %v6857_v5 }
 0x287   :  { %v2464_v23 = vadd.f32 0.2548296, %v2336_v41  ;;  %v1188_v8 = vmul.f32 0.3275911, %v7193_v2  ;;  %v3356_v49 = vsub.f32 1.0, %v3228_v42  ;;  %v2725_v7 = vsub.f32 0.0, %v1061_v17 }
 0x288   :  { %9310 = vst [vmem:[#allocation20_spill] sm:$0xff] %v7203_v35  ;;  %v3482_v12 = vmul.f32 %v3354_v9, %v9311_v25  ;;  %v3045_v44 = vmul.f32 1.442695, %v2850_v28  ;;  %v9040_v13 = vand.u32 2147483647, %v7196_v57  ;;  %v3358_v24 = vsub.f32 1.0, %v3230_v1 }
 0x289   :  { %v9312_v50 = vand.u32 2147483647, %v6960_v53  ;;  %v1316_v54 = vadd.f32 1.0, %v1188_v8  ;;  %v7214_v60 = vadd.f32 %v6635_v51, %v185_v19  ;;  %v3361_v9 = vsub.f32 1.0, %v3233_v34 }
 0x28a   :  { %v1954_v41 = vadd.f32 1.4214138, %v1826_v31  ;;  %v2851_v61 = vmul.f32 %v2723_v26, %v1059_v48  ;;  %v7218_v37 = vmul.f32 0.70710677, %v9040_v13  ;;  %v2592_v42 = vmul.f32 %v7123_v11, %v2464_v23 }
 0x28b   :  { %v3487_v3 = vmul.f32 %v3359_v16, %v9312_v50  ;;  %4730 = vrcp.f32 %v1316_v54  ;;  %v9039_v28 = vand.u32 2147483647, %v7214_v60  ;;  %v7223_v1 = vadd.f32 %v6637_v40, %v185_v19 }
 0x28c   :  { %v7226_v16 = vadd.f32 %v3482_v12, %v6857_v5  ;;  %v9313_v51 = vand.u32 2147483647, %v6937_v30  ;;  %v2853_v48 = vmul.f32 %v2725_v7, %v1061_v17  ;;  %v1190_v31 = vmul.f32 0.3275911, %v7218_v37 }
 0x28d   :  { %v9314_v26 = vand.u32 2147483647, %v6953_v22  ;;  %4732 = vpow2.f32 %v3045_v44  ;;  %v7239_v11 = vmul.f32 0.70710677, %v9039_v28  ;;  %v9038_v40 = vand.u32 2147483647, %v7223_v1 }
 0x28e   :  { %v7230_v34 = vmul.f32 %v3356_v49, %v9313_v51  ;;  %v4725_v5 = vpop.eup %4724  ;;  %v3615_v12 = vadd.f32 %v3487_v3, %v6960_v53  ;;  %v2082_v23 = vmul.f32 %v7162_v47, %v1954_v41  ;;  %v3047_v8 = vmul.f32 1.442695, %v2851_v61 }
 0x28f   :  { %v7235_v25 = vmul.f32 %v3358_v24, %v9314_v26  ;;  %v1318_v17 = vadd.f32 1.0, %v1190_v31  ;;  %v7244_v49 = vpop.eup %4726  ;;  %v9315_v7 = vand.u32 2147483647, %v7015_v38  ;;  %v3232_v50 = vmul.f32 %v4725_v5, %v2592_v42  ;;  %v7264_v26 = vpop.f32.mrb[47].mxu1 }
 0x290   :  { %v1191_v44 = vmul.f32 0.3275911, %v7239_v11  ;;  %v7251_v54 = vmul.f32 0.70710677, %v9038_v40  ;;  %v7253_v51 = vpop.eup %4728  ;;  %v1571_v53 = vmul.f32 1.0614054, %v7244_v49  ;;  %v7257_v41 = vadd.f32 %v6670_v58, %v185_v19 }
 0x291   :  { %v3489_v24 = vmul.f32 %v3361_v9, %v9315_v7  ;;  %v3051_v3 = vmul.f32 1.442695, %v2853_v48  ;;  %4734 = vrcp.f32 %v1318_v17  ;;  %v1573_v61 = vmul.f32 1.0614054, %v7253_v51  ;;  %9316 = vst [vmem:[#allocation17_spill] sm:$0xff] %v7264_v26 }
 0x292   :  { %v1319_v31 = vadd.f32 1.0, %v1191_v44  ;;  %v1193_v9 = vmul.f32 0.3275911, %v7251_v54  ;;  %v7262_v42 = vadd.f32 %v6696_v20, %v185_v19  ;;  %v7266_v5 = vmul.f32 0.5, %v3615_v12 }
 0x293   :  { %v4253_v7 = vadd.f32 -0.28449672, %v2082_v23  ;;  %v4126_v40 = vadd.f32 -1.4531521, %v1571_v53  ;;  %4736 = vpow2.f32 %v3047_v8  ;;  %v4128_v48 = vadd.f32 -1.4531521, %v1573_v61 }
 0x294   :  { %9317 = vst [vmem:[#allocation57_spill] sm:$0xff] %v7266_v5  ;;  %v2724_v17 = vsub.f32 0.0, %v7193_v2  ;;  %4738 = vrcp.f32 %v1319_v31  ;;  %v1321_v58 = vadd.f32 1.0, %v1193_v9  ;;  %v3617_v28 = vadd.f32 %v3489_v24, %v7015_v38  ;;  %v9318_v8 = vld [vmem:[#allocation30_spill] sm:$0xff]  ;;  %v9319_v53 = vld [vmem:[#allocation32_spill] sm:$0xff] }
 0x295   :  { %v3360_v44 = vsub.f32 1.0, %v3232_v50  ;;  %v1827_v13 = vmul.f32 %v7244_v49, %v4126_v40  ;;  %v9045_v20 = vand.u32 2147483647, %v7257_v41  ;;  %v7272_v19 = vpop.eup %4730  ;;  %v1829_v12 = vmul.f32 %v7253_v51, %v4128_v48  ;;  %9330 = vst [vmem:[#allocation32_spill] sm:$0xff] %v7316_v27 }
 0x296   :  { %4740 = vpow2.f32 %v3051_v3  ;;  %v9046_v23 = vand.u32 2147483647, %v7262_v42  ;;  %v4331_v61 = vpack.c.bf16 %v9319_v53, %v9318_v8  ;;  %v2338_v31 = vmul.f32 %v7162_v47, %v4253_v7  ;;  %v9320_v3 = vld [vmem:[#allocation31_spill] sm:$0xff]  ;;  %v9323_v53 = vld [vmem:[#allocation2_spill] sm:$0xff] }
 0x297   :  { %v1955_v9 = vadd.f32 1.4214138, %v1827_v13  ;;  %v1572_v38 = vmul.f32 1.0614054, %v7272_v19  ;;  %4742 = vrcp.f32 %v1321_v58  ;;  %v7280_v24 = vpop.eup %4732  ;;  %v1957_v40 = vadd.f32 1.4214138, %v1829_v12 }
 0x298   :  { %v2726_v50 = vsub.f32 0.0, %v7218_v37  ;;  %v7285_v48 = vmul.f32 0.70710677, %v9045_v20  ;;  %4332 = vmatprep.subr.bf16.mxu0 %v4331_v61  ;;  %v4395_v62 = vpack.c.bf16 %v9321_v52, %v9320_v3  ;;  %v2852_v13 = vmul.f32 %v2724_v17, %v7193_v2  ;;  %v9322_v12 = vld [vmem:[#allocation28_spill] sm:$0xff] }
 0x299   :  { %v2083_v8 = vmul.f32 %v7244_v49, %v1955_v9  ;;  %v4127_v7 = vadd.f32 -1.4531521, %v1572_v38  ;;  %v7293_v58 = vmul.f32 0.70710677, %v9046_v23  ;;  %v9324_v63 = vpack.c.bf16 %v9322_v12, %v9323_v53 }
 0x29a   :  { %v7298_v59 = vmul.f32 0.5, %v3617_v28  ;;  %v9326_v61 = vand.u32 2147483647, %v7019_v55  ;;  %v2085_v52 = vmul.f32 %v7253_v51, %v1957_v40  ;;  %v1192_v9 = vmul.f32 0.3275911, %v7285_v48  ;;  %4396 = vmatprep.subr.bf16.mxu1 %v4395_v62  ;;  %v9328_v28 = vld [vmem:[#allocation26_spill] sm:$0xff] }
 0x29b   :  { %4334 = vmatpush1.bf16.msra.mxu0 %v9324_v63  ;;  %v7306_v2 = vpop.eup %4734  ;;  %v2466_v17 = vadd.f32 0.2548296, %v2338_v31  ;;  %v4254_v38 = vadd.f32 -0.28449672, %v2083_v8  ;;  %v1828_v3 = vmul.f32 %v7272_v19, %v4127_v7  ;;  %v1194_v12 = vmul.f32 0.3275911, %v7293_v58 }
 0x29c   :  { %9325 = vst [vmem:[#allocation30_spill] sm:$0xff] %v7298_v59  ;;  %v7302_v20 = vmul.f32 %v3360_v44, %v9326_v61  ;;  %v9327_v63 = vld [vmem:[#allocation29_spill] sm:$0xff]  ;;  %v4256_v23 = vadd.f32 -0.28449672, %v2085_v52  ;;  %v1574_v44 = vmul.f32 1.0614054, %v7306_v2  ;;  %v2854_v40 = vmul.f32 %v2726_v50, %v7218_v37 }
 0x29d   :  { %v9329_v53 = vpack.c.bf16 %v9327_v63, %v9328_v28  ;;  %v1320_v61 = vadd.f32 1.0, %v1192_v9  ;;  %v4737_v36 = vpop.eup %4736  ;;  %v2339_v62 = vmul.f32 %v7244_v49, %v4254_v38  ;;  %v1956_v33 = vadd.f32 1.4214138, %v1828_v3  ;;  %v7324_v38 = vpop.permute.xlu1 %189  ;;  %v9351_v59 = vld [vmem:[#allocation42_spill] sm:$0xff] }
 0x29e   :  { %v3049_v31 = vmul.f32 1.442695, %v2852_v13  ;;  %v1322_v8 = vadd.f32 1.0, %v1194_v12  ;;  %v7318_v7 = vpop.eup %4738  ;;  %v2341_v35 = vmul.f32 %v7253_v51, %v4256_v23  ;;  %v4129_v63 = vadd.f32 -1.4531521, %v1574_v44 }
 0x29f   :  { %4398 = vmatpush1.bf16.msra.mxu1 %v9329_v53  ;;  %v2727_v52 = vsub.f32 0.0, %v7239_v11  ;;  %4744 = vrcp.f32 %v1320_v61  ;;  %v2467_v28 = vadd.f32 0.2548296, %v2339_v62  ;;  %v2084_v37 = vmul.f32 %v7272_v19, %v1956_v33  ;;  %v9331_v33 = vld [vmem:[#allocation50_spill] sm:$0xff] }
 0x2a0   :  { %v1575_v50 = vmul.f32 1.0614054, %v7318_v7  ;;  %4746 = vrcp.f32 %v1322_v8  ;;  %v4741_v9 = vpop.eup %4740  ;;  %v2594_v13 = vmul.f32 %v7162_v47, %v2466_v17  ;;  %v2469_v3 = vadd.f32 0.2548296, %v2341_v35  ;;  %v7335_v8 = vpop.f32.mrb[48].mxu1 }
 0x2a1   :  { %v1830_v12 = vmul.f32 %v7306_v2, %v4129_v63  ;;  %v3053_v53 = vmul.f32 1.442695, %v2854_v40  ;;  %v7328_v23 = vpop.eup %4742  ;;  %v2595_v44 = vmul.f32 %v7244_v49, %v2467_v28  ;;  %v4255_v61 = vadd.f32 -0.28449672, %v2084_v37 }
 0x2a2   :  { %v4130_v62 = vadd.f32 -1.4531521, %v1575_v50  ;;  %v7333_v39 = vadd.f32 %v9331_v33, %v7324_v38  ;;  %v2597_v27 = vmul.f32 %v7253_v51, %v2469_v3  ;;  %v2855_v47 = vmul.f32 %v2727_v52, %v7239_v11 }
 0x2a3   :  { %v1958_v26 = vadd.f32 1.4214138, %v1830_v12  ;;  %v1577_v35 = vmul.f32 1.0614054, %v7328_v23  ;;  %v3235_v17 = vmul.f32 %v4737_v36, %v2595_v44  ;;  %v2729_v49 = vsub.f32 0.0, %v7251_v54 }
 0x2a4   :  { %v1831_v40 = vmul.f32 %v7318_v7, %v4130_v62  ;;  %v9050_v63 = vand.u32 2147483647, %v7333_v39  ;;  %v3237_v28 = vmul.f32 %v4741_v9, %v2597_v27  ;;  %v2340_v37 = vmul.f32 %v7272_v19, %v4255_v61 }
 0x2a5   :  { %v2086_v50 = vmul.f32 %v7306_v2, %v1958_v26  ;;  %v4132_v33 = vadd.f32 -1.4531521, %v1577_v35  ;;  %v3234_v51 = vmul.f32 %v7280_v24, %v2594_v13  ;;  %v3363_v3 = vsub.f32 1.0, %v3235_v17  ;;  %v7359_v17 = vpop.f32.mrb[49].mxu0 }
 0x2a6   :  { %4748 = vpow2.f32 %v3049_v31  ;;  %v1959_v11 = vadd.f32 1.4214138, %v1831_v40  ;;  %v3365_v52 = vsub.f32 1.0, %v3237_v28  ;;  %v9332_v44 = vand.u32 2147483647, %v7153_v32 }
 0x2a7   :  { %v4257_v12 = vadd.f32 -0.28449672, %v2086_v50  ;;  %4750 = vpow2.f32 %v3053_v53  ;;  %v1833_v36 = vmul.f32 %v7328_v23, %v4132_v33  ;;  %v3055_v9 = vmul.f32 1.442695, %v2855_v47 }
 0x2a8   :  { %v3491_v62 = vmul.f32 %v3363_v3, %v9332_v44  ;;  %v2087_v27 = vmul.f32 %v7318_v7, %v1959_v11  ;;  %v7352_v26 = vmul.f32 0.70710677, %v9050_v63  ;;  %v9333_v24 = vand.u32 2147483647, %v7156_v0  ;;  %v7369_v3 = vpop.f32.mrb[49].mxu1 }
 0x2a9   :  { %v7354_v61 = vpop.eup %4744  ;;  %v2468_v13 = vadd.f32 0.2548296, %v2340_v37  ;;  %v1961_v35 = vadd.f32 1.4214138, %v1833_v36  ;;  %v2857_v53 = vmul.f32 %v2729_v49, %v7251_v54  ;;  %v7367_v33 = vadd.f32 %v6786_v43, %v7324_v38 }
 0x2aa   :  { %v3493_v31 = vmul.f32 %v3365_v52, %v9333_v24  ;;  %v7361_v40 = vpop.eup %4746  ;;  %v3619_v28 = vadd.f32 %v3491_v62, %v7153_v32  ;;  %v4258_v47 = vadd.f32 -0.28449672, %v2087_v27  ;;  %v1576_v50 = vmul.f32 1.0614054, %v7354_v61 }
 0x2ab   :  { %v2342_v11 = vmul.f32 %v7306_v2, %v4257_v12  ;;  %v2089_v54 = vmul.f32 %v7328_v23, %v1961_v35  ;;  %v1578_v49 = vmul.f32 1.0614054, %v7361_v40  ;;  %v1195_v44 = vmul.f32 0.3275911, %v7352_v26 }
 0x2ac   :  { %v3621_v37 = vadd.f32 %v3493_v31, %v7156_v0  ;;  %v7375_v52 = vmul.f32 0.5, %v3619_v28  ;;  %v2343_v32 = vmul.f32 %v7318_v7, %v4258_v47  ;;  %v4131_v36 = vadd.f32 -1.4531521, %v1576_v50 }
 0x2ad   :  { %v2596_v43 = vmul.f32 %v7272_v19, %v2468_v13  ;;  %4752 = vpow2.f32 %v3055_v9  ;;  %v4260_v27 = vadd.f32 -0.28449672, %v2089_v54  ;;  %v3362_v0 = vsub.f32 1.0, %v3234_v51 }
 0x2ae   :  { %9334 = vst [vmem:[#allocation31_spill] sm:$0xff] %v7375_v52  ;;  %v7379_v62 = vmul.f32 0.5, %v3621_v37  ;;  %v3059_v24 = vmul.f32 1.442695, %v2857_v53  ;;  %v4133_v31 = vadd.f32 -1.4531521, %v1578_v49  ;;  %v1832_v19 = vmul.f32 %v7354_v61, %v4131_v36 }
 0x2af   :  { %v2470_v28 = vadd.f32 0.2548296, %v2342_v11  ;;  %v2728_v47 = vsub.f32 0.0, %v7285_v48  ;;  %v2730_v50 = vsub.f32 0.0, %v7293_v58  ;;  %v2471_v63 = vadd.f32 0.2548296, %v2343_v32 }
 0x2b0   :  { %9335 = vst [vmem:[#allocation37_spill] sm:$0xff] %v7379_v62  ;;  %v4749_v37 = vpop.eup %4748  ;;  %v1323_v9 = vadd.f32 1.0, %v1195_v44  ;;  %v9054_v51 = vand.u32 2147483647, %v7367_v33  ;;  %v7391_v54 = vmul.f32 0.5, %v7226_v16  ;;  %v3612_v53 = vadd.f32 %v7230_v34, %v6937_v30 }
 0x2b1   :  { %v4751_v13 = vpop.eup %4750  ;;  %v3236_v49 = vmul.f32 %v4749_v37, %v2596_v43  ;;  %v2345_v11 = vmul.f32 %v7328_v23, %v4260_v27  ;;  %v3614_v35 = vadd.f32 %v7235_v25, %v6953_v22  ;;  %v3616_v32 = vadd.f32 %v7302_v20, %v7019_v55  ;;  %v9338_v20 = vld [vmem:[#allocation52_spill] sm:$0xff] }
 0x2b2   :  { %9336 = vst [vmem:[#allocation28_spill] sm:$0xff] %v7391_v54  ;;  %v1834_v36 = vmul.f32 %v7361_v40, %v4133_v31  ;;  %4754 = vrcp.f32 %v1323_v9  ;;  %v9337_v44 = vand.u32 2147483647, %v7081_v6  ;;  %v2598_v16 = vmul.f32 %v7306_v2, %v2470_v28 }
 0x2b3   :  { %4756 = vpow2.f32 %v3059_v24  ;;  %v2856_v30 = vmul.f32 %v2728_v47, %v7285_v48  ;;  %v2599_v34 = vmul.f32 %v7318_v7, %v2471_v63  ;;  %v1960_v43 = vadd.f32 1.4214138, %v1832_v19 }
 0x2b4   :  { %v3490_v12 = vmul.f32 %v3362_v0, %v9337_v44  ;;  %v2858_v27 = vmul.f32 %v2730_v50, %v7293_v58  ;;  %v1069_v22 = vmul.f32 0.70710677, %v9054_v51  ;;  %v3364_v55 = vsub.f32 1.0, %v3236_v49  ;;  %v195_v44 = vpop.permute.xlu0 %194 }
 0x2b5   :  { %v2473_v25 = vadd.f32 0.2548296, %v2345_v11  ;;  %v7411_v31 = vadd.f32 %v9338_v20, %v7324_v38  ;;  %v7415_v2 = vadd.f32 %v6835_v14, %v7324_v38  ;;  %v7417_v0 = vmul.f32 0.5, %v3612_v53 }
 0x2b6   :  { %v1962_v48 = vadd.f32 1.4214138, %v1834_v36  ;;  %v2731_v7 = vsub.f32 0.0, %v7352_v26  ;;  %v1197_v63 = vmul.f32 0.3275911, %v1069_v22  ;;  %v7420_v24 = vmul.f32 0.5, %v3614_v35 }
 0x2b7   :  { %9339 = vst [vmem:[#allocation2_spill] sm:$0xff] %v7417_v0  ;;  %v4753_v58 = vpop.eup %4752  ;;  %v7422_v28 = vmul.f32 0.5, %v3616_v32  ;;  %v3238_v47 = vmul.f32 %v4751_v13, %v2598_v16  ;;  %v3057_v50 = vmul.f32 1.442695, %v2856_v30  ;;  %v2088_v19 = vmul.f32 %v7354_v61, %v1960_v43 }
 0x2b8   :  { %9340 = vst [vmem:[#allocation29_spill] sm:$0xff] %v7420_v24  ;;  %v3239_v37 = vmul.f32 %v4753_v58, %v2599_v34  ;;  %v3061_v9 = vmul.f32 1.442695, %v2858_v27  ;;  %v1325_v49 = vadd.f32 1.0, %v1197_v63  ;;  %v3618_v14 = vadd.f32 %v3490_v12, %v7081_v6  ;;  %v7448_v27 = vpop.f32.mrb[50].mxu1 }
 0x2b9   :  { %9341 = vst [vmem:[#allocation26_spill] sm:$0xff] %v7422_v28  ;;  %v9342_v38 = vand.u32 2147483647, %v7178_v45  ;;  %v9052_v11 = vand.u32 2147483647, %v7411_v31  ;;  %v2601_v35 = vmul.f32 %v7328_v23, %v2473_v25  ;;  %v2090_v32 = vmul.f32 %v7361_v40, %v1962_v48 }
 0x2ba   :  { %v9051_v36 = vand.u32 2147483647, %v7415_v2  ;;  %v2859_v13 = vmul.f32 %v2731_v7, %v7352_v26  ;;  %4758 = vrcp.f32 %v1325_v49  ;;  %v3366_v16 = vsub.f32 1.0, %v3238_v47  ;;  %v7446_v26 = vpop.f32.mrb[50].mxu0 }
 0x2bb   :  { %v3492_v53 = vmul.f32 %v3364_v55, %v9342_v38  ;;  %4760 = vpow2.f32 %v3057_v50  ;;  %v7435_v6 = vmul.f32 0.70710677, %v9052_v11  ;;  %v3367_v34 = vsub.f32 1.0, %v3239_v37 }
 0x2bc   :  { %v7439_v12 = vmul.f32 0.70710677, %v9051_v36  ;;  %v7441_v30 = vpop.eup %4754  ;;  %v4259_v23 = vadd.f32 -0.28449672, %v2088_v19  ;;  %4762 = vpow2.f32 %v3061_v9  ;;  %v7444_v43 = vadd.f32 %v6859_v46, %v195_v44 }
 0x2bd   :  { %v4757_v55 = vpop.eup %4756  ;;  %v3620_v25 = vadd.f32 %v3492_v53, %v7178_v45  ;;  %v1579_v20 = vmul.f32 1.0614054, %v7441_v30  ;;  %v2733_v48 = vsub.f32 0.0, %v1069_v22  ;;  %v1196_v7 = vmul.f32 0.3275911, %v7435_v6 }
 0x2be   :  { %v3241_v63 = vmul.f32 %v4757_v55, %v2601_v35  ;;  %v4261_v58 = vadd.f32 -0.28449672, %v2090_v32  ;;  %v3063_v47 = vmul.f32 1.442695, %v2859_v13  ;;  %v1198_v50 = vmul.f32 0.3275911, %v7439_v12 }
 0x2bf   :  { %v9343_v46 = vand.u32 2147483647, %v7196_v57  ;;  %v4134_v19 = vadd.f32 -1.4531521, %v1579_v20  ;;  %v1324_v9 = vadd.f32 1.0, %v1196_v7  ;;  %v2344_v53 = vmul.f32 %v7354_v61, %v4259_v23  ;;  %v7463_v35 = vpop.f32.mrb[51].mxu0 }
 0x2c0   :  { %v9053_v49 = vand.u32 2147483647, %v7444_v43  ;;  %v9344_v38 = vand.u32 2147483647, %v7214_v60  ;;  %v1326_v36 = vadd.f32 1.0, %v1198_v50  ;;  %v7461_v11 = vadd.f32 %v6871_v21, %v195_v44  ;;  %v7474_v23 = vpop.f32.mrb[51].mxu1 }
 0x2c1   :  { %v3494_v37 = vmul.f32 %v3366_v16, %v9343_v46  ;;  %v1835_v32 = vmul.f32 %v7441_v30, %v4134_v19  ;;  %v2861_v13 = vmul.f32 %v2733_v48, %v1069_v22  ;;  %4764 = vrcp.f32 %v1324_v9 }
 0x2c2   :  { %v3495_v45 = vmul.f32 %v3367_v34, %v9344_v38  ;;  %v7468_v16 = vmul.f32 0.70710677, %v9053_v49  ;;  %v7470_v55 = vmul.f32 0.5, %v3618_v14  ;;  %v7472_v20 = vmul.f32 0.5, %v3620_v25  ;;  %v9347_v25 = vld [vmem:[#allocation22_spill] sm:$0xff] }
 0x2c3   :  { %v3369_v34 = vsub.f32 1.0, %v3241_v63  ;;  %4766 = vrcp.f32 %v1326_v36  ;;  %v7477_v21 = vadd.f32 %v3494_v37, %v7196_v57  ;;  %v2346_v7 = vmul.f32 %v7361_v40, %v4261_v58 }
 0x2c4   :  { %9345 = vst [vmem:[#allocation50_spill] sm:$0xff] %v7470_v55  ;;  %9346 = vst [vmem:[#allocation52_spill] sm:$0xff] %v7472_v20  ;;  %v1963_v50 = vadd.f32 1.4214138, %v1835_v32  ;;  %v1199_v22 = vmul.f32 0.3275911, %v7468_v16  ;;  %v7481_v48 = vpop.eup %4758  ;;  %v3623_v46 = vadd.f32 %v3495_v45, %v7214_v60  ;;  %4768 = vpow2.f32 %v3063_v47 }
 0x2c5   :  { %v9058_v14 = vand.u32 2147483647, %v7461_v11  ;;  %v7486_v63 = vadd.f32 %v9347_v25, %v195_v44  ;;  %v4761_v36 = vpop.eup %4760  ;;  %v2472_v19 = vadd.f32 0.2548296, %v2344_v53  ;;  %v1581_v37 = vmul.f32 1.0614054, %v7481_v48 }
 0x2c6   :  { %v2091_v57 = vmul.f32 %v7441_v30, %v1963_v50  ;;  %v3067_v58 = vmul.f32 1.442695, %v2861_v13  ;;  %v7490_v9 = vpop.eup %4762  ;;  %v9348_v38 = vand.u32 2147483647, %v7223_v1  ;;  %v1327_v49 = vadd.f32 1.0, %v1199_v22  ;;  %v9349_v53 = vld [vmem:[#allocation8_spill] sm:$0xff] }
 0x2c7   :  { %v7496_v60 = vmul.f32 0.70710677, %v9058_v14  ;;  %v9059_v47 = vand.u32 2147483647, %v7486_v63  ;;  %v4136_v25 = vadd.f32 -1.4531521, %v1581_v37  ;;  %v7500_v51 = vadd.f32 %v9349_v53, %v195_v44 }
 0x2c8   :  { %v3497_v32 = vmul.f32 %v3369_v34, %v9348_v38  ;;  %v4262_v45 = vadd.f32 -0.28449672, %v2091_v57  ;;  %v9350_v50 = vld [vmem:[#allocation38_spill] sm:$0xff]  ;;  %v7504_v62 = vmul.f32 0.5, %v3623_v46  ;;  %v2474_v5 = vadd.f32 0.2548296, %v2346_v7 }
 0x2c9   :  { %v4335_v13 = vpack.c.bf16 %v9351_v59, %v9350_v50  ;;  %4770 = vrcp.f32 %v1327_v49  ;;  %v1201_v34 = vmul.f32 0.3275911, %v7496_v60  ;;  %v2600_v22 = vmul.f32 %v7354_v61, %v2472_v19  ;;  %v9353_v7 = vld [vmem:[#allocation14_spill] sm:$0xff]  ;;  %v9354_v49 = vld [vmem:[#allocation43_spill] sm:$0xff]  ;;  %v9355_v53 = vld [vmem:[#allocation12_spill] sm:$0xff] }
 0x2ca   :  { %9352 = vst [vmem:[#allocation22_spill] sm:$0xff] %v7504_v62  ;;  %v2347_v38 = vmul.f32 %v7441_v30, %v4262_v45  ;;  %v1837_v14 = vmul.f32 %v7481_v48, %v4136_v25  ;;  %v7512_v57 = vmul.f32 0.70710677, %v9059_v47  ;;  %v3625_v44 = vadd.f32 %v3497_v32, %v7223_v1  ;;  %v9356_v50 = vld [vmem:[#allocation33_spill] sm:$0xff]  ;;  %v7523_v45 = vpop.permute.xlu1 %199  ;;  %v9360_v46 = vld [vmem:[#allocation34_spill] sm:$0xff] }
 0x2cb   :  { %4336 = vmatprep.subr.bf16.mxu0 %v4335_v13  ;;  %v1329_v59 = vadd.f32 1.0, %v1201_v34  ;;  %v4399_v37 = vpack.c.bf16 %v9354_v49, %v9353_v7  ;;  %v9357_v61 = vpack.c.bf16 %v9355_v53, %v9356_v50  ;;  %v7521_v19 = vpop.eup %4764  ;;  %4772 = vpow2.f32 %v3067_v58  ;;  %v9358_v7 = vld [vmem:[#allocation21_spill] sm:$0xff]  ;;  %v7534_v53 = vpop.f32.mrb[52].mxu0 }
 0x2cc   :  { %v2475_v25 = vadd.f32 0.2548296, %v2347_v38  ;;  %v1965_v47 = vadd.f32 1.4214138, %v1837_v14  ;;  %v1200_v13 = vmul.f32 0.3275911, %v7512_v57  ;;  %v7532_v49 = vadd.f32 %v9358_v7, %v7523_v45 }
 0x2cd   :  { %4338 = vmatpush1.bf16.msra.mxu0 %v9357_v61  ;;  %v7526_v1 = vpop.eup %4766  ;;  %v1580_v32 = vmul.f32 1.0614054, %v7521_v19  ;;  %v2732_v34 = vsub.f32 0.0, %v7435_v6  ;;  %4774 = vrcp.f32 %v1329_v59  ;;  %4400 = vmatprep.subr.bf16.mxu1 %v4399_v37  ;;  %v9359_v61 = vld [vmem:[#allocation35_spill] sm:$0xff]  ;;  %v2602_v59 = vmul.f32 %v7361_v40, %v2474_v5 }
 0x2ce   :  { %v2603_v38 = vmul.f32 %v7441_v30, %v2475_v25  ;;  %v2093_v14 = vmul.f32 %v7481_v48, %v1965_v47  ;;  %v1582_v58 = vmul.f32 1.0614054, %v7526_v1  ;;  %v1328_v50 = vadd.f32 1.0, %v1200_v13  ;;  %v4769_v55 = vpop.eup %4768  ;;  %v7548_v30 = vpop.f32.mrb[52].mxu1 }
 0x2cf   :  { %v9361_v52 = vpack.c.bf16 %v9359_v61, %v9360_v46  ;;  %v4135_v37 = vadd.f32 -1.4531521, %v1580_v32  ;;  %v2734_v7 = vsub.f32 0.0, %v7439_v12  ;;  %v9362_v20 = vand.u32 2147483647, %v7500_v51 }
 0x2d0   :  { %v3243_v47 = vmul.f32 %v4769_v55, %v2603_v38  ;;  %v4264_v25 = vadd.f32 -0.28449672, %v2093_v14  ;;  %v4137_v24 = vadd.f32 -1.4531521, %v1582_v58  ;;  %4776 = vrcp.f32 %v1328_v50 }
 0x2d1   :  { %4402 = vmatpush1.bf16.msra.mxu1 %v9361_v52  ;;  %v7546_v28 = vmul.f32 0.70710677, %v9362_v20  ;;  %v7550_v13 = vmul.f32 %v4761_v36, %v2600_v22  ;;  %v1836_v52 = vmul.f32 %v7521_v19, %v4135_v37  ;;  %v2860_v46 = vmul.f32 %v2732_v34, %v7435_v6 }
 0x2d2   :  { %v3371_v40 = vsub.f32 1.0, %v3243_v47  ;;  %v2349_v32 = vmul.f32 %v7481_v48, %v4264_v25  ;;  %v1838_v20 = vmul.f32 %v7526_v1, %v4137_v24  ;;  %v9061_v61 = vand.u32 2147483647, %v7532_v49 }
 0x2d3   :  { %v1202_v5 = vmul.f32 0.3275911, %v7546_v28  ;;  %v7558_v54 = vpop.eup %4770  ;;  %v1964_v55 = vadd.f32 1.4214138, %v1836_v52  ;;  %v2862_v38 = vmul.f32 %v2734_v7, %v7439_v12  ;;  %v2735_v36 = vsub.f32 0.0, %v7468_v16 }
 0x2d4   :  { %v9363_v14 = vand.u32 2147483647, %v7333_v39  ;;  %v2477_v34 = vadd.f32 0.2548296, %v2349_v32  ;;  %v1966_v58 = vadd.f32 1.4214138, %v1838_v20  ;;  %v7578_v20 = vmul.f32 %v7490_v9, %v2602_v59 }
 0x2d5   :  { %v1330_v22 = vadd.f32 1.0, %v1202_v5  ;;  %v1583_v50 = vmul.f32 1.0614054, %v7558_v54  ;;  %v2092_v37 = vmul.f32 %v7521_v19, %v1964_v55  ;;  %v3065_v24 = vmul.f32 1.442695, %v2860_v46  ;;  %v4773_v25 = vpop.eup %4772 }
 0x2d6   :  { %v3499_v6 = vmul.f32 %v3371_v40, %v9363_v14  ;;  %v7568_v47 = vmul.f32 0.70710677, %v9061_v61  ;;  %v2605_v7 = vmul.f32 %v7481_v48, %v2477_v34  ;;  %v2094_v52 = vmul.f32 %v7526_v1, %v1966_v58 }
 0x2d7   :  { %4778 = vrcp.f32 %v1330_v22  ;;  %v4138_v5 = vadd.f32 -1.4531521, %v1583_v50  ;;  %v7573_v40 = vpop.eup %4774  ;;  %v7575_v32 = vmul.f32 0.5, %v3625_v44  ;;  %v4263_v46 = vadd.f32 -0.28449672, %v2092_v37 }
 0x2d8   :  { %v3627_v12 = vadd.f32 %v3499_v6, %v7333_v39  ;;  %v1203_v55 = vmul.f32 0.3275911, %v7568_v47  ;;  %v3245_v14 = vmul.f32 %v4773_v25, %v2605_v7  ;;  %v2863_v48 = vmul.f32 %v2735_v36, %v7468_v16  ;;  %v7585_v6 = vpop.f32.mrb[53].mxu0 }
 0x2d9   :  { %9364 = vst [vmem:[#allocation8_spill] sm:$0xff] %v7575_v32  ;;  %v1839_v39 = vmul.f32 %v7558_v54, %v4138_v5  ;;  %9366 = vst [vmem:[#allocation42_spill] sm:$0xff] %v7585_v6  ;;  %4780 = vpow2.f32 %v3065_v24  ;;  %v3069_v34 = vmul.f32 1.442695, %v2862_v38  ;;  %v1585_v44 = vmul.f32 1.0614054, %v7573_v40 }
 0x2da   :  { %v7581_v22 = vmul.f32 0.5, %v3627_v12  ;;  %v1331_v58 = vadd.f32 1.0, %v1203_v55  ;;  %v7588_v50 = vpop.eup %4776  ;;  %v3373_v59 = vsub.f32 1.0, %v3245_v14  ;;  %v4265_v37 = vadd.f32 -0.28449672, %v2094_v52 }
 0x2db   :  { %v1967_v12 = vadd.f32 1.4214138, %v1839_v39  ;;  %v2348_v25 = vmul.f32 %v7521_v19, %v4263_v46  ;;  %v4140_v7 = vadd.f32 -1.4531521, %v1585_v44  ;;  %v1584_v16 = vmul.f32 1.0614054, %v7588_v50 }
 0x2dc   :  { %9365 = vst [vmem:[#allocation38_spill] sm:$0xff] %v7581_v22  ;;  %4782 = vrcp.f32 %v1331_v58  ;;  %v9367_v36 = vand.u32 2147483647, %v7367_v33  ;;  %v3071_v5 = vmul.f32 1.442695, %v2863_v48  ;;  %v2737_v55 = vsub.f32 0.0, %v7496_v60 }
 0x2dd   :  { %v2095_v24 = vmul.f32 %v7558_v54, %v1967_v12  ;;  %v3368_v61 = vsub.f32 1.0, %v7550_v13  ;;  %v1841_v14 = vmul.f32 %v7573_v40, %v4140_v7  ;;  %v4139_v52 = vadd.f32 -1.4531521, %v1584_v16  ;;  %v9368_v39 = vld [vmem:[#allocation23_spill] sm:$0xff]  ;;  %v7604_v44 = vpop.f32.mrb[53].mxu1 }
 0x2de   :  { %v3501_v38 = vmul.f32 %v3373_v59, %v9367_v36  ;;  %v7602_v46 = vadd.f32 %v9368_v39, %v7523_v45  ;;  %9369 = vst [vmem:[#allocation14_spill] sm:$0xff] %v7604_v44  ;;  %v2350_v59 = vmul.f32 %v7526_v1, %v4265_v37  ;;  %4784 = vpow2.f32 %v3069_v34 }
 0x2df   :  { %v4266_v12 = vadd.f32 -0.28449672, %v2095_v24  ;;  %v2476_v36 = vadd.f32 0.2548296, %v2348_v25  ;;  %v1969_v9 = vadd.f32 1.4214138, %v1841_v14  ;;  %v1840_v13 = vmul.f32 %v7588_v50, %v4139_v52 }
 0x2e0   :  { %v3629_v58 = vadd.f32 %v3501_v38, %v7367_v33  ;;  %v9064_v7 = vand.u32 2147483647, %v7602_v46  ;;  %4786 = vpow2.f32 %v3071_v5  ;;  %v2865_v62 = vmul.f32 %v2737_v55, %v7496_v60 }
 0x2e1   :  { %v7608_v48 = vpop.eup %4778  ;;  %v2351_v39 = vmul.f32 %v7558_v54, %v4266_v12  ;;  %v2736_v33 = vsub.f32 0.0, %v7512_v57  ;;  %v2739_v37 = vsub.f32 0.0, %v7568_v47  ;;  %v3370_v38 = vsub.f32 1.0, %v7578_v20 }
 0x2e2   :  { %v7612_v16 = vmul.f32 0.5, %v3629_v58  ;;  %v1586_v34 = vmul.f32 1.0614054, %v7608_v48  ;;  %v7621_v25 = vmul.f32 0.70710677, %v9064_v7  ;;  %v2097_v14 = vmul.f32 %v7573_v40, %v1969_v9 }
 0x2e3   :  { %v2738_v5 = vsub.f32 0.0, %v7546_v28  ;;  %v4781_v60 = vpop.eup %4780  ;;  %v2604_v55 = vmul.f32 %v7521_v19, %v2476_v36  ;;  %v2478_v52 = vadd.f32 0.2548296, %v2350_v59  ;;  %v1968_v58 = vadd.f32 1.4214138, %v1840_v13 }
 0x2e4   :  { %9370 = vst [vmem:[#allocation43_spill] sm:$0xff] %v7612_v16  ;;  %v1205_v12 = vmul.f32 0.3275911, %v7621_v25  ;;  %v7631_v22 = vmul.f32 0.5, %v7477_v21  ;;  %v9372_v7 = vand.u32 2147483647, %v7257_v41  ;;  %v2864_v9 = vmul.f32 %v2736_v33, %v7512_v57 }
 0x2e5   :  { %v2479_v0 = vadd.f32 0.2548296, %v2351_v39  ;;  %v3075_v44 = vmul.f32 1.442695, %v2865_v62  ;;  %v4141_v32 = vadd.f32 -1.4531521, %v1586_v34  ;;  %v2867_v16 = vmul.f32 %v2739_v37, %v7568_v47 }
 0x2e6   :  { %9371 = vst [vmem:[#allocation12_spill] sm:$0xff] %v7631_v22  ;;  %v3496_v20 = vmul.f32 %v3368_v61, %v9372_v7  ;;  %v7635_v24 = vpop.eup %4782  ;;  %v1333_v19 = vadd.f32 1.0, %v1205_v12  ;;  %v9373_v59 = vand.u32 2147483647, %v7262_v42  ;;  %v4268_v13 = vadd.f32 -0.28449672, %v2097_v14 }
 0x2e7   :  { %v2866_v21 = vmul.f32 %v2738_v5, %v7546_v28  ;;  %v1587_v22 = vmul.f32 1.0614054, %v7635_v24  ;;  %v3244_v6 = vmul.f32 %v4781_v60, %v2604_v55  ;;  %v2606_v61 = vmul.f32 %v7526_v1, %v2478_v52  ;;  %v9374_v28 = vld [vmem:[#allocation56_spill] sm:$0xff] }
 0x2e8   :  { %v3498_v36 = vmul.f32 %v3370_v38, %v9373_v59  ;;  %v2096_v62 = vmul.f32 %v7588_v50, %v1968_v58  ;;  %4788 = vrcp.f32 %v1333_v19  ;;  %v4785_v7 = vpop.eup %4784  ;;  %v3624_v57 = vadd.f32 %v3496_v20, %v7257_v41  ;;  %v9375_v41 = vld [vmem:[#allocation5_spill] sm:$0xff] }
 0x2e9   :  { %v2607_v47 = vmul.f32 %v7558_v54, %v2479_v0  ;;  %4790 = vpow2.f32 %v3075_v44  ;;  %v4142_v39 = vadd.f32 -1.4531521, %v1587_v22  ;;  %v3073_v33 = vmul.f32 1.442695, %v2864_v9 }
 0x2ea   :  { %v1842_v34 = vmul.f32 %v7608_v48, %v4141_v32  ;;  %v3079_v37 = vmul.f32 1.442695, %v2867_v16  ;;  %v7650_v38 = vadd.f32 %v9374_v28, %v7523_v45  ;;  %v4787_v14 = vpop.eup %4786  ;;  %v2353_v1 = vmul.f32 %v7573_v40, %v4268_v13 }
 0x2eb   :  { %v3077_v5 = vmul.f32 1.442695, %v2866_v21  ;;  %v1843_v60 = vmul.f32 %v7635_v24, %v4142_v39  ;;  %v7656_v55 = vadd.f32 %v9375_v41, %v7523_v45  ;;  %v3372_v54 = vsub.f32 1.0, %v3244_v6  ;;  %v7666_v45 = vpop.f32.mrb[54].mxu0  ;;  %v7668_v6 = vpop.f32.mrb[54].mxu1 }
 0x2ec   :  { %v3246_v0 = vmul.f32 %v4785_v7, %v2606_v61  ;;  %v4267_v22 = vadd.f32 -0.28449672, %v2096_v62  ;;  %v9071_v32 = vand.u32 2147483647, %v7650_v38  ;;  %v3247_v44 = vmul.f32 %v4787_v14, %v2607_v47 }
 0x2ed   :  { %v1971_v16 = vadd.f32 1.4214138, %v1843_v60  ;;  %v2741_v52 = vsub.f32 0.0, %v7621_v25  ;;  %v9067_v58 = vand.u32 2147483647, %v7656_v55  ;;  %v3626_v12 = vadd.f32 %v3498_v36, %v7262_v42 }
 0x2ee   :  { %v1970_v20 = vadd.f32 1.4214138, %v1842_v34  ;;  %4792 = vpow2.f32 %v3079_v37  ;;  %v7664_v9 = vmul.f32 0.70710677, %v9071_v32  ;;  %v7670_v19 = vmul.f32 0.5, %v3624_v57 }
 0x2ef   :  { %v2481_v59 = vadd.f32 0.2548296, %v2353_v1  ;;  %v2099_v13 = vmul.f32 %v7635_v24, %v1971_v16  ;;  %v7675_v21 = vmul.f32 0.70710677, %v9067_v58  ;;  %v3374_v42 = vsub.f32 1.0, %v3246_v0  ;;  %v7689_v0 = vpop.f32.mrb[55].mxu0 }
 0x2f0   :  { %9376 = vst [vmem:[#allocation33_spill] sm:$0xff] %v7670_v19  ;;  %v2352_v36 = vmul.f32 %v7588_v50, %v4267_v22  ;;  %4794 = vpow2.f32 %v3073_v33  ;;  %v1204_v61 = vmul.f32 0.3275911, %v7664_v9  ;;  %v3375_v62 = vsub.f32 1.0, %v3247_v44 }
 0x2f1   :  { %4796 = vpow2.f32 %v3077_v5  ;;  %v4270_v7 = vadd.f32 -0.28449672, %v2099_v13  ;;  %v1206_v47 = vmul.f32 0.3275911, %v7675_v21  ;;  %v9377_v39 = vand.u32 2147483647, %v7411_v31 }
 0x2f2   :  { %v7680_v57 = vpop.eup %4788  ;;  %v2098_v37 = vmul.f32 %v7608_v48, %v1970_v20  ;;  %v2869_v28 = vmul.f32 %v2741_v52, %v7621_v25  ;;  %v1332_v14 = vadd.f32 1.0, %v1204_v61  ;;  %v2609_v33 = vmul.f32 %v7573_v40, %v2481_v59  ;;  %v205_v20 = vpop.permute.xlu0 %204 }
 0x2f3   :  { %v3500_v34 = vmul.f32 %v3372_v54, %v9377_v39  ;;  %v4791_v1 = vpop.eup %4790  ;;  %v2355_v60 = vmul.f32 %v7635_v24, %v4270_v7  ;;  %v1589_v5 = vmul.f32 1.0614054, %v7680_v57  ;;  %v1334_v41 = vadd.f32 1.0, %v1206_v47  ;;  %v9381_v47 = vld [vmem:[#allocation19_spill] sm:$0xff] }
 0x2f4   :  { %v7691_v22 = vmul.f32 0.5, %v3626_v12  ;;  %v9379_v44 = vand.u32 2147483647, %v7415_v2  ;;  %v2480_v16 = vadd.f32 0.2548296, %v2352_v36  ;;  %4798 = vrcp.f32 %v1332_v14  ;;  %v7701_v12 = vpop.f32.mrb[55].mxu1 }
 0x2f5   :  { %v9380_v25 = vand.u32 2147483647, %v7444_v43  ;;  %v2483_v13 = vadd.f32 0.2548296, %v2355_v60  ;;  %v4144_v40 = vadd.f32 -1.4531521, %v1589_v5  ;;  %4800 = vrcp.f32 %v1334_v41 }
 0x2f6   :  { %9378 = vst [vmem:[#allocation21_spill] sm:$0xff] %v7691_v22  ;;  %v3502_v54 = vmul.f32 %v3374_v42, %v9379_v44  ;;  %v3628_v59 = vadd.f32 %v3500_v34, %v7411_v31  ;;  %v4269_v61 = vadd.f32 -0.28449672, %v2098_v37  ;;  %v3083_v7 = vmul.f32 1.442695, %v2869_v28 }
 0x2f7   :  { %v3503_v52 = vmul.f32 %v3375_v62, %v9380_v25  ;;  %v7699_v39 = vadd.f32 %v9381_v47, %v205_v20  ;;  %v3249_v58 = vmul.f32 %v4791_v1, %v2609_v33  ;;  %v2611_v42 = vmul.f32 %v7635_v24, %v2483_v13  ;;  %v9382_v13 = vld [vmem:[#allocation44_spill] sm:$0xff] }
 0x2f8   :  { %v1845_v36 = vmul.f32 %v7680_v57, %v4144_v40  ;;  %v7706_v14 = vadd.f32 %v7121_v29, %v205_v20  ;;  %v4793_v62 = vpop.eup %4792  ;;  %v7709_v60 = vadd.f32 %v3502_v54, %v7415_v2  ;;  %v2608_v31 = vmul.f32 %v7588_v50, %v2480_v16  ;;  %v9383_v40 = vld [vmem:[#allocation4_spill] sm:$0xff] }
 0x2f9   :  { %v9070_v34 = vand.u32 2147483647, %v7699_v39  ;;  %v7714_v37 = vadd.f32 %v7130_v18, %v205_v20  ;;  %v3631_v28 = vadd.f32 %v3503_v52, %v7444_v43  ;;  %v3251_v1 = vmul.f32 %v4793_v62, %v2611_v42 }
 0x2fa   :  { %v1973_v24 = vadd.f32 1.4214138, %v1845_v36  ;;  %v9069_v33 = vand.u32 2147483647, %v7706_v14  ;;  %v4795_v5 = vpop.eup %4794  ;;  %v2354_v29 = vmul.f32 %v7608_v48, %v4269_v61  ;;  %4802 = vpow2.f32 %v3083_v7 }
 0x2fb   :  { %v7721_v2 = vmul.f32 0.70710677, %v9070_v34  ;;  %v9068_v50 = vand.u32 2147483647, %v7714_v37  ;;  %v7724_v41 = vpop.eup %4796  ;;  %v3377_v18 = vsub.f32 1.0, %v3249_v58  ;;  %v3379_v44 = vsub.f32 1.0, %v3251_v1 }
 0x2fc   :  { %v2101_v43 = vmul.f32 %v7680_v57, %v1973_v24  ;;  %v7729_v54 = vmul.f32 0.70710677, %v9069_v33  ;;  %v7737_v52 = vadd.f32 %v7136_v4, %v205_v20  ;;  %v4339_v61 = vpack.c.bf16 %v9383_v40, %v9382_v13  ;;  %v9387_v13 = vld [vmem:[#allocation15_spill] sm:$0xff] }
 0x2fd   :  { %v1207_v16 = vmul.f32 0.3275911, %v7721_v2  ;;  %v7734_v25 = vmul.f32 0.70710677, %v9068_v50  ;;  %v3248_v58 = vmul.f32 %v4795_v5, %v2608_v31  ;;  %v9384_v7 = vand.u32 2147483647, %v7532_v49 }
 0x2fe   :  { %v4272_v42 = vadd.f32 -0.28449672, %v2101_v43  ;;  %v1209_v36 = vmul.f32 0.3275911, %v7729_v54  ;;  %v7744_v62 = vpop.eup %4798  ;;  %v7746_v1 = vmul.f32 0.5, %v3631_v28  ;;  %4340 = vmatprep.subr.bf16.mxu0 %v4339_v61  ;;  %v9386_v43 = vld [vmem:[#allocation18_spill] sm:$0xff] }
 0x2ff   :  { %v3507_v47 = vmul.f32 %v3379_v44, %v9384_v7  ;;  %v2482_v24 = vadd.f32 0.2548296, %v2354_v29  ;;  %v1335_v50 = vadd.f32 1.0, %v1207_v16  ;;  %v1208_v33 = vmul.f32 0.3275911, %v7734_v25  ;;  %v7749_v4 = vpop.eup %4800  ;;  %v7757_v28 = vpop.f32.mrb[56].mxu0 }
 0x300   :  { %9385 = vst [vmem:[#allocation35_spill] sm:$0xff] %v7746_v1  ;;  %v2357_v31 = vmul.f32 %v7680_v57, %v4272_v42  ;;  %v1588_v5 = vmul.f32 1.0614054, %v7744_v62  ;;  %v1337_v44 = vadd.f32 1.0, %v1209_v36  ;;  %v9388_v40 = vpack.c.bf16 %v9386_v43, %v9387_v13  ;;  %v7765_v36 = vpop.f32.mrb[56].mxu1 }
 0x301   :  { %v3635_v20 = vadd.f32 %v3507_v47, %v7532_v49  ;;  %v9389_v29 = vand.u32 2147483647, %v7461_v11  ;;  %v1590_v61 = vmul.f32 1.0614054, %v7749_v4  ;;  %4804 = vrcp.f32 %v1335_v50 }
 0x302   :  { %4342 = vmatpush1.bf16.msra.mxu0 %v9388_v40  ;;  %v9073_v7 = vand.u32 2147483647, %v7737_v52  ;;  %v2485_v47 = vadd.f32 0.2548296, %v2357_v31  ;;  %v4143_v42 = vadd.f32 -1.4531521, %v1588_v5  ;;  %4806 = vrcp.f32 %v1337_v44 }
 0x303   :  { %v3505_v16 = vmul.f32 %v3377_v18, %v9389_v29  ;;  %v7763_v49 = vmul.f32 0.5, %v3635_v20  ;;  %v3376_v34 = vsub.f32 1.0, %v3248_v58  ;;  %v2740_v43 = vsub.f32 0.0, %v7664_v9  ;;  %v9392_v44 = vld [vmem:[#allocation45_spill] sm:$0xff] }
 0x304   :  { %v4145_v13 = vadd.f32 -1.4531521, %v1590_v61  ;;  %v1336_v40 = vadd.f32 1.0, %v1208_v33  ;;  %v7768_v32 = vmul.f32 0.5, %v3628_v59  ;;  %v2613_v50 = vmul.f32 %v7680_v57, %v2485_v47  ;;  %v4803_v29 = vpop.eup %4802  ;;  %v9393_v33 = vld [vmem:[#allocation46_spill] sm:$0xff]  ;;  %v7782_v61 = vpop.permute.xlu1 %209 }
 0x305   :  { %9390 = vst [vmem:[#allocation34_spill] sm:$0xff] %v7763_v49  ;;  %v1844_v20 = vmul.f32 %v7744_v62, %v4143_v42  ;;  %v2610_v31 = vmul.f32 %v7608_v48, %v2482_v24  ;;  %v7778_v58 = vmul.f32 0.70710677, %v9073_v7  ;;  %v4403_v59 = vpack.c.bf16 %v9393_v33, %v9392_v44 }
 0x306   :  { %9391 = vst [vmem:[#allocation23_spill] sm:$0xff] %v7768_v32  ;;  %v1846_v5 = vmul.f32 %v7749_v4, %v4145_v13  ;;  %v3633_v18 = vadd.f32 %v3505_v16, %v7461_v11  ;;  %v3253_v1 = vmul.f32 %v4803_v29, %v2613_v50  ;;  %4808 = vrcp.f32 %v1336_v40  ;;  %v9396_v16 = vld [vmem:[#allocation40_spill] sm:$0xff]  ;;  %v9397_v40 = vld [vmem:[#allocation39_spill] sm:$0xff] }
 0x307   :  { %v1972_v57 = vadd.f32 1.4214138, %v1844_v20  ;;  %v9394_v47 = vand.u32 2147483647, %v7486_v63  ;;  %v2868_v48 = vmul.f32 %v2740_v43, %v7664_v9  ;;  %v1210_v24 = vmul.f32 0.3275911, %v7778_v58  ;;  %4404 = vmatprep.subr.bf16.mxu1 %v4403_v59 }
 0x308   :  { %v7791_v13 = vadd.f32 %v7198_v10, %v7782_v61  ;;  %v7794_v44 = vmul.f32 0.5, %v7709_v60  ;;  %v3381_v33 = vsub.f32 1.0, %v3253_v1  ;;  %v2742_v11 = vsub.f32 0.0, %v7675_v21 }
 0x309   :  { %v3504_v42 = vmul.f32 %v3376_v34, %v9394_v47  ;;  %v9398_v50 = vpack.c.bf16 %v9396_v16, %v9397_v40  ;;  %v7802_v9 = vadd.f32 %v7200_v56, %v7782_v61  ;;  %v7804_v34 = vpop.f32.mrb[57].mxu0  ;;  %v2100_v43 = vmul.f32 %v7744_v62, %v1972_v57 }
 0x30a   :  { %9395 = vst [vmem:[#allocation56_spill] sm:$0xff] %v7794_v44  ;;  %v1974_v10 = vadd.f32 1.4214138, %v1846_v5  ;;  %v1338_v20 = vadd.f32 1.0, %v1210_v24  ;;  %v9074_v60 = vand.u32 2147483647, %v7791_v13  ;;  %v7811_v1 = vmul.f32 %v7724_v41, %v2610_v31 }
 0x30b   :  { %4406 = vmatpush1.bf16.msra.mxu1 %v9398_v50  ;;  %v7808_v29 = vmul.f32 0.5, %v3633_v18  ;;  %v9400_v59 = vand.u32 2147483647, %v7602_v46  ;;  %v9076_v16 = vand.u32 2147483647, %v7802_v9  ;;  %v7816_v56 = vpop.eup %4804  ;;  %v3632_v40 = vadd.f32 %v3504_v42, %v7486_v63 }
 0x30c   :  { %v3081_v50 = vmul.f32 1.442695, %v2868_v48  ;;  %4810 = vrcp.f32 %v1338_v20  ;;  %v7821_v5 = vmul.f32 0.70710677, %v9074_v60  ;;  %v7823_v18 = vpop.eup %4806  ;;  %v2870_v31 = vmul.f32 %v2742_v11, %v7675_v21 }
 0x30d   :  { %9399 = vst [vmem:[#allocation5_spill] sm:$0xff] %v7808_v29  ;;  %v3509_v47 = vmul.f32 %v3381_v33, %v9400_v59  ;;  %v1591_v57 = vmul.f32 1.0614054, %v7816_v56  ;;  %v2743_v24 = vsub.f32 0.0, %v7721_v2  ;;  %v4271_v33 = vadd.f32 -0.28449672, %v2100_v43 }
 0x30e   :  { %v2102_v59 = vmul.f32 %v7749_v4, %v1974_v10  ;;  %v1593_v63 = vmul.f32 1.0614054, %v7823_v18  ;;  %v1211_v42 = vmul.f32 0.3275911, %v7821_v5  ;;  %v3378_v48 = vsub.f32 1.0, %v7811_v1 }
 0x30f   :  { %v3637_v41 = vadd.f32 %v3509_v47, %v7602_v46  ;;  %v4146_v7 = vadd.f32 -1.4531521, %v1591_v57  ;;  %v7837_v46 = vmul.f32 0.70710677, %v9076_v16  ;;  %v7839_v21 = vmul.f32 0.5, %v3632_v40 }
 0x310   :  { %v4148_v11 = vadd.f32 -1.4531521, %v1593_v63  ;;  %v2745_v43 = vsub.f32 0.0, %v7729_v54  ;;  %v1339_v47 = vadd.f32 1.0, %v1211_v42  ;;  %v7842_v10 = vpop.eup %4808  ;;  %v3085_v49 = vmul.f32 1.442695, %v2870_v31 }
 0x311   :  { %v7833_v20 = vmul.f32 0.5, %v3637_v41  ;;  %9402 = vst [vmem:[#allocation44_spill] sm:$0xff] %v7839_v21  ;;  %v1847_v1 = vmul.f32 %v7816_v56, %v4146_v7  ;;  %v2871_v41 = vmul.f32 %v2743_v24, %v7721_v2  ;;  %v4273_v57 = vadd.f32 -0.28449672, %v2102_v59  ;;  %v7850_v63 = vpop.f32.mrb[57].mxu1 }
 0x312   :  { %v1849_v16 = vmul.f32 %v7823_v18, %v4148_v11  ;;  %v1592_v40 = vmul.f32 1.0614054, %v7842_v10  ;;  %4812 = vrcp.f32 %v1339_v47  ;;  %9403 = vst [vmem:[#allocation4_spill] sm:$0xff] %v7850_v63  ;;  %v2356_v42 = vmul.f32 %v7744_v62, %v4271_v33 }
 0x313   :  { %9401 = vst [vmem:[#allocation19_spill] sm:$0xff] %v7833_v20  ;;  %4814 = vpow2.f32 %v3081_v50  ;;  %v1975_v21 = vadd.f32 1.4214138, %v1847_v1  ;;  %v1213_v44 = vmul.f32 0.3275911, %v7837_v46  ;;  %v2873_v31 = vmul.f32 %v2745_v43, %v7729_v54 }
 0x314   :  { %v1977_v60 = vadd.f32 1.4214138, %v1849_v16  ;;  %v4147_v7 = vadd.f32 -1.4531521, %v1592_v40  ;;  %v2744_v2 = vsub.f32 0.0, %v7734_v25  ;;  %v7859_v47 = vadd.f32 %v7208_v15, %v7782_v61 }
 0x315   :  { %v2103_v24 = vmul.f32 %v7816_v56, %v1975_v21  ;;  %v3087_v59 = vmul.f32 1.442695, %v2871_v41  ;;  %v1341_v11 = vadd.f32 1.0, %v1213_v44  ;;  %v2358_v50 = vmul.f32 %v7749_v4, %v4273_v57 }
 0x316   :  { %v7861_v29 = vpop.eup %4810  ;;  %4816 = vpow2.f32 %v3085_v49  ;;  %v2105_v16 = vmul.f32 %v7823_v18, %v1977_v60  ;;  %v1848_v54 = vmul.f32 %v7842_v10, %v4147_v7  ;;  %v2484_v33 = vadd.f32 0.2548296, %v2356_v42  ;;  %v9404_v7 = vld [vmem:[#allocation17_spill] sm:$0xff] }
 0x317   :  { %v4274_v43 = vadd.f32 -0.28449672, %v2103_v24  ;;  %v1594_v1 = vmul.f32 1.0614054, %v7861_v29  ;;  %4818 = vrcp.f32 %v1341_v11  ;;  %v3091_v44 = vmul.f32 1.442695, %v2873_v31 }
 0x318   :  { %v4276_v21 = vadd.f32 -0.28449672, %v2105_v16  ;;  %v2872_v41 = vmul.f32 %v2744_v2, %v7734_v25  ;;  %v2747_v15 = vsub.f32 0.0, %v7821_v5  ;;  %4820 = vpow2.f32 %v3087_v59 }
 0x319   :  { %v2359_v40 = vmul.f32 %v7816_v56, %v4274_v43  ;;  %v4149_v57 = vadd.f32 -1.4531521, %v1594_v1  ;;  %v9079_v49 = vand.u32 2147483647, %v7859_v47  ;;  %v2486_v60 = vadd.f32 0.2548296, %v2358_v50 }
 0x31a   :  { %v1976_v20 = vadd.f32 1.4214138, %v1848_v54  ;;  %v2746_v42 = vsub.f32 0.0, %v7778_v58  ;;  %v7874_v24 = vadd.f32 %v9404_v7, %v7782_v61  ;;  %v9405_v31 = vand.u32 2147483647, %v7500_v51  ;;  %v7888_v43 = vpop.f32.mrb[58].mxu0 }
 0x31b   :  { %v2612_v25 = vmul.f32 %v7744_v62, %v2484_v33  ;;  %v2361_v2 = vmul.f32 %v7823_v18, %v4276_v21  ;;  %v7882_v59 = vmul.f32 0.70710677, %v9079_v49  ;;  %4822 = vpow2.f32 %v3091_v44  ;;  %9406 = vst [vmem:[#allocation18_spill] sm:$0xff] %v7888_v43 }
 0x31c   :  { %v3506_v11 = vmul.f32 %v3378_v48, %v9405_v31  ;;  %v7884_v16 = vpop.eup %4812  ;;  %v3089_v50 = vmul.f32 1.442695, %v2872_v41  ;;  %v2875_v54 = vmul.f32 %v2747_v15, %v7821_v5  ;;  %v2749_v61 = vsub.f32 0.0, %v7837_v46 }
 0x31d   :  { %v4815_v1 = vpop.eup %4814  ;;  %v2487_v48 = vadd.f32 0.2548296, %v2359_v40  ;;  %v1850_v62 = vmul.f32 %v7861_v29, %v4149_v57  ;;  %v1595_v33 = vmul.f32 1.0614054, %v7884_v16  ;;  %v1212_v21 = vmul.f32 0.3275911, %v7882_v59 }
 0x31e   :  { %v2614_v7 = vmul.f32 %v7749_v4, %v2486_v60  ;;  %v2104_v31 = vmul.f32 %v7842_v10, %v1976_v20  ;;  %v2874_v44 = vmul.f32 %v2746_v42, %v7778_v58  ;;  %v9080_v5 = vand.u32 2147483647, %v7874_v24  ;;  %v7906_v42 = vpop.f32.mrb[58].mxu1 }
 0x31f   :  { %v3252_v41 = vmul.f32 %v4815_v1, %v2612_v25  ;;  %v2489_v15 = vadd.f32 0.2548296, %v2361_v2  ;;  %v4150_v49 = vadd.f32 -1.4531521, %v1595_v33  ;;  %v1340_v22 = vadd.f32 1.0, %v1212_v21  ;;  %9407 = vst [vmem:[#allocation15_spill] sm:$0xff] %v7906_v42 }
 0x320   :  { %v4817_v32 = vpop.eup %4816  ;;  %4824 = vpow2.f32 %v3089_v50  ;;  %v3095_v40 = vmul.f32 1.442695, %v2875_v54  ;;  %v2877_v57 = vmul.f32 %v2749_v61, %v7837_v46  ;;  %v7900_v19 = vmul.f32 0.70710677, %v9080_v5  ;;  %v7909_v61 = vpop.permute.xlu0 %214 }
 0x321   :  { %v7902_v4 = vpop.eup %4818  ;;  %v2615_v20 = vmul.f32 %v7816_v56, %v2487_v48  ;;  %v1978_v58 = vadd.f32 1.4214138, %v1850_v62  ;;  %v1851_v60 = vmul.f32 %v7884_v16, %v4150_v49  ;;  %4826 = vrcp.f32 %v1340_v22  ;;  %v9408_v22 = vld [vmem:[#allocation32_spill] sm:$0xff] }
 0x322   :  { %v3254_v25 = vmul.f32 %v4817_v32, %v2614_v7  ;;  %v4275_v2 = vadd.f32 -0.28449672, %v2104_v31  ;;  %v3093_v50 = vmul.f32 1.442695, %v2874_v44  ;;  %v1597_v54 = vmul.f32 1.0614054, %v7902_v4  ;;  %v4821_v46 = vpop.eup %4820 }
 0x323   :  { %v3380_v1 = vsub.f32 1.0, %v3252_v41  ;;  %v2617_v33 = vmul.f32 %v7823_v18, %v2489_v15  ;;  %v1979_v21 = vadd.f32 1.4214138, %v1851_v60  ;;  %v1214_v56 = vmul.f32 0.3275911, %v7900_v19 }
 0x324   :  { %4828 = vpow2.f32 %v3095_v40  ;;  %v4152_v48 = vadd.f32 -1.4531521, %v1597_v54  ;;  %v3099_v49 = vmul.f32 1.442695, %v2877_v57  ;;  %v7915_v62 = vadd.f32 %v9408_v22, %v7909_v61  ;;  %v7924_v40 = vpop.f32.mrb[59].mxu0 }
 0x325   :  { %v3255_v32 = vmul.f32 %v4821_v46, %v2615_v20  ;;  %v2106_v7 = vmul.f32 %v7861_v29, %v1978_v58  ;;  %v2107_v31 = vmul.f32 %v7884_v16, %v1979_v21  ;;  %v1342_v44 = vadd.f32 1.0, %v1214_v56  ;;  %v4823_v5 = vpop.eup %4822  ;;  %9409 = vst [vmem:[#allocation45_spill] sm:$0xff] %v7924_v40  ;;  %v7996_v63 = vpop.f32.mrb[60].mxu0 }
 0x326   :  { %v7920_v41 = vadd.f32 %v3506_v11, %v7500_v51  ;;  %v2360_v18 = vmul.f32 %v7842_v10, %v4275_v2  ;;  %4830 = vpow2.f32 %v3093_v50  ;;  %v1853_v15 = vmul.f32 %v7902_v4, %v4152_v48 }
 0x327   :  { %v3382_v57 = vsub.f32 1.0, %v3254_v25  ;;  %v3257_v60 = vmul.f32 %v4823_v5, %v2617_v33  ;;  %v4278_v54 = vadd.f32 -0.28449672, %v2107_v31  ;;  %4832 = vrcp.f32 %v1342_v44 }
 0x328   :  { %v9410_v20 = vand.u32 2147483647, %v7650_v38  ;;  %v1981_v46 = vadd.f32 1.4214138, %v1853_v15  ;;  %4834 = vpow2.f32 %v3099_v49  ;;  %v2748_v21 = vsub.f32 0.0, %v7882_v59 }
 0x329   :  { %v3383_v51 = vsub.f32 1.0, %v3255_v32  ;;  %v4277_v11 = vadd.f32 -0.28449672, %v2106_v7  ;;  %v2363_v2 = vmul.f32 %v7884_v16, %v4278_v54  ;;  %v9081_v50 = vand.u32 2147483647, %v7915_v62 }
 0x32a   :  { %v3508_v58 = vmul.f32 %v3380_v1, %v9410_v20  ;;  %v4825_v56 = vpop.eup %4824  ;;  %v2488_v48 = vadd.f32 0.2548296, %v2360_v18  ;;  %v2109_v25 = vmul.f32 %v7902_v4, %v1981_v46  ;;  %v7934_v5 = vadd.f32 %v7335_v8, %v7909_v61 }
 0x32b   :  { %v7938_v1 = vadd.f32 %v7359_v17, %v7909_v61  ;;  %v7940_v33 = vpop.eup %4826  ;;  %v9411_v49 = vand.u32 2147483647, %v7656_v55  ;;  %v3385_v32 = vsub.f32 1.0, %v3257_v60  ;;  %v2491_v7 = vadd.f32 0.2548296, %v2363_v2 }
 0x32c   :  { %v7948_v31 = vmul.f32 0.70710677, %v9081_v50  ;;  %v7951_v44 = vadd.f32 %v3508_v58, %v7650_v38  ;;  %v4280_v8 = vadd.f32 -0.28449672, %v2109_v25  ;;  %v1596_v18 = vmul.f32 1.0614054, %v7940_v33 }
 0x32d   :  { %v7944_v22 = vmul.f32 %v3382_v57, %v9411_v49  ;;  %v2876_v17 = vmul.f32 %v2748_v21, %v7882_v59  ;;  %v9412_v15 = vand.u32 2147483647, %v7699_v39  ;;  %v2362_v57 = vmul.f32 %v7861_v29, %v4277_v11  ;;  %v7966_v11 = vpop.f32.mrb[59].mxu1 }
 0x32e   :  { %v2619_v60 = vmul.f32 %v7884_v16, %v2491_v7  ;;  %v1215_v20 = vmul.f32 0.3275911, %v7948_v31  ;;  %v4829_v46 = vpop.eup %4828  ;;  %v2365_v2 = vmul.f32 %v7902_v4, %v4280_v8  ;;  %v4151_v49 = vadd.f32 -1.4531521, %v1596_v18  ;;  %9414 = vst [vmem:[#allocation46_spill] sm:$0xff] %v7966_v11 }
 0x32f   :  { %v3511_v54 = vmul.f32 %v3383_v51, %v9412_v15  ;;  %v9082_v38 = vand.u32 2147483647, %v7934_v5  ;;  %v9083_v58 = vand.u32 2147483647, %v7938_v1  ;;  %v9413_v25 = vand.u32 2147483647, %v7706_v14 }
 0x330   :  { %v2616_v21 = vmul.f32 %v7842_v10, %v2488_v48  ;;  %v3259_v51 = vmul.f32 %v4829_v46, %v2619_v60  ;;  %v1343_v15 = vadd.f32 1.0, %v1215_v20  ;;  %v4831_v16 = vpop.eup %4830  ;;  %v2493_v7 = vadd.f32 0.2548296, %v2365_v2 }
 0x331   :  { %v3513_v59 = vmul.f32 %v3385_v32, %v9413_v25  ;;  %v1852_v50 = vmul.f32 %v7940_v33, %v4151_v49  ;;  %v7971_v8 = vmul.f32 0.70710677, %v9082_v38  ;;  %v7975_v18 = vmul.f32 0.70710677, %v9083_v58  ;;  %v7977_v40 = vpop.eup %4832 }
 0x332   :  { %v3639_v10 = vadd.f32 %v3511_v54, %v7699_v39  ;;  %v2490_v48 = vadd.f32 0.2548296, %v2362_v57  ;;  %v3387_v32 = vsub.f32 1.0, %v3259_v51  ;;  %4836 = vrcp.f32 %v1343_v15  ;;  %v4835_v60 = vpop.eup %4834 }
 0x333   :  { %v2621_v20 = vmul.f32 %v7902_v4, %v2493_v7  ;;  %v1980_v46 = vadd.f32 1.4214138, %v1852_v50  ;;  %v1598_v2 = vmul.f32 1.0614054, %v7977_v40  ;;  %v1217_v49 = vmul.f32 0.3275911, %v7971_v8 }
 0x334   :  { %v9415_v25 = vand.u32 2147483647, %v7791_v13  ;;  %v2750_v58 = vsub.f32 0.0, %v7900_v19  ;;  %v1216_v11 = vmul.f32 0.3275911, %v7975_v18  ;;  %v7989_v39 = vadd.f32 %v7369_v3, %v7909_v61 }
 0x335   :  { %v3261_v54 = vmul.f32 %v4835_v60, %v2621_v20  ;;  %v2108_v57 = vmul.f32 %v7940_v33, %v1980_v46  ;;  %v4153_v4 = vadd.f32 -1.4531521, %v1598_v2  ;;  %v1345_v50 = vadd.f32 1.0, %v1217_v49  ;;  %v8016_v46 = vpop.permute.xlu1 %219 }
 0x336   :  { %v3515_v38 = vmul.f32 %v3387_v32, %v9415_v25  ;;  %v3641_v51 = vadd.f32 %v3513_v59, %v7706_v14  ;;  %v3256_v15 = vmul.f32 %v4825_v56, %v2616_v21  ;;  %v1344_v42 = vadd.f32 1.0, %v1216_v11 }
 0x337   :  { %v2618_v32 = vmul.f32 %v7861_v29, %v2490_v48  ;;  %v3389_v25 = vsub.f32 1.0, %v3261_v54  ;;  %v1854_v43 = vmul.f32 %v7977_v40, %v4153_v4  ;;  %4838 = vrcp.f32 %v1345_v50  ;;  %v9419_v48 = vld [vmem:[#allocation49_spill] sm:$0xff] }
 0x338   :  { %v3643_v7 = vadd.f32 %v3515_v38, %v7791_v13  ;;  %v7998_v3 = vmul.f32 0.5, %v3639_v10  ;;  %v4279_v60 = vadd.f32 -0.28449672, %v2108_v57  ;;  %4840 = vrcp.f32 %v1344_v42  ;;  %v8006_v38 = vpop.f32.mrb[60].mxu1  ;;  %v9420_v42 = vld [vmem:[#allocation10_spill] sm:$0xff]  ;;  %v9423_v54 = vld [vmem:[#allocation9_spill] sm:$0xff] }
 0x339   :  { %v9418_v14 = vand.u32 2147483647, %v7802_v9  ;;  %v1982_v59 = vadd.f32 1.4214138, %v1854_v43  ;;  %v2878_v13 = vmul.f32 %v2750_v58, %v7900_v19  ;;  %v9084_v29 = vand.u32 2147483647, %v7989_v39 }
 0x33a   :  { %9416 = vst [vmem:[#allocation40_spill] sm:$0xff] %v7998_v3  ;;  %v8000_v61 = vmul.f32 0.5, %v3643_v7  ;;  %v8010_v21 = vadd.f32 %v7944_v22, %v7656_v55  ;;  %v3097_v10 = vmul.f32 1.442695, %v2876_v17  ;;  %v4343_v20 = vpack.c.bf16 %v9420_v42, %v9419_v48  ;;  %v9422_v17 = vld [vmem:[#allocation51_spill] sm:$0xff] }
 0x33b   :  { %v3517_v56 = vmul.f32 %v3389_v25, %v9418_v14  ;;  %v3258_v43 = vmul.f32 %v4831_v16, %v2618_v32  ;;  %v2110_v58 = vmul.f32 %v7977_v40, %v1982_v59  ;;  %v8022_v2 = vmul.f32 0.70710677, %v9084_v29  ;;  %v9426_v25 = vld [vmem:[#allocation3_spill] sm:$0xff]  ;;  %v8049_v59 = vpop.f32.mrb[61].mxu1 }
 0x33c   :  { %9417 = vst [vmem:[#allocation39_spill] sm:$0xff] %v8000_v61  ;;  %v8024_v55 = vpop.eup %4836  ;;  %v8026_v22 = vmul.f32 0.5, %v3641_v51  ;;  %v3384_v49 = vsub.f32 1.0, %v3256_v15  ;;  %4344 = vmatprep.subr.bf16.mxu0 %v4343_v20  ;;  %v4407_v57 = vpack.c.bf16 %v9423_v54, %v9422_v17  ;;  %v8032_v16 = vadd.f32 %v7446_v26, %v8016_v46  ;;  %v9425_v51 = vld [vmem:[#allocation27_spill] sm:$0xff]  ;;  %v9428_v20 = vld [vmem:[#allocation48_spill] sm:$0xff] }
 0x33d   :  { %v3645_v19 = vadd.f32 %v3517_v56, %v7802_v9  ;;  %v8034_v9 = vpop.f32.mrb[61].mxu0  ;;  %v2364_v50 = vmul.f32 %v7940_v33, %v4279_v60  ;;  %v3101_v7 = vmul.f32 1.442695, %v2878_v13  ;;  %v1599_v32 = vmul.f32 1.0614054, %v8024_v55 }
 0x33e   :  { %9421 = vst [vmem:[#allocation17_spill] sm:$0xff] %v8026_v22  ;;  %v9427_v15 = vpack.c.bf16 %v9425_v51, %v9426_v25  ;;  %4842 = vpow2.f32 %v3097_v10  ;;  %v1218_v14 = vmul.f32 0.3275911, %v8022_v2  ;;  %4408 = vmatprep.subr.bf16.mxu1 %v4407_v57  ;;  %v9085_v26 = vand.u32 2147483647, %v8032_v16 }
 0x33f   :  { %v8036_v4 = vmul.f32 0.5, %v3645_v19  ;;  %v8047_v56 = vadd.f32 %v7448_v27, %v8016_v46  ;;  %v3386_v60 = vsub.f32 1.0, %v3258_v43  ;;  %v4281_v48 = vadd.f32 -0.28449672, %v2110_v58  ;;  %v9429_v19 = vld [vmem:[#allocation47_spill] sm:$0xff] }
 0x340   :  { %4346 = vmatpush1.bf16.msra.mxu0 %v9427_v15  ;;  %v4154_v42 = vadd.f32 -1.4531521, %v1599_v32  ;;  %v9430_v10 = vpack.c.bf16 %v9428_v20, %v9429_v19  ;;  %v9431_v17 = vand.u32 2147483647, %v7714_v37  ;;  %v2751_v57 = vsub.f32 0.0, %v7948_v31 }
 0x341   :  { %9424 = vst [vmem:[#allocation32_spill] sm:$0xff] %v8036_v4  ;;  %v1346_v51 = vadd.f32 1.0, %v1218_v14  ;;  %v8061_v27 = vmul.f32 0.70710677, %v9085_v26  ;;  %v8063_v43 = vpop.eup %4838  ;;  %v2492_v25 = vadd.f32 0.2548296, %v2364_v50  ;;  %4844 = vpow2.f32 %v3101_v7 }
 0x342   :  { %4410 = vmatpush1.bf16.msra.mxu1 %v9430_v10  ;;  %v3512_v54 = vmul.f32 %v3384_v49, %v9431_v17  ;;  %v1855_v58 = vmul.f32 %v8024_v55, %v4154_v42  ;;  %v8068_v32 = vadd.f32 %v7463_v35, %v8016_v46  ;;  %v8070_v15 = vpop.eup %4840  ;;  %v1601_v49 = vmul.f32 1.0614054, %v8063_v43 }
 0x343   :  { %4846 = vrcp.f32 %v1346_v51  ;;  %v1219_v14 = vmul.f32 0.3275911, %v8061_v27  ;;  %v9432_v19 = vand.u32 2147483647, %v7737_v52  ;;  %v2366_v50 = vmul.f32 %v7977_v40, %v4281_v48 }
 0x344   :  { %v1983_v7 = vadd.f32 1.4214138, %v1855_v58  ;;  %v1600_v42 = vmul.f32 1.0614054, %v8070_v15  ;;  %v2879_v35 = vmul.f32 %v2751_v57, %v7948_v31  ;;  %v4156_v17 = vadd.f32 -1.4531521, %v1601_v49 }
 0x345   :  { %v3514_v10 = vmul.f32 %v3386_v60, %v9432_v19  ;;  %v2753_v13 = vsub.f32 0.0, %v7971_v8  ;;  %v1347_v11 = vadd.f32 1.0, %v1219_v14  ;;  %v2620_v51 = vmul.f32 %v7940_v33, %v2492_v25 }
 0x346   :  { %v2111_v29 = vmul.f32 %v8024_v55, %v1983_v7  ;;  %v2752_v26 = vsub.f32 0.0, %v7975_v18  ;;  %v1857_v60 = vmul.f32 %v8063_v43, %v4156_v17  ;;  %v4155_v48 = vadd.f32 -1.4531521, %v1600_v42 }
 0x347   :  { %4848 = vrcp.f32 %v1347_v11  ;;  %v9433_v58 = vand.u32 2147483647, %v8047_v56  ;;  %v8091_v31 = vmul.f32 0.5, %v7920_v41  ;;  %v8094_v57 = vmul.f32 0.5, %v7951_v44 }
 0x348   :  { %v8097_v33 = vmul.f32 0.5, %v8010_v21  ;;  %v2494_v25 = vadd.f32 0.2548296, %v2366_v50  ;;  %v4843_v49 = vpop.eup %4842  ;;  %v3640_v14 = vadd.f32 %v3512_v54, %v7714_v37  ;;  %v4282_v7 = vadd.f32 -0.28449672, %v2111_v29 }
 0x349   :  { %v8088_v19 = vmul.f32 0.70710677, %v9433_v58  ;;  %v1985_v42 = vadd.f32 1.4214138, %v1857_v60  ;;  %v3642_v17 = vadd.f32 %v3514_v10, %v7737_v52  ;;  %v3260_v58 = vmul.f32 %v4843_v49, %v2620_v51  ;;  %v8128_v49 = vpop.permute.xlu0 %224 }
 0x34a   :  { %v3103_v20 = vmul.f32 1.442695, %v2879_v35  ;;  %v2881_v41 = vmul.f32 %v2753_v13, %v7971_v8  ;;  %v1856_v44 = vmul.f32 %v8070_v15, %v4155_v48  ;;  %v2880_v22 = vmul.f32 %v2752_v26, %v7975_v18  ;;  %v8121_v35 = vpop.f32.mrb[62].mxu0 }
 0x34b   :  { %v1221_v11 = vmul.f32 0.3275911, %v8088_v19  ;;  %v9434_v50 = vand.u32 2147483647, %v8068_v32  ;;  %v4845_v37 = vpop.eup %4844  ;;  %v2622_v29 = vmul.f32 %v7977_v40, %v2494_v25  ;;  %v2754_v54 = vsub.f32 0.0, %v8022_v2 }
 0x34c   :  { %v2755_v52 = vsub.f32 0.0, %v8061_v27  ;;  %v8114_v10 = vadd.f32 %v7474_v23, %v8016_v46  ;;  %v2367_v18 = vmul.f32 %v8024_v55, %v4282_v7  ;;  %v2113_v26 = vmul.f32 %v8063_v43, %v1985_v42 }
 0x34d   :  { %v1349_v21 = vadd.f32 1.0, %v1221_v11  ;;  %v8107_v4 = vmul.f32 0.70710677, %v9434_v50  ;;  %v8116_v8 = vpop.eup %4846  ;;  %v8123_v40 = vmul.f32 0.5, %v3640_v14  ;;  %v3388_v51 = vsub.f32 1.0, %v3260_v58  ;;  %v8132_v50 = vpop.f32.mrb[62].mxu1 }
 0x34e   :  { %v1602_v60 = vmul.f32 1.0614054, %v8116_v8  ;;  %v8126_v48 = vmul.f32 0.5, %v3642_v17  ;;  %v3107_v23 = vmul.f32 1.442695, %v2881_v41  ;;  %v3262_v7 = vmul.f32 %v4845_v37, %v2622_v29 }
 0x34f   :  { %4850 = vrcp.f32 %v1349_v21  ;;  %v1220_v13 = vmul.f32 0.3275911, %v8107_v4  ;;  %9435 = vst [vmem:[#allocation49_spill] sm:$0xff] %v8123_v40  ;;  %v1984_v46 = vadd.f32 1.4214138, %v1856_v44  ;;  %v2883_v11 = vmul.f32 %v2755_v52, %v8061_v27 }
 0x350   :  { %4852 = vpow2.f32 %v3103_v20  ;;  %9436 = vst [vmem:[#allocation10_spill] sm:$0xff] %v8126_v48  ;;  %v3105_v42 = vmul.f32 1.442695, %v2880_v22  ;;  %v9088_v21 = vand.u32 2147483647, %v8114_v10  ;;  %v2882_v17 = vmul.f32 %v2754_v54, %v8022_v2 }
 0x351   :  { %v1348_v25 = vadd.f32 1.0, %v1220_v13  ;;  %v8134_v14 = vpop.eup %4848  ;;  %v2495_v20 = vadd.f32 0.2548296, %v2367_v18  ;;  %v4284_v58 = vadd.f32 -0.28449672, %v2113_v26  ;;  %v8139_v41 = vadd.f32 %v7534_v53, %v8128_v49 }
 0x352   :  { %v9437_v44 = vand.u32 2147483647, %v7859_v47  ;;  %v4157_v22 = vadd.f32 -1.4531521, %v1602_v60  ;;  %v1603_v27 = vmul.f32 1.0614054, %v8134_v14  ;;  %v2112_v52 = vmul.f32 %v8070_v15, %v1984_v46 }
 0x353   :  { %v2757_v29 = vsub.f32 0.0, %v8088_v19  ;;  %4854 = vrcp.f32 %v1348_v25  ;;  %v8148_v18 = vmul.f32 0.70710677, %v9088_v21  ;;  %v9090_v2 = vand.u32 2147483647, %v8139_v41 }
 0x354   :  { %v3516_v37 = vmul.f32 %v3388_v51, %v9437_v44  ;;  %v3390_v54 = vsub.f32 1.0, %v3262_v7  ;;  %4856 = vpow2.f32 %v3107_v23  ;;  %v4158_v53 = vadd.f32 -1.4531521, %v1603_v27 }
 0x355   :  { %v3111_v26 = vmul.f32 1.442695, %v2883_v11  ;;  %v2623_v13 = vmul.f32 %v8024_v55, %v2495_v20  ;;  %v2369_v51 = vmul.f32 %v8063_v43, %v4284_v58  ;;  %4858 = vpow2.f32 %v3105_v42  ;;  %v8164_v42 = vpop.f32.mrb[63].mxu0 }
 0x356   :  { %v1222_v60 = vmul.f32 0.3275911, %v8148_v18  ;;  %v1858_v46 = vmul.f32 %v8116_v8, %v4157_v22  ;;  %v3109_v25 = vmul.f32 1.442695, %v2882_v17  ;;  %v1859_v44 = vmul.f32 %v8134_v14, %v4158_v53 }
 0x357   :  { %v2885_v21 = vmul.f32 %v2757_v29, %v8088_v19  ;;  %v3644_v23 = vadd.f32 %v3516_v37, %v7859_v47  ;;  %v4283_v7 = vadd.f32 -0.28449672, %v2112_v52  ;;  %v8162_v55 = vmul.f32 0.70710677, %v9090_v2 }
 0x358   :  { %v1350_v11 = vadd.f32 1.0, %v1222_v60  ;;  %v9438_v58 = vand.u32 2147483647, %v7874_v24  ;;  %v1987_v22 = vadd.f32 1.4214138, %v1859_v44  ;;  %4860 = vpow2.f32 %v3111_v26 }
 0x359   :  { %v8157_v3 = vpop.eup %4850  ;;  %v2756_v19 = vsub.f32 0.0, %v8107_v4  ;;  %v2497_v29 = vadd.f32 0.2548296, %v2369_v51  ;;  %v1986_v37 = vadd.f32 1.4214138, %v1858_v46  ;;  %v8172_v2 = vmul.f32 0.5, %v3644_v23 }
 0x35a   :  { %v4853_v20 = vpop.eup %4852  ;;  %v3518_v17 = vmul.f32 %v3390_v54, %v9438_v58  ;;  %v1605_v47 = vmul.f32 1.0614054, %v8157_v3  ;;  %4862 = vrcp.f32 %v1350_v11  ;;  %v2115_v52 = vmul.f32 %v8134_v14, %v1987_v22  ;;  %v8190_v58 = vpop.f32.mrb[63].mxu1 }
 0x35b   :  { %v3263_v27 = vmul.f32 %v4853_v20, %v2623_v13  ;;  %v3115_v53 = vmul.f32 1.442695, %v2885_v21  ;;  %v1223_v60 = vmul.f32 0.3275911, %v8162_v55  ;;  %9439 = vst [vmem:[#allocation51_spill] sm:$0xff] %v8172_v2  ;;  %v2368_v61 = vmul.f32 %v8070_v15, %v4283_v7 }
 0x35c   :  { %4864 = vpow2.f32 %v3109_v25  ;;  %v4160_v54 = vadd.f32 -1.4531521, %v1605_v47  ;;  %v8176_v26 = vadd.f32 %v3518_v17, %v7874_v24  ;;  %v4286_v13 = vadd.f32 -0.28449672, %v2115_v52  ;;  %v9440_v47 = vld [vmem:[#allocation42_spill] sm:$0xff] }
 0x35d   :  { %v2884_v51 = vmul.f32 %v2756_v19, %v8107_v4  ;;  %v1351_v44 = vadd.f32 1.0, %v1223_v60  ;;  %v8179_v11 = vpop.eup %4854  ;;  %v3391_v46 = vsub.f32 1.0, %v3263_v27  ;;  %v2625_v21 = vmul.f32 %v8063_v43, %v2497_v29 }
 0x35e   :  { %v1861_v20 = vmul.f32 %v8157_v3, %v4160_v54  ;;  %v8185_v23 = vadd.f32 %v7548_v30, %v8128_v49  ;;  %v4857_v25 = vpop.eup %4856  ;;  %v2114_v7 = vmul.f32 %v8116_v8, %v1986_v37  ;;  %v2371_v24 = vmul.f32 %v8134_v14, %v4286_v13 }
 0x35f   :  { %4866 = vpow2.f32 %v3115_v53  ;;  %v1604_v4 = vmul.f32 1.0614054, %v8179_v11  ;;  %v4859_v17 = vpop.eup %4858  ;;  %v2496_v22 = vadd.f32 0.2548296, %v2368_v61  ;;  %v3113_v30 = vmul.f32 1.442695, %v2884_v51 }
 0x360   :  { %v1989_v19 = vadd.f32 1.4214138, %v1861_v20  ;;  %4868 = vrcp.f32 %v1351_v44  ;;  %v9092_v43 = vand.u32 2147483647, %v8185_v23  ;;  %v2499_v27 = vadd.f32 0.2548296, %v2371_v24 }
 0x361   :  { %v4159_v29 = vadd.f32 -1.4531521, %v1604_v4  ;;  %v8195_v52 = vadd.f32 %v9440_v47, %v8128_v49  ;;  %v9441_v37 = vand.u32 2147483647, %v7915_v62  ;;  %v3265_v60 = vmul.f32 %v4857_v25, %v2625_v21  ;;  %v9442_v25 = vld [vmem:[#allocation53_spill] sm:$0xff] }
 0x362   :  { %v2117_v54 = vmul.f32 %v8157_v3, %v1989_v19  ;;  %v8202_v61 = vmul.f32 0.70710677, %v9092_v43  ;;  %v4861_v13 = vpop.eup %4860  ;;  %v4285_v44 = vadd.f32 -0.28449672, %v2114_v7  ;;  %v2627_v20 = vmul.f32 %v8134_v14, %v2499_v27  ;;  %v9443_v19 = vld [vmem:[#allocation55_spill] sm:$0xff] }
 0x363   :  { %v3519_v53 = vmul.f32 %v3391_v46, %v9441_v37  ;;  %v1860_v51 = vmul.f32 %v8179_v11, %v4159_v29  ;;  %v2624_v47 = vmul.f32 %v8070_v15, %v2496_v22  ;;  %v4347_v37 = vpack.c.bf16 %v9443_v19, %v9442_v25  ;;  %v9447_v19 = vld [vmem:[#allocation11_spill] sm:$0xff] }
 0x364   :  { %v8207_v4 = vpop.eup %4862  ;;  %v4288_v46 = vadd.f32 -0.28449672, %v2117_v54  ;;  %v1225_v21 = vmul.f32 0.3275911, %v8202_v61  ;;  %v3267_v43 = vmul.f32 %v4861_v13, %v2627_v20  ;;  %4870 = vpow2.f32 %v3113_v30  ;;  %v9445_v30 = vld [vmem:[#allocation14_spill] sm:$0xff] }
 0x365   :  { %v1988_v48 = vadd.f32 1.4214138, %v1860_v51  ;;  %v1606_v7 = vmul.f32 1.0614054, %v8207_v4  ;;  %v2758_v29 = vsub.f32 0.0, %v8148_v18  ;;  %4348 = vmatprep.subr.bf16.mxu0 %v4347_v37  ;;  %v3393_v54 = vsub.f32 1.0, %v3265_v60 }
 0x366   :  { %v8214_v14 = vpop.eup %4864  ;;  %v2373_v27 = vmul.f32 %v8157_v3, %v4288_v46  ;;  %v1353_v24 = vadd.f32 1.0, %v1225_v21  ;;  %v9444_v15 = vand.u32 2147483647, %v8195_v52  ;;  %v2370_v25 = vmul.f32 %v8116_v8, %v4285_v44  ;;  %v9446_v51 = vld [vmem:[#allocation36_spill] sm:$0xff] }
 0x367   :  { %v3395_v13 = vsub.f32 1.0, %v3267_v43  ;;  %v8225_v20 = vadd.f32 %v9445_v30, %v8128_v49  ;;  %v9448_v2 = vpack.c.bf16 %v9446_v51, %v9447_v19  ;;  %v4161_v40 = vadd.f32 -1.4531521, %v1606_v7 }
 0x368   :  { %v8220_v22 = vmul.f32 0.70710677, %v9444_v15  ;;  %v2501_v46 = vadd.f32 0.2548296, %v2373_v27  ;;  %4872 = vrcp.f32 %v1353_v24  ;;  %v3647_v37 = vadd.f32 %v3519_v53, %v7915_v62 }
 0x369   :  { %4350 = vmatpush1.bf16.msra.mxu0 %v9448_v2  ;;  %v4867_v15 = vpop.eup %4866  ;;  %v8232_v60 = vmul.f32 %v4859_v17, %v2624_v47  ;;  %v9449_v43 = vand.u32 2147483647, %v8032_v16  ;;  %v2116_v49 = vmul.f32 %v8179_v11, %v1988_v48  ;;  %v2886_v2 = vmul.f32 %v2758_v29, %v8148_v18 }
 0x36a   :  { %v1224_v21 = vmul.f32 0.3275911, %v8220_v22  ;;  %v8237_v30 = vpop.eup %4868  ;;  %v2629_v51 = vmul.f32 %v8157_v3, %v2501_v46  ;;  %v2759_v24 = vsub.f32 0.0, %v8162_v55  ;;  %v9450_v27 = vand.u32 2147483647, %v7934_v5 }
 0x36b   :  { %v3523_v44 = vmul.f32 %v3395_v13, %v9449_v43  ;;  %v2498_v62 = vadd.f32 0.2548296, %v2370_v25  ;;  %v1607_v53 = vmul.f32 1.0614054, %v8237_v30  ;;  %v1862_v48 = vmul.f32 %v8207_v4, %v4161_v40  ;;  %v9453_v25 = vld [vmem:[#allocation54_spill] sm:$0xff] }
 0x36c   :  { %v1352_v7 = vadd.f32 1.0, %v1224_v21  ;;  %v3521_v19 = vmul.f32 %v3393_v54, %v9450_v27  ;;  %v3269_v47 = vmul.f32 %v4867_v15, %v2629_v51  ;;  %v9093_v13 = vand.u32 2147483647, %v8225_v20  ;;  %v9454_v15 = vld [vmem:[#allocation6_spill] sm:$0xff] }
 0x36d   :  { %v3651_v17 = vadd.f32 %v3523_v44, %v8032_v16  ;;  %v8248_v3 = vmul.f32 0.5, %v3647_v37  ;;  %v4287_v29 = vadd.f32 -0.28449672, %v2116_v49  ;;  %v4162_v46 = vadd.f32 -1.4531521, %v1607_v53 }
 0x36e   :  { %4874 = vrcp.f32 %v1352_v7  ;;  %v3397_v21 = vsub.f32 1.0, %v3269_v47  ;;  %v2887_v54 = vmul.f32 %v2759_v24, %v8162_v55  ;;  %v8255_v16 = vmul.f32 0.70710677, %v9093_v13  ;;  %v8259_v40 = vpop.eup %4870  ;;  %v8266_v7 = vpop.permute.xlu1 %229  ;;  %v9457_v47 = vld [vmem:[#allocation13_spill] sm:$0xff] }
 0x36f   :  { %9451 = vst [vmem:[#allocation9_spill] sm:$0xff] %v8248_v3  ;;  %v8250_v18 = vmul.f32 0.5, %v3651_v17  ;;  %v4411_v43 = vpack.c.bf16 %v9454_v15, %v9453_v25  ;;  %v3649_v44 = vadd.f32 %v3521_v19, %v7934_v5  ;;  %v2626_v37 = vmul.f32 %v8116_v8, %v2498_v62  ;;  %v9456_v62 = vld [vmem:[#allocation7_spill] sm:$0xff] }
 0x370   :  { %v1863_v51 = vmul.f32 %v8237_v30, %v4162_v46  ;;  %v3392_v55 = vsub.f32 1.0, %v8232_v60  ;;  %v9455_v24 = vand.u32 2147483647, %v8047_v56  ;;  %v1990_v17 = vadd.f32 1.4214138, %v1862_v48 }
 0x371   :  { %9452 = vst [vmem:[#allocation27_spill] sm:$0xff] %v8250_v18  ;;  %v1226_v53 = vmul.f32 0.3275911, %v8255_v16  ;;  %4412 = vmatprep.subr.bf16.mxu1 %v4411_v43  ;;  %v2372_v5 = vmul.f32 %v8179_v11, %v4287_v29  ;;  %v3117_v19 = vmul.f32 1.442695, %v2886_v2  ;;  %v9458_v25 = vpack.c.bf16 %v9456_v62, %v9457_v47 }
 0x372   :  { %v3525_v27 = vmul.f32 %v3397_v21, %v9455_v24  ;;  %v1991_v8 = vadd.f32 1.4214138, %v1863_v51  ;;  %v8278_v46 = vadd.f32 %v7666_v45, %v8266_v7  ;;  %v8280_v60 = vpop.eup %4872  ;;  %v3119_v48 = vmul.f32 1.442695, %v2887_v54 }
 0x373   :  { %4414 = vmatpush1.bf16.msra.mxu1 %v9458_v25  ;;  %v1354_v15 = vadd.f32 1.0, %v1226_v53  ;;  %v8285_v43 = vadd.f32 %v7668_v6, %v8266_v7  ;;  %v8287_v2 = vmul.f32 0.5, %v3649_v44  ;;  %v3266_v29 = vmul.f32 %v8214_v14, %v2626_v37 }
 0x374   :  { %v3653_v21 = vadd.f32 %v3525_v27, %v8047_v56  ;;  %v2119_v51 = vmul.f32 %v8237_v30, %v1991_v8  ;;  %v1609_v24 = vmul.f32 1.0614054, %v8280_v60  ;;  %v2118_v62 = vmul.f32 %v8207_v4, %v1990_v17 }
 0x375   :  { %9459 = vst [vmem:[#allocation3_spill] sm:$0xff] %v8287_v2  ;;  %v2761_v56 = vsub.f32 0.0, %v8202_v61  ;;  %v9094_v54 = vand.u32 2147483647, %v8278_v46  ;;  %v2500_v27 = vadd.f32 0.2548296, %v2372_v5  ;;  %4876 = vrcp.f32 %v1354_v15 }
 0x376   :  { %v8292_v45 = vmul.f32 0.5, %v3653_v21  ;;  %v4290_v53 = vadd.f32 -0.28449672, %v2119_v51  ;;  %v4164_v6 = vadd.f32 -1.4531521, %v1609_v24  ;;  %4878 = vpow2.f32 %v3119_v48 }
 0x377   :  { %v1099_v37 = vmul.f32 0.70710677, %v9094_v54  ;;  %v9103_v8 = vand.u32 2147483647, %v8285_v43  ;;  %v3394_v17 = vsub.f32 1.0, %v3266_v29  ;;  %v2760_v5 = vsub.f32 0.0, %v8220_v22 }
 0x378   :  { %9460 = vst [vmem:[#allocation48_spill] sm:$0xff] %v8292_v45  ;;  %v8297_v44 = vpop.eup %4874  ;;  %v2375_v47 = vmul.f32 %v8237_v30, %v4290_v53  ;;  %v1865_v25 = vmul.f32 %v8280_v60, %v4164_v6  ;;  %v4289_v21 = vadd.f32 -0.28449672, %v2118_v62  ;;  %v8310_v24 = vadd.f32 %v7689_v0, %v8266_v7 }
 0x379   :  { %v1608_v15 = vmul.f32 1.0614054, %v8297_v44  ;;  %v1227_v51 = vmul.f32 0.3275911, %v1099_v37  ;;  %v2628_v48 = vmul.f32 %v8179_v11, %v2500_v27  ;;  %v2889_v29 = vmul.f32 %v2761_v56, %v8202_v61 }
 0x37a   :  { %v2503_v14 = vadd.f32 0.2548296, %v2375_v47  ;;  %v1993_v49 = vadd.f32 1.4214138, %v1865_v25  ;;  %v9461_v53 = vand.u32 2147483647, %v7938_v1  ;;  %v2888_v0 = vmul.f32 %v2760_v5, %v8220_v22 }
 0x37b   :  { %v4163_v6 = vadd.f32 -1.4531521, %v1608_v15  ;;  %v1355_v54 = vadd.f32 1.0, %v1227_v51  ;;  %v8318_v62 = vmul.f32 0.70710677, %v9103_v8  ;;  %v2762_v45 = vsub.f32 0.0, %v8255_v16 }
 0x37c   :  { %v3520_v13 = vmul.f32 %v3392_v55, %v9461_v53  ;;  %v2121_v2 = vmul.f32 %v8280_v60, %v1993_v49  ;;  %v9097_v11 = vand.u32 2147483647, %v8310_v24  ;;  %v2374_v27 = vmul.f32 %v8207_v4, %v4289_v21 }
 0x37d   :  { %v1864_v61 = vmul.f32 %v8297_v44, %v4163_v6  ;;  %4880 = vrcp.f32 %v1355_v54  ;;  %v1229_v55 = vmul.f32 0.3275911, %v8318_v62  ;;  %v9462_v56 = vand.u32 2147483647, %v7989_v39 }
 0x37e   :  { %v3268_v25 = vmul.f32 %v8259_v40, %v2628_v48  ;;  %4882 = vpow2.f32 %v3117_v19  ;;  %v3123_v49 = vmul.f32 1.442695, %v2889_v29  ;;  %v8331_v22 = vmul.f32 0.5, %v8176_v26 }
 0x37f   :  { %v3522_v47 = vmul.f32 %v3394_v17, %v9462_v56  ;;  %v2631_v5 = vmul.f32 %v8237_v30, %v2503_v14  ;;  %v1357_v15 = vadd.f32 1.0, %v1229_v55  ;;  %v8336_v21 = vmul.f32 0.70710677, %v9097_v11  ;;  %v8338_v54 = vpop.eup %4876 }
 0x380   :  { %v3648_v51 = vadd.f32 %v3520_v13, %v7938_v1  ;;  %v4292_v53 = vadd.f32 -0.28449672, %v2121_v2  ;;  %v3121_v17 = vmul.f32 1.442695, %v2888_v0  ;;  %v2890_v40 = vmul.f32 %v2762_v45, %v8255_v16  ;;  %v4879_v19 = vpop.eup %4878  ;;  %v8349_v13 = vpop.permute.xlu0 %234 }
 0x381   :  { %v2502_v48 = vadd.f32 0.2548296, %v2374_v27  ;;  %v1992_v29 = vadd.f32 1.4214138, %v1864_v61  ;;  %4884 = vrcp.f32 %v1357_v15  ;;  %v1228_v26 = vmul.f32 0.3275911, %v8336_v21 }
 0x382   :  { %v3650_v30 = vadd.f32 %v3522_v47, %v7989_v39  ;;  %v3396_v14 = vsub.f32 1.0, %v3268_v25  ;;  %4886 = vpow2.f32 %v3123_v49  ;;  %v2763_v6 = vsub.f32 0.0, %v1099_v37 }
 0x383   :  { %v3271_v55 = vmul.f32 %v4879_v19, %v2631_v5  ;;  %v1610_v56 = vmul.f32 1.0614054, %v8338_v54  ;;  %v1356_v11 = vadd.f32 1.0, %v1228_v26  ;;  %v8347_v1 = vadd.f32 %v7701_v12, %v8266_v7 }
 0x384   :  { %v8351_v16 = vmul.f32 0.5, %v3648_v51  ;;  %v2377_v2 = vmul.f32 %v8280_v60, %v4292_v53  ;;  %4888 = vpow2.f32 %v3121_v17  ;;  %v3125_v45 = vmul.f32 1.442695, %v2890_v40 }
 0x385   :  { %v2630_v39 = vmul.f32 %v8207_v4, %v2502_v48  ;;  %v2120_v0 = vmul.f32 %v8297_v44, %v1992_v29  ;;  %v9098_v27 = vand.u32 2147483647, %v8347_v1  ;;  %v8359_v61 = vadd.f32 %v7757_v28, %v8349_v13 }
 0x386   :  { %v8361_v12 = vmul.f32 0.5, %v3650_v30  ;;  %v2891_v7 = vmul.f32 %v2763_v6, %v1099_v37  ;;  %v2765_v47 = vsub.f32 0.0, %v8318_v62  ;;  %4890 = vrcp.f32 %v1356_v11 }
 0x387   :  { %v8364_v25 = vpop.eup %4880  ;;  %v9464_v49 = vand.u32 2147483647, %v8068_v32  ;;  %v3399_v4 = vsub.f32 1.0, %v3271_v55  ;;  %v4165_v15 = vadd.f32 -1.4531521, %v1610_v56  ;;  %v8376_v11 = vadd.f32 %v7765_v36, %v8349_v13 }
 0x388   :  { %9463 = vst [vmem:[#allocation47_spill] sm:$0xff] %v8361_v12  ;;  %v8370_v51 = vmul.f32 0.70710677, %v9098_v27  ;;  %v4883_v53 = vpop.eup %4882  ;;  %v2505_v28 = vadd.f32 0.2548296, %v2377_v2  ;;  %4892 = vpow2.f32 %v3125_v45  ;;  %v2893_v30 = vmul.f32 %v2765_v47, %v8318_v62 }
 0x389   :  { %v3524_v5 = vmul.f32 %v3396_v14, %v9464_v49  ;;  %v1611_v17 = vmul.f32 1.0614054, %v8364_v25  ;;  %v9099_v37 = vand.u32 2147483647, %v8359_v61  ;;  %v3270_v40 = vmul.f32 %v4883_v53, %v2630_v39 }
 0x38a   :  { %v4291_v19 = vadd.f32 -0.28449672, %v2120_v0  ;;  %v1230_v48 = vmul.f32 0.3275911, %v8370_v51  ;;  %v3127_v26 = vmul.f32 1.442695, %v2891_v7  ;;  %v1866_v36 = vmul.f32 %v8338_v54, %v4165_v15 }
 0x38b   :  { %v4166_v29 = vadd.f32 -1.4531521, %v1611_v17  ;;  %v8382_v14 = vmul.f32 0.70710677, %v9099_v37  ;;  %v8384_v6 = vpop.eup %4884  ;;  %v9465_v55 = vand.u32 2147483647, %v8139_v41  ;;  %v2633_v0 = vmul.f32 %v8280_v60, %v2505_v28 }
 0x38c   :  { %v2764_v2 = vsub.f32 0.0, %v8336_v21  ;;  %v1358_v45 = vadd.f32 1.0, %v1230_v48  ;;  %v4887_v39 = vpop.eup %4886  ;;  %v1613_v62 = vmul.f32 1.0614054, %v8384_v6  ;;  %v9100_v47 = vand.u32 2147483647, %v8376_v11 }
 0x38d   :  { %v3527_v56 = vmul.f32 %v3399_v4, %v9465_v55  ;;  %v1867_v7 = vmul.f32 %v8364_v25, %v4166_v29  ;;  %v8395_v49 = vadd.f32 %v3524_v5, %v8068_v32  ;;  %v2376_v53 = vmul.f32 %v8297_v44, %v4291_v19 }
 0x38e   :  { %4894 = vrcp.f32 %v1358_v45  ;;  %v1231_v4 = vmul.f32 0.3275911, %v8382_v14  ;;  %v4889_v15 = vpop.eup %4888  ;;  %v3398_v17 = vsub.f32 1.0, %v3270_v40  ;;  %v3131_v55 = vmul.f32 1.442695, %v2893_v30 }
 0x38f   :  { %v1995_v48 = vadd.f32 1.4214138, %v1867_v7  ;;  %4896 = vpow2.f32 %v3127_v26  ;;  %v1994_v60 = vadd.f32 1.4214138, %v1866_v36  ;;  %v4168_v28 = vadd.f32 -1.4531521, %v1613_v62 }
 0x390   :  { %v2892_v29 = vmul.f32 %v2764_v2, %v8336_v21  ;;  %v1359_v27 = vadd.f32 1.0, %v1231_v4  ;;  %v8400_v37 = vpop.eup %4890  ;;  %v3655_v32 = vadd.f32 %v3527_v56, %v8139_v41  ;;  %v3273_v5 = vmul.f32 %v4887_v39, %v2633_v0 }
 0x391   :  { %v2123_v19 = vmul.f32 %v8364_v25, %v1995_v48  ;;  %v8406_v45 = vmul.f32 0.70710677, %v9100_v47  ;;  %v2504_v40 = vadd.f32 0.2548296, %v2376_v53  ;;  %v1869_v26 = vmul.f32 %v8384_v6, %v4168_v28 }
 0x392   :  { %v1612_v30 = vmul.f32 1.0614054, %v8400_v37  ;;  %4898 = vrcp.f32 %v1359_v27  ;;  %v9466_v21 = vand.u32 2147483647, %v8114_v10  ;;  %v8415_v56 = vpop.eup %4892  ;;  %v2122_v39 = vmul.f32 %v8338_v54, %v1994_v60 }
 0x393   :  { %v4294_v2 = vadd.f32 -0.28449672, %v2123_v19  ;;  %4900 = vpow2.f32 %v3131_v55  ;;  %v1233_v41 = vmul.f32 0.3275911, %v8406_v45  ;;  %v1997_v0 = vadd.f32 1.4214138, %v1869_v26 }
 0x394   :  { %v8412_v36 = vmul.f32 %v3398_v17, %v9466_v21  ;;  %v4167_v7 = vadd.f32 -1.4531521, %v1612_v30  ;;  %v3129_v62 = vmul.f32 1.442695, %v2892_v29  ;;  %v8418_v53 = vmul.f32 0.5, %v3655_v32  ;;  %v9467_v29 = vld [vmem:[#allocation4_spill] sm:$0xff] }
 0x395   :  { %v3401_v4 = vsub.f32 1.0, %v3273_v5  ;;  %v2379_v27 = vmul.f32 %v8364_v25, %v4294_v2  ;;  %v1361_v48 = vadd.f32 1.0, %v1233_v41  ;;  %v2632_v17 = vmul.f32 %v8297_v44, %v2504_v40  ;;  %v9468_v40 = vld [vmem:[#allocation20_spill] sm:$0xff]  ;;  %v9469_v21 = vld [vmem:[#allocation2_spill] sm:$0xff] }
 0x396   :  { %v2125_v28 = vmul.f32 %v8384_v6, %v1997_v0  ;;  %v1868_v55 = vmul.f32 %v8400_v37, %v4167_v7  ;;  %v8426_v19 = vadd.f32 %v7804_v34, %v8349_v13  ;;  %v2766_v26 = vsub.f32 0.0, %v8370_v51 }
 0x397   :  { %v2507_v60 = vadd.f32 0.2548296, %v2379_v27  ;;  %4902 = vrcp.f32 %v1361_v48  ;;  %v8431_v32 = vadd.f32 %v9467_v29, %v8349_v13  ;;  %v4293_v30 = vadd.f32 -0.28449672, %v2122_v39 }
 0x398   :  { %v8433_v5 = vpop.eup %4894  ;;  %v4296_v44 = vadd.f32 -0.28449672, %v2125_v28  ;;  %4904 = vpow2.f32 %v3129_v62  ;;  %v4351_v2 = vpack.c.bf16 %v9469_v21, %v9468_v40  ;;  %v9470_v34 = vand.u32 2147483647, %v8185_v23 }
 0x399   :  { %v4897_v41 = vpop.eup %4896  ;;  %v2635_v7 = vmul.f32 %v8364_v25, %v2507_v60  ;;  %v1614_v27 = vmul.f32 1.0614054, %v8433_v5  ;;  %v9102_v48 = vand.u32 2147483647, %v8426_v19  ;;  %v3272_v13 = vmul.f32 %v4889_v15, %v2632_v17  ;;  %v9471_v25 = vld [vmem:[#allocation41_spill] sm:$0xff]  ;;  %v9472_v60 = vld [vmem:[#allocation24_spill] sm:$0xff] }
 0x39a   :  { %v3529_v0 = vmul.f32 %v3401_v4, %v9470_v34  ;;  %v2381_v29 = vmul.f32 %v8384_v6, %v4296_v44  ;;  %v1996_v47 = vadd.f32 1.4214138, %v1868_v55  ;;  %v9101_v39 = vand.u32 2147483647, %v8431_v32  ;;  %4352 = vmatprep.subr.bf16.mxu0 %v4351_v2  ;;  %v9474_v44 = vld [vmem:[#allocation28_spill] sm:$0xff]  ;;  %v9475_v2 = vld [vmem:[#allocation29_spill] sm:$0xff] }
 0x39b   :  { %v3275_v62 = vmul.f32 %v4897_v41, %v2635_v7  ;;  %v4169_v28 = vadd.f32 -1.4531521, %v1614_v27  ;;  %v2894_v40 = vmul.f32 %v2766_v26, %v8370_v51  ;;  %v8447_v4 = vmul.f32 0.70710677, %v9102_v48  ;;  %v9478_v48 = vld [vmem:[#allocation16_spill] sm:$0xff] }
 0x39c   :  { %v9473_v21 = vpack.c.bf16 %v9471_v25, %v9472_v60  ;;  %v8452_v34 = vpop.eup %4898  ;;  %v2378_v15 = vmul.f32 %v8338_v54, %v4293_v30  ;;  %v2509_v17 = vadd.f32 0.2548296, %v2381_v29  ;;  %v8457_v55 = vmul.f32 0.70710677, %v9101_v39 }
 0x39d   :  { %v4415_v51 = vpack.c.bf16 %v9475_v2, %v9474_v44  ;;  %v4901_v26 = vpop.eup %4900  ;;  %v3657_v41 = vadd.f32 %v3529_v0, %v8185_v23  ;;  %v3403_v7 = vsub.f32 1.0, %v3275_v62  ;;  %v1615_v27 = vmul.f32 1.0614054, %v8452_v34  ;;  %v9477_v62 = vld [vmem:[#allocation25_spill] sm:$0xff] }
 0x39e   :  { %4354 = vmatpush1.bf16.msra.mxu0 %v9473_v21  ;;  %v1232_v25 = vmul.f32 0.3275911, %v8447_v4  ;;  %v2637_v60 = vmul.f32 %v8384_v6, %v2509_v17  ;;  %v2124_v30 = vmul.f32 %v8400_v37, %v1996_v47  ;;  %v2767_v29 = vsub.f32 0.0, %v8382_v14 }
 0x39f   :  { %v1234_v21 = vmul.f32 0.3275911, %v8457_v55  ;;  %4416 = vmatprep.subr.bf16.mxu1 %v4415_v51  ;;  %v9476_v39 = vand.u32 2147483647, %v8278_v46  ;;  %v1870_v2 = vmul.f32 %v8433_v5, %v4169_v28  ;;  %v4170_v23 = vadd.f32 -1.4531521, %v1615_v27 }
 0x3a0   :  { %v1360_v0 = vadd.f32 1.0, %v1232_v25  ;;  %v9479_v8 = vpack.c.bf16 %v9477_v62, %v9478_v48  ;;  %v3400_v3 = vsub.f32 1.0, %v3272_v13  ;;  %v2506_v6 = vadd.f32 0.2548296, %v2378_v15 }
 0x3a1   :  { %v3531_v44 = vmul.f32 %v3403_v7, %v9476_v39  ;;  %v3277_v17 = vmul.f32 %v4901_v26, %v2637_v60  ;;  %v1362_v47 = vadd.f32 1.0, %v1234_v21  ;;  %v8474_v18 = vpop.eup %4902  ;;  %v1871_v51 = vmul.f32 %v8452_v34, %v4170_v23 }
 0x3a2   :  { %4418 = vmatpush1.bf16.msra.mxu1 %v9479_v8  ;;  %v2769_v39 = vsub.f32 0.0, %v8406_v45  ;;  %4906 = vrcp.f32 %v1360_v0  ;;  %v8479_v28 = vpop.eup %4904  ;;  %v4295_v27 = vadd.f32 -0.28449672, %v2124_v30  ;;  %v2895_v48 = vmul.f32 %v2767_v29, %v8382_v14  ;;  %v8489_v0 = vpop.permute.xlu1 %239 }
 0x3a3   :  { %v3659_v12 = vadd.f32 %v3531_v44, %v8278_v46  ;;  %v3405_v7 = vsub.f32 1.0, %v3277_v17  ;;  %v1617_v8 = vmul.f32 1.0614054, %v8474_v18  ;;  %v1998_v15 = vadd.f32 1.4214138, %v1870_v2 }
 0x3a4   :  { %v1999_v26 = vadd.f32 1.4214138, %v1871_v51  ;;  %4908 = vrcp.f32 %v1362_v47  ;;  %v9480_v46 = vand.u32 2147483647, %v8195_v52  ;;  %v9481_v60 = vand.u32 2147483647, %v8285_v43 }
 0x3a5   :  { %v8483_v13 = vmul.f32 0.5, %v3659_v12  ;;  %v3133_v44 = vmul.f32 1.442695, %v2894_v40  ;;  %v4172_v23 = vadd.f32 -1.4531521, %v1617_v8  ;;  %v2634_v30 = vmul.f32 %v8338_v54, %v2506_v6  ;;  %v9482_v40 = vld [vmem:[#allocation18_spill] sm:$0xff] }
 0x3a6   :  { %v3528_v25 = vmul.f32 %v3400_v3, %v9480_v46  ;;  %v3533_v21 = vmul.f32 %v3405_v7, %v9481_v60  ;;  %v2127_v12 = vmul.f32 %v8452_v34, %v1999_v26  ;;  %v2897_v29 = vmul.f32 %v2769_v39, %v8406_v45  ;;  %v9483_v51 = vld [vmem:[#allocation15_spill] sm:$0xff] }
 0x3a7   :  { %v2380_v3 = vmul.f32 %v8400_v37, %v4295_v27  ;;  %v1873_v62 = vmul.f32 %v8474_v18, %v4172_v23  ;;  %v8501_v17 = vadd.f32 %v9482_v40, %v8489_v0  ;;  %v2126_v47 = vmul.f32 %v8433_v5, %v1998_v15 }
 0x3a8   :  { %v3661_v2 = vadd.f32 %v3533_v21, %v8285_v43  ;;  %v4298_v54 = vadd.f32 -0.28449672, %v2127_v12  ;;  %v3135_v6 = vmul.f32 1.442695, %v2895_v48  ;;  %v8506_v7 = vadd.f32 %v9483_v51, %v8489_v0 }
 0x3a9   :  { %v8508_v8 = vmul.f32 0.5, %v3657_v41  ;;  %v2001_v43 = vadd.f32 1.4214138, %v1873_v62  ;;  %v9110_v39 = vand.u32 2147483647, %v8501_v17  ;;  %v3654_v27 = vadd.f32 %v8412_v36, %v8114_v10 }
 0x3aa   :  { %v8510_v45 = vmul.f32 0.5, %v3661_v2  ;;  %4910 = vpow2.f32 %v3133_v44  ;;  %v3139_v26 = vmul.f32 1.442695, %v2897_v29  ;;  %v9106_v15 = vand.u32 2147483647, %v8506_v7 }
 0x3ab   :  { %9484 = vst [vmem:[#allocation42_spill] sm:$0xff] %v8508_v8  ;;  %v2508_v46 = vadd.f32 0.2548296, %v2380_v3  ;;  %v2129_v60 = vmul.f32 %v8474_v18, %v2001_v43  ;;  %v1107_v41 = vmul.f32 0.70710677, %v9110_v39  ;;  %v3656_v23 = vadd.f32 %v3528_v25, %v8195_v52 }
 0x3ac   :  { %v8521_v21 = vpop.eup %4906  ;;  %v3274_v12 = vmul.f32 %v8415_v56, %v2634_v30  ;;  %v4297_v10 = vadd.f32 -0.28449672, %v2126_v47  ;;  %v8527_v36 = vmul.f32 0.70710677, %v9106_v15  ;;  %v2383_v44 = vmul.f32 %v8452_v34, %v4298_v54 }
 0x3ad   :  { %4912 = vpow2.f32 %v3135_v6  ;;  %v4300_v29 = vadd.f32 -0.28449672, %v2129_v60  ;;  %v1616_v2 = vmul.f32 1.0614054, %v8521_v21  ;;  %v2768_v62 = vsub.f32 0.0, %v8447_v4 }
 0x3ae   :  { %v8531_v3 = vpop.eup %4908  ;;  %4914 = vpow2.f32 %v3139_v26  ;;  %v1235_v40 = vmul.f32 0.3275911, %v1107_v41  ;;  %v1237_v52 = vmul.f32 0.3275911, %v8527_v36  ;;  %v2636_v56 = vmul.f32 %v8400_v37, %v2508_v46 }
 0x3af   :  { %v2385_v25 = vmul.f32 %v8474_v18, %v4300_v29  ;;  %v4171_v30 = vadd.f32 -1.4531521, %v1616_v2  ;;  %v1618_v47 = vmul.f32 1.0614054, %v8531_v3  ;;  %v2382_v54 = vmul.f32 %v8433_v5, %v4297_v10 }
 0x3b0   :  { %v2770_v6 = vsub.f32 0.0, %v8457_v55  ;;  %v1363_v51 = vadd.f32 1.0, %v1235_v40  ;;  %v1365_v43 = vadd.f32 1.0, %v1237_v52  ;;  %v2511_v60 = vadd.f32 0.2548296, %v2383_v44 }
 0x3b1   :  { %v2513_v26 = vadd.f32 0.2548296, %v2385_v25  ;;  %v1872_v48 = vmul.f32 %v8521_v21, %v4171_v30  ;;  %v4173_v14 = vadd.f32 -1.4531521, %v1618_v47  ;;  %v8542_v15 = vmul.f32 0.5, %v8395_v49  ;;  %v8552_v49 = vpop.permute.xlu0 %244 }
 0x3b2   :  { %v3402_v37 = vsub.f32 1.0, %v3274_v12  ;;  %v2896_v46 = vmul.f32 %v2768_v62, %v8447_v4  ;;  %4916 = vrcp.f32 %v1363_v51  ;;  %v8545_v29 = vmul.f32 0.5, %v3654_v27  ;;  %v9485_v62 = vld [vmem:[#allocation45_spill] sm:$0xff] }
 0x3b3   :  { %v3276_v10 = vmul.f32 %v8479_v28, %v2636_v56  ;;  %v2000_v2 = vadd.f32 1.4214138, %v1872_v48  ;;  %v1874_v40 = vmul.f32 %v8531_v3, %v4173_v14  ;;  %v8549_v44 = vmul.f32 0.5, %v3656_v23  ;;  %v9487_v56 = vld [vmem:[#allocation46_spill] sm:$0xff] }
 0x3b4   :  { %v4911_v52 = vpop.eup %4910  ;;  %v2510_v25 = vadd.f32 0.2548296, %v2382_v54  ;;  %v2898_v30 = vmul.f32 %v2770_v6, %v8457_v55  ;;  %4918 = vrcp.f32 %v1365_v43  ;;  %v2639_v12 = vmul.f32 %v8452_v34, %v2511_v60 }
 0x3b5   :  { %v2641_v4 = vmul.f32 %v8474_v18, %v2513_v26  ;;  %v2771_v27 = vsub.f32 0.0, %v1107_v41  ;;  %v8558_v28 = vadd.f32 %v9485_v62, %v8489_v0  ;;  %v9486_v14 = vand.u32 2147483647, %v8225_v20 }
 0x3b6   :  { %v3137_v23 = vmul.f32 1.442695, %v2896_v46  ;;  %v8564_v47 = vadd.f32 %v9487_v56, %v8489_v0  ;;  %v8568_v55 = vadd.f32 %v7996_v63, %v8552_v49  ;;  %v3404_v54 = vsub.f32 1.0, %v3276_v10 }
 0x3b7   :  { %v3530_v48 = vmul.f32 %v3402_v37, %v9486_v14  ;;  %v4913_v34 = vpop.eup %4912  ;;  %v2128_v18 = vmul.f32 %v8521_v21, %v2000_v2  ;;  %v2002_v6 = vadd.f32 1.4214138, %v1874_v40  ;;  %v9109_v51 = vand.u32 2147483647, %v8558_v28 }
 0x3b8   :  { %v4915_v43 = vpop.eup %4914  ;;  %v2638_v60 = vmul.f32 %v8433_v5, %v2510_v25  ;;  %v3141_v26 = vmul.f32 1.442695, %v2898_v30  ;;  %v9108_v37 = vand.u32 2147483647, %v8564_v47  ;;  %v9107_v0 = vand.u32 2147483647, %v8568_v55 }
 0x3b9   :  { %v3279_v46 = vmul.f32 %v4913_v34, %v2639_v12  ;;  %v3281_v62 = vmul.f32 %v4915_v43, %v2641_v4  ;;  %v2899_v14 = vmul.f32 %v2771_v27, %v1107_v41  ;;  %v8577_v63 = vmul.f32 0.70710677, %v9109_v51 }
 0x3ba   :  { %v8580_v10 = vadd.f32 %v3530_v48, %v8225_v20  ;;  %4920 = vpow2.f32 %v3137_v23  ;;  %v2773_v2 = vsub.f32 0.0, %v8527_v36  ;;  %v8585_v5 = vmul.f32 0.70710677, %v9108_v37 }
 0x3bb   :  { %v9488_v40 = vand.u32 2147483647, %v8310_v24  ;;  %v4299_v30 = vadd.f32 -0.28449672, %v2128_v18  ;;  %v2130_v41 = vmul.f32 %v8531_v3, %v2002_v6  ;;  %v1236_v12 = vmul.f32 0.3275911, %v8577_v63 }
 0x3bc   :  { %v8593_v4 = vpop.eup %4916  ;;  %v3278_v20 = vmul.f32 %v4911_v52, %v2638_v60  ;;  %4922 = vpow2.f32 %v3141_v26  ;;  %v1238_v27 = vmul.f32 0.3275911, %v8585_v5  ;;  %v8598_v48 = vmul.f32 0.70710677, %v9107_v0 }
 0x3bd   :  { %v8589_v25 = vmul.f32 %v3404_v54, %v9488_v40  ;;  %v3407_v23 = vsub.f32 1.0, %v3279_v46  ;;  %v3409_v56 = vsub.f32 1.0, %v3281_v62  ;;  %v1619_v34 = vmul.f32 1.0614054, %v8593_v4 }
 0x3be   :  { %v3143_v54 = vmul.f32 1.442695, %v2899_v14  ;;  %v8601_v18 = vpop.eup %4918  ;;  %v2901_v6 = vmul.f32 %v2773_v2, %v8527_v36  ;;  %v1364_v43 = vadd.f32 1.0, %v1236_v12  ;;  %v8606_v52 = vadd.f32 %v8006_v38, %v8552_v49 }
 0x3bf   :  { %v8610_v60 = vadd.f32 %v8034_v9, %v8552_v49  ;;  %v2384_v26 = vmul.f32 %v8521_v21, %v4299_v30  ;;  %v4301_v46 = vadd.f32 -0.28449672, %v2130_v41  ;;  %v4174_v62 = vadd.f32 -1.4531521, %v1619_v34 }
 0x3c0   :  { %v1621_v40 = vmul.f32 1.0614054, %v8601_v18  ;;  %v3406_v14 = vsub.f32 1.0, %v3278_v20  ;;  %4924 = vrcp.f32 %v1364_v43  ;;  %v1366_v0 = vadd.f32 1.0, %v1238_v27 }
 0x3c1   :  { %9489 = vst [vmem:[#allocation53_spill] sm:$0xff] %v8610_v60  ;;  %v1239_v36 = vmul.f32 0.3275911, %v8598_v48  ;;  %v9490_v2 = vand.u32 2147483647, %v8359_v61  ;;  %v1875_v9 = vmul.f32 %v8593_v4, %v4174_v62  ;;  %4926 = vpow2.f32 %v3143_v54 }
 0x3c2   :  { %v9491_v38 = vand.u32 2147483647, %v8376_v11  ;;  %v4176_v51 = vadd.f32 -1.4531521, %v1621_v40  ;;  %v3147_v30 = vmul.f32 1.442695, %v2901_v6  ;;  %v2386_v27 = vmul.f32 %v8531_v3, %v4301_v46 }
 0x3c3   :  { %v3535_v12 = vmul.f32 %v3407_v23, %v9490_v2  ;;  %v9113_v41 = vand.u32 2147483647, %v8606_v52  ;;  %v9112_v34 = vand.u32 2147483647, %v8610_v60  ;;  %v2512_v20 = vadd.f32 0.2548296, %v2384_v26 }
 0x3c4   :  { %v3537_v37 = vmul.f32 %v3409_v56, %v9491_v38  ;;  %v2003_v43 = vadd.f32 1.4214138, %v1875_v9  ;;  %v1877_v39 = vmul.f32 %v8601_v18, %v4176_v51  ;;  %v4921_v8 = vpop.eup %4920  ;;  %4928 = vrcp.f32 %v1366_v0 }
 0x3c5   :  { %v1367_v23 = vadd.f32 1.0, %v1239_v36  ;;  %v8626_v56 = vmul.f32 0.70710677, %v9113_v41  ;;  %v8630_v54 = vmul.f32 0.70710677, %v9112_v34  ;;  %v3663_v6 = vadd.f32 %v3535_v12, %v8359_v61 }
 0x3c6   :  { %v3665_v26 = vadd.f32 %v3537_v37, %v8376_v11  ;;  %v2131_v46 = vmul.f32 %v8593_v4, %v2003_v43  ;;  %v2005_v62 = vadd.f32 1.4214138, %v1877_v39  ;;  %v4923_v40 = vpop.eup %4922  ;;  %4930 = vpow2.f32 %v3147_v30 }
 0x3c7   :  { %v2772_v51 = vsub.f32 0.0, %v8577_v63  ;;  %v2774_v0 = vsub.f32 0.0, %v8585_v5  ;;  %v1241_v36 = vmul.f32 0.3275911, %v8626_v56  ;;  %v9492_v2 = vand.u32 2147483647, %v8347_v1 }
 0x3c8   :  { %v2640_v9 = vmul.f32 %v8521_v21, %v2512_v20  ;;  %v4302_v61 = vadd.f32 -0.28449672, %v2131_v46  ;;  %v2133_v11 = vmul.f32 %v8601_v18, %v2005_v62  ;;  %v2514_v37 = vadd.f32 0.2548296, %v2386_v27 }
 0x3c9   :  { %v8640_v38 = vmul.f32 %v3406_v14, %v9492_v2  ;;  %4932 = vrcp.f32 %v1367_v23  ;;  %v1369_v39 = vadd.f32 1.0, %v1241_v36  ;;  %v1240_v12 = vmul.f32 0.3275911, %v8630_v54  ;;  %v9493_v2 = vld [vmem:[#allocation26_spill] sm:$0xff] }
 0x3ca   :  { %v8645_v30 = vmul.f32 0.5, %v3663_v6  ;;  %v8647_v43 = vmul.f32 0.5, %v3665_v26  ;;  %v2387_v34 = vmul.f32 %v8593_v4, %v4302_v61  ;;  %v4304_v41 = vadd.f32 -0.28449672, %v2133_v11  ;;  %v8650_v60 = vpop.eup %4924 }
 0x3cb   :  { %v2900_v14 = vmul.f32 %v2772_v51, %v8577_v63  ;;  %v2902_v21 = vmul.f32 %v2774_v0, %v8585_v5  ;;  %4934 = vrcp.f32 %v1369_v39  ;;  %v1368_v20 = vadd.f32 1.0, %v1240_v12  ;;  %v4927_v26 = vpop.eup %4926  ;;  %v9494_v63 = vld [vmem:[#allocation52_spill] sm:$0xff]  ;;  %v9495_v5 = vld [vmem:[#allocation50_spill] sm:$0xff] }
 0x3cc   :  { %v2515_v27 = vadd.f32 0.2548296, %v2387_v34  ;;  %v2389_v23 = vmul.f32 %v8601_v18, %v4304_v41  ;;  %v1620_v46 = vmul.f32 1.0614054, %v8650_v60  ;;  %v8658_v6 = vadd.f32 %v8049_v59, %v8552_v49  ;;  %v9496_v0 = vld [vmem:[#allocation12_spill] sm:$0xff]  ;;  %v8667_v34 = vpop.permute.xlu1 %249 }
 0x3cd   :  { %v8660_v62 = vmul.f32 %v4921_v8, %v2640_v9  ;;  %v2642_v36 = vmul.f32 %v8531_v3, %v2514_v37  ;;  %v4355_v51 = vpack.c.bf16 %v9494_v63, %v9493_v2  ;;  %v4419_v61 = vpack.c.bf16 %v9496_v0, %v9495_v5 }
 0x3ce   :  { %v2643_v41 = vmul.f32 %v8593_v4, %v2515_v27  ;;  %v2517_v11 = vadd.f32 0.2548296, %v2389_v23  ;;  %v4175_v39 = vadd.f32 -1.4531521, %v1620_v46  ;;  %4936 = vrcp.f32 %v1368_v20  ;;  %v8670_v59 = vpop.eup %4928  ;;  %v9497_v20 = vld [vmem:[#allocation31_spill] sm:$0xff]  ;;  %v9498_v23 = vld [vmem:[#allocation57_spill] sm:$0xff] }
 0x3cf   :  { %v3145_v49 = vmul.f32 1.442695, %v2900_v14  ;;  %v3149_v8 = vmul.f32 1.442695, %v2902_v21  ;;  %v9116_v9 = vand.u32 2147483647, %v8658_v6  ;;  %4356 = vmatprep.subr.bf16.mxu0 %v4355_v51  ;;  %4420 = vmatprep.subr.bf16.mxu1 %v4419_v61  ;;  %v8675_v3 = vadd.f32 %v8121_v35, %v8667_v34 }
 0x3d0   :  { %v3283_v37 = vmul.f32 %v4927_v26, %v2643_v41  ;;  %v2645_v12 = vmul.f32 %v8601_v18, %v2517_v11  ;;  %v1876_v4 = vmul.f32 %v8650_v60, %v4175_v39  ;;  %v1622_v27 = vmul.f32 1.0614054, %v8670_v59  ;;  %v9500_v14 = vld [vmem:[#allocation37_spill] sm:$0xff]  ;;  %v9501_v21 = vld [vmem:[#allocation30_spill] sm:$0xff]  ;;  %v4931_v63 = vpop.eup %4930 }
 0x3d1   :  { %v9499_v46 = vpack.c.bf16 %v9497_v20, %v9498_v23  ;;  %v9502_v2 = vpack.c.bf16 %v9500_v14, %v9501_v21  ;;  %v3408_v51 = vsub.f32 1.0, %v8660_v62  ;;  %v8689_v35 = vmul.f32 0.70710677, %v9116_v9 }
 0x3d2   :  { %v9117_v18 = vand.u32 2147483647, %v8675_v3  ;;  %v8694_v26 = vadd.f32 %v8132_v50, %v8667_v34  ;;  %v3411_v5 = vsub.f32 1.0, %v3283_v37  ;;  %v3285_v0 = vmul.f32 %v4931_v63, %v2645_v12 }
 0x3d3   :  { %4358 = vmatpush1.bf16.msra.mxu0 %v9499_v46  ;;  %4422 = vmatpush1.bf16.msra.mxu1 %v9502_v2  ;;  %v2004_v61 = vadd.f32 1.4214138, %v1876_v4  ;;  %v4177_v41 = vadd.f32 -1.4531521, %v1622_v27  ;;  %v8696_v11 = vpop.eup %4932  ;;  %v8698_v39 = vmul.f32 %v4923_v40, %v2642_v36  ;;  %4938 = vpow2.f32 %v3145_v49 }
 0x3d4   :  { %v1242_v62 = vmul.f32 0.3275911, %v8689_v35  ;;  %v8703_v20 = vmul.f32 0.70710677, %v9117_v18  ;;  %v9503_v23 = vand.u32 2147483647, %v8501_v17  ;;  %4940 = vpow2.f32 %v3149_v8 }
 0x3d5   :  { %v3413_v50 = vsub.f32 1.0, %v3285_v0  ;;  %v2132_v37 = vmul.f32 %v8650_v60, %v2004_v61  ;;  %v1878_v12 = vmul.f32 %v8670_v59, %v4177_v41  ;;  %v8709_v4 = vpop.eup %4934  ;;  %v1623_v40 = vmul.f32 1.0614054, %v8696_v11 }
 0x3d6   :  { %v3539_v46 = vmul.f32 %v3411_v5, %v9503_v23  ;;  %v2775_v36 = vsub.f32 0.0, %v8598_v48  ;;  %v1370_v49 = vadd.f32 1.0, %v1242_v62  ;;  %v9504_v21 = vand.u32 2147483647, %v8506_v7 }
 0x3d7   :  { %v4303_v63 = vadd.f32 -0.28449672, %v2132_v37  ;;  %v2006_v5 = vadd.f32 1.4214138, %v1878_v12  ;;  %v4178_v0 = vadd.f32 -1.4531521, %v1623_v40 }
 0x3d8   :  { %v3667_v14 = vadd.f32 %v3539_v46, %v8501_v17  ;;  %v3541_v2 = vmul.f32 %v3413_v50, %v9504_v21  ;;  %v1625_v61 = vmul.f32 1.0614054, %v8709_v4  ;;  %v1243_v41 = vmul.f32 0.3275911, %v8703_v20  ;;  %v8719_v23 = vpop.eup %4936 }
 0x3d9   :  { %v2388_v18 = vmul.f32 %v8650_v60, %v4303_v63  ;;  %v2134_v17 = vmul.f32 %v8670_v59, %v2006_v5  ;;  %v1879_v46 = vmul.f32 %v8696_v11, %v4178_v0  ;;  %v1624_v8 = vmul.f32 1.0614054, %v8719_v23 }
 0x3da   :  { %v8721_v9 = vmul.f32 0.5, %v3667_v14  ;;  %v3669_v62 = vadd.f32 %v3541_v2, %v8506_v7  ;;  %v4180_v50 = vadd.f32 -1.4531521, %v1625_v61  ;;  %4942 = vrcp.f32 %v1370_v49 }
 0x3db   :  { %v2516_v40 = vadd.f32 0.2548296, %v2388_v18  ;;  %v4305_v14 = vadd.f32 -0.28449672, %v2134_v17  ;;  %v2007_v21 = vadd.f32 1.4214138, %v1879_v46  ;;  %v2903_v49 = vmul.f32 %v2775_v36, %v8598_v48 }
 0x3dc   :  { %v8730_v12 = vmul.f32 0.5, %v3669_v62  ;;  %v1881_v7 = vmul.f32 %v8709_v4, %v4180_v50  ;;  %v4179_v2 = vadd.f32 -1.4531521, %v1624_v8  ;;  %v1371_v63 = vadd.f32 1.0, %v1243_v41 }
 0x3dd   :  { %v2644_v0 = vmul.f32 %v8650_v60, %v2516_v40  ;;  %v2390_v61 = vmul.f32 %v8670_v59, %v4305_v14  ;;  %v4939_v27 = vpop.eup %4938  ;;  %v2135_v62 = vmul.f32 %v8696_v11, %v2007_v21  ;;  %v2777_v18 = vsub.f32 0.0, %v8626_v56 }
 0x3de   :  { %v4445_v5 = vpack.c.bf16 %v8730_v12, %v8647_v43  ;;  %v2009_v37 = vadd.f32 1.4214138, %v1881_v7  ;;  %4944 = vrcp.f32 %v1371_v63  ;;  %v9505_v17 = vand.u32 2147483647, %v8426_v19 }
 0x3df   :  { %v2518_v41 = vadd.f32 0.2548296, %v2390_v61  ;;  %v2776_v50 = vsub.f32 0.0, %v8630_v54  ;;  %v9506_v8 = vand.u32 2147483647, %v8694_v26  ;;  %v3410_v40 = vsub.f32 1.0, %v8698_v39  ;;  %v4941_v61 = vpop.eup %4940 }
 0x3e0   :  { %v3536_v46 = vmul.f32 %v3408_v51, %v9505_v17  ;;  %v3284_v14 = vmul.f32 %v4939_v27, %v2644_v0  ;;  %v1880_v48 = vmul.f32 %v8719_v23, %v4179_v2  ;;  %v8749_v36 = vadd.f32 %v8164_v42, %v8667_v34 }
 0x3e1   :  { %v1117_v60 = vmul.f32 0.70710677, %v9506_v8  ;;  %v3660_v21 = vadd.f32 %v8589_v25, %v8310_v24  ;;  %v4306_v7 = vadd.f32 -0.28449672, %v2135_v62  ;;  %v3151_v51 = vmul.f32 1.442695, %v2903_v49 }
 0x3e2   :  { %v8754_v17 = vmul.f32 0.5, %v8580_v10  ;;  %v2646_v8 = vmul.f32 %v8670_v59, %v2518_v41  ;;  %v2137_v39 = vmul.f32 %v8709_v4, %v2009_v37  ;;  %v2905_v27 = vmul.f32 %v2777_v18, %v8626_v56 }
 0x3e3   :  { %v1245_v63 = vmul.f32 0.3275911, %v1117_v60  ;;  %v3662_v42 = vadd.f32 %v8640_v38, %v8347_v1  ;;  %v3664_v2 = vadd.f32 %v3536_v46, %v8426_v19  ;;  %v2904_v24 = vmul.f32 %v2776_v50, %v8630_v54 }
 0x3e4   :  { %v2779_v25 = vsub.f32 0.0, %v8703_v20  ;;  %v8764_v0 = vpop.eup %4942  ;;  %v3412_v49 = vsub.f32 1.0, %v3284_v14  ;;  %v2008_v10 = vadd.f32 1.4214138, %v1880_v48  ;;  %v988_v59 = vand.u32 2147483647, %v8749_v36 }
 0x3e5   :  { %v1373_v62 = vadd.f32 1.0, %v1245_v63  ;;  %v8767_v41 = vmul.f32 0.5, %v3660_v21  ;;  %v9507_v56 = vand.u32 2147483647, %v8431_v32  ;;  %v2391_v1 = vmul.f32 %v8696_v11, %v4306_v7 }
 0x3e6   :  { %4946 = vpow2.f32 %v3151_v51  ;;  %v3286_v19 = vmul.f32 %v4941_v61, %v2646_v8  ;;  %v4308_v38 = vadd.f32 -0.28449672, %v2137_v39  ;;  %v3155_v54 = vmul.f32 1.442695, %v2905_v27 }
 0x3e7   :  { %v3538_v37 = vmul.f32 %v3410_v40, %v9507_v56  ;;  %4948 = vrcp.f32 %v1373_v62  ;;  %v8772_v18 = vmul.f32 0.5, %v3662_v42  ;;  %v8774_v46 = vmul.f32 0.5, %v3664_v2 }
 0x3e8   :  { %v3153_v50 = vmul.f32 1.442695, %v2904_v24  ;;  %v1626_v14 = vmul.f32 1.0614054, %v8764_v0  ;;  %v8777_v48 = vpop.eup %4944  ;;  %v9508_v21 = vand.u32 2147483647, %v8558_v28  ;;  %v2136_v40 = vmul.f32 %v8719_v23, %v2008_v10 }
 0x3e9   :  { %v2907_v7 = vmul.f32 %v2779_v25, %v8703_v20  ;;  %v8785_v51 = vmul.f32 0.70710677, %v988_v59  ;;  %v3666_v61 = vadd.f32 %v3538_v37, %v8431_v32  ;;  %v2519_v8 = vadd.f32 0.2548296, %v2391_v1 }
 0x3ea   :  { %v3540_v63 = vmul.f32 %v3412_v49, %v9508_v21  ;;  %v1627_v39 = vmul.f32 1.0614054, %v8777_v48  ;;  %v2781_v27 = vsub.f32 0.0, %v1117_v60  ;;  %v3414_v42 = vsub.f32 1.0, %v3286_v19 }
 0x3eb   :  { %v2393_v2 = vmul.f32 %v8709_v4, %v4308_v38  ;;  %4950 = vpow2.f32 %v3155_v54  ;;  %v1244_v24 = vmul.f32 0.3275911, %v8785_v51  ;;  %v4181_v49 = vadd.f32 -1.4531521, %v1626_v14 }
 0x3ec   :  { %4952 = vpow2.f32 %v3153_v50  ;;  %v2778_v20 = vsub.f32 0.0, %v8689_v35  ;;  %v4182_v25 = vadd.f32 -1.4531521, %v1627_v39  ;;  %v3668_v10 = vadd.f32 %v3540_v63, %v8558_v28 }
 0x3ed   :  { %v4307_v62 = vadd.f32 -0.28449672, %v2136_v40  ;;  %v3159_v56 = vmul.f32 1.442695, %v2907_v7  ;;  %v1372_v32 = vadd.f32 1.0, %v1244_v24  ;;  %v2647_v37 = vmul.f32 %v8696_v11, %v2519_v8  ;;  %v9511_v8 = vld [vmem:[#allocation23_spill] sm:$0xff] }
 0x3ee   :  { %v1883_v1 = vmul.f32 %v8777_v48, %v4182_v25  ;;  %v2909_v19 = vmul.f32 %v2781_v27, %v1117_v60  ;;  %v8797_v38 = vadd.f32 %v8190_v58, %v8667_v34  ;;  %v8799_v54 = vmul.f32 0.5, %v3666_v61  ;;  %v9510_v61 = vld [vmem:[#allocation33_spill] sm:$0xff] }
 0x3ef   :  { %v9509_v50 = vand.u32 2147483647, %v8564_v47  ;;  %v2521_v21 = vadd.f32 0.2548296, %v2393_v2  ;;  %4954 = vrcp.f32 %v1372_v32  ;;  %v1882_v63 = vmul.f32 %v8764_v0, %v4181_v49  ;;  %v9512_v25 = vld [vmem:[#allocation21_spill] sm:$0xff] }
 0x3f0   :  { %v4947_v28 = vpop.eup %4946  ;;  %v8805_v40 = vmul.f32 %v2778_v20, %v8689_v35  ;;  %v2011_v11 = vadd.f32 1.4214138, %v1883_v1  ;;  %v990_v60 = vand.u32 2147483647, %v8797_v38  ;;  %v8810_v58 = vmul.f32 0.5, %v3668_v10  ;;  %v9513_v10 = vld [vmem:[#allocation56_spill] sm:$0xff] }
 0x3f1   :  { %v3542_v14 = vmul.f32 %v3414_v42, %v9509_v50  ;;  %v8808_v7 = vpop.eup %4948  ;;  %v2392_v34 = vmul.f32 %v8719_v23, %v4307_v62  ;;  %4956 = vpow2.f32 %v3159_v56  ;;  %v4359_v39 = vpack.c.bf16 %v9511_v8, %v9510_v61  ;;  %v9514_v1 = vld [vmem:[#allocation38_spill] sm:$0xff] }
 0x3f2   :  { %v3287_v27 = vmul.f32 %v4947_v28, %v2647_v37  ;;  %v2139_v42 = vmul.f32 %v8777_v48, %v2011_v11  ;;  %v1629_v2 = vmul.f32 1.0614054, %v8808_v7  ;;  %v3163_v35 = vmul.f32 1.442695, %v2909_v19  ;;  %v9515_v50 = vld [vmem:[#allocation22_spill] sm:$0xff]  ;;  %v9517_v19 = vld [vmem:[#allocation44_spill] sm:$0xff] }
 0x3f3   :  { %v3670_v24 = vadd.f32 %v3542_v14, %v8564_v47  ;;  %v2649_v49 = vmul.f32 %v8709_v4, %v2521_v21  ;;  %v8821_v20 = vmul.f32 0.70710677, %v990_v60  ;;  %4360 = vmatprep.subr.bf16.mxu0 %v4359_v39  ;;  %v4423_v62 = vpack.c.bf16 %v9513_v10, %v9512_v25 }
 0x3f4   :  { %v2010_v56 = vadd.f32 1.4214138, %v1882_v63  ;;  %v4310_v32 = vadd.f32 -0.28449672, %v2139_v42  ;;  %v4184_v37 = vadd.f32 -1.4531521, %v1629_v2  ;;  %v9516_v28 = vpack.c.bf16 %v9514_v1, %v9515_v50 }
 0x3f5   :  { %v4363_v47 = vpack.c.bf16 %v8094_v57, %v9517_v19  ;;  %v4951_v14 = vpop.eup %4950  ;;  %v2520_v4 = vadd.f32 0.2548296, %v2392_v34  ;;  %v2780_v21 = vsub.f32 0.0, %v8785_v51  ;;  %v1246_v11 = vmul.f32 0.3275911, %v8821_v20  ;;  %4424 = vmatprep.subr.bf16.mxu1 %v4423_v62  ;;  %v9518_v2 = vld [vmem:[#allocation43_spill] sm:$0xff] }
 0x3f6   :  { %4362 = vmatpush1.bf16.msra.mxu0 %v9516_v28  ;;  %v4427_v61 = vpack.c.bf16 %v8097_v33, %v8091_v31  ;;  %v8834_v63 = vpop.eup %4952  ;;  %v3415_v8 = vsub.f32 1.0, %v3287_v27  ;;  %v2395_v39 = vmul.f32 %v8777_v48, %v4310_v32  ;;  %v1885_v42 = vmul.f32 %v8808_v7, %v4184_v37  ;;  %v9519_v57 = vld [vmem:[#allocation8_spill] sm:$0xff]  ;;  %v9521_v62 = vld [vmem:[#allocation49_spill] sm:$0xff]  ;;  %v9522_v1 = vld [vmem:[#allocation51_spill] sm:$0xff] }
 0x3f7   :  { %4958 = vpow2.f32 %v3163_v35  ;;  %v9520_v25 = vpack.c.bf16 %v9518_v2, %v9519_v57  ;;  %4364 = vmatprep.subr.bf16.mxu0 %v4363_v47  ;;  %v8841_v34 = vmul.f32 0.5, %v3670_v24  ;;  %v1374_v10 = vadd.f32 1.0, %v1246_v11  ;;  %v9523_v33 = vld [vmem:[#allocation10_spill] sm:$0xff]  ;;  %v9525_v28 = vld [vmem:[#allocation35_spill] sm:$0xff] }
 0x3f8   :  { %v4367_v31 = vpack.c.bf16 %v9522_v1, %v9521_v62  ;;  %v4431_v27 = vpack.c.bf16 %v8331_v22, %v9523_v33  ;;  %v2138_v32 = vmul.f32 %v8764_v0, %v2010_v56  ;;  %v2523_v50 = vadd.f32 0.2548296, %v2395_v39  ;;  %v9524_v35 = vld [vmem:[#allocation34_spill] sm:$0xff]  ;;  %v9532_v1 = vld [vmem:[#allocation39_spill] sm:$0xff] }
 0x3f9   :  { %4426 = vmatpush1.bf16.msra.mxu1 %v9520_v25  ;;  %v2013_v37 = vadd.f32 1.4214138, %v1885_v42  ;;  %v9526_v19 = vpack.c.bf16 %v9524_v35, %v9525_v28  ;;  %v4371_v24 = vpack.c.bf16 %v8542_v15, %v8351_v16  ;;  %v8853_v47 = vpop.eup %4954  ;;  %v2908_v11 = vmul.f32 %v2780_v21, %v8785_v51  ;;  %v9528_v16 = vld [vmem:[#allocation19_spill] sm:$0xff]  ;;  %v9529_v15 = vld [vmem:[#allocation5_spill] sm:$0xff] }
 0x3fa   :  { %4428 = vmatprep.subr.bf16.mxu1 %v4427_v61  ;;  %4960 = vrcp.f32 %v1374_v10  ;;  %v9527_v61 = vld [vmem:[#allocation47_spill] sm:$0xff]  ;;  %v4375_v56 = vpack.c.bf16 %v8767_v41, %v8549_v44  ;;  %v3289_v39 = vmul.f32 %v4951_v14, %v2649_v49  ;;  %v2651_v42 = vmul.f32 %v8777_v48, %v2523_v50  ;;  %v8869_v51 = vld.sshfl [vmem:[%s8949_s3] sm:$0x33 pattern:$0x76325410] }
 0x3fb   :  { %4366 = vmatpush1.bf16.msra.mxu0 %v9526_v19  ;;  %v4435_v22 = vpack.c.bf16 %v8545_v29, %v9527_v61  ;;  %v2141_v2 = vmul.f32 %v8808_v7, %v2013_v37  ;;  %v1628_v57 = vmul.f32 1.0614054, %v8853_v47  ;;  %v9530_v25 = vpack.c.bf16 %v9528_v16, %v9529_v15  ;;  %v4957_v29 = vpop.eup %4956  ;;  %v9543_v15 = vld [vmem:[#allocation3_spill] sm:$0xff] }
 0x3fc   :  { %4368 = vmatprep.subr.bf16.mxu0 %v4367_v31  ;;  %v9531_v21 = vand.u32 2147483647, %v8568_v55  ;;  %v4439_v41 = vpack.c.bf16 %v8772_v18, %v8754_v17  ;;  %v4379_v48 = vpack.c.bf16 %v8810_v58, %v8774_v46  ;;  %v4443_v49 = vpack.c.bf16 %v8841_v34, %v8799_v54  ;;  %v9533_v31 = vld [vmem:[#allocation40_spill] sm:$0xff]  ;;  %v9536_v34 = vld [vmem:[#allocation17_spill] sm:$0xff] }
 0x3fd   :  { %4430 = vmatpush1.bf16.msra.mxu1 %v9530_v25  ;;  %v3291_v14 = vmul.f32 %v4957_v29, %v2651_v42  ;;  %v4312_v10 = vadd.f32 -0.28449672, %v2141_v2  ;;  %v4183_v62 = vadd.f32 -1.4531521, %v1628_v57  ;;  %v9534_v33 = vpack.c.bf16 %v9532_v1, %v9533_v31  ;;  %v9535_v58 = vld [vmem:[#allocation32_spill] sm:$0xff]  ;;  %v9539_v2 = vld [vmem:[#allocation27_spill] sm:$0xff] }
 0x3fe   :  { %v3543_v44 = vmul.f32 %v3415_v8, %v9531_v21  ;;  %4432 = vmatprep.subr.bf16.mxu1 %v4431_v27  ;;  %v4309_v50 = vadd.f32 -0.28449672, %v2138_v32  ;;  %v3161_v37 = vmul.f32 1.442695, %v2908_v11  ;;  %v3822_v8 = vcombine.high %v8869_v51, %v8869_v51  ;;  %v9540_v57 = vld [vmem:[#allocation9_spill] sm:$0xff] }
 0x3ff   :  { %4370 = vmatpush1.bf16.msra.mxu0 %v9534_v33  ;;  %v3157_v17 = vmul.f32 1.442695, %v8805_v40  ;;  %v3419_v18 = vsub.f32 1.0, %v3291_v14  ;;  %v2397_v46 = vmul.f32 %v8808_v7, %v4312_v10  ;;  %v1884_v54 = vmul.f32 %v8853_v47, %v4183_v62 }
 0x400   :  { %4372 = vmatprep.subr.bf16.mxu0 %v4371_v24  ;;  %v9537_v27 = vpack.c.bf16 %v9535_v58, %v9536_v34  ;;  %v3671_v35 = vadd.f32 %v3543_v44, %v8568_v55  ;;  %v3417_v28 = vsub.f32 1.0, %v3289_v39  ;;  %v2648_v32 = vmul.f32 %v8719_v23, %v2520_v4  ;;  %3889 = vmatprep.mubr.f32.mxu0 %v3822_v8  ;;  %v9542_v39 = vld [vmem:[#allocation48_spill] sm:$0xff] }
 0x401   :  { %v2782_v19 = vsub.f32 0.0, %v8821_v20  ;;  %v4959_v24 = vpop.eup %4958  ;;  %v9538_v40 = vand.u32 2147483647, %v8675_v3  ;;  %v2525_v61 = vadd.f32 0.2548296, %v2397_v46  ;;  %v9541_v16 = vpack.c.bf16 %v9539_v2, %v9540_v57  ;;  %3960 = vmatprep.mubr.f32.mxu1 %v3822_v8 }
 0x402   :  { %4434 = vmatpush1.bf16.msra.mxu1 %v9537_v27  ;;  %v2012_v42 = vadd.f32 1.4214138, %v1884_v54  ;;  %v2394_v55 = vmul.f32 %v8764_v0, %v4309_v50  ;;  %4962 = vpow2.f32 %v3161_v37  ;;  %v9544_v25 = vpack.c.bf16 %v9542_v39, %v9543_v15 }
 0x403   :  { %4436 = vmatprep.subr.bf16.mxu1 %v4435_v22  ;;  %v3547_v11 = vmul.f32 %v3419_v18, %v9538_v40  ;;  %4374 = vmatpush1.bf16.msra.mxu0 %v9541_v16  ;;  %4964 = vpow2.f32 %v3157_v17  ;;  %v2653_v4 = vmul.f32 %v8808_v7, %v2525_v61  ;;  %v3799_v21 = vmul.f32 0.5, %v3671_v35 }
 0x404   :  { %4376 = vmatprep.subr.bf16.mxu0 %v4375_v56  ;;  %v2140_v22 = vmul.f32 %v8853_v47, %v2012_v42  ;;  %v4961_v29 = vpop.eup %4960  ;;  %v9545_v44 = vand.u32 2147483647, %v8606_v52  ;;  %v3288_v10 = vmul.f32 %v8834_v63, %v2648_v32  ;;  %v2910_v56 = vmul.f32 %v2782_v19, %v8821_v20  ;;  %v9547_v63 = vld [vmem:[#allocation42_spill] sm:$0xff] }
 0x405   :  { %v3675_v23 = vadd.f32 %v3547_v11, %v8675_v3  ;;  %v3293_v3 = vmul.f32 %v4959_v24, %v2653_v4  ;;  %v1630_v7 = vmul.f32 1.0614054, %v4961_v29  ;;  %v9546_v31 = vpack.c.bf16 %v8483_v13, %v8418_v53 }
 0x406   :  { %4438 = vmatpush1.bf16.msra.mxu1 %v9544_v25  ;;  %v3545_v14 = vmul.f32 %v3417_v28, %v9545_v44  ;;  %v4311_v1 = vadd.f32 -0.28449672, %v2140_v22  ;;  %v2522_v33 = vadd.f32 0.2548296, %v2394_v55  ;;  %v9548_v18 = vpack.c.bf16 %v8510_v45, %v9547_v63 }
 0x407   :  { %4440 = vmatprep.subr.bf16.mxu1 %v4439_v41  ;;  %v3803_v62 = vmul.f32 0.5, %v3675_v23  ;;  %4378 = vmatpush1.bf16.msra.mxu0 %v9546_v31  ;;  %v3421_v37 = vsub.f32 1.0, %v3293_v3  ;;  %v4185_v17 = vadd.f32 -1.4531521, %v1630_v7  ;;  %v3416_v20 = vsub.f32 1.0, %v3288_v10  ;;  %v3812_v10 = vpop.permute.xlu0 %3811 }
 0x408   :  { %4380 = vmatprep.subr.bf16.mxu0 %v4379_v48  ;;  %v2396_v8 = vmul.f32 %v8853_v47, %v4311_v1  ;;  %v3165_v41 = vmul.f32 1.442695, %v2910_v56  ;;  %v3673_v46 = vadd.f32 %v3545_v14, %v8606_v52  ;;  %v9549_v54 = vand.u32 2147483647, %v8694_v26 }
 0x409   :  { %v4385_v50 = vpack.c.bf16 %v3803_v62, %v3799_v21  ;;  %v1886_v58 = vmul.f32 %v4961_v29, %v4185_v17  ;;  %v9550_v48 = vpack.c.bf16 %v8721_v9, %v8645_v30  ;;  %v2650_v34 = vmul.f32 %v8764_v0, %v2522_v33 }
 0x40a   :  { %4442 = vmatpush1.bf16.msra.mxu1 %v9548_v18  ;;  %v3549_v53 = vmul.f32 %v3421_v37, %v9549_v54  ;;  %v2524_v13 = vadd.f32 0.2548296, %v2396_v8  ;;  %4966 = vpow2.f32 %v3165_v41  ;;  %v3801_v24 = vmul.f32 0.5, %v3673_v46 }
 0x40b   :  { %4444 = vmatprep.subr.bf16.mxu1 %v4443_v49  ;;  %4382 = vmatpush1.bf16.msra.mxu0 %v9550_v48  ;;  %v2014_v35 = vadd.f32 1.4214138, %v1886_v58  ;;  %v9551_v49 = vld [vmem:[#allocation53_spill] sm:$0xff]  ;;  %v9553_v4 = vand.u32 2147483647, %v8658_v6  ;;  %v3976_v31 = vlaneseq }
 0x40c   :  { %v3677_v27 = vadd.f32 %v3549_v53, %v8694_v26  ;;  %v2652_v45 = vmul.f32 %v8853_v47, %v2524_v13  ;;  %v4963_v52 = vpop.eup %4962  ;;  %v9552_v28 = vand.u32 2147483647, %v9551_v49 }
 0x40d   :  { %v4965_v19 = vpop.eup %4964  ;;  %v2142_v40 = vmul.f32 %v4961_v29, %v2014_v35 }
 0x40e   :  { %4446 = vmatpush1.bf16.msra.mxu1 %v4445_v5  ;;  %v3544_v32 = vmul.f32 %v3416_v20, %v9552_v28  ;;  %v3805_v30 = vmul.f32 0.5, %v3677_v27  ;;  %v3292_v9 = vmul.f32 %v4963_v52, %v2652_v45  ;;  %v3290_v0 = vmul.f32 %v4965_v19, %v2650_v34 }
 0x40f   :  { %v4313_v61 = vadd.f32 -0.28449672, %v2142_v40 }
 0x410   :  { %v4449_v11 = vpack.c.bf16 %v3805_v30, %v3801_v24  ;;  %v3420_v26 = vsub.f32 1.0, %v3292_v9  ;;  %v3672_v47 = vadd.f32 %v3544_v32, %v9551_v49  ;;  %v3418_v5 = vsub.f32 1.0, %v3290_v0 }
 0x411   :  { %v2398_v12 = vmul.f32 %v4961_v29, %v4313_v61 }
 0x412   :  { %v3548_v43 = vmul.f32 %v3420_v26, %v988_v59  ;;  %v3800_v57 = vmul.f32 0.5, %v3672_v47  ;;  %v3546_v22 = vmul.f32 %v3418_v5, %v9553_v4 }
 0x413   :  { %v2526_v2 = vadd.f32 0.2548296, %v2398_v12 }
 0x414   :  { %v3676_v42 = vadd.f32 %v3548_v43, %v8749_v36  ;;  %v4967_v23 = vpop.eup %4966  ;;  %v3674_v21 = vadd.f32 %v3546_v22, %v8658_v6  ;;  %v4970_v6 = vmov 1983009808  }
 0x415   :  { %v2654_v55 = vmul.f32 %v4961_v29, %v2526_v2  ;;  %v3974_v7 = vunpack.c.l.s4 %v4970_v6 }
 0x416   :  { %v3804_v16 = vmul.f32 0.5, %v3676_v42  ;;  %v3802_v44 = vmul.f32 0.5, %v3674_v21 }
 0x417   :  { %v3294_v39 = vmul.f32 %v4967_v23, %v2654_v55  ;;  %v3975_v33 = vunpack.c.0.s8 %v3974_v7 }
 0x418   :  { %v4383_v15 = vpack.c.bf16 %v3804_v16, %v3800_v57 }
 0x419   :  { %v3422_v25 = vsub.f32 1.0, %v3294_v39 }
 0x41a   :  { %4384 = vmatprep.subr.bf16.mxu0 %v4383_v15 }
 0x41b   :  { %4386 = vmatpush1.bf16.msra.mxu0 %v4385_v50  ;;  %v3550_v59 = vmul.f32 %v3422_v25, %v990_v60 }
 0x41d   :  { %v3678_v36 = vadd.f32 %v3550_v59, %v8797_v38  ;;  %v3977_v38 = vshrl.u32 %v3976_v31, 7 }
 0x41e   :  { %3890 = vmatmul.mubr.f32.vlgmr.msra.gmra.mrb[64].mxu0 %v8869_v51 }
 0x41f   :  { %v3806_v29 = vmul.f32 0.5, %v3678_v36  ;;  %v3978_v37 = vsub.s32 %v3975_v33, %v3977_v38 }
 0x421   :  { %v4447_v14 = vpack.c.bf16 %v3806_v29, %v3802_v44 }
 0x423   :  { %4448 = vmatprep.subr.bf16.mxu1 %v4447_v14 }
 0x424   :  { %4450 = vmatpush1.bf16.msra.mxu1 %v4449_v11 }
 0x427   :  { %3961 = vmatmul.mubr.f32.vlgmr.msra.gmra.mrb[64].mxu1 %v8869_v51 }
 0x4f1   :  { %v3891_v56 = vpop.f32.mrb[64].mxu0 }
 0x4f2   :  { %v3892_v62 = vadd.f32 %v3891_v56, %v3812_v10  ;;  %v3893_v3 = vpop.f32.mrb[65].mxu0 }
 0x4f3   :  { %v3894_v1 = vadd.f32 %v3893_v3, %v3812_v10 }
 0x4f5   :  { %v3971_v60 = vcombine.low %v3892_v62, %v3894_v1 }
 0x4f7   :  { %v3979_v18 = vrot.slane %v3971_v60, %v3978_v37 }
 0x4fa   :  { %v3962_v50 = vpop.f32.mrb[64].mxu1 }
 0x4fb   :  { %v3963_v8 = vadd.f32 %v3962_v50, %v3812_v10  ;;  %v3964_v17 = vpop.f32.mrb[65].mxu1 }
 0x4fc   :  { %v3965_v63 = vadd.f32 %v3964_v17, %v3812_v10 }
 0x4fe   :  { %v3972_v20 = vcombine.low %v3963_v8, %v3965_v63 }
 0x500   :  { %v3986_v41 = vrot.slane %v3972_v20, %v3978_v37 }
 0x502   :  { %v3987_v51 = vcombine.low %v3979_v18, %v3986_v41 }
 0x504   :  { %3989 = vst [vmem:[%s8950_s5] sm:$0xff] %v3987_v51 }

</bundles_post_ra>
